<compile_context>
chip_gen: v5e
topology: v5e:2x2
jax: 0.10.0
libtpu: 0.0.40
codegen_flags: <defaults>
</compile_context>

<pallas_src>
import math
import functools

import jax
import jax.numpy as jnp
from jax.experimental import pallas as pl
from jax.experimental.pallas import tpu as pltpu


MXU_DTYPE = jnp.bfloat16            # MXU operand dtype (f32 accumulation)
VMEM_LIMIT = 32 * 1024 * 1024       # safe scoped-VMEM request on v5e/v6e/v7x


def _pick_tile(dim, candidates):
    """Largest candidate tile that divides `dim`, else the full dim."""
    for c in candidates:
        if dim % c == 0:
            return c
    return dim


# --------------------------- tiled matmul + bias (+ReLU) ---------------------------

def _mm_bias_kernel(a_ref, w_ref, b_ref, o_ref, acc_ref, *, relu):
    k = pl.program_id(2)

    @pl.when(k == 0)
    def _init():
        acc_ref[...] = jnp.zeros_like(acc_ref)

    acc_ref[...] += jnp.dot(a_ref[...], w_ref[...],
                            preferred_element_type=jnp.float32)

    @pl.when(k == pl.num_programs(2) - 1)
    def _finalize():
        out = acc_ref[...] + b_ref[...]          # bias only once, at finalize
        if relu:
            out = jnp.maximum(out, 0.0)
        o_ref[...] = out.astype(o_ref.dtype)


def matmul_bias(a, w, b, *, relu=False, out_dtype=MXU_DTYPE):
    """o = relu?(a @ w + b); a:(M,K), w:(K,N) bf16; b:(N,) f32; f32 accumulate."""
    M, K = a.shape
    Kw, N = w.shape
    assert K == Kw
    tm = _pick_tile(M, (256, 128, 64, 32, 16, 8))
    tn = _pick_tile(N, (256, 128))
    tk = _pick_tile(K, (512, 256, 128))
    grid = (M // tm, N // tn, K // tk)
    return pl.pallas_call(
        functools.partial(_mm_bias_kernel, relu=relu),
        grid=grid,
        in_specs=[
            pl.BlockSpec((tm, tk), lambda i, j, k: (i, k)),
            pl.BlockSpec((tk, tn), lambda i, j, k: (k, j)),
            pl.BlockSpec((1, tn), lambda i, j, k: (0, j)),   # stays VMEM-resident
        ],
        out_specs=pl.BlockSpec((tm, tn), lambda i, j, k: (i, j)),
        out_shape=jax.ShapeDtypeStruct((M, N), out_dtype),
        scratch_shapes=[pltpu.VMEM((tm, tn), jnp.float32)],
        compiler_params=pltpu.CompilerParams(
            dimension_semantics=("parallel", "parallel", "arbitrary"),
            vmem_limit_bytes=VMEM_LIMIT,
        ),
    )(a, w, b.reshape(1, N).astype(jnp.float32))


# ---------------- fused ZeroConv2d matmul + affine-coupling epilogue ----------------

def _zc_coupling_kernel(a_ref, ws_ref, wt_ref, bs_ref, bt_ref, ss_ref, st_ref,
                        inb_ref, outb_ref, ld_ref, accs_ref, acct_ref):
    k = pl.program_id(1)

    @pl.when(k == 0)
    def _init():
        accs_ref[...] = jnp.zeros_like(accs_ref)
        acct_ref[...] = jnp.zeros_like(acct_ref)

    a = a_ref[...]
    accs_ref[...] += jnp.dot(a, ws_ref[...], preferred_element_type=jnp.float32)
    acct_ref[...] += jnp.dot(a, wt_ref[...], preferred_element_type=jnp.float32)

    @pl.when(k == pl.num_programs(1) - 1)
    def _finalize():
        # ZeroConv2d epilogue: (conv + bias) * exp(scale * 3), split into log_s / t
        log_s = (accs_ref[...] + bs_ref[...]) * ss_ref[...]
        t = (acct_ref[...] + bt_ref[...]) * st_ref[...]
        s = 1.0 / (1.0 + jnp.exp(-(log_s + 2.0)))            # sigmoid(log_s + 2)
        outb_ref[...] = (inb_ref[...] + t) * s
        ld_ref[...] = jnp.sum(jnp.log(s), axis=-1, keepdims=True)   # per-row logdet


def zeroconv_coupling(a, w, bias, scale, in_b):
    """Fused ZeroConv2d (as a K-tiled matmul over im2col rows) + coupling epilogue.

    a:(M,K) bf16 (im2col, pad-value 1), w:(K,C) bf16, bias/scale:(C,) f32,
    in_b:(M, C//2) f32.  Returns out_b:(M, C//2) f32 and per-row logdet (M,1) f32.
    The intermediate `net` (M, C) never leaves VMEM.
    """
    M, K = a.shape
    _, C = w.shape
    ch = in_b.shape[-1]
    tm = _pick_tile(M, (256, 128, 64, 32, 16, 8))
    tk = _pick_tile(K, (512, 256, 128))
    grid = (M // tm, K // tk)

    f32 = jnp.float32
    exp_scale = jnp.exp(scale.astype(f32) * 3.0)
    args = (
        a,
        w[:, :ch], w[:, ch:],                                  # log_s / t halves
        bias[:ch].reshape(1, ch).astype(f32), bias[ch:].reshape(1, ch).astype(f32),
        exp_scale[:ch].reshape(1, ch), exp_scale[ch:].reshape(1, ch),
        in_b.astype(f32),
    )
    vec_spec = lambda: pl.BlockSpec((1, ch), lambda i, k: (0, 0))
    out_b, ld = pl.pallas_call(
        _zc_coupling_kernel,
        grid=grid,
        in_specs=[
            pl.BlockSpec((tm, tk), lambda i, k: (i, k)),
            pl.BlockSpec((tk, ch), lambda i, k: (k, 0)),
            pl.BlockSpec((tk, ch), lambda i, k: (k, 0)),
            vec_spec(), vec_spec(), vec_spec(), vec_spec(),
            pl.BlockSpec((tm, ch), lambda i, k: (i, 0)),
        ],
        out_specs=[
            pl.BlockSpec((tm, ch), lambda i, k: (i, 0)),
            pl.BlockSpec((tm, 1), lambda i, k: (i, 0)),
        ],
        out_shape=[
            jax.ShapeDtypeStruct((M, ch), jnp.float32),
            jax.ShapeDtypeStruct((M, 1), jnp.float32),
        ],
        scratch_shapes=[pltpu.VMEM((tm, ch), jnp.float32),
                        pltpu.VMEM((tm, ch), jnp.float32)],
        compiler_params=pltpu.CompilerParams(
            dimension_semantics=("parallel", "arbitrary"),
            vmem_limit_bytes=VMEM_LIMIT,
        ),
    )(*args)
    return out_b, ld


# --------------------------------- JAX-side glue ---------------------------------

def _im2col3x3(x_nhwc, pad_value):
    """3x3 patches; feature order [cin][kh*3+kw] matches torch conv-weight flatten."""
    B, H, W, C = x_nhwc.shape
    xp = jnp.pad(x_nhwc, ((0, 0), (1, 1), (1, 1), (0, 0)),
                 constant_values=pad_value)
    cols = [xp[:, kh:kh + H, kw:kw + W, :] for kh in range(3) for kw in range(3)]
    p = jnp.stack(cols, axis=3)                 # (B, H, W, 9, C)
    p = jnp.transpose(p, (0, 1, 2, 4, 3))       # (B, H, W, C, 9)
    return p.reshape(B * H * W, C * 9)


def affine_coupling_forward(x_nchw, params, *, filter_size=512):
    """Forward of PyTorch AffineCoupling (affine=True).

    Returns (cat([in_a, (in_b + t) * s], dim=1), logdet) like the module.
    """
    B, C, H, W = x_nchw.shape
    ch = C // 2
    M = B * H * W

    x = jnp.transpose(x_nchw, (0, 2, 3, 1))                    # NHWC f32
    in_a, in_b = x[..., :ch], x[..., ch:]

    # net(in_a) = Conv3x3(pad=1, zeros) -> ReLU -> Conv1x1 -> ReLU -> ZeroConv2d
    a1 = _im2col3x3(in_a.astype(MXU_DTYPE), 0.0)               # (M, ch*9)  bf16
    h1 = matmul_bias(a1, params['c1_w'], params['c1_b'], relu=True)   # (M, F) bf16
    h2 = matmul_bias(h1, params['c2_w'], params['c2_b'], relu=True)   # (M, F) bf16
    # TODO(synk): fold this im2col (9x HBM inflation of h2) into the fused kernel as
    # nine shifted tap-matmuls accumulating into the f32 scratch.
    a3 = _im2col3x3(h2.reshape(B, H, W, filter_size), 1.0)     # (M, F*9) bf16, pad=1

    out_b2d, ld_row = zeroconv_coupling(a3, params['zc_w'], params['zc_b'],
                                        params['zc_scale'], in_b.reshape(M, ch))

    out = jnp.concatenate([in_a, out_b2d.reshape(B, H, W, ch)], axis=-1)
    logdet = ld_row.reshape(B, H * W).sum(axis=1)
    return jnp.transpose(out, (0, 3, 1, 2)), logdet


# --------------------------------- parameters ---------------------------------

def init_affine_coupling(key, in_channel, filter_size=512):
    """Matches AffineCoupling.__init__: conv weights ~ N(0, 0.05), zero biases,
    ZeroConv2d weight/bias/scale all zero.  Weights are pre-flattened for matmul
    (K index = cin*9 + kh*3 + kw) and pre-cast to bf16 once."""
    k1, k2 = jax.random.split(key)
    ch = in_channel // 2
    w1 = 0.05 * jax.random.normal(k1, (filter_size, ch, 3, 3), jnp.float32)
    w2 = 0.05 * jax.random.normal(k2, (filter_size, filter_size, 1, 1), jnp.float32)
    return dict(
        c1_w=w1.reshape(filter_size, ch * 9).T.astype(MXU_DTYPE),
        c1_b=jnp.zeros((filter_size,), jnp.float32),
        c2_w=w2.reshape(filter_size, filter_size).T.astype(MXU_DTYPE),
        c2_b=jnp.zeros((filter_size,), jnp.float32),
        zc_w=jnp.zeros((filter_size * 9, in_channel), MXU_DTYPE),
        zc_b=jnp.zeros((in_channel,), jnp.float32),
        zc_scale=jnp.zeros((in_channel,), jnp.float32),
    )


if __name__ == "__main__":
    key = jax.random.PRNGKey(0)
    k_in, k_p = jax.random.split(key)
    B, C, H, W = 2, 4, 16, 16
    filter_size = 512

    x = jax.random.normal(k_in, (B, C, H, W), dtype=jnp.float32)
    params = init_affine_coupling(k_p, C, filter_size=filter_size)

    fwd = jax.jit(functools.partial(affine_coupling_forward, filter_size=filter_size))
    out, logdet = fwd(x, params)
    jax.block_until_ready((out, logdet))

    # Sanity: ZeroConv2d is zero-initialized, so net == 0 exactly =>
    #   out = cat([in_a, in_b * sigmoid(2)]),  logdet = ch*H*W*log(sigmoid(2))
    ch = C // 2
    sig2 = 1.0 / (1.0 + math.exp(-2.0))
    ref_out = jnp.concatenate([x[:, :ch], x[:, ch:] * sig2], axis=1)
    ref_ld = jnp.full((B,), ch * H * W * math.log(sig2), jnp.float32)
    assert out.shape == (B, C, H, W) and logdet.shape == (B,)
    assert bool(jnp.allclose(out, ref_out, atol=1e-5, rtol=1e-5)), "out mismatch"
    assert bool(jnp.allclose(logdet, ref_ld, atol=1e-3, rtol=1e-5)), "logdet mismatch"

    print("KERNEL_OK")
</pallas_src>

<mosaic_0001>
module attributes {stable_mosaic.version = 11 : i64} {
  func.func @_mm_bias_kernel(%arg0: i32, %arg1: i32, %arg2: i32, %arg3: memref<256x18xbf16, #tpu.memory_space<vmem>>, %arg4: memref<18x256xbf16, #tpu.memory_space<vmem>>, %arg5: memref<1x256xf32, #tpu.memory_space<vmem>>, %arg6: memref<256x256xbf16, #tpu.memory_space<vmem>>, %arg7: memref<256x256xf32, #tpu.memory_space<vmem>>) attributes {dimension_semantics = [#tpu.dimension_semantics<parallel>, #tpu.dimension_semantics<parallel>, #tpu.dimension_semantics<arbitrary>], iteration_bounds = array<i64: 2, 2, 1>, scalar_prefetch = 0 : i64, scratch_operands = 1 : i64, tpu.core_type = #tpu.core_type<tc>, window_params = [{transform_indices = @transform_0, window_bounds = array<i64: 256, 18>}, {transform_indices = @transform_1, window_bounds = array<i64: 18, 256>}, {transform_indices = @transform_2, window_bounds = array<i64: 1, 256>}, {transform_indices = @transform_3, window_bounds = array<i64: 256, 256>}]} {
    %c0_i32 = arith.constant 0 : i32
    %0 = arith.cmpi eq, %arg2, %c0_i32 : i32
    %1 = arith.extui %0 : i1 to i32
    %c0_i32_0 = arith.constant 0 : i32
    %2 = arith.cmpi ne, %1, %c0_i32_0 : i32
    scf.if %2 {
      %cst_10 = arith.constant 0.000000e+00 : f32
      %12 = vector.broadcast %cst_10 : f32 to vector<256x256xf32>
      %c0_11 = arith.constant 0 : index
      %c0_12 = arith.constant 0 : index
      %13 = vector.load %arg7[%c0_11, %c0_12] : memref<256x256xf32, #tpu.memory_space<vmem>>, vector<256x256xf32>
      tpu.vector_store %arg7[%c0_11, %c0_12], %12 {strides = array<i32>} : memref<256x256xf32, #tpu.memory_space<vmem>>, vector<256x256xf32>,
    } else {
    }
    %c0 = arith.constant 0 : index
    %c0_1 = arith.constant 0 : index
    %3 = vector.load %arg7[%c0, %c0_1] : memref<256x256xf32, #tpu.memory_space<vmem>>, vector<256x256xf32>
    %c0_2 = arith.constant 0 : index
    %c0_3 = arith.constant 0 : index
    %4 = vector.load %arg3[%c0_2, %c0_3] : memref<256x18xbf16, #tpu.memory_space<vmem>>, vector<256x18xbf16>
    %c0_4 = arith.constant 0 : index
    %c0_5 = arith.constant 0 : index
    %5 = vector.load %arg4[%c0_4, %c0_5] : memref<18x256xbf16, #tpu.memory_space<vmem>>, vector<18x256xbf16>
    %cst = arith.constant dense<0.000000e+00> : vector<256x256xf32>
    %6 = tpu.matmul %4, %5, %cst {dimension_numbers = #tpu.dot_dimension_numbers<[1], [0], [0], [1], [0, 0, 1, 1], [], []>} : vector<256x18xbf16>, vector<18x256xbf16>, vector<256x256xf32> -> vector<256x256xf32>
    %7 = arith.addf %3, %6 : vector<256x256xf32>
    %c0_6 = arith.constant 0 : index
    %c0_7 = arith.constant 0 : index
    %8 = vector.load %arg7[%c0_6, %c0_7] : memref<256x256xf32, #tpu.memory_space<vmem>>, vector<256x256xf32>
    tpu.vector_store %arg7[%c0_6, %c0_7], %7 {strides = array<i32>} : memref<256x256xf32, #tpu.memory_space<vmem>>, vector<256x256xf32>,
    %c0_i32_8 = arith.constant 0 : i32
    %9 = arith.cmpi eq, %arg2, %c0_i32_8 : i32
    %10 = arith.extui %9 : i1 to i32
    %c0_i32_9 = arith.constant 0 : i32
    %11 = arith.cmpi ne, %10, %c0_i32_9 : i32
    scf.if %11 {
      %c0_10 = arith.constant 0 : index
      %c0_11 = arith.constant 0 : index
      %12 = vector.load %arg7[%c0_10, %c0_11] : memref<256x256xf32, #tpu.memory_space<vmem>>, vector<256x256xf32>
      %c0_12 = arith.constant 0 : index
      %c0_13 = arith.constant 0 : index
      %13 = vector.load %arg5[%c0_12, %c0_13] : memref<1x256xf32, #tpu.memory_space<vmem>>, vector<1x256xf32>
      %14 = vector.broadcast %13 : vector<1x256xf32> to vector<256x256xf32>
      %15 = arith.addf %12, %14 : vector<256x256xf32>
      %cst_14 = arith.constant 0.000000e+00 : f32
      %16 = vector.broadcast %cst_14 : f32 to vector<256x256xf32>
      %17 = arith.maximumf %15, %16 : vector<256x256xf32>
      %18 = arith.truncf %17 : vector<256x256xf32> to vector<256x256xbf16>
      %c0_15 = arith.constant 0 : index
      %c0_16 = arith.constant 0 : index
      %19 = vector.load %arg6[%c0_15, %c0_16] : memref<256x256xbf16, #tpu.memory_space<vmem>>, vector<256x256xbf16>
      tpu.vector_store %arg6[%c0_15, %c0_16], %18 {strides = array<i32>} : memref<256x256xbf16, #tpu.memory_space<vmem>>, vector<256x256xbf16>,
    } else {
    }
    return
  }
  func.func @transform_0(%arg0: i32, %arg1: i32, %arg2: i32) -> (i32, i32) {
    %c0_i32 = arith.constant 0 : i32
    return %arg0, %arg2 : i32, i32
  }
  func.func @transform_1(%arg0: i32, %arg1: i32, %arg2: i32) -> (i32, i32) {
    %c0_i32 = arith.constant 0 : i32
    return %arg2, %arg1 : i32, i32
  }
  func.func @transform_2(%arg0: i32, %arg1: i32, %arg2: i32) -> (i32, i32) {
    %c0_i32 = arith.constant 0 : i32
    %c0_i32_0 = arith.constant 0 : i32
    return %c0_i32, %arg1 : i32, i32
  }
  func.func @transform_3(%arg0: i32, %arg1: i32, %arg2: i32) -> (i32, i32) {
    %c0_i32 = arith.constant 0 : i32
    return %arg0, %arg1 : i32, i32
  }
}

module attributes {stable_mosaic.version = 11 : i64} {
  func.func @_mm_bias_kernel(%arg0: i32, %arg1: i32, %arg2: i32, %arg3: memref<256x512xbf16, #tpu.memory_space<vmem>>, %arg4: memref<512x256xbf16, #tpu.memory_space<vmem>>, %arg5: memref<1x256xf32, #tpu.memory_space<vmem>>, %arg6: memref<256x256xbf16, #tpu.memory_space<vmem>>, %arg7: memref<256x256xf32, #tpu.memory_space<vmem>>) attributes {dimension_semantics = [#tpu.dimension_semantics<parallel>, #tpu.dimension_semantics<parallel>, #tpu.dimension_semantics<arbitrary>], iteration_bounds = array<i64: 2, 2, 1>, scalar_prefetch = 0 : i64, scratch_operands = 1 : i64, tpu.core_type = #tpu.core_type<tc>, window_params = [{transform_indices = @transform_0, window_bounds = array<i64: 256, 512>}, {transform_indices = @transform_1, window_bounds = array<i64: 512, 256>}, {transform_indices = @transform_2, window_bounds = array<i64: 1, 256>}, {transform_indices = @transform_3, window_bounds = array<i64: 256, 256>}]} {
    %c0_i32 = arith.constant 0 : i32
    %0 = arith.cmpi eq, %arg2, %c0_i32 : i32
    %1 = arith.extui %0 : i1 to i32
    %c0_i32_0 = arith.constant 0 : i32
    %2 = arith.cmpi ne, %1, %c0_i32_0 : i32
    scf.if %2 {
      %cst_10 = arith.constant 0.000000e+00 : f32
      %12 = vector.broadcast %cst_10 : f32 to vector<256x256xf32>
      %c0_11 = arith.constant 0 : index
      %c0_12 = arith.constant 0 : index
      %13 = vector.load %arg7[%c0_11, %c0_12] : memref<256x256xf32, #tpu.memory_space<vmem>>, vector<256x256xf32>
      tpu.vector_store %arg7[%c0_11, %c0_12], %12 {strides = array<i32>} : memref<256x256xf32, #tpu.memory_space<vmem>>, vector<256x256xf32>,
    } else {
    }
    %c0 = arith.constant 0 : index
    %c0_1 = arith.constant 0 : index
    %3 = vector.load %arg7[%c0, %c0_1] : memref<256x256xf32, #tpu.memory_space<vmem>>, vector<256x256xf32>
    %c0_2 = arith.constant 0 : index
    %c0_3 = arith.constant 0 : index
    %4 = vector.load %arg3[%c0_2, %c0_3] : memref<256x512xbf16, #tpu.memory_space<vmem>>, vector<256x512xbf16>
    %c0_4 = arith.constant 0 : index
    %c0_5 = arith.constant 0 : index
    %5 = vector.load %arg4[%c0_4, %c0_5] : memref<512x256xbf16, #tpu.memory_space<vmem>>, vector<512x256xbf16>
    %cst = arith.constant dense<0.000000e+00> : vector<256x256xf32>
    %6 = tpu.matmul %4, %5, %cst {dimension_numbers = #tpu.dot_dimension_numbers<[1], [0], [0], [1], [0, 0, 1, 1], [], []>} : vector<256x512xbf16>, vector<512x256xbf16>, vector<256x256xf32> -> vector<256x256xf32>
    %7 = arith.addf %3, %6 : vector<256x256xf32>
    %c0_6 = arith.constant 0 : index
    %c0_7 = arith.constant 0 : index
    %8 = vector.load %arg7[%c0_6, %c0_7] : memref<256x256xf32, #tpu.memory_space<vmem>>, vector<256x256xf32>
    tpu.vector_store %arg7[%c0_6, %c0_7], %7 {strides = array<i32>} : memref<256x256xf32, #tpu.memory_space<vmem>>, vector<256x256xf32>,
    %c0_i32_8 = arith.constant 0 : i32
    %9 = arith.cmpi eq, %arg2, %c0_i32_8 : i32
    %10 = arith.extui %9 : i1 to i32
    %c0_i32_9 = arith.constant 0 : i32
    %11 = arith.cmpi ne, %10, %c0_i32_9 : i32
    scf.if %11 {
      %c0_10 = arith.constant 0 : index
      %c0_11 = arith.constant 0 : index
      %12 = vector.load %arg7[%c0_10, %c0_11] : memref<256x256xf32, #tpu.memory_space<vmem>>, vector<256x256xf32>
      %c0_12 = arith.constant 0 : index
      %c0_13 = arith.constant 0 : index
      %13 = vector.load %arg5[%c0_12, %c0_13] : memref<1x256xf32, #tpu.memory_space<vmem>>, vector<1x256xf32>
      %14 = vector.broadcast %13 : vector<1x256xf32> to vector<256x256xf32>
      %15 = arith.addf %12, %14 : vector<256x256xf32>
      %cst_14 = arith.constant 0.000000e+00 : f32
      %16 = vector.broadcast %cst_14 : f32 to vector<256x256xf32>
      %17 = arith.maximumf %15, %16 : vector<256x256xf32>
      %18 = arith.truncf %17 : vector<256x256xf32> to vector<256x256xbf16>
      %c0_15 = arith.constant 0 : index
      %c0_16 = arith.constant 0 : index
      %19 = vector.load %arg6[%c0_15, %c0_16] : memref<256x256xbf16, #tpu.memory_space<vmem>>, vector<256x256xbf16>
      tpu.vector_store %arg6[%c0_15, %c0_16], %18 {strides = array<i32>} : memref<256x256xbf16, #tpu.memory_space<vmem>>, vector<256x256xbf16>,
    } else {
    }
    return
  }
  func.func @transform_0(%arg0: i32, %arg1: i32, %arg2: i32) -> (i32, i32) {
    %c0_i32 = arith.constant 0 : i32
    return %arg0, %arg2 : i32, i32
  }
  func.func @transform_1(%arg0: i32, %arg1: i32, %arg2: i32) -> (i32, i32) {
    %c0_i32 = arith.constant 0 : i32
    return %arg2, %arg1 : i32, i32
  }
  func.func @transform_2(%arg0: i32, %arg1: i32, %arg2: i32) -> (i32, i32) {
    %c0_i32 = arith.constant 0 : i32
    %c0_i32_0 = arith.constant 0 : i32
    return %c0_i32, %arg1 : i32, i32
  }
  func.func @transform_3(%arg0: i32, %arg1: i32, %arg2: i32) -> (i32, i32) {
    %c0_i32 = arith.constant 0 : i32
    return %arg0, %arg1 : i32, i32
  }
}

module attributes {stable_mosaic.version = 11 : i64} {
  func.func @_zc_coupling_kernel(%arg0: i32, %arg1: i32, %arg2: memref<256x512xbf16, #tpu.memory_space<vmem>>, %arg3: memref<512x2xbf16, #tpu.memory_space<vmem>>, %arg4: memref<512x2xbf16, #tpu.memory_space<vmem>>, %arg5: memref<1x2xf32, #tpu.memory_space<vmem>>, %arg6: memref<1x2xf32, #tpu.memory_space<vmem>>, %arg7: memref<1x2xf32, #tpu.memory_space<vmem>>, %arg8: memref<1x2xf32, #tpu.memory_space<vmem>>, %arg9: memref<256x2xf32, #tpu.memory_space<vmem>>, %arg10: memref<256x2xf32, #tpu.memory_space<vmem>>, %arg11: memref<256x1xf32, #tpu.memory_space<vmem>>, %arg12: memref<256x2xf32, #tpu.memory_space<vmem>>, %arg13: memref<256x2xf32, #tpu.memory_space<vmem>>) attributes {dimension_semantics = [#tpu.dimension_semantics<parallel>, #tpu.dimension_semantics<arbitrary>], iteration_bounds = array<i64: 2, 9>, scalar_prefetch = 0 : i64, scratch_operands = 2 : i64, tpu.core_type = #tpu.core_type<tc>, window_params = [{transform_indices = @transform_0, window_bounds = array<i64: 256, 512>}, {transform_indices = @transform_1, window_bounds = array<i64: 512, 2>}, {transform_indices = @transform_2, window_bounds = array<i64: 512, 2>}, {pipeline_mode = #tpu.pipeline_mode<synchronous>, transform_indices = @transform_3, window_bounds = array<i64: 1, 2>}, {pipeline_mode = #tpu.pipeline_mode<synchronous>, transform_indices = @transform_4, window_bounds = array<i64: 1, 2>}, {pipeline_mode = #tpu.pipeline_mode<synchronous>, transform_indices = @transform_5, window_bounds = array<i64: 1, 2>}, {pipeline_mode = #tpu.pipeline_mode<synchronous>, transform_indices = @transform_6, window_bounds = array<i64: 1, 2>}, {transform_indices = @transform_7, window_bounds = array<i64: 256, 2>}, {transform_indices = @transform_8, window_bounds = array<i64: 256, 2>}, {transform_indices = @transform_9, window_bounds = array<i64: 256, 1>}]} {
    %c0_i32 = arith.constant 0 : i32
    %0 = arith.cmpi eq, %arg1, %c0_i32 : i32
    %1 = arith.extui %0 : i1 to i32
    %c0_i32_0 = arith.constant 0 : i32
    %2 = arith.cmpi ne, %1, %c0_i32_0 : i32
    scf.if %2 {
      %cst_16 = arith.constant 0.000000e+00 : f32
      %17 = vector.broadcast %cst_16 : f32 to vector<256x2xf32>
      %c0_17 = arith.constant 0 : index
      %c0_18 = arith.constant 0 : index
      %18 = vector.load %arg12[%c0_17, %c0_18] : memref<256x2xf32, #tpu.memory_space<vmem>>, vector<256x2xf32>
      tpu.vector_store %arg12[%c0_17, %c0_18], %17 {strides = array<i32>} : memref<256x2xf32, #tpu.memory_space<vmem>>, vector<256x2xf32>,
      %cst_19 = arith.constant 0.000000e+00 : f32
      %19 = vector.broadcast %cst_19 : f32 to vector<256x2xf32>
      %c0_20 = arith.constant 0 : index
      %c0_21 = arith.constant 0 : index
      %20 = vector.load %arg13[%c0_20, %c0_21] : memref<256x2xf32, #tpu.memory_space<vmem>>, vector<256x2xf32>
      tpu.vector_store %arg13[%c0_20, %c0_21], %19 {strides = array<i32>} : memref<256x2xf32, #tpu.memory_space<vmem>>, vector<256x2xf32>,
    } else {
    }
    %c0 = arith.constant 0 : index
    %c0_1 = arith.constant 0 : index
    %3 = vector.load %arg2[%c0, %c0_1] : memref<256x512xbf16, #tpu.memory_space<vmem>>, vector<256x512xbf16>
    %c0_2 = arith.constant 0 : index
    %c0_3 = arith.constant 0 : index
    %4 = vector.load %arg12[%c0_2, %c0_3] : memref<256x2xf32, #tpu.memory_space<vmem>>, vector<256x2xf32>
    %c0_4 = arith.constant 0 : index
    %c0_5 = arith.constant 0 : index
    %5 = vector.load %arg3[%c0_4, %c0_5] : memref<512x2xbf16, #tpu.memory_space<vmem>>, vector<512x2xbf16>
    %cst = arith.constant dense<0.000000e+00> : vector<256x2xf32>
    %6 = tpu.matmul %3, %5, %cst {dimension_numbers = #tpu.dot_dimension_numbers<[1], [0], [0], [1], [0, 0, 1, 1], [], []>} : vector<256x512xbf16>, vector<512x2xbf16>, vector<256x2xf32> -> vector<256x2xf32>
    %7 = arith.addf %4, %6 : vector<256x2xf32>
    %c0_6 = arith.constant 0 : index
    %c0_7 = arith.constant 0 : index
    %8 = vector.load %arg12[%c0_6, %c0_7] : memref<256x2xf32, #tpu.memory_space<vmem>>, vector<256x2xf32>
    tpu.vector_store %arg12[%c0_6, %c0_7], %7 {strides = array<i32>} : memref<256x2xf32, #tpu.memory_space<vmem>>, vector<256x2xf32>,
    %c0_8 = arith.constant 0 : index
    %c0_9 = arith.constant 0 : index
    %9 = vector.load %arg13[%c0_8, %c0_9] : memref<256x2xf32, #tpu.memory_space<vmem>>, vector<256x2xf32>
    %c0_10 = arith.constant 0 : index
    %c0_11 = arith.constant 0 : index
    %10 = vector.load %arg4[%c0_10, %c0_11] : memref<512x2xbf16, #tpu.memory_space<vmem>>, vector<512x2xbf16>
    %cst_12 = arith.constant dense<0.000000e+00> : vector<256x2xf32>
    %11 = tpu.matmul %3, %10, %cst_12 {dimension_numbers = #tpu.dot_dimension_numbers<[1], [0], [0], [1], [0, 0, 1, 1], [], []>} : vector<256x512xbf16>, vector<512x2xbf16>, vector<256x2xf32> -> vector<256x2xf32>
    %12 = arith.addf %9, %11 : vector<256x2xf32>
    %c0_13 = arith.constant 0 : index
    %c0_14 = arith.constant 0 : index
    %13 = vector.load %arg13[%c0_13, %c0_14] : memref<256x2xf32, #tpu.memory_space<vmem>>, vector<256x2xf32>
    tpu.vector_store %arg13[%c0_13, %c0_14], %12 {strides = array<i32>} : memref<256x2xf32, #tpu.memory_space<vmem>>, vector<256x2xf32>,
    %c8_i32 = arith.constant 8 : i32
    %14 = arith.cmpi eq, %arg1, %c8_i32 : i32
    %15 = arith.extui %14 : i1 to i32
    %c0_i32_15 = arith.constant 0 : i32
    %16 = arith.cmpi ne, %15, %c0_i32_15 : i32
    scf.if %16 {
      %c0_16 = arith.constant 0 : index
      %c0_17 = arith.constant 0 : index
      %17 = vector.load %arg12[%c0_16, %c0_17] : memref<256x2xf32, #tpu.memory_space<vmem>>, vector<256x2xf32>
      %c0_18 = arith.constant 0 : index
      %c0_19 = arith.constant 0 : index
      %18 = vector.load %arg5[%c0_18, %c0_19] : memref<1x2xf32, #tpu.memory_space<vmem>>, vector<1x2xf32>
      %19 = vector.broadcast %18 : vector<1x2xf32> to vector<256x2xf32>
      %20 = arith.addf %17, %19 : vector<256x2xf32>
      %c0_20 = arith.constant 0 : index
      %c0_21 = arith.constant 0 : index
      %21 = vector.load %arg7[%c0_20, %c0_21] : memref<1x2xf32, #tpu.memory_space<vmem>>, vector<1x2xf32>
      %22 = vector.broadcast %21 : vector<1x2xf32> to vector<256x2xf32>
      %23 = arith.mulf %20, %22 : vector<256x2xf32>
      %c0_22 = arith.constant 0 : index
      %c0_23 = arith.constant 0 : index
      %24 = vector.load %arg13[%c0_22, %c0_23] : memref<256x2xf32, #tpu.memory_space<vmem>>, vector<256x2xf32>
      %c0_24 = arith.constant 0 : index
      %c0_25 = arith.constant 0 : index
      %25 = vector.load %arg6[%c0_24, %c0_25] : memref<1x2xf32, #tpu.memory_space<vmem>>, vector<1x2xf32>
      %26 = vector.broadcast %25 : vector<1x2xf32> to vector<256x2xf32>
      %27 = arith.addf %24, %26 : vector<256x2xf32>
      %c0_26 = arith.constant 0 : index
      %c0_27 = arith.constant 0 : index
      %28 = vector.load %arg8[%c0_26, %c0_27] : memref<1x2xf32, #tpu.memory_space<vmem>>, vector<1x2xf32>
      %29 = vector.broadcast %28 : vector<1x2xf32> to vector<256x2xf32>
      %30 = arith.mulf %27, %29 : vector<256x2xf32>
      %cst_28 = arith.constant 2.000000e+00 : f32
      %31 = vector.broadcast %cst_28 : f32 to vector<256x2xf32>
      %32 = arith.addf %23, %31 : vector<256x2xf32>
      %cst_29 = arith.constant 0.000000e+00 : f32
      %33 = vector.broadcast %cst_29 : f32 to vector<256x2xf32>
      %34 = arith.subf %33, %32 : vector<256x2xf32>
      %35 = math.exp %34 : vector<256x2xf32>
      %cst_30 = arith.constant 1.000000e+00 : f32
      %36 = vector.broadcast %cst_30 : f32 to vector<256x2xf32>
      %37 = arith.addf %36, %35 : vector<256x2xf32>
      %cst_31 = arith.constant 1.000000e+00 : f32
      %38 = vector.broadcast %cst_31 : f32 to vector<256x2xf32>
      %39 = arith.divf %38, %37 : vector<256x2xf32>
      %c0_32 = arith.constant 0 : index
      %c0_33 = arith.constant 0 : index
      %40 = vector.load %arg9[%c0_32, %c0_33] : memref<256x2xf32, #tpu.memory_space<vmem>>, vector<256x2xf32>
      %41 = arith.addf %40, %30 : vector<256x2xf32>
      %42 = arith.mulf %41, %39 : vector<256x2xf32>
      %c0_34 = arith.constant 0 : index
      %c0_35 = arith.constant 0 : index
      %43 = vector.load %arg10[%c0_34, %c0_35] : memref<256x2xf32, #tpu.memory_space<vmem>>, vector<256x2xf32>
      tpu.vector_store %arg10[%c0_34, %c0_35], %42 {strides = array<i32>} : memref<256x2xf32, #tpu.memory_space<vmem>>, vector<256x2xf32>,
      %44 = math.log %39 : vector<256x2xf32>
      %cst_36 = arith.constant dense<0.000000e+00> : vector<256xf32>
      %45 = vector.multi_reduction <add>, %44, %cst_36 [1] : vector<256x2xf32> to vector<256xf32>
      %46 = vector.shape_cast %45 : vector<256xf32> to vector<256x1xf32>
      %c0_37 = arith.constant 0 : index
      %c0_38 = arith.constant 0 : index
      %47 = vector.load %arg11[%c0_37, %c0_38] : memref<256x1xf32, #tpu.memory_space<vmem>>, vector<256x1xf32>
      tpu.vector_store %arg11[%c0_37, %c0_38], %46 {strides = array<i32>} : memref<256x1xf32, #tpu.memory_space<vmem>>, vector<256x1xf32>,
    } else {
    }
    return
  }
  func.func @transform_0(%arg0: i32, %arg1: i32) -> (i32, i32) {
    %c0_i32 = arith.constant 0 : i32
    return %arg0, %arg1 : i32, i32
  }
  func.func @transform_1(%arg0: i32, %arg1: i32) -> (i32, i32) {
    %c0_i32 = arith.constant 0 : i32
    %c0_i32_0 = arith.constant 0 : i32
    return %arg1, %c0_i32 : i32, i32
  }
  func.func @transform_2(%arg0: i32, %arg1: i32) -> (i32, i32) {
    %c0_i32 = arith.constant 0 : i32
    %c0_i32_0 = arith.constant 0 : i32
    return %arg1, %c0_i32 : i32, i32
  }
  func.func @transform_3(%arg0: i32, %arg1: i32) -> (i32, i32) {
    %c0_i32 = arith.constant 0 : i32
    %c0_i32_0 = arith.constant 0 : i32
    %c0_i32_1 = arith.constant 0 : i32
    return %c0_i32, %c0_i32_0 : i32, i32
  }
  func.func @transform_4(%arg0: i32, %arg1: i32) -> (i32, i32) {
    %c0_i32 = arith.constant 0 : i32
    %c0_i32_0 = arith.constant 0 : i32
    %c0_i32_1 = arith.constant 0 : i32
    return %c0_i32, %c0_i32_0 : i32, i32
  }
  func.func @transform_5(%arg0: i32, %arg1: i32) -> (i32, i32) {
    %c0_i32 = arith.constant 0 : i32
    %c0_i32_0 = arith.constant 0 : i32
    %c0_i32_1 = arith.constant 0 : i32
    return %c0_i32, %c0_i32_0 : i32, i32
  }
  func.func @transform_6(%arg0: i32, %arg1: i32) -> (i32, i32) {
    %c0_i32 = arith.constant 0 : i32
    %c0_i32_0 = arith.constant 0 : i32
    %c0_i32_1 = arith.constant 0 : i32
    return %c0_i32, %c0_i32_0 : i32, i32
  }
  func.func @transform_7(%arg0: i32, %arg1: i32) -> (i32, i32) {
    %c0_i32 = arith.constant 0 : i32
    %c0_i32_0 = arith.constant 0 : i32
    return %arg0, %c0_i32 : i32, i32
  }
  func.func @transform_8(%arg0: i32, %arg1: i32) -> (i32, i32) {
    %c0_i32 = arith.constant 0 : i32
    %c0_i32_0 = arith.constant 0 : i32
    return %arg0, %c0_i32 : i32, i32
  }
  func.func @transform_9(%arg0: i32, %arg1: i32) -> (i32, i32) {
    %c0_i32 = arith.constant 0 : i32
    %c0_i32_0 = arith.constant 0 : i32
    return %arg0, %c0_i32 : i32, i32
  }
}

</mosaic_0001>

<bundles_post_ra>
// kernel: affine_coupling_forward.3
= control target key start
LH: loop header
LB: loop body
LE: loop exit
PB: predicated region body
PF: predicated region fallthrough
CT: control target
= control target key end

     0   :  { %s2272_s0 = inlined_call_operand.vmem [shape: bf16[512,18], index: 0, kind: input, shape index: {}]   ;;  %s2273_s1 = inlined_call_operand.hbm [shape: bf16[18,512], index: 1, kind: input, shape index: {}]   ;;  %s2274_s2 = inlined_call_operand.hbm [shape: f32[1,512], index: 2, kind: input, shape index: {}]   ;;  %s2275_s3 = inlined_call_operand.vmem [shape: bf16[512,512], index: 3, kind: output, shape index: {}]  }
   0x1   :  { %2279 = sst [smem:[#allocation14_spill]] %s2273_s1 }
   0x2   :  { %8 = vsyncpa [#allocation4], 0 }
   0x3   :  { %10 = vsyncpa [#allocation4 + $0x1], 0 }
   0x4   :  { %11 = vsyncpa [#allocation6], 0 }
   0x5   :  { %13 = vsyncpa [#allocation6 + $0x1], 0  ;;  %s1886_s12 = smov 0   ;;  %s1888_s13 = smov 0  }
   0x6   :  { %s1890_s14 = smov 0   ;;  %s1892_s15 = smov 0  }
   0x7   :  { %s1894_s16 = smov 0   ;;  %s1896_s17 = smov 0  }
   0x8   :  { %s1898_s18 = smov 0   ;;  %s1900_s19 = smov 0  }
   0x9   :  { %s1902_s20 = smov 0   ;;  %s1904_s21 = smov 0  }
   0xa LB: > { %2280 = sst [smem:[#allocation10_spill]] %s1857_s20  ;;  %s1470_s22 = sadd.s32 4294967295, %s1861_s21   ;;  %s1861_s21 = sphi %s1904_s21, %s19_s21   ;;  %s1857_s20 = sphi %s1902_s20, %s2292_s20   ;;  %s1853_s19 = sphi %s1900_s19, %s2299_s19   ;;  %s1849_s18 = sphi %s1898_s18, %s2290_s18   ;;  %s1845_s17 = sphi %s1896_s17, %s2298_s17   ;;  %s1841_s16 = sphi %s1894_s16, %s2297_s16   ;;  %s1837_s15 = sphi %s1892_s15, %s2296_s15   ;;  %s1833_s14 = sphi %s1890_s14, %s2295_s14   ;;  %s1829_s13 = sphi %s1888_s13, %s2294_s13   ;;  %s1825_s12 = sphi %s1886_s12, %s2293_s12  }
   0xb   : > { %s34_s23 = sadd.s32 1, %s1853_s19  ;;  %s38_s24 = sadd.s32 1, %s1857_s20 }
   0xc   : > { %p36_p0 = scmp.ge.s32.totalorder %s34_s23, 2  ;;  %s75_s25 = sadd.s32 1, %s1841_s16 }
   0xd   : > { %p82_p1 = scmp.ne.s32.totalorder %s1841_s16, %s1837_s15  ;;  %p83_p2 = scmp.eq.s32.totalorder %s1861_s21, 0 }
   0xe   : > { %s2301_s23 = smov (%p36_p0, %s34_s23), 0  ;;  %s2303_s24 = smov (!%p36_p0, %s38_s24), %s1857_s20 }
   0xf   : > { %2281 = sst [smem:[#allocation11_spill]] %s2301_s23  ;;  %s71_s26 = ssub.s32 %s1853_s19, %s2301_s23 }
  0x10   : > { %p40_p3 = scmp.ge.s32.totalorder %s2303_s24, 2  ;;  %p73_p4 = scmp.eq.s32.totalorder %s71_s26, 0 }
  0x11   : > { %p1946_p5 = por %p83_p2, %p82_p1  ;;  %p88_p6 = scmp.ne.s32.totalorder %s1837_s15, %s1833_s14 }
  0x12   : > { %s2305_s24 = smov (%p40_p3, %s2303_s24), 0  ;;  %p89_p7 = scmp.eq.s32.totalorder %s1470_s22, 0 }
  0x13   : > { %2283 = sst [smem:[#allocation12_spill]] %s2305_s24  ;;  %s124_s29 = ssub.s32 %s1857_s20, %s2305_s24 }
  0x14   : > { %s1954_s28 = scalar_select %p73_p4, %s1841_s16, %s75_s25  }
  0x15   : > { %s126_s30 = sor.u32 %s124_s29, %s71_s26  ;;  %s129_s4 = sadd.s32 1, %s1829_s13 }
  0x16   : > { %2284 = sst [smem:[#allocation13_spill]] %s1954_s28  ;;  %p1959_p8 = por %p89_p7, %p88_p6 }
  0x17   : > { %p127_p9 = scmp.eq.s32.totalorder %s126_s30, 0  ;;  %p139_p10 = scmp.ne.s32.totalorder %s1829_s13, %s1825_s12 }
  0x18   : > { %p140_p11 = scmp.eq.s32.totalorder %s1470_s22, 3  ;;  %p1631_p13 = scmp.lt.s32.totalorder %s1861_s21, 4 }
  0x19   : > { %s1966_s6 = scalar_select %p127_p9, %s1829_s13, %s129_s4  }
  0x1a   : > { %p1968_p12 = por %p140_p11, %p139_p10  ;;  %s1974_s8 = sand.u32 1, %s1841_s16  }
  0x1b   : > { %s1618_s9 = smul.u32 24, %s1974_s8  ;;  %s1594_s10 = sshll.u32 %s1853_s19, 3 }
  0x1c   : > { %p1980_p0 = pnand %p1631_p13, %p1946_p5  ;;  %s2288_s1 = sld [smem:[#allocation14_spill]] }
  0x1d   : > { %s182_s29 = scalar_lea.vmem [#allocation3], %s1618_s9  ;;  %s179_s4 = scalar_lea.sflag [#allocation4], %s1974_s8 }
  0x1e   : > { %s193_s30 = sshll.u32 %s182_s29, 4  ;;  %s1863_s24 = smov 256   ;;  %s194_s30 = int_to_ptr.vmem [resolvable:$true] %s193_s30 }
  0x1f   : > { %s1864_s27 = smov 128   ;;  %s1865_s23 = smov 8  }
  0x20   : > { %p1478_p1 = scmp.ge.s32.totalorder %s1861_s21, 1  ;;  %p220_p2 = scmp.lt.s32.totalorder %s1861_s21, 5 }
  0x21   : > { %s1476_s20 = sshll.u32 %s1974_s8, 1  ;;  %s1477_s14 = sshll.u32 %s1853_s19, 1 }
  0x22   : > { %s190_s25 = scalar_lea.hbm %s2288_s1, %s1594_s10  ;;  %p221_p3 = pnand %p1478_p1, %p220_p2 }
  0x23   : > { %s191_s26 = sshll.u32 %s190_s25, 4  ;;  %s207_s22 = scalar_lea.vmem [#allocation5], %s1476_s20  ;;  %s192_s26 = int_to_ptr.hbm [resolvable:$true] %s191_s26 }
  0x24   : > { %1627 = dma.hbm_to_vmem [thread:$0]  (!%p1980_p0), %s192_s26, 384, %s194_s30, %s179_s4, %s1863_s24, %s1864_s27, %s1865_s23  }
  0x25   : > { %s215_s10 = sshll.u32 %s207_s22, 4  ;;  %s211_s29 = scalar_lea.hbm %s2274_s2, %s1477_s14  ;;  %s216_s10 = int_to_ptr.vmem [resolvable:$true] %s215_s10 }
  0x26   : > { %s213_s1 = sshll.u32 %s211_s29, 4  ;;  %s204_s28 = scalar_lea.sflag [#allocation6], %s1974_s8  ;;  %s214_s1 = int_to_ptr.hbm [resolvable:$true] %s213_s1 }
  0x27   : > { %1630 = dma.hbm_to_vmem [thread:$0]  (!%p1980_p0), %s214_s1, 32, %s216_s10, %s204_s28  }
  0x28   : > { %224 = sbr.rel (%p221_p3) target bundleno = 330 (0x14a), region = 32  ;;  %s226_s23 = sand.u32 (!%p221_p3), 1, %s1837_s15  }
  0x29   : > { %s1619_s24 = smul.u32 (!%p221_p3), 24, %s226_s23  ;;  %s227_s26 = scalar_lea.sflag (!%p221_p3), [#allocation4], %s226_s23 }
  0x2b   : > { %s230_s30 = scalar_lea.vmem (!%p221_p3), [#allocation3], %s1619_s24 }
  0x2d   : > { %1816 = dma.done.wait (%p1959_p8), %s227_s26, 384  }
  0x2e   : > { %1818 = vsyncadd (%p1959_p8), %s227_s26, 4294966912  ;;  %s1479_s20 = sshll.u32 %s226_s23, 1  ;;  %s237_s4 = scalar_lea.sflag [#allocation6], %s226_s23 }
  0x2f   : > { %s2005_s27 = scalar_lea.vmem [#allocation5], %s1479_s20 }
  0x30   : > { %1820 = dma.done.wait (%p1959_p8), %s237_s4, 32  }
  0x31   : > { %1822 = vsyncadd (%p1959_p8), %s237_s4, 4294967264  ;;  %s1481_s1 = sshll.u32 %s1849_s18, 5  ;;  %v457_v0 = vld [vmem:[%s230_s30 + $0x10] sm:$0x11]  ;;  %vm602_vm0 = vcmask 1040384   ;;  %vm553_vm1 = vcmask 146432  }
  0x32   : > { %p277_p4 = scmp.lt.s32.totalorder %s1481_s1, 63  ;;  %v545_v1 = vunpack.c.l.b16 %v457_v0  ;;  %v546_v2 = vunpack.c.h.b16 %v457_v0  ;;  %v1549_v5 = vld [vmem:[%s230_s30] sm:$0xf]  ;;  %v1612_v6 = vld [vmem:[%s230_s30 + $0x4] sm:$0xf0]  ;;  %s273_s14 = sand.u32 1, %s1825_s12  }
  0x33   : > { %v1611_v7 = vld [vmem:[%s230_s30 + $0x4] sm:$0xf]  ;;  %v1551_v8 = vld [vmem:[%s230_s30 + $0x8] sm:$0xf0]  ;;  %v1550_v11 = vor.u32 %v1612_v6, %v1549_v5  ;;  %v982_v29 = vld [vmem:[%s2005_s27] sm:$0x3] }
  0x34   : > { %s2307_s1 = smov (!%p277_p4, %s1481_s1), 63  ;;  %v549_v3 = vpack.c.b16 %v545_v1, %v545_v1  ;;  %v550_v4 = vpack.c.b16 %v546_v2, %v546_v2  ;;  %v1554_v12 = vor.u32 %v1611_v7, %v1551_v8  ;;  %v2066_v30 = vperm.slane %v982_v29, 0  ;;  %s1480_s22 = sshll.u32 %s273_s14, 8 }
  0x35   : > { %s1482_s28 = sshll.u32 %s2307_s1, 2  ;;  %v2068_v31 = vperm.slane %v982_v29, 1  ;;  %s2074_s10 = scalar_lea.vmem [#allocation7], %s1480_s22 }
  0x36   : > { %v604_v9 = vsel %vm602_vm0, %v549_v3, 0  ;;  %v607_v10 = vsel %vm602_vm0, %v550_v4, 0  ;;  %s2015_s11 = scalar_lea.vmem %s2272_s0, %s1482_s28  ;;  %s1589_s12 = sshll.u32 (%p1968_p12), %s1845_s17, 1 }
  0x37   : > { %615 = vmatpush.bf16.msra.mxu0 %v604_v9  ;;  %1614 = vmatpush.bf16.msra.mxu2 %v604_v9  ;;  %v1595_v13 = vld [vmem:[%s2015_s11] sm:$0xff]  ;;  %v1596_v15 = vld [vmem:[%s2015_s11 + $0x8] sm:$0xff]  ;;  %v1597_v17 = vld [vmem:[%s2015_s11 + $0x10] sm:$0xff]  ;;  %s1613_s25 = sshll.u32 (%p1968_p12), %s1849_s18, 7 }
  0x38   : > { %704 = vmatpush.bf16.msra.mxu1 %v607_v10  ;;  %1616 = vmatpush.bf16.msra.mxu3 %v607_v10  ;;  %v1603_v14 = vld [vmem:[%s2015_s11 + $0x40] sm:$0xff]  ;;  %v1604_v16 = vld [vmem:[%s2015_s11 + $0x48] sm:$0xff]  ;;  %v1605_v18 = vld [vmem:[%s2015_s11 + $0x50] sm:$0xff]  ;;  %s1190_s9 = sadd.s32 (%p1968_p12), %s1613_s25, %s1589_s12 }
  0x39   : > { %v1598_v19 = vld [vmem:[%s2015_s11 + $0x18] sm:$0xff]  ;;  %v1599_v21 = vld [vmem:[%s2015_s11 + $0x20] sm:$0xff]  ;;  %v1600_v23 = vld [vmem:[%s2015_s11 + $0x28] sm:$0xff]  ;;  %s1591_s29 = sshll.u32 (%p1968_p12), %s1190_s9, 2 }
  0x3a   : > { %v1606_v20 = vld [vmem:[%s2015_s11 + $0x58] sm:$0xff]  ;;  %v1607_v22 = vld [vmem:[%s2015_s11 + $0x60] sm:$0xff]  ;;  %v1608_v24 = vld [vmem:[%s2015_s11 + $0x68] sm:$0xff]  ;;  %s2178_s24 = scalar_lea.vmem (%p1968_p12), %s2275_s3, %s1591_s29 }
  0x3b   : > { %616 = vmatpush.bf16.msra.mxu0 %v1550_v11  ;;  %1615 = vmatpush.bf16.msra.mxu2 %v1550_v11  ;;  %v1601_v25 = vld [vmem:[%s2015_s11 + $0x30] sm:$0xff]  ;;  %v1602_v27 = vld [vmem:[%s2015_s11 + $0x38] sm:$0xff] }
  0x3c   : > { %705 = vmatpush.bf16.msra.mxu1 %v1554_v12  ;;  %1617 = vmatpush.bf16.msra.mxu3 %v1554_v12  ;;  %v1609_v26 = vld [vmem:[%s2015_s11 + $0x70] sm:$0xff]  ;;  %v1610_v28 = vld [vmem:[%s2015_s11 + $0x78] sm:$0xff] }
  0x3e   : > { %1555 = vmatmul.msk.bf16.vlgmr.msra.gmra.mxu0 %vm553_vm1, %v1595_v13  ;;  %1563 = vmatmul.msk.bf16.vlgmr.msra.gmra.mxu2 %vm553_vm1, %v1603_v14 }
  0x3f   : > { %1571 = vmatmul.msk.bf16.vlgmr.msra.gmra.mxu1 %vm553_vm1, %v1595_v13  ;;  %1579 = vmatmul.msk.bf16.vlgmr.msra.gmra.mxu3 %vm553_vm1, %v1603_v14 }
  0x4e   : > { %1556 = vmatmul.msk.bf16.gmra.mxu0 %vm553_vm1, %v1596_v15  ;;  %1564 = vmatmul.msk.bf16.gmra.mxu2 %vm553_vm1, %v1604_v16 }
  0x4f   : > { %1572 = vmatmul.msk.bf16.gmra.mxu1 %vm553_vm1, %v1596_v15  ;;  %1580 = vmatmul.msk.bf16.gmra.mxu3 %vm553_vm1, %v1604_v16 }
  0x5e   : > { %1557 = vmatmul.msk.bf16.gmra.mxu0 %vm553_vm1, %v1597_v17  ;;  %1565 = vmatmul.msk.bf16.gmra.mxu2 %vm553_vm1, %v1605_v18 }
  0x5f   : > { %1573 = vmatmul.msk.bf16.gmra.mxu1 %vm553_vm1, %v1597_v17  ;;  %1581 = vmatmul.msk.bf16.gmra.mxu3 %vm553_vm1, %v1605_v18 }
  0x6e   : > { %1558 = vmatmul.msk.bf16.gmra.mxu0 %vm553_vm1, %v1598_v19  ;;  %1566 = vmatmul.msk.bf16.gmra.mxu2 %vm553_vm1, %v1606_v20 }
  0x6f   : > { %1574 = vmatmul.msk.bf16.gmra.mxu1 %vm553_vm1, %v1598_v19  ;;  %1582 = vmatmul.msk.bf16.gmra.mxu3 %vm553_vm1, %v1606_v20 }
  0x7e   : > { %1559 = vmatmul.msk.bf16.gmra.mxu0 %vm553_vm1, %v1599_v21  ;;  %1567 = vmatmul.msk.bf16.gmra.mxu2 %vm553_vm1, %v1607_v22 }
  0x7f   : > { %1575 = vmatmul.msk.bf16.gmra.mxu1 %vm553_vm1, %v1599_v21  ;;  %1583 = vmatmul.msk.bf16.gmra.mxu3 %vm553_vm1, %v1607_v22 }
  0x8e   : > { %1560 = vmatmul.msk.bf16.gmra.mxu0 %vm553_vm1, %v1600_v23  ;;  %1568 = vmatmul.msk.bf16.gmra.mxu2 %vm553_vm1, %v1608_v24 }
  0x8f   : > { %1576 = vmatmul.msk.bf16.gmra.mxu1 %vm553_vm1, %v1600_v23  ;;  %1584 = vmatmul.msk.bf16.gmra.mxu3 %vm553_vm1, %v1608_v24 }
  0x9e   : > { %1561 = vmatmul.msk.bf16.gmra.mxu0 %vm553_vm1, %v1601_v25  ;;  %1569 = vmatmul.msk.bf16.gmra.mxu2 %vm553_vm1, %v1609_v26 }
  0x9f   : > { %1577 = vmatmul.msk.bf16.gmra.mxu1 %vm553_vm1, %v1601_v25  ;;  %1585 = vmatmul.msk.bf16.gmra.mxu3 %vm553_vm1, %v1609_v26 }
  0xae   : > { %1562 = vmatmul.msk.bf16.gmra.mxu0 %vm553_vm1, %v1602_v27  ;;  %1570 = vmatmul.msk.bf16.gmra.mxu2 %vm553_vm1, %v1610_v28 }
  0xaf   : > { %1578 = vmatmul.msk.bf16.gmra.mxu1 %vm553_vm1, %v1602_v27  ;;  %1586 = vmatmul.msk.bf16.gmra.mxu3 %vm553_vm1, %v1610_v28 }
  0xbb   : > { %v618_v32 = vpop.f32.mrf.mxu0 }
  0xbc   : > { %v988_v33 = vadd.f32 %v2066_v30, %v618_v32  ;;  %v707_v34 = vpop.f32.mrf.mxu1 }
  0xbd   : > { %v989_v35 = vadd.f32 %v2068_v31, %v707_v34 }
  0xbe   : > { %v1052_v36 = vmax.f32 %v988_v33, 0.0 }
  0xbf   : > { %v1053_v37 = vmax.f32 %v989_v35, 0.0 }
  0xc1   : > { %v1116_v38 = vpack.c.bf16 %v1053_v37, %v1052_v36  ;;  %v658_v39 = vpop.f32.mrf.mxu2 }
  0xc2   : > { %v1020_v40 = vadd.f32 %v2066_v30, %v658_v39  ;;  %v747_v41 = vpop.f32.mrf.mxu3 }
  0xc3   : > { %1148 = vst [vmem:[%s2074_s10] sm:$0xff] %v1116_v38  ;;  %v1021_v42 = vadd.f32 %v2068_v31, %v747_v41  ;;  %v620_v43 = vpop.f32.mrf.mxu0 }
  0xc4   : > { %v1084_v44 = vmax.f32 %v1020_v40, 0.0  ;;  %v990_v45 = vadd.f32 %v2066_v30, %v620_v43  ;;  %v709_v46 = vpop.f32.mrf.mxu1 }
  0xc5   : > { %v1085_v47 = vmax.f32 %v1021_v42, 0.0  ;;  %v991_v48 = vadd.f32 %v2068_v31, %v709_v46 }
  0xc6   : > { %v1054_v49 = vmax.f32 %v990_v45, 0.0 }
  0xc7   : > { %v1132_v50 = vpack.c.bf16 %v1085_v47, %v1084_v44  ;;  %v1055_v51 = vmax.f32 %v991_v48, 0.0 }
  0xc9   : > { %1164 = vst [vmem:[%s2074_s10 + $0x80] sm:$0xff] %v1132_v50  ;;  %v1117_v52 = vpack.c.bf16 %v1055_v51, %v1054_v49  ;;  %v660_v53 = vpop.f32.mrf.mxu2 }
  0xca   : > { %v1022_v54 = vadd.f32 %v2066_v30, %v660_v53  ;;  %v749_v55 = vpop.f32.mrf.mxu3 }
  0xcb   : > { %1149 = vst [vmem:[%s2074_s10 + $0x8] sm:$0xff] %v1117_v52  ;;  %v1023_v56 = vadd.f32 %v2068_v31, %v749_v55  ;;  %v623_v57 = vpop.f32.mrf.mxu0 }
  0xcc   : > { %v1086_v58 = vmax.f32 %v1022_v54, 0.0  ;;  %v992_v59 = vadd.f32 %v2066_v30, %v623_v57  ;;  %v712_v60 = vpop.f32.mrf.mxu1 }
  0xcd   : > { %v1087_v61 = vmax.f32 %v1023_v56, 0.0  ;;  %v993_v62 = vadd.f32 %v2068_v31, %v712_v60 }
  0xce   : > { %v1056_v63 = vmax.f32 %v992_v59, 0.0 }
  0xcf   : > { %v1133_v0 = vpack.c.bf16 %v1087_v61, %v1086_v58  ;;  %v1057_v1 = vmax.f32 %v993_v62, 0.0 }
  0xd1   : > { %1165 = vst [vmem:[%s2074_s10 + $0x88] sm:$0xff] %v1133_v0  ;;  %v1118_v2 = vpack.c.bf16 %v1057_v1, %v1056_v63  ;;  %v663_v3 = vpop.f32.mrf.mxu2 }
  0xd2   : > { %v1024_v4 = vadd.f32 %v2066_v30, %v663_v3  ;;  %v752_v5 = vpop.f32.mrf.mxu3 }
  0xd3   : > { %1150 = vst [vmem:[%s2074_s10 + $0x10] sm:$0xff] %v1118_v2  ;;  %v1025_v6 = vadd.f32 %v2068_v31, %v752_v5  ;;  %v625_v7 = vpop.f32.mrf.mxu0 }
  0xd4   : > { %v1088_v8 = vmax.f32 %v1024_v4, 0.0  ;;  %v994_v9 = vadd.f32 %v2066_v30, %v625_v7  ;;  %v714_v10 = vpop.f32.mrf.mxu1 }
  0xd5   : > { %v1089_v11 = vmax.f32 %v1025_v6, 0.0  ;;  %v995_v12 = vadd.f32 %v2068_v31, %v714_v10 }
  0xd6   : > { %v1058_v13 = vmax.f32 %v994_v9, 0.0 }
  0xd7   : > { %v1134_v14 = vpack.c.bf16 %v1089_v11, %v1088_v8  ;;  %v1059_v15 = vmax.f32 %v995_v12, 0.0 }
  0xd9   : > { %1166 = vst [vmem:[%s2074_s10 + $0x90] sm:$0xff] %v1134_v14  ;;  %v1119_v16 = vpack.c.bf16 %v1059_v15, %v1058_v13  ;;  %v665_v17 = vpop.f32.mrf.mxu2 }
  0xda   : > { %v1026_v18 = vadd.f32 %v2066_v30, %v665_v17  ;;  %v754_v19 = vpop.f32.mrf.mxu3 }
  0xdb   : > { %1151 = vst [vmem:[%s2074_s10 + $0x18] sm:$0xff] %v1119_v16  ;;  %v1027_v20 = vadd.f32 %v2068_v31, %v754_v19  ;;  %v628_v21 = vpop.f32.mrf.mxu0 }
  0xdc   : > { %v1090_v22 = vmax.f32 %v1026_v18, 0.0  ;;  %v996_v23 = vadd.f32 %v2066_v30, %v628_v21  ;;  %v717_v24 = vpop.f32.mrf.mxu1 }
  0xdd   : > { %v1091_v25 = vmax.f32 %v1027_v20, 0.0  ;;  %v997_v26 = vadd.f32 %v2068_v31, %v717_v24 }
  0xde   : > { %v1060_v27 = vmax.f32 %v996_v23, 0.0 }
  0xdf   : > { %v1135_v28 = vpack.c.bf16 %v1091_v25, %v1090_v22  ;;  %v1061_v29 = vmax.f32 %v997_v26, 0.0 }
  0xe1   : > { %1167 = vst [vmem:[%s2074_s10 + $0x98] sm:$0xff] %v1135_v28  ;;  %v1120_v32 = vpack.c.bf16 %v1061_v29, %v1060_v27  ;;  %v668_v33 = vpop.f32.mrf.mxu2 }
  0xe2   : > { %v1028_v34 = vadd.f32 %v2066_v30, %v668_v33  ;;  %v757_v35 = vpop.f32.mrf.mxu3 }
  0xe3   : > { %1152 = vst [vmem:[%s2074_s10 + $0x20] sm:$0xff] %v1120_v32  ;;  %v1029_v36 = vadd.f32 %v2068_v31, %v757_v35  ;;  %v630_v37 = vpop.f32.mrf.mxu0 }
  0xe4   : > { %v1092_v38 = vmax.f32 %v1028_v34, 0.0  ;;  %v998_v39 = vadd.f32 %v2066_v30, %v630_v37  ;;  %v719_v40 = vpop.f32.mrf.mxu1 }
  0xe5   : > { %v1093_v41 = vmax.f32 %v1029_v36, 0.0  ;;  %v999_v42 = vadd.f32 %v2068_v31, %v719_v40 }
  0xe6   : > { %v1062_v43 = vmax.f32 %v998_v39, 0.0 }
  0xe7   : > { %v1136_v44 = vpack.c.bf16 %v1093_v41, %v1092_v38  ;;  %v1063_v45 = vmax.f32 %v999_v42, 0.0 }
  0xe9   : > { %1168 = vst [vmem:[%s2074_s10 + $0xa0] sm:$0xff] %v1136_v44  ;;  %v1121_v46 = vpack.c.bf16 %v1063_v45, %v1062_v43  ;;  %v670_v47 = vpop.f32.mrf.mxu2 }
  0xea   : > { %v1030_v48 = vadd.f32 %v2066_v30, %v670_v47  ;;  %v759_v49 = vpop.f32.mrf.mxu3 }
  0xeb   : > { %1153 = vst [vmem:[%s2074_s10 + $0x28] sm:$0xff] %v1121_v46  ;;  %v1031_v50 = vadd.f32 %v2068_v31, %v759_v49  ;;  %v633_v51 = vpop.f32.mrf.mxu0 }
  0xec   : > { %v1094_v52 = vmax.f32 %v1030_v48, 0.0  ;;  %v1000_v53 = vadd.f32 %v2066_v30, %v633_v51  ;;  %v722_v54 = vpop.f32.mrf.mxu1 }
  0xed   : > { %v1095_v55 = vmax.f32 %v1031_v50, 0.0  ;;  %v1001_v56 = vadd.f32 %v2068_v31, %v722_v54 }
  0xee   : > { %v1064_v57 = vmax.f32 %v1000_v53, 0.0 }
  0xef   : > { %v1137_v58 = vpack.c.bf16 %v1095_v55, %v1094_v52  ;;  %v1065_v59 = vmax.f32 %v1001_v56, 0.0 }
  0xf1   : > { %1169 = vst [vmem:[%s2074_s10 + $0xa8] sm:$0xff] %v1137_v58  ;;  %v1122_v60 = vpack.c.bf16 %v1065_v59, %v1064_v57  ;;  %v673_v61 = vpop.f32.mrf.mxu2 }
  0xf2   : > { %v1032_v62 = vadd.f32 %v2066_v30, %v673_v61  ;;  %v762_v63 = vpop.f32.mrf.mxu3 }
  0xf3   : > { %1154 = vst [vmem:[%s2074_s10 + $0x30] sm:$0xff] %v1122_v60  ;;  %v1033_v0 = vadd.f32 %v2068_v31, %v762_v63  ;;  %v635_v1 = vpop.f32.mrf.mxu0 }
  0xf4   : > { %v1096_v2 = vmax.f32 %v1032_v62, 0.0  ;;  %v1002_v3 = vadd.f32 %v2066_v30, %v635_v1  ;;  %v724_v4 = vpop.f32.mrf.mxu1 }
  0xf5   : > { %v1097_v5 = vmax.f32 %v1033_v0, 0.0  ;;  %v1003_v6 = vadd.f32 %v2068_v31, %v724_v4 }
  0xf6   : > { %v1066_v7 = vmax.f32 %v1002_v3, 0.0 }
  0xf7   : > { %v1138_v8 = vpack.c.bf16 %v1097_v5, %v1096_v2  ;;  %v1067_v9 = vmax.f32 %v1003_v6, 0.0 }
  0xf9   : > { %1170 = vst [vmem:[%s2074_s10 + $0xb0] sm:$0xff] %v1138_v8  ;;  %v1123_v10 = vpack.c.bf16 %v1067_v9, %v1066_v7  ;;  %v675_v11 = vpop.f32.mrf.mxu2 }
  0xfa   : > { %v1034_v12 = vadd.f32 %v2066_v30, %v675_v11  ;;  %v764_v13 = vpop.f32.mrf.mxu3 }
  0xfb   : > { %1155 = vst [vmem:[%s2074_s10 + $0x38] sm:$0xff] %v1123_v10  ;;  %v1035_v14 = vadd.f32 %v2068_v31, %v764_v13  ;;  %v638_v15 = vpop.f32.mrf.mxu0 }
  0xfc   : > { %v1098_v16 = vmax.f32 %v1034_v12, 0.0  ;;  %v1004_v17 = vadd.f32 %v2066_v30, %v638_v15  ;;  %v727_v18 = vpop.f32.mrf.mxu1 }
  0xfd   : > { %v1099_v19 = vmax.f32 %v1035_v14, 0.0  ;;  %v1005_v20 = vadd.f32 %v2068_v31, %v727_v18 }
  0xfe   : > { %v1068_v21 = vmax.f32 %v1004_v17, 0.0 }
  0xff   : > { %v1139_v22 = vpack.c.bf16 %v1099_v19, %v1098_v16  ;;  %v1069_v23 = vmax.f32 %v1005_v20, 0.0 }
 0x101   : > { %1171 = vst [vmem:[%s2074_s10 + $0xb8] sm:$0xff] %v1139_v22  ;;  %v1124_v24 = vpack.c.bf16 %v1069_v23, %v1068_v21  ;;  %v678_v25 = vpop.f32.mrf.mxu2 }
 0x102   : > { %v1036_v26 = vadd.f32 %v2066_v30, %v678_v25  ;;  %v767_v27 = vpop.f32.mrf.mxu3 }
 0x103   : > { %1156 = vst [vmem:[%s2074_s10 + $0x40] sm:$0xff] %v1124_v24  ;;  %v1037_v28 = vadd.f32 %v2068_v31, %v767_v27  ;;  %v640_v29 = vpop.f32.mrf.mxu0 }
 0x104   : > { %v1100_v32 = vmax.f32 %v1036_v26, 0.0  ;;  %v1006_v33 = vadd.f32 %v2066_v30, %v640_v29  ;;  %v729_v34 = vpop.f32.mrf.mxu1 }
 0x105   : > { %v1101_v35 = vmax.f32 %v1037_v28, 0.0  ;;  %v1007_v36 = vadd.f32 %v2068_v31, %v729_v34 }
 0x106   : > { %v1070_v37 = vmax.f32 %v1006_v33, 0.0 }
 0x107   : > { %v1140_v38 = vpack.c.bf16 %v1101_v35, %v1100_v32  ;;  %v1071_v39 = vmax.f32 %v1007_v36, 0.0 }
 0x109   : > { %1172 = vst [vmem:[%s2074_s10 + $0xc0] sm:$0xff] %v1140_v38  ;;  %v1125_v40 = vpack.c.bf16 %v1071_v39, %v1070_v37  ;;  %v680_v41 = vpop.f32.mrf.mxu2 }
 0x10a   : > { %v1038_v42 = vadd.f32 %v2066_v30, %v680_v41  ;;  %v769_v43 = vpop.f32.mrf.mxu3 }
 0x10b   : > { %1157 = vst [vmem:[%s2074_s10 + $0x48] sm:$0xff] %v1125_v40  ;;  %v1039_v44 = vadd.f32 %v2068_v31, %v769_v43  ;;  %v643_v45 = vpop.f32.mrf.mxu0 }
 0x10c   : > { %v1102_v46 = vmax.f32 %v1038_v42, 0.0  ;;  %v1008_v47 = vadd.f32 %v2066_v30, %v643_v45  ;;  %v732_v48 = vpop.f32.mrf.mxu1 }
 0x10d   : > { %v1103_v49 = vmax.f32 %v1039_v44, 0.0  ;;  %v1009_v50 = vadd.f32 %v2068_v31, %v732_v48 }
 0x10e   : > { %v1072_v51 = vmax.f32 %v1008_v47, 0.0 }
 0x10f   : > { %v1141_v52 = vpack.c.bf16 %v1103_v49, %v1102_v46  ;;  %v1073_v53 = vmax.f32 %v1009_v50, 0.0 }
 0x111   : > { %1173 = vst [vmem:[%s2074_s10 + $0xc8] sm:$0xff] %v1141_v52  ;;  %v1126_v54 = vpack.c.bf16 %v1073_v53, %v1072_v51  ;;  %v683_v55 = vpop.f32.mrf.mxu2 }
 0x112   : > { %v1040_v56 = vadd.f32 %v2066_v30, %v683_v55  ;;  %v772_v57 = vpop.f32.mrf.mxu3 }
 0x113   : > { %1158 = vst [vmem:[%s2074_s10 + $0x50] sm:$0xff] %v1126_v54  ;;  %v1041_v58 = vadd.f32 %v2068_v31, %v772_v57  ;;  %v645_v59 = vpop.f32.mrf.mxu0 }
 0x114   : > { %v1104_v60 = vmax.f32 %v1040_v56, 0.0  ;;  %v1010_v61 = vadd.f32 %v2066_v30, %v645_v59  ;;  %v734_v62 = vpop.f32.mrf.mxu1 }
 0x115   : > { %v1105_v63 = vmax.f32 %v1041_v58, 0.0  ;;  %v1011_v0 = vadd.f32 %v2068_v31, %v734_v62 }
 0x116   : > { %v1074_v1 = vmax.f32 %v1010_v61, 0.0 }
 0x117   : > { %v1142_v2 = vpack.c.bf16 %v1105_v63, %v1104_v60  ;;  %v1075_v3 = vmax.f32 %v1011_v0, 0.0 }
 0x119   : > { %1174 = vst [vmem:[%s2074_s10 + $0xd0] sm:$0xff] %v1142_v2  ;;  %v1127_v4 = vpack.c.bf16 %v1075_v3, %v1074_v1  ;;  %v685_v5 = vpop.f32.mrf.mxu2 }
 0x11a   : > { %v1042_v6 = vadd.f32 %v2066_v30, %v685_v5  ;;  %v774_v7 = vpop.f32.mrf.mxu3 }
 0x11b   : > { %1159 = vst [vmem:[%s2074_s10 + $0x58] sm:$0xff] %v1127_v4  ;;  %v1043_v8 = vadd.f32 %v2068_v31, %v774_v7  ;;  %v648_v9 = vpop.f32.mrf.mxu0  ;;  %v1289_v7 = vld [vmem:[%s2074_s10 + $0x18] sm:$0xff] (%p1968_p12) }
 0x11c   : > { %v1106_v10 = vmax.f32 %v1042_v6, 0.0  ;;  %v1012_v11 = vadd.f32 %v2066_v30, %v648_v9  ;;  %v737_v12 = vpop.f32.mrf.mxu1  ;;  %v1287_v6 = vld [vmem:[%s2074_s10 + $0x10] sm:$0xff] (%p1968_p12)  ;;  %v1293_v9 = vld [vmem:[%s2074_s10 + $0x28] sm:$0xff] (%p1968_p12)  ;;  %1290 = vst [vmem:[%s2178_s24 + $0x30] sm:$0xff] (%p1968_p12), %v1289_v7 }
 0x11d   : > { %v1107_v13 = vmax.f32 %v1043_v8, 0.0  ;;  %v1013_v14 = vadd.f32 %v2068_v31, %v737_v12  ;;  %v1291_v8 = vld [vmem:[%s2074_s10 + $0x20] sm:$0xff] (%p1968_p12)  ;;  %1288 = vst [vmem:[%s2178_s24 + $0x20] sm:$0xff] (%p1968_p12), %v1287_v6 }
 0x11e   : > { %v1076_v15 = vmax.f32 %v1012_v11, 0.0  ;;  %1292 = vst [vmem:[%s2178_s24 + $0x40] sm:$0xff] (%p1968_p12), %v1291_v8  ;;  %v1297_v11 = vld [vmem:[%s2074_s10 + $0x38] sm:$0xff] (%p1968_p12)  ;;  %v1299_v12 = vld [vmem:[%s2074_s10 + $0x40] sm:$0xff] (%p1968_p12) }
 0x11f   : > { %v1143_v16 = vpack.c.bf16 %v1107_v13, %v1106_v10  ;;  %v1077_v17 = vmax.f32 %v1013_v14, 0.0  ;;  %v1295_v10 = vld [vmem:[%s2074_s10 + $0x30] sm:$0xff] (%p1968_p12)  ;;  %1294 = vst [vmem:[%s2178_s24 + $0x50] sm:$0xff] (%p1968_p12), %v1293_v9  ;;  %v1301_v13 = vld [vmem:[%s2074_s10 + $0x48] sm:$0xff] (%p1968_p12) }
 0x120   : > { %1296 = vst [vmem:[%s2178_s24 + $0x60] sm:$0xff] (%p1968_p12), %v1295_v10  ;;  %v1303_v14 = vld [vmem:[%s2074_s10 + $0x50] sm:$0xff] (%p1968_p12) }
 0x121   : > { %1175 = vst [vmem:[%s2074_s10 + $0xd8] sm:$0xff] %v1143_v16  ;;  %v1128_v18 = vpack.c.bf16 %v1077_v17, %v1076_v15  ;;  %v688_v19 = vpop.f32.mrf.mxu2 }
 0x122   : > { %v1044_v20 = vadd.f32 %v2066_v30, %v688_v19  ;;  %v777_v21 = vpop.f32.mrf.mxu3  ;;  %1298 = vst [vmem:[%s2178_s24 + $0x70] sm:$0xff] (%p1968_p12), %v1297_v11  ;;  %v1305_v15 = vld [vmem:[%s2074_s10 + $0x58] sm:$0xff] (%p1968_p12) }
 0x123   : > { %1160 = vst [vmem:[%s2074_s10 + $0x60] sm:$0xff] %v1128_v18  ;;  %v1045_v22 = vadd.f32 %v2068_v31, %v777_v21  ;;  %v650_v23 = vpop.f32.mrf.mxu0  ;;  %v1317_v21 = vld [vmem:[%s2074_s10 + $0x88] sm:$0xff] (%p1968_p12) }
 0x124   : > { %v1108_v24 = vmax.f32 %v1044_v20, 0.0  ;;  %v1014_v25 = vadd.f32 %v2066_v30, %v650_v23  ;;  %v739_v26 = vpop.f32.mrf.mxu1  ;;  %1300 = vst [vmem:[%s2178_s24 + $0x80] sm:$0xff] (%p1968_p12), %v1299_v12  ;;  %v1315_v20 = vld [vmem:[%s2074_s10 + $0x80] sm:$0xff] (%p1968_p12)  ;;  %v1321_v23 = vld [vmem:[%s2074_s10 + $0x98] sm:$0xff] (%p1968_p12) }
 0x125   : > { %v1109_v27 = vmax.f32 %v1045_v22, 0.0  ;;  %v1015_v28 = vadd.f32 %v2068_v31, %v739_v26  ;;  %1302 = vst [vmem:[%s2178_s24 + $0x90] sm:$0xff] (%p1968_p12), %v1301_v13  ;;  %v1319_v22 = vld [vmem:[%s2074_s10 + $0x90] sm:$0xff] (%p1968_p12) }
 0x126   : > { %v1078_v29 = vmax.f32 %v1014_v25, 0.0  ;;  %1304 = vst [vmem:[%s2178_s24 + $0xa0] sm:$0xff] (%p1968_p12), %v1303_v14  ;;  %v1325_v25 = vld [vmem:[%s2074_s10 + $0xa8] sm:$0xff] (%p1968_p12)  ;;  %v1327_v26 = vld [vmem:[%s2074_s10 + $0xb0] sm:$0xff] (%p1968_p12) }
 0x127   : > { %v1144_v32 = vpack.c.bf16 %v1109_v27, %v1108_v24  ;;  %v1079_v33 = vmax.f32 %v1015_v28, 0.0  ;;  %1306 = vst [vmem:[%s2178_s24 + $0xb0] sm:$0xff] (%p1968_p12), %v1305_v15  ;;  %v1323_v24 = vld [vmem:[%s2074_s10 + $0xa0] sm:$0xff] (%p1968_p12)  ;;  %v1329_v27 = vld [vmem:[%s2074_s10 + $0xb8] sm:$0xff] (%p1968_p12) }
 0x128   : > { %1316 = vst [vmem:[%s2178_s24 + $0x100] sm:$0xff] (%p1968_p12), %v1315_v20  ;;  %v1331_v28 = vld [vmem:[%s2074_s10 + $0xc0] sm:$0xff] (%p1968_p12) }
 0x129   : > { %1176 = vst [vmem:[%s2074_s10 + $0xe0] sm:$0xff] %v1144_v32  ;;  %v1129_v34 = vpack.c.bf16 %v1079_v33, %v1078_v29  ;;  %v690_v35 = vpop.f32.mrf.mxu2  ;;  %v1333_v29 = vld [vmem:[%s2074_s10 + $0xc8] sm:$0xff] (%p1968_p12)  ;;  %v1335_v32 = vld [vmem:[%s2074_s10 + $0xd0] sm:$0xff] (%p1968_p12)  ;;  %v1337_v33 = vld [vmem:[%s2074_s10 + $0xd8] sm:$0xff] (%p1968_p12) }
 0x12a   : > { %v1046_v36 = vadd.f32 %v2066_v30, %v690_v35  ;;  %v779_v37 = vpop.f32.mrf.mxu3  ;;  %v1307_v16 = vld [vmem:[%s2074_s10 + $0x60] sm:$0xff] (%p1968_p12)  ;;  %1318 = vst [vmem:[%s2178_s24 + $0x110] sm:$0xff] (%p1968_p12), %v1317_v21 }
 0x12b   : > { %1161 = vst [vmem:[%s2074_s10 + $0x68] sm:$0xff] %v1129_v34  ;;  %v1047_v38 = vadd.f32 %v2068_v31, %v779_v37  ;;  %v653_v39 = vpop.f32.mrf.mxu0 }
 0x12c   : > { %v1110_v40 = vmax.f32 %v1046_v36, 0.0  ;;  %v1016_v41 = vadd.f32 %v2066_v30, %v653_v39  ;;  %v742_v42 = vpop.f32.mrf.mxu1  ;;  %1308 = vst [vmem:[%s2178_s24 + $0xc0] sm:$0xff] (%p1968_p12), %v1307_v16 }
 0x12d   : > { %v1111_v43 = vmax.f32 %v1047_v38, 0.0  ;;  %v1017_v44 = vadd.f32 %v2068_v31, %v742_v42  ;;  %1320 = vst [vmem:[%s2178_s24 + $0x120] sm:$0xff] (%p1968_p12), %v1319_v22 }
 0x12e   : > { %v1080_v45 = vmax.f32 %v1016_v41, 0.0  ;;  %1322 = vst [vmem:[%s2178_s24 + $0x130] sm:$0xff] (%p1968_p12), %v1321_v23 }
 0x12f   : > { %v1145_v46 = vpack.c.bf16 %v1111_v43, %v1110_v40  ;;  %v1081_v47 = vmax.f32 %v1017_v44, 0.0  ;;  %1324 = vst [vmem:[%s2178_s24 + $0x140] sm:$0xff] (%p1968_p12), %v1323_v24 }
 0x130   : > { %1326 = vst [vmem:[%s2178_s24 + $0x150] sm:$0xff] (%p1968_p12), %v1325_v25  ;;  %v1339_v34 = vld [vmem:[%s2074_s10 + $0xe0] sm:$0xff] (%p1968_p12) }
 0x131   : > { %1177 = vst [vmem:[%s2074_s10 + $0xe8] sm:$0xff] %v1145_v46  ;;  %v1130_v48 = vpack.c.bf16 %v1081_v47, %v1080_v45  ;;  %v693_v49 = vpop.f32.mrf.mxu2 }
 0x132   : > { %v1048_v50 = vadd.f32 %v2066_v30, %v693_v49  ;;  %v782_v51 = vpop.f32.mrf.mxu3  ;;  %v1309_v17 = vld [vmem:[%s2074_s10 + $0x68] sm:$0xff] (%p1968_p12)  ;;  %1328 = vst [vmem:[%s2178_s24 + $0x160] sm:$0xff] (%p1968_p12), %v1327_v26 }
 0x133   : > { %1162 = vst [vmem:[%s2074_s10 + $0x70] sm:$0xff] %v1130_v48  ;;  %v1049_v52 = vadd.f32 %v2068_v31, %v782_v51  ;;  %v655_v53 = vpop.f32.mrf.mxu0 }
 0x134   : > { %v1112_v54 = vmax.f32 %v1048_v50, 0.0  ;;  %v1018_v55 = vadd.f32 %v2066_v30, %v655_v53  ;;  %v744_v56 = vpop.f32.mrf.mxu1  ;;  %1310 = vst [vmem:[%s2178_s24 + $0xd0] sm:$0xff] (%p1968_p12), %v1309_v17 }
 0x135   : > { %v1113_v57 = vmax.f32 %v1049_v52, 0.0  ;;  %v1019_v58 = vadd.f32 %v2068_v31, %v744_v56  ;;  %1330 = vst [vmem:[%s2178_s24 + $0x170] sm:$0xff] (%p1968_p12), %v1329_v27 }
 0x136   : > { %v1082_v59 = vmax.f32 %v1018_v55, 0.0  ;;  %1332 = vst [vmem:[%s2178_s24 + $0x180] sm:$0xff] (%p1968_p12), %v1331_v28 }
 0x137   : > { %v1146_v60 = vpack.c.bf16 %v1113_v57, %v1112_v54  ;;  %v1083_v61 = vmax.f32 %v1019_v58, 0.0  ;;  %1334 = vst [vmem:[%s2178_s24 + $0x190] sm:$0xff] (%p1968_p12), %v1333_v29 }
 0x138   : > { %1336 = vst [vmem:[%s2178_s24 + $0x1a0] sm:$0xff] (%p1968_p12), %v1335_v32  ;;  %v1341_v35 = vld [vmem:[%s2074_s10 + $0xe8] sm:$0xff] (%p1968_p12) }
 0x139   : > { %1178 = vst [vmem:[%s2074_s10 + $0xf0] sm:$0xff] %v1146_v60  ;;  %v1131_v62 = vpack.c.bf16 %v1083_v61, %v1082_v59  ;;  %v695_v63 = vpop.f32.mrf.mxu2 }
 0x13a   : > { %v1050_v0 = vadd.f32 %v2066_v30, %v695_v63  ;;  %v784_v1 = vpop.f32.mrf.mxu3  ;;  %v1283_v30 = vld [vmem:[%s2074_s10] sm:$0xff] (%p1968_p12)  ;;  %v1311_v18 = vld [vmem:[%s2074_s10 + $0x70] sm:$0xff] (%p1968_p12)  ;;  %1338 = vst [vmem:[%s2178_s24 + $0x1b0] sm:$0xff] (%p1968_p12), %v1337_v33 }
 0x13b   : > { %1163 = vst [vmem:[%s2074_s10 + $0x78] sm:$0xff] %v1131_v62  ;;  %v1051_v2 = vadd.f32 %v2068_v31, %v784_v1  ;;  %v1285_v31 = vld [vmem:[%s2074_s10 + $0x8] sm:$0xff] (%p1968_p12) }
 0x13c   : > { %v1114_v3 = vmax.f32 %v1050_v0, 0.0  ;;  %1284 = vst [vmem:[%s2178_s24] sm:$0xff] (%p1968_p12), %v1283_v30 }
 0x13d   : > { %v1115_v4 = vmax.f32 %v1051_v2, 0.0  ;;  %1186 = sbr.rel (!%p1968_p12) target bundleno = 330 (0x14a), region = 52  ;;  %1286 = vst [vmem:[%s2178_s24 + $0x10] sm:$0xff] (%p1968_p12), %v1285_v31 }
 0x13e   : > { %1312 = vst [vmem:[%s2178_s24 + $0xe0] sm:$0xff] (%p1968_p12), %v1311_v18 }
 0x13f   : > { %v1147_v5 = vpack.c.bf16 %v1115_v4, %v1114_v3  ;;  %1340 = vst [vmem:[%s2178_s24 + $0x1c0] sm:$0xff] (%p1968_p12), %v1339_v34 }
 0x140   : > { %v1343_v36 = vld [vmem:[%s2074_s10 + $0xf0] sm:$0xff] (%p1968_p12)  ;;  %1342 = vst [vmem:[%s2178_s24 + $0x1d0] sm:$0xff] (%p1968_p12), %v1341_v35 }
 0x141   : > { %1179 = vst [vmem:[%s2074_s10 + $0xf8] sm:$0xff] %v1147_v5 }
 0x142   : > { %v1313_v19 = vld [vmem:[%s2074_s10 + $0x78] sm:$0xff]  ;;  %1344 = vst [vmem:[%s2178_s24 + $0x1e0] sm:$0xff] %v1343_v36 }
 0x143   : > { %1314 = vst [vmem:[%s2178_s24 + $0xf0] sm:$0xff] %v1313_v19 }
 0x148   : > { %v1345_v37 = vld [vmem:[%s2074_s10 + $0xf8] sm:$0xff] }
 0x149   : > { %1346 = vst [vmem:[%s2178_s24 + $0x1f0] sm:$0xff] %v1345_v37 }
 0x14a PF: > { %s19_s21 = sadd.s32 1, %s1861_s21   ;;  %s2289_s17 = sld [smem:[#allocation13_spill]] }
 0x14b   : > { %p16_p5 = scmp.ge.s32.totalorder %s19_s21, 6   ;;  %s2290_s18 = sld [smem:[#allocation10_spill]] }
 0x14c   : > { %s2291_s26 = sld [smem:[#allocation11_spill]]  ;;  %s2293_s12 = smov %s1829_s13 }
 0x14d   : > { %s2292_s20 = sld [smem:[#allocation12_spill]]  ;;  %s2294_s13 = smov %s1966_s6 }
 0x14e   : > { %s2295_s14 = smov %s1837_s15  ;;  %s2296_s15 = smov %s1841_s16 }
 0x14f   :  { %18 = sbr.rel (!%p16_p5) target bundleno = 10 (0xa), region = 134 }
 0x150   : > { %s2297_s16 = smov %s2289_s17  ;;  %s2298_s17 = smov %s1853_s19 }
 0x152   : > { %s2299_s19 = smov %s2291_s26 }
 0x154   :  { %1362 = vsyncpa [#allocation4], 1 }
 0x155   :  { %1364 = vsyncpa [#allocation4 + $0x1], 1 }
 0x156   :  { %1365 = vsyncpa [#allocation6], 1 }
 0x157   :  { %1367 = vsyncpa [#allocation6 + $0x1], 1 }

// kernel: affine_coupling_forward.4
= control target key start
LH: loop header
LB: loop body
LE: loop exit
PB: predicated region body
PF: predicated region fallthrough
CT: control target
= control target key end

     0   :  { %s4489_s0 = inlined_call_operand.vmem [shape: bf16[512,512], index: 0, kind: input, shape index: {}]   ;;  %s4490_s1 = inlined_call_operand.hbm [shape: bf16[512,512], index: 1, kind: input, shape index: {}]   ;;  %s4491_s2 = inlined_call_operand.hbm [shape: f32[1,512], index: 2, kind: input, shape index: {}]   ;;  %s4492_s3 = inlined_call_operand.vmem [shape: bf16[512,512], index: 3, kind: output, shape index: {}]  }
   0x1   :  { %4516 = sst [smem:[#allocation43_spill]] %s4490_s1 }
   0x2   :  { %8 = vsyncpa [#allocation4], 0 }
   0x3   :  { %10 = vsyncpa [#allocation4 + $0x1], 0 }
   0x4   :  { %11 = vsyncpa [#allocation6], 0 }
   0x5   :  { %13 = vsyncpa [#allocation6 + $0x1], 0  ;;  %s3528_s12 = smov 0   ;;  %s3530_s13 = smov 0  }
   0x6   :  { %s3532_s14 = smov 0   ;;  %s3534_s15 = smov 0  }
   0x7   :  { %s3536_s16 = smov 0   ;;  %s3538_s17 = smov 0  }
   0x8   :  { %s3540_s18 = smov 0   ;;  %s3542_s19 = smov 0  }
   0x9   :  { %s3544_s20 = smov 0   ;;  %s3546_s21 = smov 0  }
   0xa LB: > { %4517 = sst [smem:[#allocation10_spill]] %s3499_s20  ;;  %s2596_s22 = sadd.s32 4294967295, %s3503_s21   ;;  %s3503_s21 = sphi %s3546_s21, %s19_s21   ;;  %s3499_s20 = sphi %s3544_s20, %s4588_s20   ;;  %s3495_s19 = sphi %s3542_s19, %s4595_s19   ;;  %s3491_s18 = sphi %s3540_s18, %s4586_s18   ;;  %s3487_s17 = sphi %s3538_s17, %s4594_s17   ;;  %s3483_s16 = sphi %s3536_s16, %s4593_s16   ;;  %s3479_s15 = sphi %s3534_s15, %s4592_s15   ;;  %s3475_s14 = sphi %s3532_s14, %s4591_s14   ;;  %s3471_s13 = sphi %s3530_s13, %s4590_s13   ;;  %s3467_s12 = sphi %s3528_s12, %s4589_s12  }
   0xb   : > { %s34_s23 = sadd.s32 1, %s3495_s19  ;;  %s38_s24 = sadd.s32 1, %s3499_s20 }
   0xc   : > { %p36_p0 = scmp.ge.s32.totalorder %s34_s23, 2  ;;  %s75_s25 = sadd.s32 1, %s3483_s16 }
   0xd   : > { %p82_p1 = scmp.ne.s32.totalorder %s3483_s16, %s3479_s15  ;;  %p83_p2 = scmp.eq.s32.totalorder %s3503_s21, 0 }
   0xe   : > { %s4597_s23 = smov (%p36_p0, %s34_s23), 0  ;;  %s4599_s24 = smov (!%p36_p0, %s38_s24), %s3499_s20 }
   0xf   : > { %4518 = sst [smem:[#allocation11_spill]] %s4597_s23  ;;  %s71_s26 = ssub.s32 %s3495_s19, %s4597_s23 }
  0x10   : > { %p40_p3 = scmp.ge.s32.totalorder %s4599_s24, 2  ;;  %p73_p4 = scmp.eq.s32.totalorder %s71_s26, 0 }
  0x11   : > { %p3588_p5 = por %p83_p2, %p82_p1  ;;  %p88_p6 = scmp.ne.s32.totalorder %s3479_s15, %s3475_s14 }
  0x12   : > { %s4601_s24 = smov (%p40_p3, %s4599_s24), 0  ;;  %p89_p7 = scmp.eq.s32.totalorder %s2596_s22, 0 }
  0x13   : > { %4520 = sst [smem:[#allocation12_spill]] %s4601_s24  ;;  %s124_s29 = ssub.s32 %s3499_s20, %s4601_s24 }
  0x14   : > { %s3596_s28 = scalar_select %p73_p4, %s3483_s16, %s75_s25  }
  0x15   : > { %s126_s30 = sor.u32 %s124_s29, %s71_s26  ;;  %s129_s4 = sadd.s32 1, %s3471_s13 }
  0x16   : > { %4521 = sst [smem:[#allocation13_spill]] %s3596_s28  ;;  %p3601_p8 = por %p89_p7, %p88_p6 }
  0x17   : > { %p127_p9 = scmp.eq.s32.totalorder %s126_s30, 0  ;;  %p139_p10 = scmp.ne.s32.totalorder %s3471_s13, %s3467_s12 }
  0x18   : > { %p140_p11 = scmp.eq.s32.totalorder %s2596_s22, 3  ;;  %p3273_p13 = scmp.lt.s32.totalorder %s3503_s21, 4 }
  0x19   : > { %s3608_s6 = scalar_select %p127_p9, %s3471_s13, %s129_s4  }
  0x1a   : > { %p3610_p12 = por %p140_p11, %p139_p10  ;;  %s3616_s8 = sand.u32 1, %s3483_s16  }
  0x1b   : > { %s2600_s9 = sshll.u32 %s3616_s8, 9  ;;  %s3131_s10 = sshll.u32 %s3495_s19, 3 }
  0x1c   : > { %s4524_s1 = sld [smem:[#allocation43_spill]]  ;;  %s185_s25 = scalar_lea.vmem [#allocation3], %s2600_s9 }
  0x1d   : > { %s196_s26 = sshll.u32 %s185_s25, 4  ;;  %p3625_p0 = pnand %p3273_p13, %p3588_p5  ;;  %s197_s26 = int_to_ptr.vmem [resolvable:$true] %s196_s26 }
  0x1e   : > { %s182_s4 = scalar_lea.sflag [#allocation4], %s3616_s8  ;;  %s3505_s24 = smov 256  }
  0x1f   : > { %s3506_s23 = smov 128   ;;  %s3507_s20 = smov 8  }
  0x20   : > { %p2605_p1 = scmp.ge.s32.totalorder %s3503_s21, 1  ;;  %p223_p2 = scmp.lt.s32.totalorder %s3503_s21, 5 }
  0x21   : > { %s2603_s9 = sshll.u32 %s3616_s8, 1  ;;  %s207_s28 = scalar_lea.sflag [#allocation6], %s3616_s8 }
  0x22   : > { %s193_s22 = scalar_lea.hbm %s4524_s1, %s3131_s10  ;;  %p224_p3 = pnand %p2605_p1, %p223_p2 }
  0x23   : > { %s194_s29 = sshll.u32 %s193_s22, 4  ;;  %s2604_s10 = sshll.u32 %s3495_s19, 1  ;;  %s195_s29 = int_to_ptr.hbm [resolvable:$true] %s194_s29 }
  0x24   : > { %3269 = dma.hbm_to_vmem [thread:$0]  (!%p3625_p0), %s195_s29, 8192, %s197_s26, %s182_s4, %s3505_s24, %s3506_s23, %s3507_s20  }
  0x25   : > { %s210_s11 = scalar_lea.vmem [#allocation5], %s2603_s9  ;;  %s214_s25 = scalar_lea.hbm %s4491_s2, %s2604_s10 }
  0x26   : > { %s218_s27 = sshll.u32 %s210_s11, 4  ;;  %s216_s1 = sshll.u32 %s214_s25, 4  ;;  %s219_s27 = int_to_ptr.vmem [resolvable:$true] %s218_s27  ;;  %s217_s1 = int_to_ptr.hbm [resolvable:$true] %s216_s1 }
  0x27   : > { %3272 = dma.hbm_to_vmem [thread:$0]  (!%p3625_p0), %s217_s1, 32, %s219_s27, %s207_s28  }
  0x28   : > { %227 = sbr.rel (%p224_p3) target bundleno = 743 (0x2e7), region = 32 }
  0x2d   : > { %s229_s20 = sand.u32 1, %s3479_s15  }
  0x2e   : > { %s2606_s23 = sshll.u32 %s229_s20, 9  ;;  %s230_s24 = scalar_lea.sflag [#allocation4], %s229_s20 }
  0x2f   : > { %s3643_s26 = scalar_lea.vmem [#allocation3], %s2606_s23 }
  0x30   : > { %3458 = dma.done.wait (%p3601_p8), %s230_s24, 8192  }
  0x31   : > { %3460 = vsyncadd (%p3601_p8), %s230_s24, 4294959104  ;;  %s2607_s29 = sshll.u32 %s229_s20, 1  ;;  %s240_s4 = scalar_lea.sflag [#allocation6], %s229_s20 }
  0x32   : > { %s3649_s9 = scalar_lea.vmem [#allocation5], %s2607_s29 }
  0x33   : > { %3462 = dma.done.wait (%p3601_p8), %s240_s4, 32  }
  0x34   : > { %3464 = vsyncadd (%p3601_p8), %s240_s4, 4294967264  ;;  %s2609_s1 = sshll.u32 %s3491_s18, 5  ;;  %v2926_v0 = vld [vmem:[%s3643_s26 + $0x70] sm:$0xf]  ;;  %v3212_v1 = vld [vmem:[%s3643_s26 + $0x74] sm:$0xf0] }
  0x35   : > { %v2990_v2 = vld [vmem:[%s3643_s26 + $0xf0] sm:$0xf]  ;;  %v2927_v3 = vor.u32 %v3212_v1, %v2926_v0  ;;  %v3228_v4 = vld [vmem:[%s3643_s26 + $0xf4] sm:$0xf0]  ;;  %v2918_v11 = vld [vmem:[%s3643_s26 + $0x60] sm:$0xf] }
  0x36   : > { %v3054_v5 = vld [vmem:[%s3643_s26 + $0x170] sm:$0xf]  ;;  %v3244_v6 = vld [vmem:[%s3643_s26 + $0x174] sm:$0xf0]  ;;  %v2991_v7 = vor.u32 %v3228_v4, %v2990_v2  ;;  %v3210_v13 = vld [vmem:[%s3643_s26 + $0x64] sm:$0xf0] }
  0x37   : > { %v3055_v8 = vor.u32 %v3244_v6, %v3054_v5  ;;  %v3118_v9 = vld [vmem:[%s3643_s26 + $0x1f0] sm:$0xf]  ;;  %v3260_v10 = vld [vmem:[%s3643_s26 + $0x1f4] sm:$0xf0]  ;;  %1198 = vmatpush.bf16.msra.mxu0 %v2927_v3  ;;  %v2982_v14 = vld [vmem:[%s3643_s26 + $0xe0] sm:$0xf]  ;;  %v2919_v16 = vor.u32 %v3210_v13, %v2918_v11 }
  0x38   : > { %v3119_v12 = vor.u32 %v3260_v10, %v3118_v9  ;;  %v3226_v15 = vld [vmem:[%s3643_s26 + $0xe4] sm:$0xf0]  ;;  %1287 = vmatpush.bf16.msra.mxu1 %v2991_v7  ;;  %v3046_v18 = vld [vmem:[%s3643_s26 + $0x160] sm:$0xf]  ;;  %v2910_v23 = vld [vmem:[%s3643_s26 + $0x50] sm:$0xf] }
  0x39   : > { %1376 = vmatpush.bf16.msra.mxu2 %v3055_v8  ;;  %v2983_v17 = vor.u32 %v3226_v15, %v2982_v14  ;;  %v3242_v19 = vld [vmem:[%s3643_s26 + $0x164] sm:$0xf0]  ;;  %v3110_v20 = vld [vmem:[%s3643_s26 + $0x1e0] sm:$0xf]  ;;  %v3208_v24 = vld [vmem:[%s3643_s26 + $0x54] sm:$0xf0] }
  0x3a   : > { %1465 = vmatpush.bf16.msra.mxu3 %v3119_v12  ;;  %v3047_v21 = vor.u32 %v3242_v19, %v3046_v18  ;;  %v3258_v22 = vld [vmem:[%s3643_s26 + $0x1e4] sm:$0xf0]  ;;  %v2974_v26 = vld [vmem:[%s3643_s26 + $0xd0] sm:$0xf]  ;;  %v3224_v27 = vld [vmem:[%s3643_s26 + $0xd4] sm:$0xf0]  ;;  %v2911_v29 = vor.u32 %v3208_v24, %v2910_v23 }
  0x3b   : > { %v3111_v25 = vor.u32 %v3258_v22, %v3110_v20  ;;  %v3038_v28 = vld [vmem:[%s3643_s26 + $0x150] sm:$0xf]  ;;  %1199 = vmatpush.bf16.msra.mxu0 %v2919_v16  ;;  %v3240_v30 = vld [vmem:[%s3643_s26 + $0x154] sm:$0xf0]  ;;  %v2975_v33 = vor.u32 %v3224_v27, %v2974_v26  ;;  %v2902_v35 = vld [vmem:[%s3643_s26 + $0x40] sm:$0xf] }
  0x3c   : > { %v3102_v31 = vld [vmem:[%s3643_s26 + $0x1d0] sm:$0xf]  ;;  %v3256_v32 = vld [vmem:[%s3643_s26 + $0x1d4] sm:$0xf0]  ;;  %1288 = vmatpush.bf16.msra.mxu1 %v2983_v17  ;;  %v3039_v34 = vor.u32 %v3240_v30, %v3038_v28  ;;  %v3206_v36 = vld [vmem:[%s3643_s26 + $0x44] sm:$0xf0] }
  0x3d   : > { %1377 = vmatpush.bf16.msra.mxu2 %v3047_v21  ;;  %v2966_v37 = vld [vmem:[%s3643_s26 + $0xc0] sm:$0xf]  ;;  %v3103_v38 = vor.u32 %v3256_v32, %v3102_v31  ;;  %v3222_v39 = vld [vmem:[%s3643_s26 + $0xc4] sm:$0xf0]  ;;  %v2903_v44 = vor.u32 %v3206_v36, %v2902_v35  ;;  %p3690_p4 = scmp.lt.s32.totalorder %s2609_s1, 63  ;;  %s278_s11 = sand.u32 1, %s3467_s12  }
  0x3e   : > { %1466 = vmatpush.bf16.msra.mxu3 %v3111_v25  ;;  %v3030_v40 = vld [vmem:[%s3643_s26 + $0x140] sm:$0xf]  ;;  %v3238_v41 = vld [vmem:[%s3643_s26 + $0x144] sm:$0xf0]  ;;  %v2967_v45 = vor.u32 %v3222_v39, %v2966_v37  ;;  %v2894_v47 = vld [vmem:[%s3643_s26 + $0x30] sm:$0xf] }
  0x3f   : > { %v3094_v42 = vld [vmem:[%s3643_s26 + $0x1c0] sm:$0xf]  ;;  %v3254_v43 = vld [vmem:[%s3643_s26 + $0x1c4] sm:$0xf0]  ;;  %1200 = vmatpush.bf16.msra.mxu0 %v2911_v29  ;;  %v3031_v46 = vor.u32 %v3238_v41, %v3030_v40  ;;  %v3204_v48 = vld [vmem:[%s3643_s26 + $0x34] sm:$0xf0] }
  0x40   : > { %1289 = vmatpush.bf16.msra.mxu1 %v2975_v33  ;;  %v2958_v49 = vld [vmem:[%s3643_s26 + $0xb0] sm:$0xf]  ;;  %v3095_v50 = vor.u32 %v3254_v43, %v3094_v42  ;;  %v3220_v51 = vld [vmem:[%s3643_s26 + $0xb4] sm:$0xf0]  ;;  %v2895_v56 = vor.u32 %v3204_v48, %v2894_v47  ;;  %s4603_s1 = smov (!%p3690_p4, %s2609_s1), 63  ;;  %s2608_s27 = sshll.u32 %s278_s11, 8 }
  0x41   : > { %1378 = vmatpush.bf16.msra.mxu2 %v3039_v34  ;;  %v3022_v52 = vld [vmem:[%s3643_s26 + $0x130] sm:$0xf]  ;;  %v3236_v53 = vld [vmem:[%s3643_s26 + $0x134] sm:$0xf0]  ;;  %v2959_v57 = vor.u32 %v3220_v51, %v2958_v49  ;;  %v2886_v59 = vld [vmem:[%s3643_s26 + $0x20] sm:$0xf] }
  0x42   : > { %1467 = vmatpush.bf16.msra.mxu3 %v3103_v38  ;;  %v3086_v54 = vld [vmem:[%s3643_s26 + $0x1b0] sm:$0xf]  ;;  %v3252_v55 = vld [vmem:[%s3643_s26 + $0x1b4] sm:$0xf0]  ;;  %v3023_v58 = vor.u32 %v3236_v53, %v3022_v52  ;;  %v3202_v60 = vld [vmem:[%s3643_s26 + $0x24] sm:$0xf0] }
  0x43   : > { %1201 = vmatpush.bf16.msra.mxu0 %v2903_v44  ;;  %v2950_v61 = vld [vmem:[%s3643_s26 + $0xa0] sm:$0xf]  ;;  %v3087_v62 = vor.u32 %v3252_v55, %v3086_v54  ;;  %v3218_v63 = vld [vmem:[%s3643_s26 + $0xa4] sm:$0xf0]  ;;  %v2887_v4 = vor.u32 %v3202_v60, %v2886_v59  ;;  %s3132_s5 = sshll.u32 %s4603_s1, 4  ;;  %s4233_s12 = scalar_lea.vmem [#allocation7], %s2608_s27 }
  0x44   : > { %1290 = vmatpush.bf16.msra.mxu1 %v2967_v45  ;;  %v3014_v0 = vld [vmem:[%s3643_s26 + $0x120] sm:$0xf]  ;;  %v3234_v1 = vld [vmem:[%s3643_s26 + $0x124] sm:$0xf0]  ;;  %v2951_v5 = vor.u32 %v3218_v63, %v2950_v61  ;;  %v2878_v7 = vld [vmem:[%s3643_s26 + $0x10] sm:$0xf]  ;;  %s3729_s10 = scalar_lea.vmem %s4489_s0, %s3132_s5 }
  0x45   : > { %1379 = vmatpush.bf16.msra.mxu2 %v3031_v46  ;;  %v3078_v2 = vld [vmem:[%s3643_s26 + $0x1a0] sm:$0xf]  ;;  %v3250_v3 = vld [vmem:[%s3643_s26 + $0x1a4] sm:$0xf0]  ;;  %v3015_v6 = vor.u32 %v3234_v1, %v3014_v0  ;;  %v3200_v8 = vld [vmem:[%s3643_s26 + $0x14] sm:$0xf0] }
  0x46   : > { %1468 = vmatpush.bf16.msra.mxu3 %v3095_v50  ;;  %v2942_v9 = vld [vmem:[%s3643_s26 + $0x90] sm:$0xf]  ;;  %v3079_v10 = vor.u32 %v3250_v3, %v3078_v2  ;;  %v3216_v11 = vld [vmem:[%s3643_s26 + $0x94] sm:$0xf0]  ;;  %v2870_v16 = vld [vmem:[%s3643_s26] sm:$0xf]  ;;  %v2879_v17 = vor.u32 %v3200_v8, %v2878_v7 }
  0x47   : > { %1202 = vmatpush.bf16.msra.mxu0 %v2895_v56  ;;  %v3006_v12 = vld [vmem:[%s3643_s26 + $0x110] sm:$0xf]  ;;  %v3232_v13 = vld [vmem:[%s3643_s26 + $0x114] sm:$0xf0]  ;;  %v3198_v18 = vld [vmem:[%s3643_s26 + $0x4] sm:$0xf0]  ;;  %v2943_v21 = vor.u32 %v3216_v11, %v2942_v9 }
  0x48   : > { %1291 = vmatpush.bf16.msra.mxu1 %v2959_v57  ;;  %v3070_v14 = vld [vmem:[%s3643_s26 + $0x190] sm:$0xf]  ;;  %v3248_v15 = vld [vmem:[%s3643_s26 + $0x194] sm:$0xf0]  ;;  %v2934_v19 = vld [vmem:[%s3643_s26 + $0x80] sm:$0xf]  ;;  %v3007_v22 = vor.u32 %v3232_v13, %v3006_v12  ;;  %v2871_v33 = vor.u32 %v3198_v18, %v2870_v16 }
  0x49   : > { %1380 = vmatpush.bf16.msra.mxu2 %v3023_v58  ;;  %v3214_v20 = vld [vmem:[%s3643_s26 + $0x84] sm:$0xf0]  ;;  %v2998_v23 = vld [vmem:[%s3643_s26 + $0x100] sm:$0xf]  ;;  %v3071_v26 = vor.u32 %v3248_v15, %v3070_v14  ;;  %v3135_v29 = vld [vmem:[%s3729_s10 + $0xc] sm:$0xf0] }
  0x4a   : > { %1469 = vmatpush.bf16.msra.mxu3 %v3087_v62  ;;  %v3230_v24 = vld [vmem:[%s3643_s26 + $0x104] sm:$0xf0]  ;;  %v3062_v25 = vld [vmem:[%s3643_s26 + $0x180] sm:$0xf]  ;;  %v3133_v30 = vld [vmem:[%s3729_s10 + $0x4] sm:$0xf]  ;;  %v2935_v37 = vor.u32 %v3214_v20, %v2934_v19 }
  0x4b   : > { %1203 = vmatpush.bf16.msra.mxu0 %v2887_v4  ;;  %v3246_v27 = vld [vmem:[%s3643_s26 + $0x184] sm:$0xf0]  ;;  %v2614_v28 = vld [vmem:[%s3729_s10] sm:$0xf]  ;;  %v3243_v31 = vld [vmem:[%s3643_s26 + $0x174] sm:$0xf]  ;;  %v2999_v38 = vor.u32 %v3230_v24, %v2998_v23 }
  0x4c   : > { %1292 = vmatpush.bf16.msra.mxu1 %v2951_v5  ;;  %v3056_v32 = vld [vmem:[%s3643_s26 + $0x178] sm:$0xf0]  ;;  %v2616_v34 = vld [vmem:[%s3729_s10 + $0x10] sm:$0xf0]  ;;  %v2622_v39 = vld [vmem:[%s3729_s10 + $0x8] sm:$0xf]  ;;  %v3063_v42 = vor.u32 %v3246_v27, %v3062_v25  ;;  %v3752_v47 = vor.u32 %v3135_v29, %v2614_v28 }
  0x4d   : > { %1381 = vmatpush.bf16.msra.mxu2 %v3015_v6  ;;  %v3259_v35 = vld [vmem:[%s3643_s26 + $0x1f4] sm:$0xf]  ;;  %v3120_v36 = vld [vmem:[%s3643_s26 + $0x1f8] sm:$0xf0]  ;;  %v3136_v40 = vld [vmem:[%s3729_s10 + $0x14] sm:$0xf0]  ;;  %v3059_v44 = vor.u32 %v3243_v31, %v3056_v32  ;;  %v3756_v51 = vor.u32 %v3133_v30, %v2616_v34 }
  0x4e   : > { %1470 = vmatpush.bf16.msra.mxu3 %v3079_v10  ;;  %v3134_v41 = vld [vmem:[%s3729_s10 + $0xc] sm:$0xf]  ;;  %v2624_v43 = vld [vmem:[%s3729_s10 + $0x18] sm:$0xf0]  ;;  %v3211_v45 = vld [vmem:[%s3643_s26 + $0x74] sm:$0xf]  ;;  %v3123_v48 = vor.u32 %v3259_v35, %v3120_v36  ;;  %v3758_v52 = vor.u32 %v3136_v40, %v2622_v39 }
  0x4f   : > { %1204 = vmatpush.bf16.msra.mxu0 %v2879_v17  ;;  %v2928_v46 = vld [vmem:[%s3643_s26 + $0x78] sm:$0xf0]  ;;  %v3227_v49 = vld [vmem:[%s3643_s26 + $0xf4] sm:$0xf]  ;;  %v3760_v53 = vor.u32 %v3134_v41, %v2624_v43  ;;  %v3241_v56 = vld [vmem:[%s3643_s26 + $0x164] sm:$0xf] }
  0x50   : > { %1293 = vmatpush.bf16.msra.mxu1 %v2943_v21  ;;  %v2992_v50 = vld [vmem:[%s3643_s26 + $0xf8] sm:$0xf0]  ;;  %v2931_v54 = vor.u32 %v3211_v45, %v2928_v46  ;;  %v3048_v57 = vld [vmem:[%s3643_s26 + $0x168] sm:$0xf0]  ;;  %v3257_v58 = vld [vmem:[%s3643_s26 + $0x1e4] sm:$0xf] }
  0x51   : > { %1382 = vmatpush.bf16.msra.mxu2 %v3007_v22  ;;  %v2995_v55 = vor.u32 %v3227_v49, %v2992_v50  ;;  %v3051_v59 = vor.u32 %v3241_v56, %v3048_v57  ;;  %v3112_v60 = vld [vmem:[%s3643_s26 + $0x1e8] sm:$0xf0]  ;;  %v3209_v61 = vld [vmem:[%s3643_s26 + $0x64] sm:$0xf]  ;;  %v2630_v4 = vld [vmem:[%s3729_s10 + $0x20] sm:$0xf] }
  0x52   : > { %1471 = vmatpush.bf16.msra.mxu3 %v3071_v26  ;;  %v2920_v62 = vld [vmem:[%s3643_s26 + $0x68] sm:$0xf0]  ;;  %v3115_v63 = vor.u32 %v3257_v58, %v3112_v60  ;;  %v3225_v1 = vld [vmem:[%s3643_s26 + $0xe4] sm:$0xf]  ;;  %v3139_v5 = vld [vmem:[%s3729_s10 + $0x2c] sm:$0xf0] }
  0x53   : > { %1205 = vmatpush.bf16.msra.mxu0 %v2871_v33  ;;  %v2923_v0 = vor.u32 %v3209_v61, %v2920_v62  ;;  %v2984_v2 = vld [vmem:[%s3643_s26 + $0xe8] sm:$0xf0]  ;;  %v3137_v6 = vld [vmem:[%s3729_s10 + $0x24] sm:$0xf]  ;;  %v2632_v7 = vld [vmem:[%s3729_s10 + $0x30] sm:$0xf0]  ;;  %v3782_v12 = vor.u32 %v3139_v5, %v2630_v4 }
  0x54   : > { %1294 = vmatpush.bf16.msra.mxu1 %v2935_v37  ;;  %v2987_v3 = vor.u32 %v3225_v1, %v2984_v2  ;;  %v2638_v8 = vld [vmem:[%s3729_s10 + $0x28] sm:$0xf]  ;;  %v3140_v9 = vld [vmem:[%s3729_s10 + $0x34] sm:$0xf0]  ;;  %v3138_v10 = vld [vmem:[%s3729_s10 + $0x2c] sm:$0xf]  ;;  %v3784_v13 = vor.u32 %v3137_v6, %v2632_v7 }
  0x55   : > { %1383 = vmatpush.bf16.msra.mxu2 %v2999_v38  ;;  %v2640_v11 = vld [vmem:[%s3729_s10 + $0x38] sm:$0xf0]  ;;  %v3786_v14 = vor.u32 %v3140_v9, %v2638_v8  ;;  %v2646_v16 = vld [vmem:[%s3729_s10 + $0x40] sm:$0xf]  ;;  %v3143_v17 = vld [vmem:[%s3729_s10 + $0x4c] sm:$0xf0] }
  0x56   : > { %1472 = vmatpush.bf16.msra.mxu3 %v3063_v42  ;;  %1206 = vmatmul.bf16.vlgmr.msra.gmra.mxu0 %v3752_v47  ;;  %v3788_v15 = vor.u32 %v3138_v10, %v2640_v11  ;;  %v3141_v18 = vld [vmem:[%s3729_s10 + $0x44] sm:$0xf]  ;;  %v2648_v19 = vld [vmem:[%s3729_s10 + $0x50] sm:$0xf0]  ;;  %v2654_v20 = vld [vmem:[%s3729_s10 + $0x48] sm:$0xf]  ;;  %v3802_v24 = vor.u32 %v3143_v17, %v2646_v16 }
  0x57   : > { %1295 = vmatmul.bf16.vlgmr.msra.gmra.mxu1 %v3756_v51  ;;  %1554 = vmatpush.bf16.msrb.mxu0 %v2931_v54  ;;  %v3144_v21 = vld [vmem:[%s3729_s10 + $0x54] sm:$0xf0]  ;;  %v3142_v22 = vld [vmem:[%s3729_s10 + $0x4c] sm:$0xf]  ;;  %v2656_v23 = vld [vmem:[%s3729_s10 + $0x58] sm:$0xf0]  ;;  %v3804_v25 = vor.u32 %v3141_v18, %v2648_v19 }
  0x58   : > { %1384 = vmatmul.bf16.vlgmr.msra.gmra.mxu2 %v3758_v52  ;;  %1643 = vmatpush.bf16.msrb.mxu1 %v2995_v55  ;;  %v3806_v26 = vor.u32 %v3144_v21, %v2654_v20  ;;  %v3808_v27 = vor.u32 %v3142_v22, %v2656_v23  ;;  %v3239_v28 = vld [vmem:[%s3643_s26 + $0x154] sm:$0xf]  ;;  %v3040_v29 = vld [vmem:[%s3643_s26 + $0x158] sm:$0xf0]  ;;  %v2662_v40 = vld [vmem:[%s3729_s10 + $0x60] sm:$0xf] }
  0x59   : > { %1732 = vmatpush.bf16.msrb.mxu2 %v3059_v44  ;;  %1473 = vmatmul.bf16.vlgmr.msra.gmra.mxu3 %v3760_v53  ;;  %v3255_v30 = vld [vmem:[%s3643_s26 + $0x1d4] sm:$0xf]  ;;  %v3043_v31 = vor.u32 %v3239_v28, %v3040_v29  ;;  %v3104_v32 = vld [vmem:[%s3643_s26 + $0x1d8] sm:$0xf0]  ;;  %v3147_v41 = vld [vmem:[%s3729_s10 + $0x6c] sm:$0xf0] }
  0x5a   : > { %1821 = vmatpush.bf16.msrb.mxu3 %v3123_v48  ;;  %v3207_v33 = vld [vmem:[%s3643_s26 + $0x54] sm:$0xf]  ;;  %v2912_v34 = vld [vmem:[%s3643_s26 + $0x58] sm:$0xf0]  ;;  %v3107_v35 = vor.u32 %v3255_v30, %v3104_v32  ;;  %v3145_v42 = vld [vmem:[%s3729_s10 + $0x64] sm:$0xf]  ;;  %v3830_v49 = vor.u32 %v3147_v41, %v2662_v40 }
  0x5b   : > { %1555 = vmatpush.bf16.msrb.mxu0 %v2923_v0  ;;  %v2915_v36 = vor.u32 %v3207_v33, %v2912_v34  ;;  %v3223_v37 = vld [vmem:[%s3643_s26 + $0xd4] sm:$0xf]  ;;  %v2976_v38 = vld [vmem:[%s3643_s26 + $0xd8] sm:$0xf0]  ;;  %v2670_v44 = vld [vmem:[%s3729_s10 + $0x68] sm:$0xf] }
  0x5c   : > { %1644 = vmatpush.bf16.msrb.mxu1 %v2987_v3  ;;  %v2979_v39 = vor.u32 %v3223_v37, %v2976_v38  ;;  %v2664_v43 = vld [vmem:[%s3729_s10 + $0x70] sm:$0xf0]  ;;  %v3148_v45 = vld [vmem:[%s3729_s10 + $0x74] sm:$0xf0]  ;;  %v3146_v46 = vld [vmem:[%s3729_s10 + $0x6c] sm:$0xf] }
  0x5d   : > { %1733 = vmatpush.bf16.msrb.mxu2 %v3051_v59  ;;  %v2672_v48 = vld [vmem:[%s3729_s10 + $0x78] sm:$0xf0]  ;;  %v3832_v50 = vor.u32 %v3145_v42, %v2664_v43  ;;  %v3834_v54 = vor.u32 %v3148_v45, %v2670_v44  ;;  %v2678_v56 = vld [vmem:[%s3729_s10 + $0x80] sm:$0xf]  ;;  %v3151_v57 = vld [vmem:[%s3729_s10 + $0x8c] sm:$0xf0] }
  0x5e   : > { %1822 = vmatpush.bf16.msrb.mxu3 %v3115_v63  ;;  %v3836_v55 = vor.u32 %v3146_v46, %v2672_v48  ;;  %v3149_v58 = vld [vmem:[%s3729_s10 + $0x84] sm:$0xf]  ;;  %v2680_v59 = vld [vmem:[%s3729_s10 + $0x90] sm:$0xf0]  ;;  %v2686_v60 = vld [vmem:[%s3729_s10 + $0x88] sm:$0xf]  ;;  %v3850_v0 = vor.u32 %v3151_v57, %v2678_v56 }
  0x5f   : > { %1556 = vmatpush.bf16.msrb.mxu0 %v2915_v36  ;;  %v3152_v61 = vld [vmem:[%s3729_s10 + $0x94] sm:$0xf0]  ;;  %v3150_v62 = vld [vmem:[%s3729_s10 + $0x8c] sm:$0xf]  ;;  %v2688_v63 = vld [vmem:[%s3729_s10 + $0x98] sm:$0xf0]  ;;  %v3852_v1 = vor.u32 %v3149_v58, %v2680_v59 }
  0x60   : > { %1645 = vmatpush.bf16.msrb.mxu1 %v2979_v39  ;;  %v3854_v2 = vor.u32 %v3152_v61, %v2686_v60  ;;  %v3856_v3 = vor.u32 %v3150_v62, %v2688_v63  ;;  %v3237_v4 = vld [vmem:[%s3643_s26 + $0x144] sm:$0xf]  ;;  %v3032_v5 = vld [vmem:[%s3643_s26 + $0x148] sm:$0xf0]  ;;  %v2694_v20 = vld [vmem:[%s3729_s10 + $0xa0] sm:$0xf] }
  0x61   : > { %1734 = vmatpush.bf16.msrb.mxu2 %v3043_v31  ;;  %v3253_v6 = vld [vmem:[%s3643_s26 + $0x1c4] sm:$0xf]  ;;  %v3035_v7 = vor.u32 %v3237_v4, %v3032_v5  ;;  %v3096_v8 = vld [vmem:[%s3643_s26 + $0x1c8] sm:$0xf0]  ;;  %v3155_v21 = vld [vmem:[%s3729_s10 + $0xac] sm:$0xf0] }
  0x62   : > { %1823 = vmatpush.bf16.msrb.mxu3 %v3107_v35  ;;  %v3205_v9 = vld [vmem:[%s3643_s26 + $0x44] sm:$0xf]  ;;  %v2904_v10 = vld [vmem:[%s3643_s26 + $0x48] sm:$0xf0]  ;;  %v3099_v11 = vor.u32 %v3253_v6, %v3096_v8  ;;  %v2696_v23 = vld [vmem:[%s3729_s10 + $0xb0] sm:$0xf0]  ;;  %v3878_v32 = vor.u32 %v3155_v21, %v2694_v20 }
  0x63   : > { %v2907_v16 = vor.u32 %v3205_v9, %v2904_v10  ;;  %v3221_v17 = vld [vmem:[%s3643_s26 + $0xc4] sm:$0xf]  ;;  %v2968_v18 = vld [vmem:[%s3643_s26 + $0xc8] sm:$0xf0]  ;;  %v2702_v28 = vld [vmem:[%s3729_s10 + $0xa8] sm:$0xf] }
  0x64   : > { %v2971_v19 = vor.u32 %v3221_v17, %v2968_v18  ;;  %v3153_v22 = vld [vmem:[%s3729_s10 + $0xa4] sm:$0xf]  ;;  %v3156_v29 = vld [vmem:[%s3729_s10 + $0xb4] sm:$0xf0]  ;;  %v3154_v30 = vld [vmem:[%s3729_s10 + $0xac] sm:$0xf] }
  0x65   : > { %1735 = vmatpush.bf16.msrb.mxu2 %v3035_v7  ;;  %1557 = vmatpush.bf16.msrb.mxu0 %v2907_v16  ;;  %v2704_v31 = vld [vmem:[%s3729_s10 + $0xb8] sm:$0xf0]  ;;  %v3880_v33 = vor.u32 %v3153_v22, %v2696_v23  ;;  %v3882_v34 = vor.u32 %v3156_v29, %v2702_v28  ;;  %v2710_v36 = vld [vmem:[%s3729_s10 + $0xc0] sm:$0xf]  ;;  %v3159_v37 = vld [vmem:[%s3729_s10 + $0xcc] sm:$0xf0] }
  0x66   : > { %1211 = vmatmul.bf16.gmra.mxu0 %v3782_v12  ;;  %1824 = vmatpush.bf16.msrb.mxu3 %v3099_v11  ;;  %v3884_v35 = vor.u32 %v3154_v30, %v2704_v31  ;;  %v3157_v38 = vld [vmem:[%s3729_s10 + $0xc4] sm:$0xf]  ;;  %v2712_v39 = vld [vmem:[%s3729_s10 + $0xd0] sm:$0xf0]  ;;  %v2718_v40 = vld [vmem:[%s3729_s10 + $0xc8] sm:$0xf]  ;;  %v3898_v44 = vor.u32 %v3159_v37, %v2710_v36 }
  0x67   : > { %1300 = vmatmul.bf16.gmra.mxu1 %v3784_v13  ;;  %v3160_v41 = vld [vmem:[%s3729_s10 + $0xd4] sm:$0xf0]  ;;  %v3158_v42 = vld [vmem:[%s3729_s10 + $0xcc] sm:$0xf]  ;;  %v2720_v43 = vld [vmem:[%s3729_s10 + $0xd8] sm:$0xf0]  ;;  %v3900_v45 = vor.u32 %v3157_v38, %v2712_v39 }
  0x68   : > { %1389 = vmatmul.bf16.gmra.mxu2 %v3786_v14  ;;  %1646 = vmatpush.bf16.msrb.mxu1 %v2971_v19  ;;  %v3902_v46 = vor.u32 %v3160_v41, %v2718_v40  ;;  %v3904_v48 = vor.u32 %v3158_v42, %v2720_v43  ;;  %v3235_v56 = vld [vmem:[%s3643_s26 + $0x134] sm:$0xf]  ;;  %v3024_v57 = vld [vmem:[%s3643_s26 + $0x138] sm:$0xf0]  ;;  %v2726_v62 = vld [vmem:[%s3729_s10 + $0xe0] sm:$0xf] }
  0x69   : > { %1478 = vmatmul.bf16.gmra.mxu3 %v3788_v15  ;;  %v3251_v58 = vld [vmem:[%s3643_s26 + $0x1b4] sm:$0xf]  ;;  %v3027_v59 = vor.u32 %v3235_v56, %v3024_v57  ;;  %v3088_v60 = vld [vmem:[%s3643_s26 + $0x1b8] sm:$0xf0]  ;;  %v3163_v63 = vld [vmem:[%s3729_s10 + $0xec] sm:$0xf0] }
  0x6a   : > { %v3091_v61 = vor.u32 %v3251_v58, %v3088_v60  ;;  %v3161_v4 = vld [vmem:[%s3729_s10 + $0xe4] sm:$0xf]  ;;  %v2728_v5 = vld [vmem:[%s3729_s10 + $0xf0] sm:$0xf0]  ;;  %v2734_v6 = vld [vmem:[%s3729_s10 + $0xe8] sm:$0xf]  ;;  %v3925_v17 = vor.u32 %v3163_v63, %v2726_v62 }
  0x6b   : > { %1736 = vmatpush.bf16.msrb.mxu2 %v3027_v59  ;;  %v3164_v7 = vld [vmem:[%s3729_s10 + $0xf4] sm:$0xf0]  ;;  %v3162_v8 = vld [vmem:[%s3729_s10 + $0xec] sm:$0xf]  ;;  %v2736_v9 = vld [vmem:[%s3729_s10 + $0xf8] sm:$0xf0]  ;;  %v3928_v20 = vor.u32 %v3161_v4, %v2728_v5 }
  0x6c   : > { %1825 = vmatpush.bf16.msrb.mxu3 %v3091_v61  ;;  %v3203_v10 = vld [vmem:[%s3643_s26 + $0x34] sm:$0xf]  ;;  %v2896_v11 = vld [vmem:[%s3643_s26 + $0x38] sm:$0xf0]  ;;  %v3930_v21 = vor.u32 %v3164_v7, %v2734_v6  ;;  %v3932_v23 = vor.u32 %v3162_v8, %v2736_v9  ;;  %v2742_v28 = vld [vmem:[%s3729_s10 + $0x100] sm:$0xf] }
  0x6d   : > { %v3219_v16 = vld [vmem:[%s3643_s26 + $0xb4] sm:$0xf]  ;;  %v2899_v18 = vor.u32 %v3203_v10, %v2896_v11  ;;  %v2960_v19 = vld [vmem:[%s3643_s26 + $0xb8] sm:$0xf0]  ;;  %v3167_v29 = vld [vmem:[%s3729_s10 + $0x10c] sm:$0xf0] }
  0x6e   : > { %v2963_v22 = vor.u32 %v3219_v16, %v2960_v19  ;;  %v3165_v30 = vld [vmem:[%s3729_s10 + $0x104] sm:$0xf]  ;;  %v2744_v31 = vld [vmem:[%s3729_s10 + $0x110] sm:$0xf0]  ;;  %v2750_v36 = vld [vmem:[%s3729_s10 + $0x108] sm:$0xf]  ;;  %v3946_v40 = vor.u32 %v3167_v29, %v2742_v28 }
  0x6f   : > { %1558 = vmatpush.bf16.msrb.mxu0 %v2899_v18  ;;  %v3168_v37 = vld [vmem:[%s3729_s10 + $0x114] sm:$0xf0]  ;;  %v3166_v38 = vld [vmem:[%s3729_s10 + $0x10c] sm:$0xf]  ;;  %v2752_v39 = vld [vmem:[%s3729_s10 + $0x118] sm:$0xf0]  ;;  %v3948_v42 = vor.u32 %v3165_v30, %v2744_v31 }
  0x70   : > { %1647 = vmatpush.bf16.msrb.mxu1 %v2963_v22  ;;  %v3950_v43 = vor.u32 %v3168_v37, %v2750_v36  ;;  %v3952_v57 = vor.u32 %v3166_v38, %v2752_v39  ;;  %v3233_v59 = vld [vmem:[%s3643_s26 + $0x124] sm:$0xf]  ;;  %v3016_v60 = vld [vmem:[%s3643_s26 + $0x128] sm:$0xf0]  ;;  %v2758_v16 = vld [vmem:[%s3729_s10 + $0x120] sm:$0xf] }
  0x71   : > { %v3249_v61 = vld [vmem:[%s3643_s26 + $0x1a4] sm:$0xf]  ;;  %v3019_v63 = vor.u32 %v3233_v59, %v3016_v60  ;;  %v3080_v4 = vld [vmem:[%s3643_s26 + $0x1a8] sm:$0xf0]  ;;  %v3171_v18 = vld [vmem:[%s3729_s10 + $0x12c] sm:$0xf0] }
  0x72   : > { %v3083_v8 = vor.u32 %v3249_v61, %v3080_v4  ;;  %v3169_v19 = vld [vmem:[%s3729_s10 + $0x124] sm:$0xf]  ;;  %v2760_v22 = vld [vmem:[%s3729_s10 + $0x130] sm:$0xf0]  ;;  %v2766_v28 = vld [vmem:[%s3729_s10 + $0x128] sm:$0xf]  ;;  %v3974_v39 = vor.u32 %v3171_v18, %v2758_v16 }
  0x73   : > { %1737 = vmatpush.bf16.msrb.mxu2 %v3019_v63  ;;  %v3172_v29 = vld [vmem:[%s3729_s10 + $0x134] sm:$0xf0]  ;;  %v3170_v30 = vld [vmem:[%s3729_s10 + $0x12c] sm:$0xf]  ;;  %v2768_v31 = vld [vmem:[%s3729_s10 + $0x138] sm:$0xf0] }
  0x74   : > { %1826 = vmatpush.bf16.msrb.mxu3 %v3083_v8  ;;  %v3201_v36 = vld [vmem:[%s3643_s26 + $0x24] sm:$0xf]  ;;  %v2888_v37 = vld [vmem:[%s3643_s26 + $0x28] sm:$0xf0]  ;;  %v3980_v63 = vor.u32 %v3172_v29, %v2766_v28  ;;  %v2774_v29 = vld [vmem:[%s3729_s10 + $0x140] sm:$0xf] }
  0x75   : > { %s3126_s14 = sshll.u32 (%p3610_p12), %s3487_s17, 1  ;;  %s3261_s22 = sshll.u32 (%p3610_p12), %s3491_s18, 7 }
  0x76   : > { %1216 = vmatmul.bf16.gmra.mxu0 %v3802_v24  ;;  %4528 = vst [vmem:[#allocation15_spill] sm:$0xff] %v3980_v63  ;;  %s2313_s25 = sadd.s32 (%p3610_p12), %s3261_s22, %s3126_s14 }
  0x77   : > { %1305 = vmatmul.bf16.gmra.mxu1 %v3804_v25  ;;  %s3128_s20 = sshll.u32 (%p3610_p12), %s2313_s25, 2 }
  0x78   : > { %1394 = vmatmul.bf16.gmra.mxu2 %v3806_v26  ;;  %s4395_s24 = scalar_lea.vmem (%p3610_p12), %s4492_s3, %s3128_s20 }
  0x79   : > { %1483 = vmatmul.bf16.gmra.mxu3 %v3808_v27 }
  0x86   : > { %1221 = vmatmul.bf16.gmra.mxu0 %v3830_v49 }
  0x87   : > { %1310 = vmatmul.bf16.gmra.mxu1 %v3832_v50 }
  0x88   : > { %1399 = vmatmul.bf16.gmra.mxu2 %v3834_v54 }
  0x89   : > { %1488 = vmatmul.bf16.gmra.mxu3 %v3836_v55 }
  0x96   : > { %1226 = vmatmul.bf16.gmra.mxu0 %v3850_v0 }
  0x97   : > { %1315 = vmatmul.bf16.gmra.mxu1 %v3852_v1 }
  0x98   : > { %1404 = vmatmul.bf16.gmra.mxu2 %v3854_v2 }
  0x99   : > { %1493 = vmatmul.bf16.gmra.mxu3 %v3856_v3 }
  0xa6   : > { %1231 = vmatmul.bf16.gmra.mxu0 %v3878_v32 }
  0xa7   : > { %1320 = vmatmul.bf16.gmra.mxu1 %v3880_v33 }
  0xa8   : > { %1409 = vmatmul.bf16.gmra.mxu2 %v3882_v34 }
  0xa9   : > { %1498 = vmatmul.bf16.gmra.mxu3 %v3884_v35 }
  0xb6   : > { %1236 = vmatmul.bf16.gmra.mxu0 %v3898_v44 }
  0xb7   : > { %1325 = vmatmul.bf16.gmra.mxu1 %v3900_v45 }
  0xb8   : > { %1414 = vmatmul.bf16.gmra.mxu2 %v3902_v46 }
  0xb9   : > { %1503 = vmatmul.bf16.gmra.mxu3 %v3904_v48 }
  0xc6   : > { %1241 = vmatmul.bf16.gmra.mxu0 %v3925_v17 }
  0xc7   : > { %1330 = vmatmul.bf16.gmra.mxu1 %v3928_v20 }
  0xc8   : > { %1419 = vmatmul.bf16.gmra.mxu2 %v3930_v21 }
  0xc9   : > { %1508 = vmatmul.bf16.gmra.mxu3 %v3932_v23 }
  0xd3   : > { %v1207_v41 = vpop.f32.mrf.mxu0 }
  0xd4   : > { %v1296_v56 = vpop.f32.mrf.mxu1 }
  0xd5   : > { %v1297_v58 = vadd.f32 %v1296_v56, %v1207_v41  ;;  %v2891_v41 = vor.u32 %v3201_v36, %v2888_v37  ;;  %v3217_v56 = vld [vmem:[%s3643_s26 + $0xa4] sm:$0xf]  ;;  %v2776_v36 = vld [vmem:[%s3729_s10 + $0x150] sm:$0xf0]  ;;  %v2782_v37 = vld [vmem:[%s3729_s10 + $0x148] sm:$0xf] }
  0xd6   : > { %1246 = vmatmul.bf16.gmra.mxu0 %v3946_v40 }
  0xd7   : > { %1335 = vmatmul.bf16.gmra.mxu1 %v3948_v42  ;;  %1559 = vmatpush.bf16.msrb.mxu0 %v2891_v41  ;;  %v3174_v41 = vld [vmem:[%s3729_s10 + $0x14c] sm:$0xf] }
  0xd8   : > { %1424 = vmatmul.bf16.gmra.mxu2 %v3950_v43 }
  0xd9   : > { %1513 = vmatmul.bf16.gmra.mxu3 %v3952_v57 }
  0xdb   : > { %v1385_v62 = vpop.f32.mrf.mxu2  ;;  %v1209_v7 = vpop.f32.mrf.mxu0 }
  0xdc   : > { %v1386_v5 = vadd.f32 %v1385_v62, %v1297_v58  ;;  %v1474_v6 = vpop.f32.mrf.mxu3  ;;  %v1298_v9 = vpop.f32.mrf.mxu1  ;;  %v2952_v58 = vld [vmem:[%s3643_s26 + $0xa8] sm:$0xf0]  ;;  %v3978_v62 = vor.u32 %v3169_v19, %v2760_v22 }
  0xdd   : > { %v1299_v11 = vadd.f32 %v1298_v9, %v1209_v7  ;;  %v2955_v4 = vor.u32 %v3217_v56, %v2952_v58  ;;  %v2784_v56 = vld [vmem:[%s3729_s10 + $0x158] sm:$0xf0] }
  0xde   : > { %v3962_v10 = vadd.f32 %v1474_v6, %v1386_v5  ;;  %4527 = vst [vmem:[#allocation14_spill] sm:$0xff] %v3978_v62  ;;  %v3982_v6 = vor.u32 %v3170_v30, %v2768_v31  ;;  %v3175_v30 = vld [vmem:[%s3729_s10 + $0x14c] sm:$0xf0]  ;;  %v3173_v31 = vld [vmem:[%s3729_s10 + $0x144] sm:$0xf] }
  0xdf   : > { %1648 = vmatpush.bf16.msrb.mxu1 %v2955_v4 }
  0xe0   : > { %4529 = vst [vmem:[#allocation16_spill] sm:$0xff] %v3982_v6 }
  0xe3   : > { %v1387_v38 = vpop.f32.mrf.mxu2  ;;  %v1212_v61 = vpop.f32.mrf.mxu0 }
  0xe4   : > { %v1388_v59 = vadd.f32 %v1387_v38, %v1299_v11  ;;  %v1476_v60 = vpop.f32.mrf.mxu3  ;;  %v1301_v5 = vpop.f32.mrf.mxu1  ;;  %v3176_v38 = vld [vmem:[%s3729_s10 + $0x154] sm:$0xf0] }
  0xe5   : > { %v1302_v8 = vadd.f32 %v1301_v5, %v1212_v61  ;;  %v4002_v5 = vor.u32 %v3173_v31, %v2776_v36  ;;  %v3247_v31 = vld [vmem:[%s3643_s26 + $0x194] sm:$0xf]  ;;  %v3072_v36 = vld [vmem:[%s3643_s26 + $0x198] sm:$0xf0] }
  0xe6   : > { %v3984_v7 = vadd.f32 %v1476_v60, %v1388_v59  ;;  %1251 = vmatmul.bf16.gmra.mxu0 %v3974_v39  ;;  %v4000_v59 = vor.u32 %v3175_v30, %v2774_v29 }
  0xe7   : > { %1340 = vmatmul.bf16.gmra.mxu1 %v3978_v62  ;;  %4532 = vst [vmem:[#allocation19_spill] sm:$0xff] %v4002_v5 }
  0xe8   : > { %1429 = vmatmul.bf16.gmra.mxu2 %v3980_v63  ;;  %4531 = vst [vmem:[#allocation18_spill] sm:$0xff] %v4000_v59 }
  0xe9   : > { %1518 = vmatmul.bf16.gmra.mxu3 %v3982_v6 }
  0xeb   : > { %v1390_v9 = vpop.f32.mrf.mxu2  ;;  %v1214_v18 = vpop.f32.mrf.mxu0 }
  0xec   : > { %v1391_v11 = vadd.f32 %v1390_v9, %v1302_v8  ;;  %v1479_v16 = vpop.f32.mrf.mxu3  ;;  %v1303_v19 = vpop.f32.mrf.mxu1  ;;  %v4004_v8 = vor.u32 %v3176_v38, %v2782_v37 }
  0xed   : > { %v1304_v28 = vadd.f32 %v1303_v19, %v1214_v18  ;;  %v3231_v19 = vld [vmem:[%s3643_s26 + $0x114] sm:$0xf] }
  0xee   : > { %v3990_v22 = vadd.f32 %v1479_v16, %v1391_v11  ;;  %4533 = vst [vmem:[#allocation20_spill] sm:$0xff] %v4004_v8  ;;  %v4006_v11 = vor.u32 %v3174_v41, %v2784_v56  ;;  %v3075_v56 = vor.u32 %v3247_v31, %v3072_v36  ;;  %v3215_v36 = vld [vmem:[%s3643_s26 + $0x94] sm:$0xf] }
  0xf0   : > { %4530 = vst [vmem:[#allocation17_spill] sm:$0xff] %v3990_v22  ;;  %1827 = vmatpush.bf16.msrb.mxu3 %v3075_v56 }
  0xf1   : > { %4534 = vst [vmem:[#allocation21_spill] sm:$0xff] %v4006_v11 }
  0xf3   : > { %v1392_v58 = vpop.f32.mrf.mxu2  ;;  %v1217_v4 = vpop.f32.mrf.mxu0 }
  0xf4   : > { %v1393_v60 = vadd.f32 %v1392_v58, %v1304_v28  ;;  %v1481_v61 = vpop.f32.mrf.mxu3  ;;  %v1306_v9 = vpop.f32.mrf.mxu1  ;;  %v3008_v28 = vld [vmem:[%s3643_s26 + $0x118] sm:$0xf0] }
  0xf5   : > { %v1307_v18 = vadd.f32 %v1306_v9, %v1217_v4  ;;  %v3011_v30 = vor.u32 %v3231_v19, %v3008_v28  ;;  %v2790_v4 = vld [vmem:[%s3729_s10 + $0x160] sm:$0xf]  ;;  %v3179_v9 = vld [vmem:[%s3729_s10 + $0x16c] sm:$0xf0]  ;;  %v3177_v19 = vld [vmem:[%s3729_s10 + $0x164] sm:$0xf] }
  0xf6   : > { %v4008_v16 = vadd.f32 %v1481_v61, %v1393_v60  ;;  %1256 = vmatmul.bf16.gmra.mxu0 %v4000_v59  ;;  %v2792_v28 = vld [vmem:[%s3729_s10 + $0x170] sm:$0xf0]  ;;  %v2880_v59 = vld [vmem:[%s3643_s26 + $0x18] sm:$0xf0]  ;;  %v4030_v31 = vor.u32 %v3179_v9, %v2790_v4  ;;  %v2806_v4 = vld [vmem:[%s3729_s10 + $0x180] sm:$0xf] }
  0xf7   : > { %1345 = vmatmul.bf16.gmra.mxu1 %v4002_v5  ;;  %1738 = vmatpush.bf16.msrb.mxu2 %v3011_v30  ;;  %v3199_v5 = vld [vmem:[%s3643_s26 + $0x14] sm:$0xf]  ;;  %v4034_v56 = vor.u32 %v3177_v19, %v2792_v28  ;;  %v3183_v9 = vld [vmem:[%s3729_s10 + $0x18c] sm:$0xf0]  ;;  %v3181_v19 = vld [vmem:[%s3729_s10 + $0x184] sm:$0xf] }
  0xf8   : > { %4535 = vst [vmem:[#allocation22_spill] sm:$0xff] %v4008_v16  ;;  %1434 = vmatmul.bf16.gmra.mxu2 %v4004_v8  ;;  %v2800_v8 = vld [vmem:[%s3729_s10 + $0x178] sm:$0xf0]  ;;  %v2883_v30 = vor.u32 %v3199_v5, %v2880_v59  ;;  %v2808_v28 = vld [vmem:[%s3729_s10 + $0x190] sm:$0xf0] }
  0xf9   : > { %1523 = vmatmul.bf16.gmra.mxu3 %v4006_v11  ;;  %v2798_v11 = vld [vmem:[%s3729_s10 + $0x168] sm:$0xf]  ;;  %4537 = vst [vmem:[#allocation24_spill] sm:$0xff] %v4030_v31 }
  0xfa   : > { %4538 = vst [vmem:[#allocation25_spill] sm:$0xff] %v4034_v56  ;;  %1560 = vmatpush.bf16.msrb.mxu0 %v2883_v30  ;;  %v3182_v30 = vld [vmem:[%s3729_s10 + $0x18c] sm:$0xf] }
  0xfb   : > { %v1395_v29 = vpop.f32.mrf.mxu2  ;;  %v1219_v41 = vpop.f32.mrf.mxu0 }
  0xfc   : > { %v1396_v37 = vadd.f32 %v1395_v29, %v1307_v18  ;;  %v1484_v38 = vpop.f32.mrf.mxu3  ;;  %v1308_v58 = vpop.f32.mrf.mxu1  ;;  %v3180_v18 = vld [vmem:[%s3729_s10 + $0x174] sm:$0xf0]  ;;  %v3178_v29 = vld [vmem:[%s3729_s10 + $0x16c] sm:$0xf] }
  0xfd   : > { %v1309_v61 = vadd.f32 %v1308_v58, %v1219_v41  ;;  %v4038_v63 = vor.u32 %v3178_v29, %v2800_v8  ;;  %v3184_v29 = vld [vmem:[%s3729_s10 + $0x194] sm:$0xf0] }
  0xfe   : > { %v4018_v60 = vadd.f32 %v1484_v38, %v1396_v37  ;;  %v2944_v37 = vld [vmem:[%s3643_s26 + $0x98] sm:$0xf0] }
  0xff   : > { %v2947_v22 = vor.u32 %v3215_v36, %v2944_v37  ;;  %4540 = vst [vmem:[#allocation27_spill] sm:$0xff] %v4038_v63  ;;  %v2816_v36 = vld [vmem:[%s3729_s10 + $0x198] sm:$0xf0] }
 0x100   : > { %4536 = vst [vmem:[#allocation23_spill] sm:$0xff] %v4018_v60  ;;  %v4036_v60 = vor.u32 %v3180_v18, %v2798_v11  ;;  %v2814_v18 = vld [vmem:[%s3729_s10 + $0x188] sm:$0xf] }
 0x101   : > { %1649 = vmatpush.bf16.msrb.mxu1 %v2947_v22 }
 0x102   : > { %4539 = vst [vmem:[#allocation26_spill] sm:$0xff] %v4036_v60 }
 0x103   : > { %v1397_v16 = vpop.f32.mrf.mxu2  ;;  %v1222_v58 = vpop.f32.mrf.mxu0 }
 0x104   : > { %v1398_v38 = vadd.f32 %v1397_v16, %v1309_v61  ;;  %v1486_v41 = vpop.f32.mrf.mxu3  ;;  %v1311_v6 = vpop.f32.mrf.mxu1 }
 0x105   : > { %v1312_v59 = vadd.f32 %v1311_v6, %v1222_v58 }
 0x106   : > { %v4040_v62 = vadd.f32 %v1486_v41, %v1398_v38  ;;  %1261 = vmatmul.bf16.gmra.mxu0 %v4030_v31  ;;  %v4056_v38 = vor.u32 %v3183_v9, %v2806_v4  ;;  %v3000_v4 = vld [vmem:[%s3643_s26 + $0x108] sm:$0xf0] }
 0x107   : > { %1350 = vmatmul.bf16.gmra.mxu1 %v4034_v56 }
 0x108   : > { %4541 = vst [vmem:[#allocation28_spill] sm:$0xff] %v4040_v62  ;;  %1439 = vmatmul.bf16.gmra.mxu2 %v4036_v60 }
 0x109   : > { %1528 = vmatmul.bf16.gmra.mxu3 %v4038_v63  ;;  %4543 = vst [vmem:[#allocation30_spill] sm:$0xff] %v4056_v38 }
 0x10b   : > { %v1400_v5 = vpop.f32.mrf.mxu2  ;;  %v1224_v16 = vpop.f32.mrf.mxu0 }
 0x10c   : > { %v1401_v8 = vadd.f32 %v1400_v5, %v1312_v59  ;;  %v1489_v11 = vpop.f32.mrf.mxu3  ;;  %v1313_v61 = vpop.f32.mrf.mxu1  ;;  %v4058_v5 = vor.u32 %v3181_v19, %v2808_v28  ;;  %v3245_v28 = vld [vmem:[%s3643_s26 + $0x184] sm:$0xf] }
 0x10d   : > { %v1314_v22 = vadd.f32 %v1313_v61, %v1224_v16  ;;  %v4062_v16 = vor.u32 %v3182_v30, %v2816_v36 }
 0x10e   : > { %v4046_v6 = vadd.f32 %v1489_v11, %v1401_v8  ;;  %4544 = vst [vmem:[#allocation31_spill] sm:$0xff] %v4058_v5  ;;  %v4060_v8 = vor.u32 %v3184_v29, %v2814_v18  ;;  %v3064_v18 = vld [vmem:[%s3643_s26 + $0x188] sm:$0xf0] }
 0x10f   : > { %4546 = vst [vmem:[#allocation33_spill] sm:$0xff] %v4062_v16 }
 0x110   : > { %4542 = vst [vmem:[#allocation29_spill] sm:$0xff] %v4046_v6 }
 0x111   : > { %4545 = vst [vmem:[#allocation32_spill] sm:$0xff] %v4060_v8 }
 0x113   : > { %v1402_v37 = vpop.f32.mrf.mxu2  ;;  %v1227_v59 = vpop.f32.mrf.mxu0 }
 0x114   : > { %v1403_v41 = vadd.f32 %v1402_v37, %v1314_v22  ;;  %v1491_v58 = vpop.f32.mrf.mxu3  ;;  %v1316_v11 = vpop.f32.mrf.mxu1  ;;  %v3229_v22 = vld [vmem:[%s3643_s26 + $0x104] sm:$0xf]  ;;  %v3067_v37 = vor.u32 %v3245_v28, %v3064_v18 }
 0x115   : > { %v1317_v6 = vadd.f32 %v1316_v11, %v1227_v59  ;;  %v3003_v19 = vor.u32 %v3229_v22, %v3000_v4  ;;  %v2822_v11 = vld [vmem:[%s3729_s10 + $0x1a0] sm:$0xf]  ;;  %v3187_v22 = vld [vmem:[%s3729_s10 + $0x1ac] sm:$0xf0]  ;;  %v3185_v4 = vld [vmem:[%s3729_s10 + $0x1a4] sm:$0xf] }
 0x116   : > { %v4064_v61 = vadd.f32 %v1491_v58, %v1403_v41  ;;  %1266 = vmatmul.bf16.gmra.mxu0 %v4056_v38  ;;  %1828 = vmatpush.bf16.msrb.mxu3 %v3067_v37  ;;  %v3197_v38 = vld [vmem:[%s3643_s26 + $0x4] sm:$0xf]  ;;  %v4086_v28 = vor.u32 %v3187_v22, %v2822_v11  ;;  %v3191_v11 = vld [vmem:[%s3729_s10 + $0x1cc] sm:$0xf0] }
 0x117   : > { %1355 = vmatmul.bf16.gmra.mxu1 %v4058_v5  ;;  %1739 = vmatpush.bf16.msrb.mxu2 %v3003_v19  ;;  %v2832_v5 = vld [vmem:[%s3729_s10 + $0x1b8] sm:$0xf0]  ;;  %v3213_v18 = vld [vmem:[%s3643_s26 + $0x84] sm:$0xf] }
 0x118   : > { %4547 = vst [vmem:[#allocation34_spill] sm:$0xff] %v4064_v61  ;;  %1444 = vmatmul.bf16.gmra.mxu2 %v4060_v8  ;;  %v2830_v8 = vld [vmem:[%s3729_s10 + $0x1a8] sm:$0xf]  ;;  %v2872_v61 = vld [vmem:[%s3643_s26 + $0x8] sm:$0xf0] }
 0x119   : > { %1533 = vmatmul.bf16.gmra.mxu3 %v4062_v16  ;;  %v2824_v16 = vld [vmem:[%s3729_s10 + $0x1b0] sm:$0xf0]  ;;  %v2875_v19 = vor.u32 %v3197_v38, %v2872_v61  ;;  %v3189_v22 = vld [vmem:[%s3729_s10 + $0x1c4] sm:$0xf] }
 0x11a   : > { %v4090_v37 = vor.u32 %v3185_v4, %v2824_v16  ;;  %v2840_v4 = vld [vmem:[%s3729_s10 + $0x1d0] sm:$0xf0] }
 0x11b   : > { %v1405_v9 = vpop.f32.mrf.mxu2  ;;  %v1229_v36 = vpop.f32.mrf.mxu0  ;;  %1561 = vmatpush.bf16.msrb.mxu0 %v2875_v19  ;;  %v3190_v19 = vld [vmem:[%s3729_s10 + $0x1cc] sm:$0xf] }
 0x11c   : > { %v1406_v29 = vadd.f32 %v1405_v9, %v1317_v6  ;;  %v1494_v30 = vpop.f32.mrf.mxu3  ;;  %v1318_v41 = vpop.f32.mrf.mxu1  ;;  %v3188_v6 = vld [vmem:[%s3729_s10 + $0x1b4] sm:$0xf0]  ;;  %v3186_v9 = vld [vmem:[%s3729_s10 + $0x1ac] sm:$0xf] }
 0x11d   : > { %v1319_v59 = vadd.f32 %v1318_v41, %v1229_v36  ;;  %v4094_v31 = vor.u32 %v3186_v9, %v2832_v5  ;;  %v3192_v9 = vld [vmem:[%s3729_s10 + $0x1d4] sm:$0xf0] }
 0x11e   : > { %v4074_v58 = vadd.f32 %v1494_v30, %v1406_v29  ;;  %v2936_v29 = vld [vmem:[%s3643_s26 + $0x88] sm:$0xf0] }
 0x11f   : > { %v2939_v60 = vor.u32 %v3213_v18, %v2936_v29  ;;  %4549 = vst [vmem:[#allocation36_spill] sm:$0xff] %v4094_v31  ;;  %v2848_v18 = vld [vmem:[%s3729_s10 + $0x1d8] sm:$0xf0] }
 0x120   : > { %4548 = vst [vmem:[#allocation35_spill] sm:$0xff] %v4074_v58  ;;  %v4092_v58 = vor.u32 %v3188_v6, %v2830_v8  ;;  %v2846_v6 = vld [vmem:[%s3729_s10 + $0x1c8] sm:$0xf] }
 0x121   : > { %1650 = vmatpush.bf16.msrb.mxu1 %v2939_v60 }
 0x123   : > { %v1407_v63 = vpop.f32.mrf.mxu2  ;;  %v1232_v41 = vpop.f32.mrf.mxu0 }
 0x124   : > { %v1408_v30 = vadd.f32 %v1407_v63, %v1319_v59  ;;  %v1496_v36 = vpop.f32.mrf.mxu3  ;;  %v1321_v56 = vpop.f32.mrf.mxu1  ;;  %v2838_v59 = vld [vmem:[%s3729_s10 + $0x1c0] sm:$0xf] }
 0x125   : > { %v1322_v38 = vadd.f32 %v1321_v56, %v1232_v41 }
 0x126   : > { %v4096_v62 = vadd.f32 %v1496_v36, %v1408_v30  ;;  %1271 = vmatmul.bf16.gmra.mxu0 %v4086_v28  ;;  %v4112_v30 = vor.u32 %v3191_v11, %v2838_v59 }
 0x127   : > { %1360 = vmatmul.bf16.gmra.mxu1 %v4090_v37 }
 0x128   : > { %1449 = vmatmul.bf16.gmra.mxu2 %v4092_v58  ;;  %4551 = vst [vmem:[#allocation38_spill] sm:$0xff] %v4112_v30 }
 0x129   : > { %1538 = vmatmul.bf16.gmra.mxu3 %v4094_v31  ;;  %v4116_v31 = vor.u32 %v3192_v9, %v2846_v6 }
 0x12b   : > { %v1410_v63 = vpop.f32.mrf.mxu2  ;;  %v1234_v16 = vpop.f32.mrf.mxu0  ;;  %4553 = vst [vmem:[#allocation40_spill] sm:$0xff] %v4116_v31 }
 0x12c   : > { %v1411_v5 = vadd.f32 %v1410_v63, %v1322_v38  ;;  %v1499_v8 = vpop.f32.mrf.mxu3  ;;  %v1323_v61 = vpop.f32.mrf.mxu1  ;;  %v4114_v63 = vor.u32 %v3189_v22, %v2840_v4 }
 0x12d   : > { %v1324_v60 = vadd.f32 %v1323_v61, %v1234_v16 }
 0x12e   : > { %v4102_v56 = vadd.f32 %v1499_v8, %v1411_v5  ;;  %4552 = vst [vmem:[#allocation39_spill] sm:$0xff] %v4114_v63  ;;  %v4118_v8 = vor.u32 %v3190_v19, %v2848_v18  ;;  %v2854_v19 = vld [vmem:[%s3729_s10 + $0x1e0] sm:$0xf]  ;;  %v3195_v18 = vld [vmem:[%s3729_s10 + $0x1ec] sm:$0xf0] }
 0x130   : > { %4550 = vst [vmem:[#allocation37_spill] sm:$0xff] %v4102_v56 }
 0x131   : > { %4554 = vst [vmem:[#allocation41_spill] sm:$0xff] %v4118_v8 }
 0x133   : > { %v1412_v29 = vpop.f32.mrf.mxu2  ;;  %v1237_v38 = vpop.f32.mrf.mxu0 }
 0x134   : > { %v1413_v36 = vadd.f32 %v1412_v29, %v1324_v60  ;;  %v1501_v41 = vpop.f32.mrf.mxu3  ;;  %v1326_v5 = vpop.f32.mrf.mxu1  ;;  %v3193_v29 = vld [vmem:[%s3729_s10 + $0x1e4] sm:$0xf] }
 0x135   : > { %v1327_v61 = vadd.f32 %v1326_v5, %v1237_v38  ;;  %v3196_v38 = vld [vmem:[%s3729_s10 + $0x1f4] sm:$0xf0]  ;;  %v3194_v5 = vld [vmem:[%s3729_s10 + $0x1ec] sm:$0xf] }
 0x136   : > { %v4120_v16 = vadd.f32 %v1501_v41, %v1413_v36  ;;  %1276 = vmatmul.bf16.gmra.mxu0 %v4112_v30  ;;  %v2856_v36 = vld [vmem:[%s3729_s10 + $0x1f0] sm:$0xf0]  ;;  %v2862_v41 = vld [vmem:[%s3729_s10 + $0x1e8] sm:$0xf]  ;;  %v4136_v30 = vor.u32 %v3195_v18, %v2854_v19 }
 0x137   : > { %1365 = vmatmul.bf16.gmra.mxu1 %v4114_v63  ;;  %v2864_v63 = vld [vmem:[%s3729_s10 + $0x1f8] sm:$0xf0]  ;;  %v4140_v56 = vor.u32 %v3196_v38, %v2862_v41 }
 0x138   : > { %4555 = vst [vmem:[#allocation42_spill] sm:$0xff] %v4120_v16  ;;  %1454 = vmatmul.bf16.gmra.mxu2 %v4116_v31 }
 0x139   : > { %1543 = vmatmul.bf16.gmra.mxu3 %v4118_v8 }
 0x13b   : > { %v1415_v60 = vpop.f32.mrf.mxu2  ;;  %v1239_v22 = vpop.f32.mrf.mxu0 }
 0x13c   : > { %v1416_v59 = vadd.f32 %v1415_v60, %v1327_v61  ;;  %v1504_v11 = vpop.f32.mrf.mxu3  ;;  %v1328_v4 = vpop.f32.mrf.mxu1  ;;  %v4138_v60 = vor.u32 %v3193_v29, %v2856_v36 }
 0x13d   : > { %v1329_v9 = vadd.f32 %v1328_v4, %v1239_v22 }
 0x13e   : > { %v4126_v6 = vadd.f32 %v1504_v11, %v1416_v59  ;;  %v4142_v11 = vor.u32 %v3194_v5, %v2864_v63 }
 0x143   : > { %v1417_v31 = vpop.f32.mrf.mxu2  ;;  %v1242_v61 = vpop.f32.mrf.mxu0 }
 0x144   : > { %v1418_v8 = vadd.f32 %v1417_v31, %v1329_v9  ;;  %v1506_v16 = vpop.f32.mrf.mxu3  ;;  %v1331_v59 = vpop.f32.mrf.mxu1 }
 0x145   : > { %v1332_v4 = vadd.f32 %v1331_v59, %v1242_v61 }
 0x146   : > { %v4144_v22 = vadd.f32 %v1506_v16, %v1418_v8  ;;  %1281 = vmatmul.bf16.gmra.mxu0 %v4136_v30 }
 0x147   : > { %1370 = vmatmul.bf16.gmra.mxu1 %v4138_v60 }
 0x148   : > { %1459 = vmatmul.bf16.gmra.mxu2 %v4140_v56 }
 0x149   : > { %1548 = vmatmul.bf16.gmra.mxu3 %v4142_v11 }
 0x14b   : > { %v1420_v31 = vpop.f32.mrf.mxu2  ;;  %v1244_v18 = vpop.f32.mrf.mxu0 }
 0x14c   : > { %v1421_v9 = vadd.f32 %v1420_v31, %v1332_v4  ;;  %v1509_v19 = vpop.f32.mrf.mxu3  ;;  %v1333_v29 = vpop.f32.mrf.mxu1 }
 0x14d   : > { %v1334_v63 = vadd.f32 %v1333_v29, %v1244_v18 }
 0x14e   : > { %v4150_v36 = vadd.f32 %v1509_v19, %v1421_v9 }
 0x153   : > { %v1422_v41 = vpop.f32.mrf.mxu2  ;;  %v1247_v38 = vpop.f32.mrf.mxu0 }
 0x154   : > { %v1423_v8 = vadd.f32 %v1422_v41, %v1334_v63  ;;  %v1511_v16 = vpop.f32.mrf.mxu3  ;;  %v1336_v5 = vpop.f32.mrf.mxu1 }
 0x155   : > { %v1337_v59 = vadd.f32 %v1336_v5, %v1247_v38 }
 0x156   : > { %v4152_v61 = vadd.f32 %v1511_v16, %v1423_v8  ;;  %1562 = vmatmul.bf16.vlgmr.msrb.gmra.mxu0 %v3752_v47 }
 0x157   : > { %1651 = vmatmul.bf16.vlgmr.msrb.gmra.mxu1 %v3756_v51 }
 0x158   : > { %1740 = vmatmul.bf16.vlgmr.msrb.gmra.mxu2 %v3758_v52 }
 0x159   : > { %1829 = vmatmul.bf16.vlgmr.msrb.gmra.mxu3 %v3760_v53 }
 0x15b   : > { %v1425_v4 = vpop.f32.mrf.mxu2  ;;  %v1249_v19 = vpop.f32.mrf.mxu0 }
 0x15c   : > { %v1426_v31 = vadd.f32 %v1425_v4, %v1337_v59  ;;  %v1514_v9 = vpop.f32.mrf.mxu3  ;;  %v1338_v18 = vpop.f32.mrf.mxu1 }
 0x15d   : > { %v1339_v63 = vadd.f32 %v1338_v18, %v1249_v19 }
 0x15e   : > { %v4158_v29 = vadd.f32 %v1514_v9, %v1426_v31 }
 0x163   : > { %v1427_v41 = vpop.f32.mrf.mxu2  ;;  %v1252_v38 = vpop.f32.mrf.mxu0 }
 0x164   : > { %v1428_v8 = vadd.f32 %v1427_v41, %v1339_v63  ;;  %v1516_v16 = vpop.f32.mrf.mxu3  ;;  %v1341_v5 = vpop.f32.mrf.mxu1 }
 0x165   : > { %v1342_v51 = vadd.f32 %v1341_v5, %v1252_v38 }
 0x166   : > { %v4160_v47 = vadd.f32 %v1516_v16, %v1428_v8  ;;  %1567 = vmatmul.bf16.gmra.mxu0 %v3782_v12 }
 0x167   : > { %1656 = vmatmul.bf16.gmra.mxu1 %v3784_v13 }
 0x168   : > { %1745 = vmatmul.bf16.gmra.mxu2 %v3786_v14 }
 0x169   : > { %1834 = vmatmul.bf16.gmra.mxu3 %v3788_v15 }
 0x16b   : > { %v1430_v52 = vpop.f32.mrf.mxu2  ;;  %v1254_v4 = vpop.f32.mrf.mxu0 }
 0x16c   : > { %v1431_v53 = vadd.f32 %v1430_v52, %v1342_v51  ;;  %v1519_v59 = vpop.f32.mrf.mxu3  ;;  %v1343_v31 = vpop.f32.mrf.mxu1 }
 0x16d   : > { %v1344_v19 = vadd.f32 %v1343_v31, %v1254_v4 }
 0x16e   : > { %v4166_v9 = vadd.f32 %v1519_v59, %v1431_v53 }
 0x173   : > { %v1432_v18 = vpop.f32.mrf.mxu2  ;;  %v1257_v8 = vpop.f32.mrf.mxu0 }
 0x174   : > { %v1433_v63 = vadd.f32 %v1432_v18, %v1344_v19  ;;  %v1521_v41 = vpop.f32.mrf.mxu3  ;;  %v1346_v16 = vpop.f32.mrf.mxu1 }
 0x175   : > { %v1347_v13 = vadd.f32 %v1346_v16, %v1257_v8 }
 0x176   : > { %v4168_v12 = vadd.f32 %v1521_v41, %v1433_v63  ;;  %1572 = vmatmul.bf16.gmra.mxu0 %v3802_v24 }
 0x177   : > { %1661 = vmatmul.bf16.gmra.mxu1 %v3804_v25 }
 0x178   : > { %1750 = vmatmul.bf16.gmra.mxu2 %v3806_v26 }
 0x179   : > { %1839 = vmatmul.bf16.gmra.mxu3 %v3808_v27 }
 0x17b   : > { %v1435_v14 = vpop.f32.mrf.mxu2  ;;  %v1259_v5 = vpop.f32.mrf.mxu0 }
 0x17c   : > { %v1436_v15 = vadd.f32 %v1435_v14, %v1347_v13  ;;  %v1524_v38 = vpop.f32.mrf.mxu3  ;;  %v1348_v51 = vpop.f32.mrf.mxu1 }
 0x17d   : > { %v1349_v53 = vadd.f32 %v1348_v51, %v1259_v5 }
 0x17e   : > { %v4174_v52 = vadd.f32 %v1524_v38, %v1436_v15 }
 0x183   : > { %v1437_v59 = vpop.f32.mrf.mxu2  ;;  %v1262_v19 = vpop.f32.mrf.mxu0 }
 0x184   : > { %v1438_v4 = vadd.f32 %v1437_v59, %v1349_v53  ;;  %v1526_v31 = vpop.f32.mrf.mxu3  ;;  %v1351_v18 = vpop.f32.mrf.mxu1 }
 0x185   : > { %v1352_v25 = vadd.f32 %v1351_v18, %v1262_v19 }
 0x186   : > { %v4176_v24 = vadd.f32 %v1526_v31, %v1438_v4  ;;  %1577 = vmatmul.bf16.gmra.mxu0 %v3830_v49 }
 0x187   : > { %1666 = vmatmul.bf16.gmra.mxu1 %v3832_v50 }
 0x188   : > { %1755 = vmatmul.bf16.gmra.mxu2 %v3834_v54 }
 0x189   : > { %1844 = vmatmul.bf16.gmra.mxu3 %v3836_v55 }
 0x18b   : > { %v1440_v26 = vpop.f32.mrf.mxu2  ;;  %v1264_v41 = vpop.f32.mrf.mxu0 }
 0x18c   : > { %v1441_v27 = vadd.f32 %v1440_v26, %v1352_v25  ;;  %v1529_v63 = vpop.f32.mrf.mxu3  ;;  %v1353_v8 = vpop.f32.mrf.mxu1 }
 0x18d   : > { %v1354_v13 = vadd.f32 %v1353_v8, %v1264_v41 }
 0x18e   : > { %v4182_v16 = vadd.f32 %v1529_v63, %v1441_v27 }
 0x193   : > { %v1442_v14 = vpop.f32.mrf.mxu2  ;;  %v1267_v5 = vpop.f32.mrf.mxu0 }
 0x194   : > { %v1443_v15 = vadd.f32 %v1442_v14, %v1354_v13  ;;  %v1531_v38 = vpop.f32.mrf.mxu3  ;;  %v1356_v51 = vpop.f32.mrf.mxu1 }
 0x195   : > { %v1357_v50 = vadd.f32 %v1356_v51, %v1267_v5 }
 0x196   : > { %v4184_v49 = vadd.f32 %v1531_v38, %v1443_v15  ;;  %1582 = vmatmul.bf16.gmra.mxu0 %v3850_v0 }
 0x197   : > { %1671 = vmatmul.bf16.gmra.mxu1 %v3852_v1 }
 0x198   : > { %1760 = vmatmul.bf16.gmra.mxu2 %v3854_v2 }
 0x199   : > { %1849 = vmatmul.bf16.gmra.mxu3 %v3856_v3 }
 0x19b   : > { %v1445_v54 = vpop.f32.mrf.mxu2  ;;  %v1269_v59 = vpop.f32.mrf.mxu0 }
 0x19c   : > { %v1446_v55 = vadd.f32 %v1445_v54, %v1357_v50  ;;  %v1534_v53 = vpop.f32.mrf.mxu3  ;;  %v1358_v4 = vpop.f32.mrf.mxu1 }
 0x19d   : > { %v1359_v19 = vadd.f32 %v1358_v4, %v1269_v59 }
 0x19e   : > { %v4190_v31 = vadd.f32 %v1534_v53, %v1446_v55 }
 0x1a3   : > { %v1447_v18 = vpop.f32.mrf.mxu2  ;;  %v1272_v27 = vpop.f32.mrf.mxu0 }
 0x1a4   : > { %v1448_v25 = vadd.f32 %v1447_v18, %v1359_v19  ;;  %v1536_v26 = vpop.f32.mrf.mxu3  ;;  %v1361_v63 = vpop.f32.mrf.mxu1 }
 0x1a5   : > { %v1362_v1 = vadd.f32 %v1361_v63, %v1272_v27 }
 0x1a6   : > { %v4192_v0 = vadd.f32 %v1536_v26, %v1448_v25  ;;  %1587 = vmatmul.bf16.gmra.mxu0 %v3878_v32 }
 0x1a7   : > { %1676 = vmatmul.bf16.gmra.mxu1 %v3880_v33 }
 0x1a8   : > { %1765 = vmatmul.bf16.gmra.mxu2 %v3882_v34 }
 0x1a9   : > { %1854 = vmatmul.bf16.gmra.mxu3 %v3884_v35 }
 0x1ab   : > { %v1450_v2 = vpop.f32.mrf.mxu2  ;;  %v1274_v8 = vpop.f32.mrf.mxu0 }
 0x1ac   : > { %v1451_v3 = vadd.f32 %v1450_v2, %v1362_v1  ;;  %v1539_v41 = vpop.f32.mrf.mxu3  ;;  %v1363_v13 = vpop.f32.mrf.mxu1 }
 0x1ad   : > { %v1364_v15 = vadd.f32 %v1363_v13, %v1274_v8 }
 0x1ae   : > { %v4198_v14 = vadd.f32 %v1539_v41, %v1451_v3 }
 0x1b3   : > { %v1452_v38 = vpop.f32.mrf.mxu2  ;;  %v1277_v50 = vpop.f32.mrf.mxu0 }
 0x1b4   : > { %v1453_v5 = vadd.f32 %v1452_v38, %v1364_v15  ;;  %v1541_v51 = vpop.f32.mrf.mxu3  ;;  %v1366_v54 = vpop.f32.mrf.mxu1 }
 0x1b5   : > { %v1367_v33 = vadd.f32 %v1366_v54, %v1277_v50 }
 0x1b6   : > { %v4200_v32 = vadd.f32 %v1541_v51, %v1453_v5  ;;  %1592 = vmatmul.bf16.gmra.mxu0 %v3898_v44  ;;  %v2105_v51 = vld [vmem:[%s3649_s9] sm:$0x3] }
 0x1b7   : > { %1681 = vmatmul.bf16.gmra.mxu1 %v3900_v45 }
 0x1b8   : > { %1770 = vmatmul.bf16.gmra.mxu2 %v3902_v46 }
 0x1b9   : > { %1859 = vmatmul.bf16.gmra.mxu3 %v3904_v48 }
 0x1bb   : > { %v1455_v34 = vpop.f32.mrf.mxu2  ;;  %v1279_v53 = vpop.f32.mrf.mxu0 }
 0x1bc   : > { %v1456_v35 = vadd.f32 %v1455_v34, %v1367_v33  ;;  %v1544_v55 = vpop.f32.mrf.mxu3  ;;  %v1368_v59 = vpop.f32.mrf.mxu1  ;;  %v4225_v34 = vperm.slane %v2105_v51, 1 }
 0x1bd   : > { %v1369_v19 = vadd.f32 %v1368_v59, %v1279_v53 }
 0x1be   : > { %v4206_v4 = vadd.f32 %v1544_v55, %v1456_v35 }
 0x1c3   : > { %v1457_v18 = vpop.f32.mrf.mxu2  ;;  %v1282_v27 = vpop.f32.mrf.mxu0 }
 0x1c4   : > { %v1458_v25 = vadd.f32 %v1457_v18, %v1369_v19  ;;  %v1546_v26 = vpop.f32.mrf.mxu3  ;;  %v1371_v63 = vpop.f32.mrf.mxu1 }
 0x1c5   : > { %v1372_v45 = vadd.f32 %v1371_v63, %v1282_v27 }
 0x1c6   : > { %v4208_v44 = vadd.f32 %v1546_v26, %v1458_v25  ;;  %1597 = vmatmul.bf16.gmra.mxu0 %v3925_v17 }
 0x1c7   : > { %1686 = vmatmul.bf16.gmra.mxu1 %v3928_v20 }
 0x1c8   : > { %1775 = vmatmul.bf16.gmra.mxu2 %v3930_v21 }
 0x1c9   : > { %1864 = vmatmul.bf16.gmra.mxu3 %v3932_v23  ;;  %v4223_v23 = vperm.slane %v2105_v51, 0 }
 0x1cb   : > { %v1460_v46 = vpop.f32.mrf.mxu2  ;;  %v1284_v2 = vpop.f32.mrf.mxu0 }
 0x1cc   : > { %v1461_v48 = vadd.f32 %v1460_v46, %v1372_v45  ;;  %v1549_v1 = vpop.f32.mrf.mxu3  ;;  %v1373_v3 = vpop.f32.mrf.mxu1  ;;  %v2113_v45 = vadd.f32 %v4223_v23, %v3984_v7 }
 0x1cd   : > { %v1374_v8 = vadd.f32 %v1373_v3, %v1284_v2  ;;  %v4557_v2 = vld [vmem:[#allocation15_spill] sm:$0xff]  ;;  %v4558_v3 = vld [vmem:[#allocation16_spill] sm:$0xff] }
 0x1ce   : > { %v4214_v41 = vadd.f32 %v1549_v1, %v1461_v48  ;;  %v4556_v1 = vld [vmem:[#allocation14_spill] sm:$0xff] }
 0x1d3   : > { %v1462_v13 = vpop.f32.mrf.mxu2  ;;  %v1563_v17 = vpop.f32.mrf.mxu0 }
 0x1d4   : > { %v1463_v15 = vadd.f32 %v1462_v13, %v1374_v8  ;;  %v1551_v38 = vpop.f32.mrf.mxu3  ;;  %v1652_v5 = vpop.f32.mrf.mxu1  ;;  %v2177_v8 = vmax.f32 %v2113_v45, 0.0  ;;  %v4562_v45 = vld [vmem:[#allocation19_spill] sm:$0xff] }
 0x1d5   : > { %v1653_v21 = vadd.f32 %v1652_v5, %v1563_v17 }
 0x1d6   : > { %v4216_v20 = vadd.f32 %v1551_v38, %v1463_v15  ;;  %1602 = vmatmul.bf16.gmra.mxu0 %v3946_v40  ;;  %v2111_v40 = vadd.f32 %v4223_v23, %v3962_v10 }
 0x1d7   : > { %1691 = vmatmul.bf16.gmra.mxu1 %v3948_v42 }
 0x1d8   : > { %1780 = vmatmul.bf16.gmra.mxu2 %v3950_v43  ;;  %v2175_v43 = vmax.f32 %v2111_v40, 0.0 }
 0x1d9   : > { %1869 = vmatmul.bf16.gmra.mxu3 %v3952_v57 }
 0x1db   : > { %v1741_v50 = vpop.f32.mrf.mxu2  ;;  %v1565_v35 = vpop.f32.mrf.mxu0 }
 0x1dc   : > { %v1742_v54 = vadd.f32 %v1741_v50, %v1653_v21  ;;  %v1830_v33 = vpop.f32.mrf.mxu3  ;;  %v1654_v55 = vpop.f32.mrf.mxu1  ;;  %v4559_v21 = vld [vmem:[#allocation17_spill] sm:$0xff] }
 0x1dd   : > { %v1655_v57 = vadd.f32 %v1654_v55, %v1565_v35 }
 0x1de   : > { %v1831_v53 = vadd.f32 %v1830_v33, %v1742_v54 }
 0x1e0   : > { %v2112_v42 = vadd.f32 %v4225_v34, %v1831_v53 }
 0x1e2   : > { %v2176_v59 = vmax.f32 %v2112_v42, 0.0 }
 0x1e3   : > { %v1743_v19 = vpop.f32.mrf.mxu2  ;;  %v1568_v27 = vpop.f32.mrf.mxu0 }
 0x1e4   : > { %v2239_v18 = vpack.c.bf16 %v2176_v59, %v2175_v43  ;;  %v1744_v25 = vadd.f32 %v1743_v19, %v1655_v57  ;;  %v1832_v26 = vpop.f32.mrf.mxu3  ;;  %v1657_v63 = vpop.f32.mrf.mxu1  ;;  %v4560_v19 = vld [vmem:[#allocation22_spill] sm:$0xff] }
 0x1e5   : > { %v1658_v48 = vadd.f32 %v1657_v63, %v1568_v27 }
 0x1e6   : > { %2271 = vst [vmem:[%s4233_s12] sm:$0xff] %v2239_v18  ;;  %v1833_v10 = vadd.f32 %v1832_v26, %v1744_v25  ;;  %1607 = vmatmul.bf16.gmra.mxu0 %v3974_v39  ;;  %v2115_v39 = vadd.f32 %v4223_v23, %v4559_v21  ;;  %v2117_v18 = vadd.f32 %v4223_v23, %v4560_v19  ;;  %v4561_v26 = vld [vmem:[#allocation18_spill] sm:$0xff] }
 0x1e7   : > { %1696 = vmatmul.bf16.gmra.mxu1 %v4556_v1 }
 0x1e8   : > { %v2114_v46 = vadd.f32 %v4225_v34, %v1833_v10  ;;  %1785 = vmatmul.bf16.gmra.mxu2 %v4557_v2  ;;  %v2179_v33 = vmax.f32 %v2115_v39, 0.0  ;;  %v4563_v10 = vld [vmem:[#allocation20_spill] sm:$0xff] }
 0x1e9   : > { %1874 = vmatmul.bf16.gmra.mxu3 %v4558_v3 }
 0x1ea   : > { %v2178_v13 = vmax.f32 %v2114_v46, 0.0  ;;  %v4564_v46 = vld [vmem:[#allocation21_spill] sm:$0xff] }
 0x1eb   : > { %v1746_v7 = vpop.f32.mrf.mxu2  ;;  %v1570_v5 = vpop.f32.mrf.mxu0 }
 0x1ec   : > { %v2240_v15 = vpack.c.bf16 %v2178_v13, %v2177_v8  ;;  %v1747_v38 = vadd.f32 %v1746_v7, %v1658_v48  ;;  %v1835_v17 = vpop.f32.mrf.mxu3  ;;  %v1659_v51 = vpop.f32.mrf.mxu1  ;;  %v2181_v48 = vmax.f32 %v2117_v18, 0.0 }
 0x1ed   : > { %v1660_v55 = vadd.f32 %v1659_v51, %v1570_v5 }
 0x1ee   : > { %2272 = vst [vmem:[%s4233_s12 + $0x8] sm:$0xff] %v2240_v15  ;;  %v1836_v50 = vadd.f32 %v1835_v17, %v1747_v38  ;;  %v4565_v38 = vld [vmem:[#allocation23_spill] sm:$0xff] }
 0x1ef   : > { %v2119_v17 = vadd.f32 %v4223_v23, %v4565_v38 }
 0x1f0   : > { %v2116_v54 = vadd.f32 %v4225_v34, %v1836_v50 }
 0x1f1   : > { %v2183_v21 = vmax.f32 %v2119_v17, 0.0 }
 0x1f2   : > { %v2180_v35 = vmax.f32 %v2116_v54, 0.0 }
 0x1f3   : > { %v1748_v40 = vpop.f32.mrf.mxu2  ;;  %v1573_v59 = vpop.f32.mrf.mxu0 }
 0x1f4   : > { %v2241_v53 = vpack.c.bf16 %v2180_v35, %v2179_v33  ;;  %v1749_v42 = vadd.f32 %v1748_v40, %v1660_v55  ;;  %v1837_v43 = vpop.f32.mrf.mxu3  ;;  %v1662_v57 = vpop.f32.mrf.mxu1 }
 0x1f5   : > { %v1663_v63 = vadd.f32 %v1662_v57, %v1573_v59  ;;  %v4567_v57 = vld [vmem:[#allocation24_spill] sm:$0xff] }
 0x1f6   : > { %2273 = vst [vmem:[%s4233_s12 + $0x10] sm:$0xff] %v2241_v53  ;;  %v1838_v25 = vadd.f32 %v1837_v43, %v1749_v42  ;;  %1612 = vmatmul.bf16.gmra.mxu0 %v4561_v26  ;;  %v4566_v42 = vld [vmem:[#allocation28_spill] sm:$0xff]  ;;  %v4569_v26 = vld [vmem:[#allocation26_spill] sm:$0xff] }
 0x1f7   : > { %1701 = vmatmul.bf16.gmra.mxu1 %v4562_v45  ;;  %v2121_v43 = vadd.f32 %v4223_v23, %v4566_v42 }
 0x1f8   : > { %v2118_v27 = vadd.f32 %v4225_v34, %v1838_v25  ;;  %1790 = vmatmul.bf16.gmra.mxu2 %v4563_v10  ;;  %v4568_v25 = vld [vmem:[#allocation25_spill] sm:$0xff] }
 0x1f9   : > { %1879 = vmatmul.bf16.gmra.mxu3 %v4564_v46 }
 0x1fa   : > { %v2182_v1 = vmax.f32 %v2118_v27, 0.0  ;;  %v4570_v27 = vld [vmem:[#allocation27_spill] sm:$0xff] }
 0x1fb   : > { %v1751_v2 = vpop.f32.mrf.mxu2  ;;  %v1575_v7 = vpop.f32.mrf.mxu0 }
 0x1fc   : > { %v2242_v3 = vpack.c.bf16 %v2182_v1, %v2181_v48  ;;  %v1752_v8 = vadd.f32 %v1751_v2, %v1663_v63  ;;  %v1840_v13 = vpop.f32.mrf.mxu3  ;;  %v1664_v15 = vpop.f32.mrf.mxu1  ;;  %v2185_v63 = vmax.f32 %v2121_v43, 0.0 }
 0x1fd   : > { %v1665_v50 = vadd.f32 %v1664_v15, %v1575_v7 }
 0x1fe   : > { %2274 = vst [vmem:[%s4233_s12 + $0x18] sm:$0xff] %v2242_v3  ;;  %v1841_v5 = vadd.f32 %v1840_v13, %v1752_v8  ;;  %v4571_v8 = vld [vmem:[#allocation29_spill] sm:$0xff] }
 0x1ff   : > { %v2123_v13 = vadd.f32 %v4223_v23, %v4571_v8 }
 0x200   : > { %v2120_v51 = vadd.f32 %v4225_v34, %v1841_v5 }
 0x201   : > { %v2187_v38 = vmax.f32 %v2123_v13, 0.0 }
 0x202   : > { %v2184_v39 = vmax.f32 %v2120_v51, 0.0 }
 0x203   : > { %v1753_v54 = vpop.f32.mrf.mxu2  ;;  %v1578_v40 = vpop.f32.mrf.mxu0 }
 0x204   : > { %v2243_v33 = vpack.c.bf16 %v2184_v39, %v2183_v21  ;;  %v1754_v35 = vadd.f32 %v1753_v54, %v1665_v50  ;;  %v1842_v55 = vpop.f32.mrf.mxu3  ;;  %v1667_v53 = vpop.f32.mrf.mxu1 }
 0x205   : > { %v1668_v18 = vadd.f32 %v1667_v53, %v1578_v40  ;;  %v4573_v53 = vld [vmem:[#allocation30_spill] sm:$0xff] }
 0x206   : > { %2275 = vst [vmem:[%s4233_s12 + $0x20] sm:$0xff] %v2243_v33  ;;  %v1843_v59 = vadd.f32 %v1842_v55, %v1754_v35  ;;  %1617 = vmatmul.bf16.gmra.mxu0 %v4567_v57  ;;  %v4572_v35 = vld [vmem:[#allocation34_spill] sm:$0xff]  ;;  %v4575_v57 = vld [vmem:[#allocation32_spill] sm:$0xff] }
 0x207   : > { %1706 = vmatmul.bf16.gmra.mxu1 %v4568_v25  ;;  %v2125_v55 = vadd.f32 %v4223_v23, %v4572_v35  ;;  %v4578_v35 = vld [vmem:[#allocation36_spill] sm:$0xff] }
 0x208   : > { %v2122_v19 = vadd.f32 %v4225_v34, %v1843_v59  ;;  %1795 = vmatmul.bf16.gmra.mxu2 %v4569_v26  ;;  %v4574_v59 = vld [vmem:[#allocation31_spill] sm:$0xff] }
 0x209   : > { %1884 = vmatmul.bf16.gmra.mxu3 %v4570_v27 }
 0x20a   : > { %v2186_v45 = vmax.f32 %v2122_v19, 0.0  ;;  %v4576_v19 = vld [vmem:[#allocation33_spill] sm:$0xff] }
 0x20b   : > { %v1756_v10 = vpop.f32.mrf.mxu2  ;;  %v1580_v2 = vpop.f32.mrf.mxu0 }
 0x20c   : > { %v2244_v46 = vpack.c.bf16 %v2186_v45, %v2185_v63  ;;  %v1757_v48 = vadd.f32 %v1756_v10, %v1668_v18  ;;  %v1845_v1 = vpop.f32.mrf.mxu3  ;;  %v1669_v3 = vpop.f32.mrf.mxu1  ;;  %v2189_v18 = vmax.f32 %v2125_v55, 0.0 }
 0x20d   : > { %v1670_v5 = vadd.f32 %v1669_v3, %v1580_v2 }
 0x20e   : > { %2276 = vst [vmem:[%s4233_s12 + $0x28] sm:$0xff] %v2244_v46  ;;  %v1846_v7 = vadd.f32 %v1845_v1, %v1757_v48  ;;  %v4577_v48 = vld [vmem:[#allocation35_spill] sm:$0xff] }
 0x20f   : > { %v2127_v1 = vadd.f32 %v4223_v23, %v4577_v48 }
 0x210   : > { %v2124_v15 = vadd.f32 %v4225_v34, %v1846_v7 }
 0x211   : > { %v2191_v8 = vmax.f32 %v2127_v1, 0.0  ;;  %v4580_v1 = vld [vmem:[#allocation42_spill] sm:$0xff] }
 0x212   : > { %v2188_v17 = vmax.f32 %v2124_v15, 0.0 }
 0x213   : > { %v1758_v51 = vpop.f32.mrf.mxu2  ;;  %v1583_v54 = vpop.f32.mrf.mxu0 }
 0x214   : > { %v2245_v21 = vpack.c.bf16 %v2188_v17, %v2187_v38  ;;  %v1759_v39 = vadd.f32 %v1758_v51, %v1670_v5  ;;  %v1847_v50 = vpop.f32.mrf.mxu3  ;;  %v1672_v33 = vpop.f32.mrf.mxu1 }
 0x215   : > { %v1673_v43 = vadd.f32 %v1672_v33, %v1583_v54 }
 0x216   : > { %2277 = vst [vmem:[%s4233_s12 + $0x30] sm:$0xff] %v2245_v21  ;;  %v1848_v40 = vadd.f32 %v1847_v50, %v1759_v39  ;;  %1622 = vmatmul.bf16.gmra.mxu0 %v4573_v53  ;;  %v2129_v39 = vadd.f32 %v4223_v23, %v4096_v62 }
 0x217   : > { %1711 = vmatmul.bf16.gmra.mxu1 %v4574_v59 }
 0x218   : > { %v2126_v42 = vadd.f32 %v4225_v34, %v1848_v40  ;;  %1800 = vmatmul.bf16.gmra.mxu2 %v4575_v57  ;;  %v2193_v55 = vmax.f32 %v2129_v39, 0.0 }
 0x219   : > { %1889 = vmatmul.bf16.gmra.mxu3 %v4576_v19  ;;  %v4579_v19 = vld [vmem:[#allocation37_spill] sm:$0xff] }
 0x21a   : > { %v2190_v25 = vmax.f32 %v2126_v42, 0.0 }
 0x21b   : > { %v1761_v26 = vpop.f32.mrf.mxu2  ;;  %v1585_v10 = vpop.f32.mrf.mxu0 }
 0x21c   : > { %v2246_v27 = vpack.c.bf16 %v2190_v25, %v2189_v18  ;;  %v1762_v63 = vadd.f32 %v1761_v26, %v1673_v43  ;;  %v1850_v45 = vpop.f32.mrf.mxu3  ;;  %v1674_v46 = vpop.f32.mrf.mxu1 }
 0x21d   : > { %v1675_v7 = vadd.f32 %v1674_v46, %v1585_v10 }
 0x21e   : > { %2278 = vst [vmem:[%s4233_s12 + $0x38] sm:$0xff] %v2246_v27  ;;  %v1851_v2 = vadd.f32 %v1850_v45, %v1762_v63 }
 0x220   : > { %v2128_v3 = vadd.f32 %v4225_v34, %v1851_v2  ;;  %v2133_v2 = vadd.f32 %v4223_v23, %v4580_v1 }
 0x222   : > { %v2192_v13 = vmax.f32 %v2128_v3, 0.0 }
 0x223   : > { %v1763_v15 = vpop.f32.mrf.mxu2  ;;  %v1588_v51 = vpop.f32.mrf.mxu0 }
 0x224   : > { %v2247_v38 = vpack.c.bf16 %v2192_v13, %v2191_v8  ;;  %v1764_v17 = vadd.f32 %v1763_v15, %v1675_v7  ;;  %v1852_v5 = vpop.f32.mrf.mxu3  ;;  %v1677_v21 = vpop.f32.mrf.mxu1  ;;  %v4581_v8 = vld [vmem:[#allocation38_spill] sm:$0xff]  ;;  %v4582_v15 = vld [vmem:[#allocation39_spill] sm:$0xff] }
 0x225   : > { %v1678_v33 = vadd.f32 %v1677_v21, %v1588_v51 }
 0x226   : > { %2279 = vst [vmem:[%s4233_s12 + $0x40] sm:$0xff] %v2247_v38  ;;  %v1853_v50 = vadd.f32 %v1852_v5, %v1764_v17  ;;  %1627 = vmatmul.bf16.gmra.mxu0 %v4086_v28  ;;  %v2131_v28 = vadd.f32 %v4223_v23, %v4579_v19  ;;  %v4583_v38 = vld [vmem:[#allocation40_spill] sm:$0xff]  ;;  %v4584_v17 = vld [vmem:[#allocation41_spill] sm:$0xff]  ;;  %v2197_v5 = vmax.f32 %v2133_v2, 0.0 }
 0x227   : > { %1716 = vmatmul.bf16.gmra.mxu1 %v4090_v37 }
 0x228   : > { %v2130_v54 = vadd.f32 %v4225_v34, %v1853_v50  ;;  %1805 = vmatmul.bf16.gmra.mxu2 %v4092_v58  ;;  %v2195_v25 = vmax.f32 %v2131_v28, 0.0 }
 0x229   : > { %1894 = vmatmul.bf16.gmra.mxu3 %v4578_v35 }
 0x22a   : > { %v2194_v40 = vmax.f32 %v2130_v54, 0.0 }
 0x22b   : > { %v1766_v53 = vpop.f32.mrf.mxu2  ;;  %v1590_v59 = vpop.f32.mrf.mxu0 }
 0x22c   : > { %v2248_v42 = vpack.c.bf16 %v2194_v40, %v2193_v55  ;;  %v1767_v43 = vadd.f32 %v1766_v53, %v1678_v33  ;;  %v1855_v62 = vpop.f32.mrf.mxu3  ;;  %v1679_v57 = vpop.f32.mrf.mxu1  ;;  %v2135_v55 = vadd.f32 %v4223_v23, %v4126_v6 }
 0x22d   : > { %v1680_v26 = vadd.f32 %v1679_v57, %v1590_v59 }
 0x22e   : > { %2280 = vst [vmem:[%s4233_s12 + $0x48] sm:$0xff] %v2248_v42  ;;  %v1856_v18 = vadd.f32 %v1855_v62, %v1767_v43  ;;  %v2199_v42 = vmax.f32 %v2135_v55, 0.0 }
 0x230   : > { %v2132_v37 = vadd.f32 %v4225_v34, %v1856_v18 }
 0x232   : > { %v2196_v58 = vmax.f32 %v2132_v37, 0.0 }
 0x233   : > { %v1768_v27 = vpop.f32.mrf.mxu2  ;;  %v1593_v46 = vpop.f32.mrf.mxu0 }
 0x234   : > { %v2249_v63 = vpack.c.bf16 %v2196_v58, %v2195_v25  ;;  %v1769_v45 = vadd.f32 %v1768_v27, %v1680_v26  ;;  %v1857_v10 = vpop.f32.mrf.mxu3  ;;  %v1682_v48 = vpop.f32.mrf.mxu1  ;;  %v2137_v25 = vadd.f32 %v4223_v23, %v4144_v22 }
 0x235   : > { %v1683_v7 = vadd.f32 %v1682_v48, %v1593_v46 }
 0x236   : > { %2281 = vst [vmem:[%s4233_s12 + $0x50] sm:$0xff] %v2249_v63  ;;  %v1858_v3 = vadd.f32 %v1857_v10, %v1769_v45  ;;  %1632 = vmatmul.bf16.gmra.mxu0 %v4581_v8  ;;  %v2201_v27 = vmax.f32 %v2137_v25, 0.0 }
 0x237   : > { %1721 = vmatmul.bf16.gmra.mxu1 %v4582_v15 }
 0x238   : > { %v2134_v13 = vadd.f32 %v4225_v34, %v1858_v3  ;;  %1810 = vmatmul.bf16.gmra.mxu2 %v4583_v38 }
 0x239   : > { %1899 = vmatmul.bf16.gmra.mxu3 %v4584_v17 }
 0x23a   : > { %v2198_v51 = vmax.f32 %v2134_v13, 0.0 }
 0x23b   : > { %v1771_v21 = vpop.f32.mrf.mxu2  ;;  %v1595_v33 = vpop.f32.mrf.mxu0 }
 0x23c   : > { %v2250_v39 = vpack.c.bf16 %v2198_v51, %v2197_v5  ;;  %v1772_v50 = vadd.f32 %v1771_v21, %v1683_v7  ;;  %v1860_v54 = vpop.f32.mrf.mxu3  ;;  %v1684_v35 = vpop.f32.mrf.mxu1  ;;  %v2141_v5 = vadd.f32 %v4223_v23, %v4152_v61 }
 0x23d   : > { %v1685_v62 = vadd.f32 %v1684_v35, %v1595_v33 }
 0x23e   : > { %2282 = vst [vmem:[%s4233_s12 + $0x58] sm:$0xff] %v2250_v39  ;;  %v1861_v40 = vadd.f32 %v1860_v54, %v1772_v50  ;;  %v2205_v39 = vmax.f32 %v2141_v5, 0.0  ;;  %v2149_v5 = vadd.f32 %v4223_v23, %v4168_v12 }
 0x240   : > { %v2136_v53 = vadd.f32 %v4225_v34, %v1861_v40 }
 0x242   : > { %v2200_v43 = vmax.f32 %v2136_v53, 0.0 }
 0x243   : > { %v1773_v59 = vpop.f32.mrf.mxu2  ;;  %v1598_v18 = vpop.f32.mrf.mxu0 }
 0x244   : > { %v2251_v57 = vpack.c.bf16 %v2200_v43, %v2199_v42  ;;  %v1774_v19 = vadd.f32 %v1773_v59, %v1685_v62  ;;  %v1862_v28 = vpop.f32.mrf.mxu3  ;;  %v1687_v37 = vpop.f32.mrf.mxu1  ;;  %v2143_v42 = vadd.f32 %v4223_v23, %v4158_v29 }
 0x245   : > { %v1688_v26 = vadd.f32 %v1687_v37, %v1598_v18 }
 0x246   : > { %2283 = vst [vmem:[%s4233_s12 + $0x60] sm:$0xff] %v2251_v57  ;;  %v1863_v58 = vadd.f32 %v1862_v28, %v1774_v19  ;;  %1637 = vmatmul.bf16.gmra.mxu0 %v4136_v30  ;;  %v2139_v30 = vadd.f32 %v4223_v23, %v4150_v36  ;;  %v2207_v62 = vmax.f32 %v2143_v42, 0.0 }
 0x247   : > { %1726 = vmatmul.bf16.gmra.mxu1 %v4138_v60 }
 0x248   : > { %v2138_v6 = vadd.f32 %v4225_v34, %v1863_v58  ;;  %1815 = vmatmul.bf16.gmra.mxu2 %v4140_v56  ;;  %v2203_v3 = vmax.f32 %v2139_v30, 0.0 }
 0x249   : > { %1904 = vmatmul.bf16.gmra.mxu3 %v4142_v11 }
 0x24a   : > { %v2202_v63 = vmax.f32 %v2138_v6, 0.0  ;;  %v2145_v6 = vadd.f32 %v4223_v23, %v4160_v47 }
 0x24b   : > { %v1776_v45 = vpop.f32.mrf.mxu2  ;;  %v1600_v48 = vpop.f32.mrf.mxu0 }
 0x24c   : > { %v2252_v10 = vpack.c.bf16 %v2202_v63, %v2201_v27  ;;  %v1777_v46 = vadd.f32 %v1776_v45, %v1688_v26  ;;  %v1865_v22 = vpop.f32.mrf.mxu3  ;;  %v1689_v1 = vpop.f32.mrf.mxu1  ;;  %v2209_v63 = vmax.f32 %v2145_v6, 0.0 }
 0x24d   : > { %v1690_v8 = vadd.f32 %v1689_v1, %v1600_v48 }
 0x24e   : > { %2284 = vst [vmem:[%s4233_s12 + $0x68] sm:$0xff] %v2252_v10  ;;  %v1866_v2 = vadd.f32 %v1865_v22, %v1777_v46 }
 0x250   : > { %v2140_v60 = vadd.f32 %v4225_v34, %v1866_v2  ;;  %v2147_v2 = vadd.f32 %v4223_v23, %v4166_v9 }
 0x252   : > { %v2204_v56 = vmax.f32 %v2140_v60, 0.0 }
 0x253   : > { %v1778_v11 = vpop.f32.mrf.mxu2  ;;  %v1603_v38 = vpop.f32.mrf.mxu0 }
 0x254   : > { %v2253_v13 = vpack.c.bf16 %v2204_v56, %v2203_v3  ;;  %v1779_v7 = vadd.f32 %v1778_v11, %v1690_v8  ;;  %v1867_v15 = vpop.f32.mrf.mxu3  ;;  %v1692_v17 = vpop.f32.mrf.mxu1  ;;  %v2211_v3 = vmax.f32 %v2147_v2, 0.0 }
 0x255   : > { %v1693_v21 = vadd.f32 %v1692_v17, %v1603_v38 }
 0x256   : > { %2285 = vst [vmem:[%s4233_s12 + $0x70] sm:$0xff] %v2253_v13  ;;  %v1868_v51 = vadd.f32 %v1867_v15, %v1779_v7 }
 0x258   : > { %v2142_v36 = vadd.f32 %v4225_v34, %v1868_v51 }
 0x25a   : > { %v2206_v50 = vmax.f32 %v2142_v36, 0.0 }
 0x25b   : > { %v1781_v54 = vpop.f32.mrf.mxu2  ;;  %v1605_v40 = vpop.f32.mrf.mxu0 }
 0x25c   : > { %v2254_v33 = vpack.c.bf16 %v2206_v50, %v2205_v39  ;;  %v1782_v35 = vadd.f32 %v1781_v54, %v1693_v21  ;;  %v1870_v55 = vpop.f32.mrf.mxu3  ;;  %v1694_v53 = vpop.f32.mrf.mxu1  ;;  %v2213_v21 = vmax.f32 %v2149_v5, 0.0 }
 0x25d   : > { %v1695_v57 = vadd.f32 %v1694_v53, %v1605_v40  ;;  %v2151_v53 = vadd.f32 %v4223_v23, %v4174_v52 }
 0x25e   : > { %2286 = vst [vmem:[%s4233_s12 + $0x78] sm:$0xff] %v2254_v33  ;;  %v1871_v43 = vadd.f32 %v1870_v55, %v1782_v35 }
 0x260   : > { %v2144_v61 = vadd.f32 %v4225_v34, %v1871_v43  ;;  %v2215_v43 = vmax.f32 %v2151_v53, 0.0 }
 0x262   : > { %v2208_v59 = vmax.f32 %v2144_v61, 0.0 }
 0x263   : > { %v1783_v19 = vpop.f32.mrf.mxu2  ;;  %v1608_v25 = vpop.f32.mrf.mxu0 }
 0x264   : > { %v2255_v28 = vpack.c.bf16 %v2208_v59, %v2207_v62  ;;  %v1784_v18 = vadd.f32 %v1783_v19, %v1695_v57  ;;  %v1872_v37 = vpop.f32.mrf.mxu3  ;;  %v1697_v58 = vpop.f32.mrf.mxu1 }
 0x265   : > { %v1698_v27 = vadd.f32 %v1697_v58, %v1608_v25  ;;  %v2153_v25 = vadd.f32 %v4223_v23, %v4176_v24 }
 0x266   : > { %2287 = vst [vmem:[%s4233_s12 + $0x80] sm:$0xff] %v2255_v28  ;;  %v1873_v26 = vadd.f32 %v1872_v37, %v1784_v18 }
 0x268   : > { %v2146_v29 = vadd.f32 %v4225_v34, %v1873_v26  ;;  %v2217_v26 = vmax.f32 %v2153_v25, 0.0 }
 0x26a   : > { %v2210_v45 = vmax.f32 %v2146_v29, 0.0 }
 0x26b   : > { %v1786_v10 = vpop.f32.mrf.mxu2  ;;  %v1610_v1 = vpop.f32.mrf.mxu0 }
 0x26c   : > { %v2256_v46 = vpack.c.bf16 %v2210_v45, %v2209_v63  ;;  %v1787_v22 = vadd.f32 %v1786_v10, %v1698_v27  ;;  %v1875_v48 = vpop.f32.mrf.mxu3  ;;  %v1699_v30 = vpop.f32.mrf.mxu1 }
 0x26d   : > { %v1700_v8 = vadd.f32 %v1699_v30, %v1610_v1 }
 0x26e   : > { %2288 = vst [vmem:[%s4233_s12 + $0x88] sm:$0xff] %v2256_v46  ;;  %v1876_v60 = vadd.f32 %v1875_v48, %v1787_v22  ;;  %v2155_v48 = vadd.f32 %v4223_v23, %v4182_v16 }
 0x270   : > { %v2148_v47 = vadd.f32 %v4225_v34, %v1876_v60  ;;  %v2219_v30 = vmax.f32 %v2155_v48, 0.0 }
 0x272   : > { %v2212_v56 = vmax.f32 %v2148_v47, 0.0 }
 0x273   : > { %v1788_v11 = vpop.f32.mrf.mxu2  ;;  %v1613_v38 = vpop.f32.mrf.mxu0 }
 0x274   : > { %v2257_v13 = vpack.c.bf16 %v2212_v56, %v2211_v3  ;;  %v1789_v7 = vadd.f32 %v1788_v11, %v1700_v8  ;;  %v1877_v15 = vpop.f32.mrf.mxu3  ;;  %v1702_v17 = vpop.f32.mrf.mxu1 }
 0x275   : > { %v1703_v36 = vadd.f32 %v1702_v17, %v1613_v38 }
 0x276   : > { %2289 = vst [vmem:[%s4233_s12 + $0x90] sm:$0xff] %v2257_v13  ;;  %v1878_v51 = vadd.f32 %v1877_v15, %v1789_v7  ;;  %v2157_v7 = vadd.f32 %v4223_v23, %v4184_v49 }
 0x278   : > { %v2150_v9 = vadd.f32 %v4225_v34, %v1878_v51  ;;  %v2221_v17 = vmax.f32 %v2157_v7, 0.0 }
 0x27a   : > { %v2214_v39 = vmax.f32 %v2150_v9, 0.0 }
 0x27b   : > { %v1791_v50 = vpop.f32.mrf.mxu2  ;;  %v1615_v55 = vpop.f32.mrf.mxu0 }
 0x27c   : > { %v2258_v54 = vpack.c.bf16 %v2214_v39, %v2213_v21  ;;  %v1792_v33 = vadd.f32 %v1791_v50, %v1703_v36  ;;  %v1880_v35 = vpop.f32.mrf.mxu3  ;;  %v1704_v40 = vpop.f32.mrf.mxu1 }
 0x27d   : > { %v1705_v62 = vadd.f32 %v1704_v40, %v1615_v55 }
 0x27e   : > { %2290 = vst [vmem:[%s4233_s12 + $0x98] sm:$0xff] %v2258_v54  ;;  %v1881_v42 = vadd.f32 %v1880_v35, %v1792_v33  ;;  %v2159_v54 = vadd.f32 %v4223_v23, %v4190_v31 }
 0x280   : > { %v2152_v12 = vadd.f32 %v4225_v34, %v1881_v42  ;;  %v2223_v35 = vmax.f32 %v2159_v54, 0.0 }
 0x282   : > { %v2216_v61 = vmax.f32 %v2152_v12, 0.0 }
 0x283   : > { %v1793_v59 = vpop.f32.mrf.mxu2  ;;  %v1618_v18 = vpop.f32.mrf.mxu0 }
 0x284   : > { %v2259_v57 = vpack.c.bf16 %v2216_v61, %v2215_v43  ;;  %v1794_v19 = vadd.f32 %v1793_v59, %v1705_v62  ;;  %v1882_v28 = vpop.f32.mrf.mxu3  ;;  %v1707_v37 = vpop.f32.mrf.mxu1  ;;  %v2161_v59 = vadd.f32 %v4223_v23, %v4192_v0 }
 0x285   : > { %v1708_v6 = vadd.f32 %v1707_v37, %v1618_v18 }
 0x286   : > { %2291 = vst [vmem:[%s4233_s12 + $0xa0] sm:$0xff] %v2259_v57  ;;  %v1883_v58 = vadd.f32 %v1882_v28, %v1794_v19  ;;  %v2225_v28 = vmax.f32 %v2161_v59, 0.0 }
 0x288   : > { %v2154_v52 = vadd.f32 %v4225_v34, %v1883_v58 }
 0x28a   : > { %v2218_v29 = vmax.f32 %v2154_v52, 0.0 }
 0x28b   : > { %v1796_v27 = vpop.f32.mrf.mxu2  ;;  %v1620_v46 = vpop.f32.mrf.mxu0 }
 0x28c   : > { %v2260_v63 = vpack.c.bf16 %v2218_v29, %v2217_v26  ;;  %v1797_v45 = vadd.f32 %v1796_v27, %v1708_v6  ;;  %v1885_v10 = vpop.f32.mrf.mxu3  ;;  %v1709_v22 = vpop.f32.mrf.mxu1  ;;  %v2163_v29 = vadd.f32 %v4223_v23, %v4198_v14 }
 0x28d   : > { %v1710_v60 = vadd.f32 %v1709_v22, %v1620_v46 }
 0x28e   : > { %2292 = vst [vmem:[%s4233_s12 + $0xa8] sm:$0xff] %v2260_v63  ;;  %v1886_v1 = vadd.f32 %v1885_v10, %v1797_v45  ;;  %v2227_v63 = vmax.f32 %v2163_v29, 0.0 }
 0x290   : > { %v2156_v24 = vadd.f32 %v4225_v34, %v1886_v1 }
 0x292   : > { %v2220_v2 = vmax.f32 %v2156_v24, 0.0 }
 0x293   : > { %v1798_v47 = vpop.f32.mrf.mxu2  ;;  %v1623_v11 = vpop.f32.mrf.mxu0 }
 0x294   : > { %v2261_v3 = vpack.c.bf16 %v2220_v2, %v2219_v30  ;;  %v1799_v56 = vadd.f32 %v1798_v47, %v1710_v60  ;;  %v1887_v8 = vpop.f32.mrf.mxu3  ;;  %v1712_v13 = vpop.f32.mrf.mxu1  ;;  %v2165_v2 = vadd.f32 %v4223_v23, %v4200_v32 }
 0x295   : > { %v1713_v38 = vadd.f32 %v1712_v13, %v1623_v11 }
 0x296   : > { %2293 = vst [vmem:[%s4233_s12 + $0xb0] sm:$0xff] %v2261_v3  ;;  %v1888_v15 = vadd.f32 %v1887_v8, %v1799_v56  ;;  %v2229_v3 = vmax.f32 %v2165_v2, 0.0  ;;  %v2430_v2 = vld [vmem:[%s4233_s12 + $0x60] sm:$0xff] (%p3610_p12) }
 0x297   : > { %2431 = vst [vmem:[%s4395_s24 + $0xc0] sm:$0xff] (%p3610_p12), %v2430_v2 }
 0x298   : > { %v2158_v16 = vadd.f32 %v4225_v34, %v1888_v15 }
 0x29a   : > { %v2222_v5 = vmax.f32 %v2158_v16, 0.0 }
 0x29b   : > { %v1801_v51 = vpop.f32.mrf.mxu2  ;;  %v1625_v39 = vpop.f32.mrf.mxu0 }
 0x29c   : > { %v2262_v9 = vpack.c.bf16 %v2222_v5, %v2221_v17  ;;  %v1802_v36 = vadd.f32 %v1801_v51, %v1713_v38  ;;  %v1890_v21 = vpop.f32.mrf.mxu3  ;;  %v1714_v50 = vpop.f32.mrf.mxu1  ;;  %v2167_v38 = vadd.f32 %v4223_v23, %v4206_v4 }
 0x29d   : > { %v1715_v40 = vadd.f32 %v1714_v50, %v1625_v39 }
 0x29e   : > { %2294 = vst [vmem:[%s4233_s12 + $0xb8] sm:$0xff] %v2262_v9  ;;  %v1891_v33 = vadd.f32 %v1890_v21, %v1802_v36  ;;  %v2231_v5 = vmax.f32 %v2167_v38, 0.0 }
 0x2a0   : > { %v2160_v49 = vadd.f32 %v4225_v34, %v1891_v33 }
 0x2a2   : > { %v2224_v55 = vmax.f32 %v2160_v49, 0.0  ;;  %v2169_v49 = vadd.f32 %v4223_v23, %v4208_v44 }
 0x2a3   : > { %v1803_v53 = vpop.f32.mrf.mxu2  ;;  %v1628_v61 = vpop.f32.mrf.mxu0 }
 0x2a4   : > { %v2263_v42 = vpack.c.bf16 %v2224_v55, %v2223_v35  ;;  %v1804_v12 = vadd.f32 %v1803_v53, %v1715_v40  ;;  %v1892_v43 = vpop.f32.mrf.mxu3  ;;  %v1717_v62 = vpop.f32.mrf.mxu1  ;;  %v2233_v40 = vmax.f32 %v2169_v49, 0.0 }
 0x2a5   : > { %v1718_v19 = vadd.f32 %v1717_v62, %v1628_v61  ;;  %v2171_v62 = vadd.f32 %v4223_v23, %v4214_v41 }
 0x2a6   : > { %2295 = vst [vmem:[%s4233_s12 + $0xc0] sm:$0xff] %v2263_v42  ;;  %v1893_v57 = vadd.f32 %v1892_v43, %v1804_v12 }
 0x2a8   : > { %v2162_v31 = vadd.f32 %v4225_v34, %v1893_v57 }
 0x2aa   : > { %v2226_v18 = vmax.f32 %v2162_v31, 0.0 }
 0x2ab   : > { %v1806_v37 = vpop.f32.mrf.mxu2  ;;  %v1630_v6 = vpop.f32.mrf.mxu0 }
 0x2ac   : > { %v2264_v25 = vpack.c.bf16 %v2226_v18, %v2225_v28  ;;  %v1807_v58 = vadd.f32 %v1806_v37, %v1718_v19  ;;  %v1895_v52 = vpop.f32.mrf.mxu3  ;;  %v1719_v26 = vpop.f32.mrf.mxu1  ;;  %v2235_v19 = vmax.f32 %v2171_v62, 0.0 }
 0x2ad   : > { %v1720_v10 = vadd.f32 %v1719_v26, %v1630_v6  ;;  %v2173_v6 = vadd.f32 %v4223_v23, %v4216_v20  ;;  %v2406_v20 = vld [vmem:[%s4233_s12] sm:$0xff] (%p3610_p12)  ;;  %v2408_v23 = vld [vmem:[%s4233_s12 + $0x8] sm:$0xff] (%p3610_p12) }
 0x2ae   : > { %2296 = vst [vmem:[%s4233_s12 + $0xc8] sm:$0xff] %v2264_v25  ;;  %v1896_v27 = vadd.f32 %v1895_v52, %v1807_v58  ;;  %v2454_v38 = vld [vmem:[%s4233_s12 + $0xc0] sm:$0xff] (%p3610_p12) }
 0x2af   : > { %v2237_v29 = vmax.f32 %v2173_v6, 0.0  ;;  %2407 = vst [vmem:[%s4395_s24] sm:$0xff] (%p3610_p12), %v2406_v20 }
 0x2b0   : > { %v2164_v0 = vadd.f32 %v4225_v34, %v1896_v27  ;;  %2409 = vst [vmem:[%s4395_s24 + $0x10] sm:$0xff] (%p3610_p12), %v2408_v23 }
 0x2b1   : > { %2455 = vst [vmem:[%s4395_s24 + $0x180] sm:$0xff] (%p3610_p12), %v2454_v38 }
 0x2b2   : > { %v2228_v45 = vmax.f32 %v2164_v0, 0.0 }
 0x2b3   : > { %v1808_v46 = vpop.f32.mrf.mxu2  ;;  %v1633_v24 = vpop.f32.mrf.mxu0 }
 0x2b4   : > { %v2265_v22 = vpack.c.bf16 %v2228_v45, %v2227_v63  ;;  %v1809_v48 = vadd.f32 %v1808_v46, %v1720_v10  ;;  %v1897_v1 = vpop.f32.mrf.mxu3  ;;  %v1722_v30 = vpop.f32.mrf.mxu1  ;;  %v2412_v63 = vld [vmem:[%s4233_s12 + $0x18] sm:$0xff] (%p3610_p12)  ;;  %v2414_v45 = vld [vmem:[%s4233_s12 + $0x20] sm:$0xff] (%p3610_p12)  ;;  %v2416_v10 = vld [vmem:[%s4233_s12 + $0x28] sm:$0xff] (%p3610_p12) }
 0x2b5   : > { %v1723_v47 = vadd.f32 %v1722_v30, %v1633_v24  ;;  %2413 = vst [vmem:[%s4395_s24 + $0x30] sm:$0xff] (%p3610_p12), %v2412_v63  ;;  %v2418_v46 = vld [vmem:[%s4233_s12 + $0x30] sm:$0xff] (%p3610_p12)  ;;  %v2428_v30 = vld [vmem:[%s4233_s12 + $0x58] sm:$0xff] (%p3610_p12) }
 0x2b6   : > { %2297 = vst [vmem:[%s4233_s12 + $0xd0] sm:$0xff] %v2265_v22  ;;  %v1898_v60 = vadd.f32 %v1897_v1, %v1809_v48  ;;  %v2420_v22 = vld [vmem:[%s4233_s12 + $0x38] sm:$0xff] (%p3610_p12)  ;;  %v2422_v48 = vld [vmem:[%s4233_s12 + $0x40] sm:$0xff] (%p3610_p12)  ;;  %v2424_v1 = vld [vmem:[%s4233_s12 + $0x48] sm:$0xff] (%p3610_p12) }
 0x2b7   : > { %2415 = vst [vmem:[%s4395_s24 + $0x40] sm:$0xff] (%p3610_p12), %v2414_v45  ;;  %v2426_v24 = vld [vmem:[%s4233_s12 + $0x50] sm:$0xff] (%p3610_p12) }
 0x2b8   : > { %v2166_v14 = vadd.f32 %v4225_v34, %v1898_v60  ;;  %2417 = vst [vmem:[%s4395_s24 + $0x50] sm:$0xff] (%p3610_p12), %v2416_v10  ;;  %v2432_v60 = vld [vmem:[%s4233_s12 + $0x68] sm:$0xff] (%p3610_p12) }
 0x2b9   : > { %2419 = vst [vmem:[%s4395_s24 + $0x60] sm:$0xff] (%p3610_p12), %v2418_v46 }
 0x2ba   : > { %v2230_v56 = vmax.f32 %v2166_v14, 0.0  ;;  %2421 = vst [vmem:[%s4395_s24 + $0x70] sm:$0xff] (%p3610_p12), %v2420_v22  ;;  %v2434_v14 = vld [vmem:[%s4233_s12 + $0x70] sm:$0xff] (%p3610_p12) }
 0x2bb   : > { %v1811_v8 = vpop.f32.mrf.mxu2  ;;  %v1635_v15 = vpop.f32.mrf.mxu0  ;;  %2423 = vst [vmem:[%s4395_s24 + $0x80] sm:$0xff] (%p3610_p12), %v2422_v48 }
 0x2bc   : > { %v2266_v11 = vpack.c.bf16 %v2230_v56, %v2229_v3  ;;  %v1812_v13 = vadd.f32 %v1811_v8, %v1723_v47  ;;  %v1900_v7 = vpop.f32.mrf.mxu3  ;;  %v1724_v16 = vpop.f32.mrf.mxu1  ;;  %2425 = vst [vmem:[%s4395_s24 + $0x90] sm:$0xff] (%p3610_p12), %v2424_v1  ;;  %v2436_v47 = vld [vmem:[%s4233_s12 + $0x78] sm:$0xff] (%p3610_p12)  ;;  %v2438_v3 = vld [vmem:[%s4233_s12 + $0x80] sm:$0xff] (%p3610_p12)  ;;  %v2440_v56 = vld [vmem:[%s4233_s12 + $0x88] sm:$0xff] (%p3610_p12) }
 0x2bd   : > { %v1725_v9 = vadd.f32 %v1724_v16, %v1635_v15  ;;  %2427 = vst [vmem:[%s4395_s24 + $0xa0] sm:$0xff] (%p3610_p12), %v2426_v24  ;;  %v2442_v8 = vld [vmem:[%s4233_s12 + $0x90] sm:$0xff] (%p3610_p12)  ;;  %v2452_v16 = vld [vmem:[%s4233_s12 + $0xb8] sm:$0xff] (%p3610_p12) }
 0x2be   : > { %2298 = vst [vmem:[%s4233_s12 + $0xd8] sm:$0xff] %v2266_v11  ;;  %v1901_v17 = vadd.f32 %v1900_v7, %v1812_v13  ;;  %v2444_v11 = vld [vmem:[%s4233_s12 + $0x98] sm:$0xff] (%p3610_p12)  ;;  %v2446_v13 = vld [vmem:[%s4233_s12 + $0xa0] sm:$0xff] (%p3610_p12)  ;;  %v2448_v7 = vld [vmem:[%s4233_s12 + $0xa8] sm:$0xff] (%p3610_p12) }
 0x2bf   : > { %2429 = vst [vmem:[%s4395_s24 + $0xb0] sm:$0xff] (%p3610_p12), %v2428_v30  ;;  %v2450_v15 = vld [vmem:[%s4233_s12 + $0xb0] sm:$0xff] (%p3610_p12) }
 0x2c0   : > { %v2168_v32 = vadd.f32 %v4225_v34, %v1901_v17  ;;  %2433 = vst [vmem:[%s4395_s24 + $0xd0] sm:$0xff] (%p3610_p12), %v2432_v60  ;;  %v2456_v17 = vld [vmem:[%s4233_s12 + $0xc8] sm:$0xff] (%p3610_p12) }
 0x2c1   : > { %2435 = vst [vmem:[%s4395_s24 + $0xe0] sm:$0xff] (%p3610_p12), %v2434_v14 }
 0x2c2   : > { %v2232_v51 = vmax.f32 %v2168_v32, 0.0  ;;  %2437 = vst [vmem:[%s4395_s24 + $0xf0] sm:$0xff] (%p3610_p12), %v2436_v47  ;;  %v2458_v32 = vld [vmem:[%s4233_s12 + $0xd0] sm:$0xff] (%p3610_p12) }
 0x2c3   : > { %v1813_v36 = vpop.f32.mrf.mxu2  ;;  %v1638_v54 = vpop.f32.mrf.mxu0  ;;  %2439 = vst [vmem:[%s4395_s24 + $0x100] sm:$0xff] (%p3610_p12), %v2438_v3 }
 0x2c4   : > { %v2267_v21 = vpack.c.bf16 %v2232_v51, %v2231_v5  ;;  %v1814_v39 = vadd.f32 %v1813_v36, %v1725_v9  ;;  %v1902_v50 = vpop.f32.mrf.mxu3  ;;  %v1727_v33 = vpop.f32.mrf.mxu1  ;;  %2441 = vst [vmem:[%s4395_s24 + $0x110] sm:$0xff] (%p3610_p12), %v2440_v56 }
 0x2c5   : > { %v1728_v55 = vadd.f32 %v1727_v33, %v1638_v54  ;;  %2443 = vst [vmem:[%s4395_s24 + $0x120] sm:$0xff] (%p3610_p12), %v2442_v8  ;;  %v2460_v5 = vld [vmem:[%s4233_s12 + $0xd8] sm:$0xff] (%p3610_p12) }
 0x2c6   : > { %2299 = vst [vmem:[%s4233_s12 + $0xe0] sm:$0xff] %v2267_v21  ;;  %v1903_v35 = vadd.f32 %v1902_v50, %v1814_v39 }
 0x2c7   : > { %2445 = vst [vmem:[%s4395_s24 + $0x130] sm:$0xff] (%p3610_p12), %v2444_v11 }
 0x2c8   : > { %v2170_v4 = vadd.f32 %v4225_v34, %v1903_v35  ;;  %2447 = vst [vmem:[%s4395_s24 + $0x140] sm:$0xff] (%p3610_p12), %v2446_v13 }
 0x2c9   : > { %2449 = vst [vmem:[%s4395_s24 + $0x150] sm:$0xff] (%p3610_p12), %v2448_v7 }
 0x2ca   : > { %v2234_v53 = vmax.f32 %v2170_v4, 0.0  ;;  %2451 = vst [vmem:[%s4395_s24 + $0x160] sm:$0xff] (%p3610_p12), %v2450_v15 }
 0x2cb   : > { %v1816_v42 = vpop.f32.mrf.mxu2  ;;  %v1640_v57 = vpop.f32.mrf.mxu0  ;;  %2453 = vst [vmem:[%s4395_s24 + $0x170] sm:$0xff] (%p3610_p12), %v2452_v16 }
 0x2cc   : > { %v2268_v12 = vpack.c.bf16 %v2234_v53, %v2233_v40  ;;  %v1817_v43 = vadd.f32 %v1816_v42, %v1728_v55  ;;  %v1905_v61 = vpop.f32.mrf.mxu3  ;;  %v1729_v31 = vpop.f32.mrf.mxu1  ;;  %2457 = vst [vmem:[%s4395_s24 + $0x190] sm:$0xff] (%p3610_p12), %v2456_v17 }
 0x2cd   : > { %v1730_v18 = vadd.f32 %v1729_v31, %v1640_v57  ;;  %v2462_v51 = vld [vmem:[%s4233_s12 + $0xe0] sm:$0xff] (%p3610_p12)  ;;  %2459 = vst [vmem:[%s4395_s24 + $0x1a0] sm:$0xff] (%p3610_p12), %v2458_v32 }
 0x2ce   : > { %2300 = vst [vmem:[%s4233_s12 + $0xe8] sm:$0xff] %v2268_v12  ;;  %v1906_v59 = vadd.f32 %v1905_v61, %v1817_v43 }
 0x2cf   : > { %2461 = vst [vmem:[%s4395_s24 + $0x1b0] sm:$0xff] (%p3610_p12), %v2460_v5 }
 0x2d0   : > { %v2172_v44 = vadd.f32 %v4225_v34, %v1906_v59  ;;  %2463 = vst [vmem:[%s4395_s24 + $0x1c0] sm:$0xff] (%p3610_p12), %v2462_v51 }
 0x2d2   : > { %v2236_v28 = vmax.f32 %v2172_v44, 0.0 }
 0x2d3   : > { %v1818_v37 = vpop.f32.mrf.mxu2 }
 0x2d4   : > { %v2269_v25 = vpack.c.bf16 %v2236_v28, %v2235_v19  ;;  %v1819_v58 = vadd.f32 %v1818_v37, %v1730_v18  ;;  %v1907_v52 = vpop.f32.mrf.mxu3 }
 0x2d5   : > { %v2464_v9 = vld [vmem:[%s4233_s12 + $0xe8] sm:$0xff] (%p3610_p12) }
 0x2d6   : > { %2301 = vst [vmem:[%s4233_s12 + $0xf0] sm:$0xff] %v2269_v25  ;;  %v1908_v26 = vadd.f32 %v1907_v52, %v1819_v58 }
 0x2d7   : > { %2465 = vst [vmem:[%s4395_s24 + $0x1d0] sm:$0xff] (%p3610_p12), %v2464_v9 }
 0x2d8   : > { %v2174_v41 = vadd.f32 %v4225_v34, %v1908_v26  ;;  %v2410_v34 = vld [vmem:[%s4233_s12 + $0x10] sm:$0xff] (%p3610_p12) }
 0x2d9   : > { %2411 = vst [vmem:[%s4395_s24 + $0x20] sm:$0xff] (%p3610_p12), %v2410_v34 }
 0x2da   : > { %v2238_v27 = vmax.f32 %v2174_v41, 0.0  ;;  %2309 = sbr.rel (!%p3610_p12) target bundleno = 743 (0x2e7), region = 52 }
 0x2dc   : > { %v2270_v0 = vpack.c.bf16 %v2238_v27, %v2237_v29 }
 0x2dd   : > { %v2466_v36 = vld [vmem:[%s4233_s12 + $0xf0] sm:$0xff] (%p3610_p12) }
 0x2de   : > { %2302 = vst [vmem:[%s4233_s12 + $0xf8] sm:$0xff] %v2270_v0 }
 0x2df   : > { %2467 = vst [vmem:[%s4395_s24 + $0x1e0] sm:$0xff] %v2466_v36 }
 0x2e5   : > { %v2468_v21 = vld [vmem:[%s4233_s12 + $0xf8] sm:$0xff] }
 0x2e6   : > { %2469 = vst [vmem:[%s4395_s24 + $0x1f0] sm:$0xff] %v2468_v21 }
 0x2e7 PF: > { %s19_s21 = sadd.s32 1, %s3503_s21   ;;  %s4585_s17 = sld [smem:[#allocation13_spill]] }
 0x2e8   : > { %p16_p5 = scmp.ge.s32.totalorder %s19_s21, 6   ;;  %s4586_s18 = sld [smem:[#allocation10_spill]] }
 0x2e9   : > { %s4587_s26 = sld [smem:[#allocation11_spill]]  ;;  %s4589_s12 = smov %s3471_s13 }
 0x2ea   : > { %s4588_s20 = sld [smem:[#allocation12_spill]]  ;;  %s4590_s13 = smov %s3608_s6 }
 0x2eb   : > { %s4591_s14 = smov %s3479_s15  ;;  %s4592_s15 = smov %s3483_s16 }
 0x2ec   :  { %18 = sbr.rel (!%p16_p5) target bundleno = 10 (0xa), region = 134 }
 0x2ed   : > { %s4593_s16 = smov %s4585_s17  ;;  %s4594_s17 = smov %s3495_s19 }
 0x2ef   : > { %s4595_s19 = smov %s4587_s26 }
 0x2f1   :  { %2485 = vsyncpa [#allocation4], 1 }
 0x2f2   :  { %2487 = vsyncpa [#allocation4 + $0x1], 1 }
 0x2f3   :  { %2488 = vsyncpa [#allocation6], 1 }
 0x2f4   :  { %2490 = vsyncpa [#allocation6 + $0x1], 1 }

// kernel: affine_coupling_forward.5
= control target key start
LH: loop header
LB: loop body
LE: loop exit
PB: predicated region body
PF: predicated region fallthrough
CT: control target
= control target key end

     0   :  { %s6789_s0 = inlined_call_operand.vmem [shape: bf16[512,4608], index: 0, kind: input, shape index: {}]   ;;  %s6790_s1 = inlined_call_operand.vmem [shape: bf16[4608,2], index: 1, kind: input, shape index: {}]   ;;  %s6791_s2 = inlined_call_operand.vmem [shape: bf16[4608,2], index: 2, kind: input, shape index: {}]   ;;  %s6792_s3 = inlined_call_operand.vmem [shape: f32[1,2], index: 3, kind: input, shape index: {}]   ;;  %s6793_s4 = inlined_call_operand.vmem [shape: f32[1,2], index: 4, kind: input, shape index: {}]   ;;  %s6794_s5 = inlined_call_operand.vmem [shape: f32[1,2], index: 5, kind: input, shape index: {}]   ;;  %s6795_s6 = inlined_call_operand.vmem [shape: f32[1,2], index: 6, kind: input, shape index: {}]   ;;  %s6796_s7 = inlined_call_operand.vmem [shape: f32[512,2], index: 7, kind: input, shape index: {}]   ;;  %s6797_s8 = inlined_call_operand.vmem [shape: f32[512,2], index: 8, kind: output, shape index: {0}]   ;;  %s6798_s9 = inlined_call_operand.vmem [shape: f32[512,1], index: 9, kind: output, shape index: {1}]  }
   0x1   :  { %6820 = sst [smem:[#allocation26_spill]] %s6789_s0 }
   0x2   :  { %6821 = sst [smem:[#allocation27_spill]] %s6790_s1 }
   0x3   :  { %s4801_s30 = smov 0   ;;  %s4803_s10 = smov 0  }
   0x4   :  { %s4805_s11 = smov 0   ;;  %s4807_s12 = smov 0  }
   0x5   :  { %s4809_s13 = smov 0   ;;  %s4811_s14 = smov 0  }
   0x6   :  { %s4813_s15 = smov 0  }
   0x7 LB: > { %s29_s16 = sadd.s32 1, %s4740_s13  ;;  %s32_s17 = sadd.s32 1, %s4744_s14  ;;  %s4748_s15 = sphi %s4813_s15, %s20_s15   ;;  %s4744_s14 = sphi %s4811_s14, %s6981_s14   ;;  %s4740_s13 = sphi %s4809_s13, %s6980_s13   ;;  %s4736_s12 = sphi %s4807_s12, %s6979_s12   ;;  %s4732_s11 = sphi %s4805_s11, %s6978_s11   ;;  %s4728_s10 = sphi %s4803_s10, %s6977_s10   ;;  %s4724_s30 = sphi %s4801_s30, %s6976_s30  }
   0x8   : > { %p30_p0 = scmp.ge.s32.totalorder %s29_s16, 9  ;;  %p48_p1 = scmp.ne.s32.totalorder %s4728_s10, %s4724_s30 }
   0x9   : > { %p49_p2 = scmp.eq.s32.totalorder %s4748_s15, 0  ;;  %s41_s21 = sadd.s32 1, %s4728_s10 }
   0xa   : > { %s6983_s16 = smov (%p30_p0, %s29_s16), 0  ;;  %s6985_s17 = smov (!%p30_p0, %s32_s17), %s4744_s14 }
   0xb   : > { %6822 = sst [smem:[#allocation5_spill]] %s6983_s16  ;;  %p50_p3 = por %p49_p2, %p48_p1 }
   0xc   : > { %p34_p4 = scmp.ge.s32.totalorder %s6985_s17, 2  ;;  %s37_s18 = ssub.s32 %s4740_s13, %s6983_s16 }
   0xd   : > { %p3772_p6 = scmp.ge.s32.totalorder %s4748_s15, 18 }
   0xe   : > { %s6987_s17 = smov (%p34_p4, %s6985_s17), 0 }
   0xf   : > { %6823 = sst [smem:[#allocation6_spill]] %s6987_s17  ;;  %s36_s19 = ssub.s32 %s4744_s14, %s6987_s17 }
  0x10   : > { %s38_s20 = sor.u32 %s37_s18, %s36_s19  ;;  %300 = sbr.rel (%p3772_p6) target bundleno = 95 (0x5f), region = 32 }
  0x11   : > { %p39_p5 = scmp.eq.s32.totalorder %s38_s20, 0 }
  0x13   : > { %s4852_s22 = scalar_select %p39_p5, %s4728_s10, %s41_s21  }
  0x15   : > { %303 = sbr.rel (!%p50_p3) target bundleno = 95 (0x5f), region = 36  ;;  %s305_s23 = sand.u32 (%p50_p3), 1, %s4728_s10  }
  0x16   : > { %s3775_s24 = sshll.u32 (%p50_p3), %s4740_s13, 2  ;;  %s3773_s25 = sshll.u32 (%p50_p3), %s305_s23, 9 }
  0x17   : > { %s4434_s26 = smul.u32 (%p50_p3), 1152, %s4744_s14  ;;  %s6824_s0 = sld [smem:[#allocation26_spill]] (%p50_p3) }
  0x18   : > { %s4866_s19 = scalar_lea.vmem (%p50_p3), [#allocation4], %s3773_s25 }
  0x19   : > { %s311_s27 = sadd.s32 (%p50_p3), %s4434_s26, %s3775_s24 }
  0x1a   : > { %s3777_s28 = sshll.u32 %s311_s27, 2 }
  0x1d   : > { %s4861_s18 = scalar_lea.vmem %s6824_s0, %s3777_s28 }
  0x1e   : > { %v326_v0 = vld [vmem:[%s4861_s18] sm:$0xff]  ;;  %v328_v1 = vld [vmem:[%s4861_s18 + $0x8] sm:$0xff]  ;;  %v330_v2 = vld [vmem:[%s4861_s18 + $0x90] sm:$0xff] }
  0x1f   : > { %327 = vst [vmem:[%s4866_s19] sm:$0xff] %v326_v0  ;;  %v332_v3 = vld [vmem:[%s4861_s18 + $0x98] sm:$0xff]  ;;  %v334_v4 = vld [vmem:[%s4861_s18 + $0x120] sm:$0xff]  ;;  %v336_v5 = vld [vmem:[%s4861_s18 + $0x128] sm:$0xff] }
  0x20   : > { %329 = vst [vmem:[%s4866_s19 + $0x8] sm:$0xff] %v328_v1  ;;  %v338_v6 = vld [vmem:[%s4861_s18 + $0x1b0] sm:$0xff]  ;;  %v340_v7 = vld [vmem:[%s4861_s18 + $0x1b8] sm:$0xff]  ;;  %v342_v8 = vld [vmem:[%s4861_s18 + $0x240] sm:$0xff] }
  0x21   : > { %331 = vst [vmem:[%s4866_s19 + $0x10] sm:$0xff] %v330_v2  ;;  %v344_v9 = vld [vmem:[%s4861_s18 + $0x248] sm:$0xff]  ;;  %v346_v10 = vld [vmem:[%s4861_s18 + $0x2d0] sm:$0xff]  ;;  %v348_v11 = vld [vmem:[%s4861_s18 + $0x2d8] sm:$0xff] }
  0x22   : > { %333 = vst [vmem:[%s4866_s19 + $0x18] sm:$0xff] %v332_v3  ;;  %v350_v12 = vld [vmem:[%s4861_s18 + $0x360] sm:$0xff]  ;;  %v352_v13 = vld [vmem:[%s4861_s18 + $0x368] sm:$0xff]  ;;  %v354_v14 = vld [vmem:[%s4861_s18 + $0x3f0] sm:$0xff] }
  0x23   : > { %335 = vst [vmem:[%s4866_s19 + $0x20] sm:$0xff] %v334_v4  ;;  %v356_v15 = vld [vmem:[%s4861_s18 + $0x3f8] sm:$0xff]  ;;  %v358_v16 = vld [vmem:[%s4861_s18 + $0x480] sm:$0xff]  ;;  %v360_v17 = vld [vmem:[%s4861_s18 + $0x488] sm:$0xff] }
  0x24   : > { %337 = vst [vmem:[%s4866_s19 + $0x28] sm:$0xff] %v336_v5  ;;  %v362_v18 = vld [vmem:[%s4861_s18 + $0x510] sm:$0xff]  ;;  %v364_v19 = vld [vmem:[%s4861_s18 + $0x518] sm:$0xff]  ;;  %v366_v20 = vld [vmem:[%s4861_s18 + $0x5a0] sm:$0xff] }
  0x25   : > { %339 = vst [vmem:[%s4866_s19 + $0x30] sm:$0xff] %v338_v6  ;;  %v368_v21 = vld [vmem:[%s4861_s18 + $0x5a8] sm:$0xff]  ;;  %v370_v22 = vld [vmem:[%s4861_s18 + $0x630] sm:$0xff]  ;;  %v372_v23 = vld [vmem:[%s4861_s18 + $0x638] sm:$0xff] }
  0x26   : > { %341 = vst [vmem:[%s4866_s19 + $0x38] sm:$0xff] %v340_v7  ;;  %v374_v24 = vld [vmem:[%s4861_s18 + $0x6c0] sm:$0xff]  ;;  %v376_v25 = vld [vmem:[%s4861_s18 + $0x6c8] sm:$0xff]  ;;  %v378_v26 = vld [vmem:[%s4861_s18 + $0x750] sm:$0xff] }
  0x27   : > { %343 = vst [vmem:[%s4866_s19 + $0x40] sm:$0xff] %v342_v8  ;;  %v380_v27 = vld [vmem:[%s4861_s18 + $0x758] sm:$0xff]  ;;  %v382_v28 = vld [vmem:[%s4861_s18 + $0x7e0] sm:$0xff]  ;;  %v384_v29 = vld [vmem:[%s4861_s18 + $0x7e8] sm:$0xff] }
  0x28   : > { %345 = vst [vmem:[%s4866_s19 + $0x48] sm:$0xff] %v344_v9  ;;  %v386_v30 = vld [vmem:[%s4861_s18 + $0x870] sm:$0xff]  ;;  %v388_v31 = vld [vmem:[%s4861_s18 + $0x878] sm:$0xff]  ;;  %v390_v32 = vld [vmem:[%s4861_s18 + $0x900] sm:$0xff] }
  0x29   : > { %347 = vst [vmem:[%s4866_s19 + $0x50] sm:$0xff] %v346_v10  ;;  %v392_v33 = vld [vmem:[%s4861_s18 + $0x908] sm:$0xff]  ;;  %v394_v34 = vld [vmem:[%s4861_s18 + $0x990] sm:$0xff]  ;;  %v396_v35 = vld [vmem:[%s4861_s18 + $0x998] sm:$0xff] }
  0x2a   : > { %349 = vst [vmem:[%s4866_s19 + $0x58] sm:$0xff] %v348_v11  ;;  %v398_v36 = vld [vmem:[%s4861_s18 + $0xa20] sm:$0xff]  ;;  %v400_v37 = vld [vmem:[%s4861_s18 + $0xa28] sm:$0xff]  ;;  %v402_v38 = vld [vmem:[%s4861_s18 + $0xab0] sm:$0xff] }
  0x2b   : > { %351 = vst [vmem:[%s4866_s19 + $0x60] sm:$0xff] %v350_v12  ;;  %v404_v39 = vld [vmem:[%s4861_s18 + $0xab8] sm:$0xff]  ;;  %v406_v40 = vld [vmem:[%s4861_s18 + $0xb40] sm:$0xff]  ;;  %v408_v41 = vld [vmem:[%s4861_s18 + $0xb48] sm:$0xff] }
  0x2c   : > { %353 = vst [vmem:[%s4866_s19 + $0x68] sm:$0xff] %v352_v13  ;;  %v410_v42 = vld [vmem:[%s4861_s18 + $0xbd0] sm:$0xff]  ;;  %v412_v43 = vld [vmem:[%s4861_s18 + $0xbd8] sm:$0xff]  ;;  %v414_v44 = vld [vmem:[%s4861_s18 + $0xc60] sm:$0xff] }
  0x2d   : > { %355 = vst [vmem:[%s4866_s19 + $0x70] sm:$0xff] %v354_v14  ;;  %v416_v45 = vld [vmem:[%s4861_s18 + $0xc68] sm:$0xff]  ;;  %v418_v46 = vld [vmem:[%s4861_s18 + $0xcf0] sm:$0xff]  ;;  %v420_v47 = vld [vmem:[%s4861_s18 + $0xcf8] sm:$0xff] }
  0x2e   : > { %357 = vst [vmem:[%s4866_s19 + $0x78] sm:$0xff] %v356_v15  ;;  %v422_v48 = vld [vmem:[%s4861_s18 + $0xd80] sm:$0xff]  ;;  %v424_v49 = vld [vmem:[%s4861_s18 + $0xd88] sm:$0xff]  ;;  %v426_v50 = vld [vmem:[%s4861_s18 + $0xe10] sm:$0xff] }
  0x2f   : > { %359 = vst [vmem:[%s4866_s19 + $0x80] sm:$0xff] %v358_v16  ;;  %v428_v51 = vld [vmem:[%s4861_s18 + $0xe18] sm:$0xff]  ;;  %v430_v52 = vld [vmem:[%s4861_s18 + $0xea0] sm:$0xff]  ;;  %v432_v53 = vld [vmem:[%s4861_s18 + $0xea8] sm:$0xff] }
  0x30   : > { %361 = vst [vmem:[%s4866_s19 + $0x88] sm:$0xff] %v360_v17  ;;  %v434_v54 = vld [vmem:[%s4861_s18 + $0xf30] sm:$0xff]  ;;  %v436_v55 = vld [vmem:[%s4861_s18 + $0xf38] sm:$0xff]  ;;  %v438_v56 = vld [vmem:[%s4861_s18 + $0xfc0] sm:$0xff] }
  0x31   : > { %363 = vst [vmem:[%s4866_s19 + $0x90] sm:$0xff] %v362_v18  ;;  %v440_v57 = vld [vmem:[%s4861_s18 + $0xfc8] sm:$0xff]  ;;  %v442_v58 = vld [vmem:[%s4861_s18 + $0x1050] sm:$0xff]  ;;  %v444_v59 = vld [vmem:[%s4861_s18 + $0x1058] sm:$0xff] }
  0x32   : > { %365 = vst [vmem:[%s4866_s19 + $0x98] sm:$0xff] %v364_v19  ;;  %v446_v60 = vld [vmem:[%s4861_s18 + $0x10e0] sm:$0xff]  ;;  %v448_v61 = vld [vmem:[%s4861_s18 + $0x10e8] sm:$0xff]  ;;  %v450_v62 = vld [vmem:[%s4861_s18 + $0x1170] sm:$0xff] }
  0x33   : > { %367 = vst [vmem:[%s4866_s19 + $0xa0] sm:$0xff] %v366_v20  ;;  %v452_v63 = vld [vmem:[%s4861_s18 + $0x1178] sm:$0xff] }
  0x34   : > { %369 = vst [vmem:[%s4866_s19 + $0xa8] sm:$0xff] %v368_v21 }
  0x35   : > { %371 = vst [vmem:[%s4866_s19 + $0xb0] sm:$0xff] %v370_v22 }
  0x36   : > { %373 = vst [vmem:[%s4866_s19 + $0xb8] sm:$0xff] %v372_v23 }
  0x37   : > { %375 = vst [vmem:[%s4866_s19 + $0xc0] sm:$0xff] %v374_v24 }
  0x38   : > { %377 = vst [vmem:[%s4866_s19 + $0xc8] sm:$0xff] %v376_v25 }
  0x39   : > { %379 = vst [vmem:[%s4866_s19 + $0xd0] sm:$0xff] %v378_v26 }
  0x3a   : > { %381 = vst [vmem:[%s4866_s19 + $0xd8] sm:$0xff] %v380_v27 }
  0x3b   : > { %383 = vst [vmem:[%s4866_s19 + $0xe0] sm:$0xff] %v382_v28 }
  0x3c   : > { %385 = vst [vmem:[%s4866_s19 + $0xe8] sm:$0xff] %v384_v29 }
  0x3d   : > { %387 = vst [vmem:[%s4866_s19 + $0xf0] sm:$0xff] %v386_v30 }
  0x3e   : > { %389 = vst [vmem:[%s4866_s19 + $0xf8] sm:$0xff] %v388_v31 }
  0x3f   : > { %391 = vst [vmem:[%s4866_s19 + $0x100] sm:$0xff] %v390_v32 }
  0x40   : > { %393 = vst [vmem:[%s4866_s19 + $0x108] sm:$0xff] %v392_v33 }
  0x41   : > { %395 = vst [vmem:[%s4866_s19 + $0x110] sm:$0xff] %v394_v34 }
  0x42   : > { %397 = vst [vmem:[%s4866_s19 + $0x118] sm:$0xff] %v396_v35 }
  0x43   : > { %399 = vst [vmem:[%s4866_s19 + $0x120] sm:$0xff] %v398_v36 }
  0x44   : > { %401 = vst [vmem:[%s4866_s19 + $0x128] sm:$0xff] %v400_v37 }
  0x45   : > { %403 = vst [vmem:[%s4866_s19 + $0x130] sm:$0xff] %v402_v38 }
  0x46   : > { %405 = vst [vmem:[%s4866_s19 + $0x138] sm:$0xff] %v404_v39 }
  0x47   : > { %407 = vst [vmem:[%s4866_s19 + $0x140] sm:$0xff] %v406_v40 }
  0x48   : > { %409 = vst [vmem:[%s4866_s19 + $0x148] sm:$0xff] %v408_v41 }
  0x49   : > { %411 = vst [vmem:[%s4866_s19 + $0x150] sm:$0xff] %v410_v42 }
  0x4a   : > { %413 = vst [vmem:[%s4866_s19 + $0x158] sm:$0xff] %v412_v43 }
  0x4b   : > { %415 = vst [vmem:[%s4866_s19 + $0x160] sm:$0xff] %v414_v44 }
  0x4c   : > { %417 = vst [vmem:[%s4866_s19 + $0x168] sm:$0xff] %v416_v45 }
  0x4d   : > { %419 = vst [vmem:[%s4866_s19 + $0x170] sm:$0xff] %v418_v46 }
  0x4e   : > { %421 = vst [vmem:[%s4866_s19 + $0x178] sm:$0xff] %v420_v47 }
  0x4f   : > { %423 = vst [vmem:[%s4866_s19 + $0x180] sm:$0xff] %v422_v48 }
  0x50   : > { %425 = vst [vmem:[%s4866_s19 + $0x188] sm:$0xff] %v424_v49 }
  0x51   : > { %427 = vst [vmem:[%s4866_s19 + $0x190] sm:$0xff] %v426_v50 }
  0x52   : > { %429 = vst [vmem:[%s4866_s19 + $0x198] sm:$0xff] %v428_v51 }
  0x53   : > { %431 = vst [vmem:[%s4866_s19 + $0x1a0] sm:$0xff] %v430_v52 }
  0x54   : > { %433 = vst [vmem:[%s4866_s19 + $0x1a8] sm:$0xff] %v432_v53 }
  0x55   : > { %435 = vst [vmem:[%s4866_s19 + $0x1b0] sm:$0xff] %v434_v54 }
  0x56   : > { %437 = vst [vmem:[%s4866_s19 + $0x1b8] sm:$0xff] %v436_v55 }
  0x57   : > { %439 = vst [vmem:[%s4866_s19 + $0x1c0] sm:$0xff] %v438_v56 }
  0x58   : > { %441 = vst [vmem:[%s4866_s19 + $0x1c8] sm:$0xff] %v440_v57 }
  0x59   : > { %443 = vst [vmem:[%s4866_s19 + $0x1d0] sm:$0xff] %v442_v58 }
  0x5a   : > { %445 = vst [vmem:[%s4866_s19 + $0x1d8] sm:$0xff] %v444_v59 }
  0x5b   : > { %447 = vst [vmem:[%s4866_s19 + $0x1e0] sm:$0xff] %v446_v60 }
  0x5c   : > { %449 = vst [vmem:[%s4866_s19 + $0x1e8] sm:$0xff] %v448_v61 }
  0x5d   : > { %451 = vst [vmem:[%s4866_s19 + $0x1f0] sm:$0xff] %v450_v62 }
  0x5e   : > { %453 = vst [vmem:[%s4866_s19 + $0x1f8] sm:$0xff] %v452_v63 }
  0x5f PF: > { %p3778_p7 = scmp.ge.s32.totalorder %s4748_s15, 1  ;;  %p485_p8 = scmp.lt.s32.totalorder %s4748_s15, 19 }
  0x61   : > { %p486_p9 = pnand %p3778_p7, %p485_p8 }
  0x63   : > { %489 = sbr.rel (%p486_p9) target bundleno = 1217 (0x4c1), region = 71 }
  0x68   : > { %s492_s17 = sand.u32 1, %s4724_s30   ;;  %s3780_s20 = sshll.u32 %s4732_s11, 6 }
  0x69   : > { %s3779_s21 = sshll.u32 %s492_s17, 9  ;;  %p550_p10 = scmp.lt.s32.totalorder %s3780_s20, 575 }
  0x6a   : > { %s3784_s23 = sshll.u32 %s4736_s12, 5  ;;  %s6825_s1 = sld [smem:[#allocation27_spill]] }
  0x6b   : > { %s6989_s20 = smov (!%p550_p10, %s3780_s20), 575  ;;  %p562_p11 = scmp.lt.s32.totalorder %s3784_s23, 63 }
  0x6c   : > { %s3781_s24 = sshll.u32 %s6989_s20, 2  ;;  %s5023_s28 = scalar_lea.vmem [#allocation4], %s3779_s21 }
  0x6d   : > { %s5006_s18 = scalar_lea.vmem %s6791_s2, %s3781_s24  ;;  %s6991_s23 = smov (!%p562_p11, %s3784_s23), 63 }
  0x6e   : > { %s3785_s19 = sshll.u32 %s6991_s23, 3  ;;  %p3790_p12 = scmp.ne.s32.totalorder %s4732_s11, 0 }
  0x6f   : > { %s5011_s17 = scalar_lea.vmem %s6796_s7, %s3785_s19  ;;  %s5016_s20 = scalar_lea.vmem %s6797_s8, %s3785_s19 }
  0x70   : > { %s5001_s27 = scalar_lea.vmem %s6825_s1, %s3781_s24  ;;  %s5021_s1 = scalar_lea.vmem %s6798_s9, %s3785_s19 }
  0x71   : > { %582 = sbr.rel (%p3790_p12) target bundleno = 183 (0xb7), region = 79 }
  0x76   : > { %vm583_vm0 = vcmask 15360   ;;  %v4750_v0 = vmov 0.0  }
  0x77   : > { %584 = vst.msk [vmem:[#allocation2] sm:$0xff] %vm583_vm0, %v4750_v0 }
  0x78   : > { %585 = vst.msk [vmem:[#allocation2 + $0x8] sm:$0xff] %vm583_vm0, %v4750_v0 }
  0x79   : > { %586 = vst.msk [vmem:[#allocation2 + $0x10] sm:$0xff] %vm583_vm0, %v4750_v0 }
  0x7a   : > { %587 = vst.msk [vmem:[#allocation2 + $0x18] sm:$0xff] %vm583_vm0, %v4750_v0 }
  0x7b   : > { %588 = vst.msk [vmem:[#allocation2 + $0x20] sm:$0xff] %vm583_vm0, %v4750_v0 }
  0x7c   : > { %589 = vst.msk [vmem:[#allocation2 + $0x28] sm:$0xff] %vm583_vm0, %v4750_v0 }
  0x7d   : > { %590 = vst.msk [vmem:[#allocation2 + $0x30] sm:$0xff] %vm583_vm0, %v4750_v0 }
  0x7e   : > { %591 = vst.msk [vmem:[#allocation2 + $0x38] sm:$0xff] %vm583_vm0, %v4750_v0 }
  0x7f   : > { %592 = vst.msk [vmem:[#allocation2 + $0x40] sm:$0xff] %vm583_vm0, %v4750_v0 }
  0x80   : > { %593 = vst.msk [vmem:[#allocation2 + $0x48] sm:$0xff] %vm583_vm0, %v4750_v0 }
  0x81   : > { %594 = vst.msk [vmem:[#allocation2 + $0x50] sm:$0xff] %vm583_vm0, %v4750_v0 }
  0x82   : > { %595 = vst.msk [vmem:[#allocation2 + $0x58] sm:$0xff] %vm583_vm0, %v4750_v0 }
  0x83   : > { %596 = vst.msk [vmem:[#allocation2 + $0x60] sm:$0xff] %vm583_vm0, %v4750_v0 }
  0x84   : > { %597 = vst.msk [vmem:[#allocation2 + $0x68] sm:$0xff] %vm583_vm0, %v4750_v0 }
  0x85   : > { %598 = vst.msk [vmem:[#allocation2 + $0x70] sm:$0xff] %vm583_vm0, %v4750_v0 }
  0x86   : > { %599 = vst.msk [vmem:[#allocation2 + $0x78] sm:$0xff] %vm583_vm0, %v4750_v0 }
  0x87   : > { %600 = vst.msk [vmem:[#allocation2 + $0x80] sm:$0xff] %vm583_vm0, %v4750_v0 }
  0x88   : > { %601 = vst.msk [vmem:[#allocation2 + $0x88] sm:$0xff] %vm583_vm0, %v4750_v0 }
  0x89   : > { %602 = vst.msk [vmem:[#allocation2 + $0x90] sm:$0xff] %vm583_vm0, %v4750_v0 }
  0x8a   : > { %603 = vst.msk [vmem:[#allocation2 + $0x98] sm:$0xff] %vm583_vm0, %v4750_v0 }
  0x8b   : > { %604 = vst.msk [vmem:[#allocation2 + $0xa0] sm:$0xff] %vm583_vm0, %v4750_v0 }
  0x8c   : > { %605 = vst.msk [vmem:[#allocation2 + $0xa8] sm:$0xff] %vm583_vm0, %v4750_v0 }
  0x8d   : > { %606 = vst.msk [vmem:[#allocation2 + $0xb0] sm:$0xff] %vm583_vm0, %v4750_v0 }
  0x8e   : > { %607 = vst.msk [vmem:[#allocation2 + $0xb8] sm:$0xff] %vm583_vm0, %v4750_v0 }
  0x8f   : > { %608 = vst.msk [vmem:[#allocation2 + $0xc0] sm:$0xff] %vm583_vm0, %v4750_v0 }
  0x90   : > { %609 = vst.msk [vmem:[#allocation2 + $0xc8] sm:$0xff] %vm583_vm0, %v4750_v0 }
  0x91   : > { %610 = vst.msk [vmem:[#allocation2 + $0xd0] sm:$0xff] %vm583_vm0, %v4750_v0 }
  0x92   : > { %611 = vst.msk [vmem:[#allocation2 + $0xd8] sm:$0xff] %vm583_vm0, %v4750_v0 }
  0x93   : > { %612 = vst.msk [vmem:[#allocation2 + $0xe0] sm:$0xff] %vm583_vm0, %v4750_v0 }
  0x94   : > { %613 = vst.msk [vmem:[#allocation2 + $0xe8] sm:$0xff] %vm583_vm0, %v4750_v0 }
  0x95   : > { %614 = vst.msk [vmem:[#allocation2 + $0xf0] sm:$0xff] %vm583_vm0, %v4750_v0 }
  0x96   : > { %615 = vst.msk [vmem:[#allocation2 + $0xf8] sm:$0xff] %vm583_vm0, %v4750_v0 }
  0x97   : > { %616 = vst.msk [vmem:[#allocation3] sm:$0xff] %vm583_vm0, %v4750_v0 }
  0x98   : > { %617 = vst.msk [vmem:[#allocation3 + $0x8] sm:$0xff] %vm583_vm0, %v4750_v0 }
  0x99   : > { %618 = vst.msk [vmem:[#allocation3 + $0x10] sm:$0xff] %vm583_vm0, %v4750_v0 }
  0x9a   : > { %619 = vst.msk [vmem:[#allocation3 + $0x18] sm:$0xff] %vm583_vm0, %v4750_v0 }
  0x9b   : > { %620 = vst.msk [vmem:[#allocation3 + $0x20] sm:$0xff] %vm583_vm0, %v4750_v0 }
  0x9c   : > { %621 = vst.msk [vmem:[#allocation3 + $0x28] sm:$0xff] %vm583_vm0, %v4750_v0 }
  0x9d   : > { %622 = vst.msk [vmem:[#allocation3 + $0x30] sm:$0xff] %vm583_vm0, %v4750_v0 }
  0x9e   : > { %623 = vst.msk [vmem:[#allocation3 + $0x38] sm:$0xff] %vm583_vm0, %v4750_v0 }
  0x9f   : > { %624 = vst.msk [vmem:[#allocation3 + $0x40] sm:$0xff] %vm583_vm0, %v4750_v0 }
  0xa0   : > { %625 = vst.msk [vmem:[#allocation3 + $0x48] sm:$0xff] %vm583_vm0, %v4750_v0 }
  0xa1   : > { %626 = vst.msk [vmem:[#allocation3 + $0x50] sm:$0xff] %vm583_vm0, %v4750_v0 }
  0xa2   : > { %627 = vst.msk [vmem:[#allocation3 + $0x58] sm:$0xff] %vm583_vm0, %v4750_v0 }
  0xa3   : > { %628 = vst.msk [vmem:[#allocation3 + $0x60] sm:$0xff] %vm583_vm0, %v4750_v0 }
  0xa4   : > { %629 = vst.msk [vmem:[#allocation3 + $0x68] sm:$0xff] %vm583_vm0, %v4750_v0 }
  0xa5   : > { %630 = vst.msk [vmem:[#allocation3 + $0x70] sm:$0xff] %vm583_vm0, %v4750_v0 }
  0xa6   : > { %631 = vst.msk [vmem:[#allocation3 + $0x78] sm:$0xff] %vm583_vm0, %v4750_v0 }
  0xa7   : > { %632 = vst.msk [vmem:[#allocation3 + $0x80] sm:$0xff] %vm583_vm0, %v4750_v0 }
  0xa8   : > { %633 = vst.msk [vmem:[#allocation3 + $0x88] sm:$0xff] %vm583_vm0, %v4750_v0 }
  0xa9   : > { %634 = vst.msk [vmem:[#allocation3 + $0x90] sm:$0xff] %vm583_vm0, %v4750_v0 }
  0xaa   : > { %635 = vst.msk [vmem:[#allocation3 + $0x98] sm:$0xff] %vm583_vm0, %v4750_v0 }
  0xab   : > { %636 = vst.msk [vmem:[#allocation3 + $0xa0] sm:$0xff] %vm583_vm0, %v4750_v0 }
  0xac   : > { %637 = vst.msk [vmem:[#allocation3 + $0xa8] sm:$0xff] %vm583_vm0, %v4750_v0 }
  0xad   : > { %638 = vst.msk [vmem:[#allocation3 + $0xb0] sm:$0xff] %vm583_vm0, %v4750_v0 }
  0xae   : > { %639 = vst.msk [vmem:[#allocation3 + $0xb8] sm:$0xff] %vm583_vm0, %v4750_v0 }
  0xaf   : > { %640 = vst.msk [vmem:[#allocation3 + $0xc0] sm:$0xff] %vm583_vm0, %v4750_v0 }
  0xb0   : > { %641 = vst.msk [vmem:[#allocation3 + $0xc8] sm:$0xff] %vm583_vm0, %v4750_v0 }
  0xb1   : > { %642 = vst.msk [vmem:[#allocation3 + $0xd0] sm:$0xff] %vm583_vm0, %v4750_v0 }
  0xb2   : > { %643 = vst.msk [vmem:[#allocation3 + $0xd8] sm:$0xff] %vm583_vm0, %v4750_v0 }
  0xb3   : > { %644 = vst.msk [vmem:[#allocation3 + $0xe0] sm:$0xff] %vm583_vm0, %v4750_v0 }
  0xb4   : > { %645 = vst.msk [vmem:[#allocation3 + $0xe8] sm:$0xff] %vm583_vm0, %v4750_v0 }
  0xb5   : > { %646 = vst.msk [vmem:[#allocation3 + $0xf0] sm:$0xff] %vm583_vm0, %v4750_v0 }
  0xb6   : > { %647 = vst.msk [vmem:[#allocation3 + $0xf8] sm:$0xff] %vm583_vm0, %v4750_v0 }
  0xb7 PF: > { %v4377_v1 = vld [vmem:[%s5001_s27 + $0x38] sm:$0xff]  ;;  %v4376_v5 = vld [vmem:[%s5001_s27 + $0x30] sm:$0xff]  ;;  %v4375_v9 = vld [vmem:[%s5001_s27 + $0x28] sm:$0xff]  ;;  %vm1708_vm1 = vcmask 15360   ;;  %p4303_p13 = scmp.ne.s32.totalorder %s4732_s11, 8 }
  0xb8   : > { %v4385_v2 = vld [vmem:[%s5001_s27 + $0x78] sm:$0xff]  ;;  %1320 = vmatpush.bf16.msra.mxu0 %v4377_v1  ;;  %v4384_v6 = vld [vmem:[%s5001_s27 + $0x70] sm:$0xff]  ;;  %v4383_v10 = vld [vmem:[%s5001_s27 + $0x68] sm:$0xff] }
  0xb9   : > { %v4393_v3 = vld [vmem:[%s5001_s27 + $0xb8] sm:$0xff]  ;;  %1409 = vmatpush.bf16.msra.mxu1 %v4385_v2  ;;  %v4392_v7 = vld [vmem:[%s5001_s27 + $0xb0] sm:$0xff]  ;;  %v4391_v11 = vld [vmem:[%s5001_s27 + $0xa8] sm:$0xff] }
  0xba   : > { %v4401_v4 = vld [vmem:[%s5001_s27 + $0xf8] sm:$0xff]  ;;  %1498 = vmatpush.bf16.msra.mxu2 %v4393_v3  ;;  %v4400_v8 = vld [vmem:[%s5001_s27 + $0xf0] sm:$0xff]  ;;  %v4399_v12 = vld [vmem:[%s5001_s27 + $0xe8] sm:$0xff] }
  0xbb   : > { %1587 = vmatpush.bf16.msra.mxu3 %v4401_v4  ;;  %v4374_v13 = vld [vmem:[%s5001_s27 + $0x20] sm:$0xff]  ;;  %v4373_v17 = vld [vmem:[%s5001_s27 + $0x18] sm:$0xff]  ;;  %v4372_v21 = vld [vmem:[%s5001_s27 + $0x10] sm:$0xff] }
  0xbc   : > { %1321 = vmatpush.bf16.msra.mxu0 %v4376_v5  ;;  %v4382_v14 = vld [vmem:[%s5001_s27 + $0x60] sm:$0xff]  ;;  %v4381_v18 = vld [vmem:[%s5001_s27 + $0x58] sm:$0xff]  ;;  %v4380_v22 = vld [vmem:[%s5001_s27 + $0x50] sm:$0xff] }
  0xbd   : > { %1410 = vmatpush.bf16.msra.mxu1 %v4384_v6  ;;  %v4390_v15 = vld [vmem:[%s5001_s27 + $0xa0] sm:$0xff]  ;;  %v4389_v19 = vld [vmem:[%s5001_s27 + $0x98] sm:$0xff]  ;;  %v4388_v23 = vld [vmem:[%s5001_s27 + $0x90] sm:$0xff] }
  0xbe   : > { %1499 = vmatpush.bf16.msra.mxu2 %v4392_v7  ;;  %v4398_v16 = vld [vmem:[%s5001_s27 + $0xe0] sm:$0xff]  ;;  %v4397_v20 = vld [vmem:[%s5001_s27 + $0xd8] sm:$0xff]  ;;  %v4396_v24 = vld [vmem:[%s5001_s27 + $0xd0] sm:$0xff] }
  0xbf   : > { %1588 = vmatpush.bf16.msra.mxu3 %v4400_v8  ;;  %v4371_v25 = vld [vmem:[%s5001_s27 + $0x8] sm:$0xff]  ;;  %v4370_v29 = vld [vmem:[%s5001_s27] sm:$0xff]  ;;  %v4308_v34 = vld [vmem:[%s5023_s28 + $0xc] sm:$0xf0] }
  0xc0   : > { %1322 = vmatpush.bf16.msra.mxu0 %v4375_v9  ;;  %v4379_v26 = vld [vmem:[%s5001_s27 + $0x48] sm:$0xff]  ;;  %v4378_v30 = vld [vmem:[%s5001_s27 + $0x40] sm:$0xff]  ;;  %v3795_v36 = vld [vmem:[%s5023_s28 + $0x10] sm:$0xf0] }
  0xc1   : > { %1411 = vmatpush.bf16.msra.mxu1 %v4383_v10  ;;  %v4387_v27 = vld [vmem:[%s5001_s27 + $0x88] sm:$0xff]  ;;  %v4386_v31 = vld [vmem:[%s5001_s27 + $0x80] sm:$0xff]  ;;  %v4309_v38 = vld [vmem:[%s5023_s28 + $0x14] sm:$0xf0] }
  0xc2   : > { %1500 = vmatpush.bf16.msra.mxu2 %v4391_v11  ;;  %v4395_v28 = vld [vmem:[%s5001_s27 + $0xc8] sm:$0xff]  ;;  %v4394_v32 = vld [vmem:[%s5001_s27 + $0xc0] sm:$0xff]  ;;  %v3803_v40 = vld [vmem:[%s5023_s28 + $0x18] sm:$0xf0] }
  0xc3   : > { %1589 = vmatpush.bf16.msra.mxu3 %v4399_v12  ;;  %v3793_v33 = vld [vmem:[%s5023_s28] sm:$0xf]  ;;  %v4306_v35 = vld [vmem:[%s5023_s28 + $0x4] sm:$0xf]  ;;  %v3801_v37 = vld [vmem:[%s5023_s28 + $0x8] sm:$0xf] }
  0xc4   : > { %1323 = vmatpush.bf16.msra.mxu0 %v4374_v13  ;;  %v4307_v39 = vld [vmem:[%s5023_s28 + $0xc] sm:$0xf]  ;;  %v4425_v41 = vld [vmem:[%s5006_s18 + $0xb8] sm:$0xff]  ;;  %v5196_v43 = vor.u32 %v4308_v34, %v3793_v33  ;;  %v5198_v44 = vor.u32 %v4306_v35, %v3795_v36  ;;  %v5200_v45 = vor.u32 %v4309_v38, %v3801_v37  ;;  %v4424_v49 = vld [vmem:[%s5006_s18 + $0xb0] sm:$0xff] }
  0xc5   : > { %1412 = vmatpush.bf16.msra.mxu1 %v4382_v14  ;;  %v4433_v42 = vld [vmem:[%s5006_s18 + $0xf8] sm:$0xff]  ;;  %v5202_v46 = vor.u32 %v4307_v39, %v3803_v40  ;;  %v4432_v50 = vld [vmem:[%s5006_s18 + $0xf0] sm:$0xff]  ;;  %v3809_v53 = vld [vmem:[%s5023_s28 + $0x20] sm:$0xf] }
  0xc6   : > { %1501 = vmatpush.bf16.msra.mxu2 %v4390_v15  ;;  %v4409_v47 = vld [vmem:[%s5006_s18 + $0x38] sm:$0xff]  ;;  %v4408_v51 = vld [vmem:[%s5006_s18 + $0x30] sm:$0xff]  ;;  %v4310_v55 = vld [vmem:[%s5023_s28 + $0x24] sm:$0xf] }
  0xc7   : > { %1590 = vmatpush.bf16.msra.mxu3 %v4398_v16  ;;  %v4417_v48 = vld [vmem:[%s5006_s18 + $0x78] sm:$0xff]  ;;  %v4416_v52 = vld [vmem:[%s5006_s18 + $0x70] sm:$0xff]  ;;  %v3817_v57 = vld [vmem:[%s5023_s28 + $0x28] sm:$0xf] }
  0xc8   : > { %1324 = vmatpush.bf16.msra.mxu0 %v4373_v17  ;;  %v4312_v54 = vld [vmem:[%s5023_s28 + $0x2c] sm:$0xf0]  ;;  %v3811_v56 = vld [vmem:[%s5023_s28 + $0x30] sm:$0xf0]  ;;  %v4313_v58 = vld [vmem:[%s5023_s28 + $0x34] sm:$0xf0] }
  0xc9   : > { %1413 = vmatpush.bf16.msra.mxu1 %v4381_v18  ;;  %v4311_v59 = vld [vmem:[%s5023_s28 + $0x2c] sm:$0xf]  ;;  %v3819_v60 = vld [vmem:[%s5023_s28 + $0x38] sm:$0xf0]  ;;  %v5222_v61 = vor.u32 %v4312_v54, %v3809_v53  ;;  %v5224_v62 = vor.u32 %v4310_v55, %v3811_v56  ;;  %v5226_v63 = vor.u32 %v4313_v58, %v3817_v57  ;;  %v3825_v1 = vld [vmem:[%s5023_s28 + $0x40] sm:$0xf] }
  0xca   : > { %1502 = vmatpush.bf16.msra.mxu2 %v4389_v19  ;;  %v5228_v0 = vor.u32 %v4311_v59, %v3819_v60  ;;  %v4316_v2 = vld [vmem:[%s5023_s28 + $0x4c] sm:$0xf0]  ;;  %v4314_v3 = vld [vmem:[%s5023_s28 + $0x44] sm:$0xf]  ;;  %v3827_v4 = vld [vmem:[%s5023_s28 + $0x50] sm:$0xf0] }
  0xcb   : > { %1591 = vmatpush.bf16.msra.mxu3 %v4397_v20  ;;  %v3833_v5 = vld [vmem:[%s5023_s28 + $0x48] sm:$0xf]  ;;  %v4317_v6 = vld [vmem:[%s5023_s28 + $0x54] sm:$0xf0]  ;;  %v4315_v7 = vld [vmem:[%s5023_s28 + $0x4c] sm:$0xf]  ;;  %v5242_v9 = vor.u32 %v4316_v2, %v3825_v1  ;;  %v5244_v10 = vor.u32 %v4314_v3, %v3827_v4 }
  0xcc   : > { %1325 = vmatpush.bf16.msra.mxu0 %v4372_v21  ;;  %v3835_v8 = vld [vmem:[%s5023_s28 + $0x58] sm:$0xf0]  ;;  %v5246_v11 = vor.u32 %v4317_v6, %v3833_v5  ;;  %v4423_v13 = vld [vmem:[%s5006_s18 + $0xa8] sm:$0xff]  ;;  %v3841_v17 = vld [vmem:[%s5023_s28 + $0x60] sm:$0xf] }
  0xcd   : > { %1414 = vmatpush.bf16.msra.mxu1 %v4380_v22  ;;  %v5248_v12 = vor.u32 %v4315_v7, %v3835_v8  ;;  %v4431_v14 = vld [vmem:[%s5006_s18 + $0xe8] sm:$0xff]  ;;  %v4320_v18 = vld [vmem:[%s5023_s28 + $0x6c] sm:$0xf0]  ;;  %v4318_v19 = vld [vmem:[%s5023_s28 + $0x64] sm:$0xf] }
  0xce   : > { %1503 = vmatpush.bf16.msra.mxu2 %v4388_v23  ;;  %v4407_v15 = vld [vmem:[%s5006_s18 + $0x28] sm:$0xff]  ;;  %v3843_v20 = vld [vmem:[%s5023_s28 + $0x70] sm:$0xf0]  ;;  %v4321_v22 = vld [vmem:[%s5023_s28 + $0x74] sm:$0xf0] }
  0xcf   : > { %1592 = vmatpush.bf16.msra.mxu3 %v4396_v24  ;;  %v4415_v16 = vld [vmem:[%s5006_s18 + $0x68] sm:$0xff]  ;;  %v3851_v24 = vld [vmem:[%s5023_s28 + $0x78] sm:$0xf0]  ;;  %v4325_v34 = vld [vmem:[%s5023_s28 + $0x94] sm:$0xf0] }
  0xd0   : > { %1326 = vmatpush.bf16.msra.mxu0 %v4371_v25  ;;  %v3849_v21 = vld [vmem:[%s5023_s28 + $0x68] sm:$0xf]  ;;  %v4319_v23 = vld [vmem:[%s5023_s28 + $0x6c] sm:$0xf]  ;;  %v5266_v25 = vor.u32 %v4320_v18, %v3841_v17  ;;  %v3867_v36 = vld [vmem:[%s5023_s28 + $0x98] sm:$0xf0] }
  0xd1   : > { %1415 = vmatpush.bf16.msra.mxu1 %v4379_v26  ;;  %v5268_v26 = vor.u32 %v4318_v19, %v3843_v20  ;;  %v3865_v33 = vld [vmem:[%s5023_s28 + $0x88] sm:$0xf]  ;;  %v4323_v35 = vld [vmem:[%s5023_s28 + $0x8c] sm:$0xf]  ;;  %v4329_v54 = vld [vmem:[%s5023_s28 + $0xb4] sm:$0xf0] }
  0xd2   : > { %1504 = vmatpush.bf16.msra.mxu2 %v4387_v27  ;;  %v5270_v27 = vor.u32 %v4321_v22, %v3849_v21  ;;  %v5290_v39 = vor.u32 %v4325_v34, %v3865_v33  ;;  %v5292_v40 = vor.u32 %v4323_v35, %v3867_v36  ;;  %v3881_v53 = vld [vmem:[%s5023_s28 + $0xa8] sm:$0xf]  ;;  %v4327_v55 = vld [vmem:[%s5023_s28 + $0xac] sm:$0xf]  ;;  %v3883_v56 = vld [vmem:[%s5023_s28 + $0xb8] sm:$0xf0] }
  0xd3   : > { %1593 = vmatpush.bf16.msra.mxu3 %v4395_v28  ;;  %v5272_v28 = vor.u32 %v4319_v23, %v3851_v24  ;;  %v5314_v59 = vor.u32 %v4329_v54, %v3881_v53  ;;  %v5316_v60 = vor.u32 %v4327_v55, %v3883_v56  ;;  %v3889_v1 = vld [vmem:[%s5023_s28 + $0xc0] sm:$0xf]  ;;  %v4332_v2 = vld [vmem:[%s5023_s28 + $0xcc] sm:$0xf0]  ;;  %v4330_v3 = vld [vmem:[%s5023_s28 + $0xc4] sm:$0xf] }
  0xd4   : > { %1327 = vmatpush.bf16.msra.mxu0 %v4370_v29  ;;  %v3857_v29 = vld [vmem:[%s5023_s28 + $0x80] sm:$0xf]  ;;  %v3891_v4 = vld [vmem:[%s5023_s28 + $0xd0] sm:$0xf0]  ;;  %v3897_v5 = vld [vmem:[%s5023_s28 + $0xc8] sm:$0xf] }
  0xd5   : > { %1416 = vmatpush.bf16.msra.mxu1 %v4378_v30  ;;  %v4324_v30 = vld [vmem:[%s5023_s28 + $0x8c] sm:$0xf0]  ;;  %v4333_v6 = vld [vmem:[%s5023_s28 + $0xd4] sm:$0xf0]  ;;  %v4331_v7 = vld [vmem:[%s5023_s28 + $0xcc] sm:$0xf] }
  0xd6   : > { %1505 = vmatpush.bf16.msra.mxu2 %v4386_v31  ;;  %v4322_v31 = vld [vmem:[%s5023_s28 + $0x84] sm:$0xf]  ;;  %v5286_v37 = vor.u32 %v4324_v30, %v3857_v29  ;;  %v3899_v8 = vld [vmem:[%s5023_s28 + $0xd8] sm:$0xf0]  ;;  %v3905_v19 = vld [vmem:[%s5023_s28 + $0xe0] sm:$0xf] }
  0xd7   : > { %1594 = vmatpush.bf16.msra.mxu3 %v4394_v32  ;;  %1328 = vmatmul.bf16.vlgmr.msra.gmra.mxu0 %v5196_v43  ;;  %v3859_v32 = vld [vmem:[%s5023_s28 + $0x90] sm:$0xf0]  ;;  %v4421_v17 = vld [vmem:[%s5006_s18 + $0x98] sm:$0xff]  ;;  %v4336_v20 = vld [vmem:[%s5023_s28 + $0xec] sm:$0xf0] }
  0xd8   : > { %1417 = vmatmul.bf16.vlgmr.msra.gmra.mxu1 %v5198_v44  ;;  %2029 = vmatpush.bf16.msrb.mxu0 %v4409_v47  ;;  %v5288_v38 = vor.u32 %v4322_v31, %v3859_v32  ;;  %v4406_v47 = vld [vmem:[%s5006_s18 + $0x20] sm:$0xff]  ;;  %v4429_v18 = vld [vmem:[%s5006_s18 + $0xd8] sm:$0xff]  ;;  %v3907_v22 = vld [vmem:[%s5023_s28 + $0xf0] sm:$0xf0]  ;;  %v5354_v33 = vor.u32 %v4336_v20, %v3905_v19 }
  0xd9   : > { %1506 = vmatmul.bf16.vlgmr.msra.gmra.mxu2 %v5200_v45  ;;  %2118 = vmatpush.bf16.msrb.mxu1 %v4417_v48  ;;  %v4414_v48 = vld [vmem:[%s5006_s18 + $0x60] sm:$0xff]  ;;  %v3913_v23 = vld [vmem:[%s5023_s28 + $0xe8] sm:$0xf]  ;;  %v4337_v24 = vld [vmem:[%s5023_s28 + $0xf4] sm:$0xf0] }
  0xda   : > { %2207 = vmatpush.bf16.msrb.mxu2 %v4425_v41  ;;  %1595 = vmatmul.bf16.vlgmr.msra.gmra.mxu3 %v5202_v46  ;;  %v4422_v41 = vld [vmem:[%s5006_s18 + $0xa0] sm:$0xff]  ;;  %v4335_v29 = vld [vmem:[%s5023_s28 + $0xec] sm:$0xf]  ;;  %v3915_v30 = vld [vmem:[%s5023_s28 + $0xf8] sm:$0xf0]  ;;  %v5358_v35 = vor.u32 %v4337_v24, %v3913_v23 }
  0xdb   : > { %2296 = vmatpush.bf16.msrb.mxu3 %v4433_v42  ;;  %v4430_v42 = vld [vmem:[%s5006_s18 + $0xe0] sm:$0xff]  ;;  %v4405_v31 = vld [vmem:[%s5006_s18 + $0x18] sm:$0xff]  ;;  %v5360_v36 = vor.u32 %v4335_v29, %v3915_v30  ;;  %v3939_v29 = vld [vmem:[%s5023_s28 + $0x130] sm:$0xf0] }
  0xdc   : > { %2030 = vmatpush.bf16.msrb.mxu0 %v4408_v51  ;;  %v4326_v51 = vld [vmem:[%s5023_s28 + $0xa4] sm:$0xf]  ;;  %v4413_v32 = vld [vmem:[%s5006_s18 + $0x58] sm:$0xff]  ;;  %v3945_v30 = vld [vmem:[%s5023_s28 + $0x128] sm:$0xf] }
  0xdd   : > { %2119 = vmatpush.bf16.msrb.mxu1 %v4416_v52  ;;  %v3875_v52 = vld [vmem:[%s5023_s28 + $0xb0] sm:$0xf0]  ;;  %v4334_v21 = vld [vmem:[%s5023_s28 + $0xe4] sm:$0xf] }
  0xde   : > { %2208 = vmatpush.bf16.msrb.mxu2 %v4424_v49  ;;  %v3873_v49 = vld [vmem:[%s5023_s28 + $0xa0] sm:$0xf]  ;;  %v5312_v58 = vor.u32 %v4326_v51, %v3875_v52  ;;  %v5356_v34 = vor.u32 %v4334_v21, %v3907_v22  ;;  %v4339_v51 = vld [vmem:[%s5023_s28 + $0x10c] sm:$0xf]  ;;  %v3931_v52 = vld [vmem:[%s5023_s28 + $0x118] sm:$0xf0] }
  0xdf   : > { %2297 = vmatpush.bf16.msrb.mxu3 %v4432_v50  ;;  %v4328_v50 = vld [vmem:[%s5023_s28 + $0xac] sm:$0xf0]  ;;  %v712_v19 = vld [vmem:[#allocation2] sm:$0xff] }
  0xe0   : > { %2031 = vmatpush.bf16.msrb.mxu0 %v4407_v15  ;;  %v5310_v57 = vor.u32 %v4328_v50, %v3873_v49  ;;  %v5334_v15 = vor.u32 %v4333_v6, %v3897_v5  ;;  %v3929_v49 = vld [vmem:[%s5023_s28 + $0x108] sm:$0xf]  ;;  %v4341_v50 = vld [vmem:[%s5023_s28 + $0x114] sm:$0xf0]  ;;  %v4428_v5 = vld [vmem:[%s5006_s18 + $0xd0] sm:$0xff] }
  0xe1   : > { %2120 = vmatpush.bf16.msrb.mxu1 %v4415_v16  ;;  %v5336_v16 = vor.u32 %v4331_v7, %v3899_v8  ;;  %v3937_v21 = vld [vmem:[%s5023_s28 + $0x120] sm:$0xf]  ;;  %v4344_v22 = vld [vmem:[%s5023_s28 + $0x12c] sm:$0xf0]  ;;  %v4342_v24 = vld [vmem:[%s5023_s28 + $0x124] sm:$0xf] }
  0xe2   : > { %2209 = vmatpush.bf16.msrb.mxu2 %v4423_v13  ;;  %v5330_v13 = vor.u32 %v4332_v2, %v3889_v1  ;;  %v5378_v1 = vor.u32 %v4341_v50, %v3929_v49  ;;  %v5380_v2 = vor.u32 %v4339_v51, %v3931_v52  ;;  %v5399_v51 = vor.u32 %v4344_v22, %v3937_v21 }
  0xe3   : > { %2298 = vmatpush.bf16.msrb.mxu3 %v4431_v14  ;;  %v5332_v14 = vor.u32 %v4330_v3, %v3891_v4  ;;  %v4420_v4 = vld [vmem:[%s5006_s18 + $0x90] sm:$0xff]  ;;  %v5401_v52 = vor.u32 %v4342_v24, %v3939_v29  ;;  %v3953_v29 = vld [vmem:[%s5023_s28 + $0x140] sm:$0xf] }
  0xe4   : > { %2032 = vmatpush.bf16.msrb.mxu0 %v4406_v47  ;;  %v4338_v47 = vld [vmem:[%s5023_s28 + $0x104] sm:$0xf] }
  0xe5   : > { %2121 = vmatpush.bf16.msrb.mxu1 %v4414_v48  ;;  %v3923_v48 = vld [vmem:[%s5023_s28 + $0x110] sm:$0xf0] }
  0xe6   : > { %2210 = vmatpush.bf16.msrb.mxu2 %v4422_v41  ;;  %v3921_v41 = vld [vmem:[%s5023_s28 + $0x100] sm:$0xf]  ;;  %v5376_v54 = vor.u32 %v4338_v47, %v3923_v48  ;;  %v4404_v47 = vld [vmem:[%s5006_s18 + $0x10] sm:$0xff] }
  0xe7   : > { %1333 = vmatmul.bf16.gmra.mxu0 %v5222_v61  ;;  %2299 = vmatpush.bf16.msrb.mxu3 %v4430_v42  ;;  %v4340_v42 = vld [vmem:[%s5023_s28 + $0x10c] sm:$0xf0] }
  0xe8   : > { %1422 = vmatmul.bf16.gmra.mxu1 %v5224_v62  ;;  %2033 = vmatpush.bf16.msrb.mxu0 %v4405_v31  ;;  %v5374_v53 = vor.u32 %v4340_v42, %v3921_v41  ;;  %v4345_v31 = vld [vmem:[%s5023_s28 + $0x134] sm:$0xf0]  ;;  %v3947_v41 = vld [vmem:[%s5023_s28 + $0x138] sm:$0xf0]  ;;  %v4412_v48 = vld [vmem:[%s5006_s18 + $0x50] sm:$0xff] }
  0xe9   : > { %1511 = vmatmul.bf16.gmra.mxu2 %v5226_v63  ;;  %2122 = vmatpush.bf16.msrb.mxu1 %v4413_v32  ;;  %v4343_v32 = vld [vmem:[%s5023_s28 + $0x12c] sm:$0xf] }
  0xea   : > { %1600 = vmatmul.bf16.gmra.mxu3 %v5228_v0  ;;  %2211 = vmatpush.bf16.msrb.mxu2 %v4421_v17 }
  0xeb   : > { %2300 = vmatpush.bf16.msrb.mxu3 %v4429_v18 }
  0xec   : > { %2034 = vmatpush.bf16.msrb.mxu0 %v4404_v47  ;;  %v4349_v47 = vld [vmem:[%s5023_s28 + $0x154] sm:$0xf0] }
  0xed   : > { %2123 = vmatpush.bf16.msrb.mxu1 %v4412_v48  ;;  %v4347_v48 = vld [vmem:[%s5023_s28 + $0x14c] sm:$0xf] }
  0xee   : > { %2212 = vmatpush.bf16.msrb.mxu2 %v4420_v4  ;;  %v5403_v4 = vor.u32 %v4345_v31, %v3945_v30  ;;  %v4348_v30 = vld [vmem:[%s5023_s28 + $0x14c] sm:$0xf0] }
  0xef   : > { %2301 = vmatpush.bf16.msrb.mxu3 %v4428_v5  ;;  %v5405_v5 = vor.u32 %v4343_v32, %v3947_v41  ;;  %v4346_v32 = vld [vmem:[%s5023_s28 + $0x144] sm:$0xf]  ;;  %v3955_v41 = vld [vmem:[%s5023_s28 + $0x150] sm:$0xf0] }
  0xf7   : > { %1338 = vmatmul.bf16.gmra.mxu0 %v5242_v9 }
  0xf8   : > { %1427 = vmatmul.bf16.gmra.mxu1 %v5244_v10 }
  0xf9   : > { %1516 = vmatmul.bf16.gmra.mxu2 %v5246_v11 }
  0xfa   : > { %1605 = vmatmul.bf16.gmra.mxu3 %v5248_v12 }
 0x107   : > { %1343 = vmatmul.bf16.gmra.mxu0 %v5266_v25 }
 0x108   : > { %1432 = vmatmul.bf16.gmra.mxu1 %v5268_v26 }
 0x109   : > { %1521 = vmatmul.bf16.gmra.mxu2 %v5270_v27 }
 0x10a   : > { %1610 = vmatmul.bf16.gmra.mxu3 %v5272_v28 }
 0x117   : > { %1348 = vmatmul.bf16.gmra.mxu0 %v5286_v37 }
 0x118   : > { %1437 = vmatmul.bf16.gmra.mxu1 %v5288_v38 }
 0x119   : > { %1526 = vmatmul.bf16.gmra.mxu2 %v5290_v39 }
 0x11a   : > { %1615 = vmatmul.bf16.gmra.mxu3 %v5292_v40 }
 0x127   : > { %1353 = vmatmul.bf16.gmra.mxu0 %v5310_v57 }
 0x128   : > { %1442 = vmatmul.bf16.gmra.mxu1 %v5312_v58 }
 0x129   : > { %1531 = vmatmul.bf16.gmra.mxu2 %v5314_v59 }
 0x12a   : > { %1620 = vmatmul.bf16.gmra.mxu3 %v5316_v60 }
 0x137   : > { %1358 = vmatmul.bf16.gmra.mxu0 %v5330_v13 }
 0x138   : > { %1447 = vmatmul.bf16.gmra.mxu1 %v5332_v14 }
 0x139   : > { %1536 = vmatmul.bf16.gmra.mxu2 %v5334_v15 }
 0x13a   : > { %1625 = vmatmul.bf16.gmra.mxu3 %v5336_v16 }
 0x147   : > { %1363 = vmatmul.bf16.gmra.mxu0 %v5354_v33 }
 0x148   : > { %1452 = vmatmul.bf16.gmra.mxu1 %v5356_v34 }
 0x149   : > { %1541 = vmatmul.bf16.gmra.mxu2 %v5358_v35 }
 0x14a   : > { %1630 = vmatmul.bf16.gmra.mxu3 %v5360_v36 }
 0x154   : > { %v1329_v55 = vpop.f32.mrf.mxu0 }
 0x155   : > { %v1418_v56 = vpop.f32.mrf.mxu1 }
 0x156   : > { %v1419_v3 = vadd.f32 %v1418_v56, %v1329_v55 }
 0x157   : > { %1368 = vmatmul.bf16.gmra.mxu0 %v5374_v53 }
 0x158   : > { %1457 = vmatmul.bf16.gmra.mxu1 %v5376_v54 }
 0x159   : > { %1546 = vmatmul.bf16.gmra.mxu2 %v5378_v1 }
 0x15a   : > { %1635 = vmatmul.bf16.gmra.mxu3 %v5380_v2 }
 0x15c   : > { %v1507_v6 = vpop.f32.mrf.mxu2  ;;  %v1331_v17 = vpop.f32.mrf.mxu0 }
 0x15d   : > { %v1596_v7 = vpop.f32.mrf.mxu3  ;;  %v1508_v8 = vadd.f32 %v1507_v6, %v1419_v3  ;;  %v1420_v18 = vpop.f32.mrf.mxu1  ;;  %v713_v6 = vld [vmem:[#allocation2 + $0x8] sm:$0xff] }
 0x15e   : > { %v1421_v42 = vadd.f32 %v1420_v18, %v1331_v17 }
 0x15f   : > { %v1597_v20 = vadd.f32 %v1596_v7, %v1508_v8 }
 0x161   : > { %v1676_v23 = vadd.f32 %v1597_v20, %v712_v19 }
 0x163   : > { %1709 = vst.msk [vmem:[#allocation2] sm:$0xff] %vm1708_vm1, %v1676_v23  ;;  %v714_v23 = vld [vmem:[#allocation2 + $0x10] sm:$0xff] }
 0x164   : > { %v1509_v49 = vpop.f32.mrf.mxu2  ;;  %v1334_v56 = vpop.f32.mrf.mxu0 }
 0x165   : > { %v1598_v50 = vpop.f32.mrf.mxu3  ;;  %v1510_v55 = vadd.f32 %v1509_v49, %v1421_v42  ;;  %v1423_v3 = vpop.f32.mrf.mxu1  ;;  %v3961_v42 = vld [vmem:[%s5023_s28 + $0x148] sm:$0xf]  ;;  %v3963_v49 = vld [vmem:[%s5023_s28 + $0x158] sm:$0xf0] }
 0x166   : > { %v1424_v17 = vadd.f32 %v1423_v3, %v1334_v56  ;;  %v5421_v3 = vor.u32 %v4348_v30, %v3953_v29  ;;  %v4427_v29 = vld [vmem:[%s5006_s18 + $0xc8] sm:$0xff] }
 0x167   : > { %v1599_v7 = vadd.f32 %v1598_v50, %v1510_v55  ;;  %1373 = vmatmul.bf16.gmra.mxu0 %v5399_v51  ;;  %2302 = vmatpush.bf16.msrb.mxu3 %v4427_v29 }
 0x168   : > { %1462 = vmatmul.bf16.gmra.mxu1 %v5401_v52  ;;  %6826 = vst [vmem:[#allocation7_spill] sm:$0xff] %v5421_v3 }
 0x169   : > { %v1677_v8 = vadd.f32 %v1599_v7, %v713_v6  ;;  %1551 = vmatmul.bf16.gmra.mxu2 %v5403_v4  ;;  %v5423_v6 = vor.u32 %v4346_v32, %v3955_v41 }
 0x16a   : > { %1640 = vmatmul.bf16.gmra.mxu3 %v5405_v5 }
 0x16b   : > { %1710 = vst.msk [vmem:[#allocation2 + $0x8] sm:$0xff] %vm1708_vm1, %v1677_v8 }
 0x16c   : > { %v1512_v18 = vpop.f32.mrf.mxu2  ;;  %v1336_v21 = vpop.f32.mrf.mxu0  ;;  %6827 = vst [vmem:[#allocation8_spill] sm:$0xff] %v5423_v6 }
 0x16d   : > { %v1601_v19 = vpop.f32.mrf.mxu3  ;;  %v1513_v20 = vadd.f32 %v1512_v18, %v1424_v17  ;;  %v1425_v22 = vpop.f32.mrf.mxu1  ;;  %v5425_v18 = vor.u32 %v4349_v47, %v3961_v42  ;;  %v716_v47 = vld [vmem:[#allocation2 + $0x20] sm:$0xff] }
 0x16e   : > { %v1426_v50 = vadd.f32 %v1425_v22, %v1336_v21 }
 0x16f   : > { %v1602_v24 = vadd.f32 %v1601_v19, %v1513_v20  ;;  %6828 = vst [vmem:[#allocation9_spill] sm:$0xff] %v5425_v18  ;;  %v5427_v19 = vor.u32 %v4347_v48, %v3963_v49  ;;  %v715_v20 = vld [vmem:[#allocation2 + $0x18] sm:$0xff]  ;;  %v3969_v49 = vld [vmem:[%s5023_s28 + $0x160] sm:$0xf] }
 0x171   : > { %v1678_v31 = vadd.f32 %v1602_v24, %v714_v23  ;;  %6829 = vst [vmem:[#allocation10_spill] sm:$0xff] %v5427_v19  ;;  %v4419_v24 = vld [vmem:[%s5006_s18 + $0x88] sm:$0xff] }
 0x172   : > { %2213 = vmatpush.bf16.msrb.mxu2 %v4419_v24 }
 0x173   : > { %1711 = vst.msk [vmem:[#allocation2 + $0x10] sm:$0xff] %vm1708_vm1, %v1678_v31 }
 0x174   : > { %v1514_v55 = vpop.f32.mrf.mxu2  ;;  %v1339_v8 = vpop.f32.mrf.mxu0 }
 0x175   : > { %v1603_v56 = vpop.f32.mrf.mxu3  ;;  %v1515_v7 = vadd.f32 %v1514_v55, %v1426_v50  ;;  %v1428_v17 = vpop.f32.mrf.mxu1  ;;  %v4352_v50 = vld [vmem:[%s5023_s28 + $0x16c] sm:$0xf0] }
 0x176   : > { %v1429_v22 = vadd.f32 %v1428_v17, %v1339_v8  ;;  %v3977_v8 = vld [vmem:[%s5023_s28 + $0x168] sm:$0xf]  ;;  %v4353_v17 = vld [vmem:[%s5023_s28 + $0x174] sm:$0xf0] }
 0x177   : > { %v1604_v23 = vadd.f32 %v1603_v56, %v1515_v7  ;;  %1378 = vmatmul.bf16.gmra.mxu0 %v5421_v3  ;;  %v4350_v56 = vld [vmem:[%s5023_s28 + $0x164] sm:$0xf]  ;;  %v3971_v7 = vld [vmem:[%s5023_s28 + $0x170] sm:$0xf0]  ;;  %v717_v3 = vld [vmem:[#allocation2 + $0x28] sm:$0xff] }
 0x178   : > { %1467 = vmatmul.bf16.gmra.mxu1 %v5423_v6  ;;  %v5449_v29 = vor.u32 %v4350_v56, %v3971_v7 }
 0x179   : > { %v1679_v21 = vadd.f32 %v1604_v23, %v715_v20  ;;  %1556 = vmatmul.bf16.gmra.mxu2 %v5425_v18  ;;  %v4351_v20 = vld [vmem:[%s5023_s28 + $0x16c] sm:$0xf]  ;;  %v3979_v23 = vld [vmem:[%s5023_s28 + $0x178] sm:$0xf0]  ;;  %v5447_v18 = vor.u32 %v4352_v50, %v3969_v49 }
 0x17a   : > { %1645 = vmatmul.bf16.gmra.mxu3 %v5427_v19  ;;  %6831 = vst [vmem:[#allocation12_spill] sm:$0xff] %v5449_v29  ;;  %v5453_v6 = vor.u32 %v4351_v20, %v3979_v23  ;;  %v4356_v20 = vld [vmem:[%s5023_s28 + $0x18c] sm:$0xf0] }
 0x17b   : > { %1712 = vst.msk [vmem:[#allocation2 + $0x18] sm:$0xff] %vm1708_vm1, %v1679_v21 }
 0x17c   : > { %v1517_v30 = vpop.f32.mrf.mxu2  ;;  %v1341_v41 = vpop.f32.mrf.mxu0  ;;  %6830 = vst [vmem:[#allocation11_spill] sm:$0xff] %v5447_v18 }
 0x17d   : > { %v1606_v31 = vpop.f32.mrf.mxu3  ;;  %v1518_v32 = vadd.f32 %v1517_v30, %v1429_v22  ;;  %v1430_v42 = vpop.f32.mrf.mxu1  ;;  %v4403_v22 = vld [vmem:[%s5006_s18 + $0x8] sm:$0xff]  ;;  %6833 = vst [vmem:[#allocation14_spill] sm:$0xff] %v5453_v6 }
 0x17e   : > { %v1431_v21 = vadd.f32 %v1430_v42, %v1341_v41  ;;  %v4411_v30 = vld [vmem:[%s5006_s18 + $0x48] sm:$0xff]  ;;  %2035 = vmatpush.bf16.msrb.mxu0 %v4403_v22  ;;  %v3987_v22 = vld [vmem:[%s5023_s28 + $0x190] sm:$0xf0] }
 0x17f   : > { %v1607_v48 = vadd.f32 %v1606_v31, %v1518_v32  ;;  %2124 = vmatpush.bf16.msrb.mxu1 %v4411_v30  ;;  %v3993_v30 = vld [vmem:[%s5023_s28 + $0x188] sm:$0xf] }
 0x181   : > { %v1680_v55 = vadd.f32 %v1607_v48, %v716_v47  ;;  %v5451_v48 = vor.u32 %v4353_v17, %v3977_v8  ;;  %v718_v8 = vld [vmem:[#allocation2 + $0x30] sm:$0xff] }
 0x183   : > { %1713 = vst.msk [vmem:[#allocation2 + $0x20] sm:$0xff] %vm1708_vm1, %v1680_v55 }
 0x184   : > { %v1519_v19 = vpop.f32.mrf.mxu2  ;;  %v1344_v32 = vpop.f32.mrf.mxu0  ;;  %6832 = vst [vmem:[#allocation13_spill] sm:$0xff] %v5451_v48 }
 0x185   : > { %v1608_v24 = vpop.f32.mrf.mxu3  ;;  %v1520_v31 = vadd.f32 %v1519_v19, %v1431_v21  ;;  %v1433_v47 = vpop.f32.mrf.mxu1  ;;  %v4354_v21 = vld [vmem:[%s5023_s28 + $0x184] sm:$0xf] }
 0x186   : > { %v1434_v19 = vadd.f32 %v1433_v47, %v1344_v32  ;;  %v3995_v32 = vld [vmem:[%s5023_s28 + $0x198] sm:$0xf0] }
 0x187   : > { %v1609_v41 = vadd.f32 %v1608_v24, %v1520_v31  ;;  %1383 = vmatmul.bf16.gmra.mxu0 %v5447_v18  ;;  %v4357_v24 = vld [vmem:[%s5023_s28 + $0x194] sm:$0xf0]  ;;  %v4355_v31 = vld [vmem:[%s5023_s28 + $0x18c] sm:$0xf] }
 0x188   : > { %1472 = vmatmul.bf16.gmra.mxu1 %v5449_v29  ;;  %v721_v18 = vld [vmem:[#allocation2 + $0x48] sm:$0xff] }
 0x189   : > { %v1681_v42 = vadd.f32 %v1609_v41, %v717_v3  ;;  %1561 = vmatmul.bf16.gmra.mxu2 %v5451_v48  ;;  %v3985_v3 = vld [vmem:[%s5023_s28 + $0x180] sm:$0xf]  ;;  %v719_v48 = vld [vmem:[#allocation2 + $0x38] sm:$0xff] }
 0x18a   : > { %1650 = vmatmul.bf16.gmra.mxu3 %v5453_v6  ;;  %v5469_v6 = vor.u32 %v4356_v20, %v3985_v3  ;;  %v4418_v3 = vld [vmem:[%s5006_s18 + $0x80] sm:$0xff] }
 0x18b   : > { %1714 = vst.msk [vmem:[#allocation2 + $0x28] sm:$0xff] %vm1708_vm1, %v1681_v42  ;;  %v4426_v20 = vld [vmem:[%s5006_s18 + $0xc0] sm:$0xff]  ;;  %2214 = vmatpush.bf16.msrb.mxu2 %v4418_v3 }
 0x18c   : > { %v1522_v49 = vpop.f32.mrf.mxu2  ;;  %v1346_v56 = vpop.f32.mrf.mxu0  ;;  %6834 = vst [vmem:[#allocation15_spill] sm:$0xff] %v5469_v6  ;;  %2303 = vmatpush.bf16.msrb.mxu3 %v4426_v20 }
 0x18d   : > { %v1611_v50 = vpop.f32.mrf.mxu3  ;;  %v1523_v55 = vadd.f32 %v1522_v49, %v1434_v19  ;;  %v1435_v7 = vpop.f32.mrf.mxu1  ;;  %v5471_v19 = vor.u32 %v4354_v21, %v3987_v22 }
 0x18e   : > { %v1436_v47 = vadd.f32 %v1435_v7, %v1346_v56 }
 0x18f   : > { %v1612_v17 = vadd.f32 %v1611_v50, %v1523_v55  ;;  %6835 = vst [vmem:[#allocation16_spill] sm:$0xff] %v5471_v19 }
 0x191   : > { %v1682_v23 = vadd.f32 %v1612_v17, %v718_v8  ;;  %v5473_v8 = vor.u32 %v4357_v24, %v3993_v30  ;;  %v5475_v17 = vor.u32 %v4355_v31, %v3995_v32  ;;  %v720_v30 = vld [vmem:[#allocation2 + $0x40] sm:$0xff]  ;;  %v4360_v32 = vld [vmem:[%s5023_s28 + $0x1ac] sm:$0xf0] }
 0x192   : > { %v4001_v31 = vld [vmem:[%s5023_s28 + $0x1a0] sm:$0xf] }
 0x193   : > { %1715 = vst.msk [vmem:[#allocation2 + $0x30] sm:$0xff] %vm1708_vm1, %v1682_v23 }
 0x194   : > { %v1524_v41 = vpop.f32.mrf.mxu2  ;;  %v1349_v50 = vpop.f32.mrf.mxu0  ;;  %6836 = vst [vmem:[#allocation17_spill] sm:$0xff] %v5473_v8 }
 0x195   : > { %v1613_v42 = vpop.f32.mrf.mxu3  ;;  %v1525_v49 = vadd.f32 %v1524_v41, %v1436_v47  ;;  %v1438_v55 = vpop.f32.mrf.mxu1  ;;  %6837 = vst [vmem:[#allocation18_spill] sm:$0xff] %v5475_v17  ;;  %v4358_v41 = vld [vmem:[%s5023_s28 + $0x1a4] sm:$0xf] }
 0x196   : > { %v1439_v7 = vadd.f32 %v1438_v55, %v1349_v50  ;;  %v4361_v50 = vld [vmem:[%s5023_s28 + $0x1b4] sm:$0xf0]  ;;  %v4359_v55 = vld [vmem:[%s5023_s28 + $0x1ac] sm:$0xf] }
 0x197   : > { %v1614_v29 = vadd.f32 %v1613_v42, %v1525_v49  ;;  %1388 = vmatmul.bf16.gmra.mxu0 %v5469_v6  ;;  %v4003_v42 = vld [vmem:[%s5023_s28 + $0x1b0] sm:$0xf0]  ;;  %v4009_v49 = vld [vmem:[%s5023_s28 + $0x1a8] sm:$0xf] }
 0x198   : > { %1477 = vmatmul.bf16.gmra.mxu1 %v5471_v19  ;;  %v5495_v19 = vor.u32 %v4360_v32, %v4001_v31  ;;  %v5497_v20 = vor.u32 %v4358_v41, %v4003_v42  ;;  %v722_v42 = vld [vmem:[#allocation2 + $0x50] sm:$0xff] }
 0x199   : > { %v1683_v56 = vadd.f32 %v1614_v29, %v719_v48  ;;  %1566 = vmatmul.bf16.gmra.mxu2 %v5473_v8 }
 0x19a   : > { %1655 = vmatmul.bf16.gmra.mxu3 %v5475_v17  ;;  %v4410_v17 = vld [vmem:[%s5006_s18 + $0x40] sm:$0xff]  ;;  %6838 = vst [vmem:[#allocation19_spill] sm:$0xff] %v5497_v20 }
 0x19b   : > { %1716 = vst.msk [vmem:[#allocation2 + $0x38] sm:$0xff] %vm1708_vm1, %v1683_v56  ;;  %v4011_v56 = vld [vmem:[%s5023_s28 + $0x1b8] sm:$0xf0]  ;;  %2125 = vmatpush.bf16.msrb.mxu1 %v4410_v17 }
 0x19c   : > { %v1527_v23 = vpop.f32.mrf.mxu2  ;;  %v1351_v48 = vpop.f32.mrf.mxu0  ;;  %v5501_v6 = vor.u32 %v4359_v55, %v4011_v56  ;;  %v4362_v56 = vld [vmem:[%s5023_s28 + $0x1c4] sm:$0xf] }
 0x19d   : > { %v1616_v21 = vpop.f32.mrf.mxu3  ;;  %v1528_v29 = vadd.f32 %v1527_v23, %v1439_v7  ;;  %v1440_v22 = vpop.f32.mrf.mxu1  ;;  %v4402_v23 = vld [vmem:[%s5006_s18] sm:$0xff] }
 0x19e   : > { %v1441_v7 = vadd.f32 %v1440_v22, %v1351_v48  ;;  %6840 = vst [vmem:[#allocation21_spill] sm:$0xff] %v5501_v6  ;;  %2036 = vmatpush.bf16.msrb.mxu0 %v4402_v23  ;;  %v4025_v23 = vld [vmem:[%s5023_s28 + $0x1c8] sm:$0xf] }
 0x19f   : > { %v1617_v24 = vadd.f32 %v1616_v21, %v1528_v29 }
 0x1a1   : > { %v1684_v47 = vadd.f32 %v1617_v24, %v720_v30  ;;  %v5499_v24 = vor.u32 %v4361_v50, %v4009_v49  ;;  %v4364_v50 = vld [vmem:[%s5023_s28 + $0x1cc] sm:$0xf0] }
 0x1a3   : > { %1717 = vst.msk [vmem:[#allocation2 + $0x40] sm:$0xff] %vm1708_vm1, %v1684_v47 }
 0x1a4   : > { %v1529_v8 = vpop.f32.mrf.mxu2  ;;  %v1354_v29 = vpop.f32.mrf.mxu0  ;;  %6839 = vst [vmem:[#allocation20_spill] sm:$0xff] %v5499_v24 }
 0x1a5   : > { %v1618_v3 = vpop.f32.mrf.mxu3  ;;  %v1530_v21 = vadd.f32 %v1529_v8, %v1441_v7  ;;  %v1443_v30 = vpop.f32.mrf.mxu1  ;;  %v4019_v7 = vld [vmem:[%s5023_s28 + $0x1d0] sm:$0xf0] }
 0x1a6   : > { %v1444_v8 = vadd.f32 %v1443_v30, %v1354_v29  ;;  %v4027_v29 = vld [vmem:[%s5023_s28 + $0x1d8] sm:$0xf0] }
 0x1a7   : > { %v1619_v48 = vadd.f32 %v1618_v3, %v1530_v21  ;;  %1393 = vmatmul.bf16.gmra.mxu0 %v5495_v19  ;;  %v4365_v3 = vld [vmem:[%s5023_s28 + $0x1d4] sm:$0xf0]  ;;  %v4363_v21 = vld [vmem:[%s5023_s28 + $0x1cc] sm:$0xf] }
 0x1a8   : > { %1482 = vmatmul.bf16.gmra.mxu1 %v5497_v20 }
 0x1a9   : > { %v1685_v22 = vadd.f32 %v1619_v48, %v721_v18  ;;  %1571 = vmatmul.bf16.gmra.mxu2 %v5499_v24  ;;  %v4017_v18 = vld [vmem:[%s5023_s28 + $0x1c0] sm:$0xf]  ;;  %v5521_v24 = vor.u32 %v4365_v3, %v4025_v23 }
 0x1aa   : > { %1660 = vmatmul.bf16.gmra.mxu3 %v5501_v6  ;;  %v5517_v6 = vor.u32 %v4364_v50, %v4017_v18  ;;  %v724_v23 = vld [vmem:[#allocation2 + $0x60] sm:$0xff] }
 0x1ab   : > { %1718 = vst.msk [vmem:[#allocation2 + $0x48] sm:$0xff] %vm1708_vm1, %v1685_v22 }
 0x1ac   : > { %v1532_v17 = vpop.f32.mrf.mxu2  ;;  %v1356_v47 = vpop.f32.mrf.mxu0  ;;  %6841 = vst [vmem:[#allocation22_spill] sm:$0xff] %v5517_v6 }
 0x1ad   : > { %v1621_v31 = vpop.f32.mrf.mxu3  ;;  %v1533_v32 = vadd.f32 %v1532_v17, %v1444_v8  ;;  %v1445_v41 = vpop.f32.mrf.mxu1  ;;  %v5519_v8 = vor.u32 %v4362_v56, %v4019_v7  ;;  %6843 = vst [vmem:[#allocation24_spill] sm:$0xff] %v5521_v24 }
 0x1ae   : > { %v1446_v30 = vadd.f32 %v1445_v41, %v1356_v47 }
 0x1af   : > { %v1622_v49 = vadd.f32 %v1621_v31, %v1533_v32  ;;  %6842 = vst [vmem:[#allocation23_spill] sm:$0xff] %v5519_v8 }
 0x1b1   : > { %v1686_v55 = vadd.f32 %v1622_v49, %v722_v42  ;;  %v5523_v42 = vor.u32 %v4363_v21, %v4027_v29  ;;  %v723_v49 = vld [vmem:[#allocation2 + $0x58] sm:$0xff]  ;;  %v4368_v21 = vld [vmem:[%s5023_s28 + $0x1ec] sm:$0xf0] }
 0x1b3   : > { %1719 = vst.msk [vmem:[#allocation2 + $0x50] sm:$0xff] %vm1708_vm1, %v1686_v55 }
 0x1b4   : > { %v1534_v48 = vpop.f32.mrf.mxu2  ;;  %v1359_v31 = vpop.f32.mrf.mxu0  ;;  %6844 = vst [vmem:[#allocation25_spill] sm:$0xff] %v5523_v42 }
 0x1b5   : > { %v1623_v22 = vpop.f32.mrf.mxu3  ;;  %v1535_v17 = vadd.f32 %v1534_v48, %v1446_v30  ;;  %v1448_v32 = vpop.f32.mrf.mxu1  ;;  %v4366_v30 = vld [vmem:[%s5023_s28 + $0x1e4] sm:$0xf]  ;;  %v4035_v48 = vld [vmem:[%s5023_s28 + $0x1f0] sm:$0xf0] }
 0x1b6   : > { %v1449_v41 = vadd.f32 %v1448_v32, %v1359_v31  ;;  %v4367_v31 = vld [vmem:[%s5023_s28 + $0x1ec] sm:$0xf]  ;;  %v4043_v32 = vld [vmem:[%s5023_s28 + $0x1f8] sm:$0xf0] }
 0x1b7   : > { %v1624_v20 = vadd.f32 %v1623_v22, %v1535_v17  ;;  %1398 = vmatmul.bf16.gmra.mxu0 %v5517_v6  ;;  %v4041_v22 = vld [vmem:[%s5023_s28 + $0x1e8] sm:$0xf]  ;;  %v4369_v17 = vld [vmem:[%s5023_s28 + $0x1f4] sm:$0xf0] }
 0x1b8   : > { %1487 = vmatmul.bf16.gmra.mxu1 %v5519_v8  ;;  %v5543_v8 = vor.u32 %v4369_v17, %v4041_v22  ;;  %v726_v22 = vld [vmem:[#allocation2 + $0x70] sm:$0xff] }
 0x1b9   : > { %v1687_v47 = vadd.f32 %v1624_v20, %v723_v49  ;;  %1576 = vmatmul.bf16.gmra.mxu2 %v5521_v24  ;;  %v4033_v20 = vld [vmem:[%s5023_s28 + $0x1e0] sm:$0xf] }
 0x1ba   : > { %1665 = vmatmul.bf16.gmra.mxu3 %v5523_v42  ;;  %v5539_v24 = vor.u32 %v4368_v21, %v4033_v20 }
 0x1bb   : > { %1720 = vst.msk [vmem:[#allocation2 + $0x58] sm:$0xff] %vm1708_vm1, %v1687_v47 }
 0x1bc   : > { %v1537_v18 = vpop.f32.mrf.mxu2  ;;  %v1361_v56 = vpop.f32.mrf.mxu0 }
 0x1bd   : > { %v1626_v50 = vpop.f32.mrf.mxu3  ;;  %v1538_v55 = vadd.f32 %v1537_v18, %v1449_v41  ;;  %v1450_v7 = vpop.f32.mrf.mxu1  ;;  %v5541_v41 = vor.u32 %v4366_v30, %v4035_v48 }
 0x1be   : > { %v1451_v49 = vadd.f32 %v1450_v7, %v1361_v56 }
 0x1bf   : > { %v1627_v3 = vadd.f32 %v1626_v50, %v1538_v55 }
 0x1c1   : > { %v1688_v29 = vadd.f32 %v1627_v3, %v724_v23  ;;  %v5545_v23 = vor.u32 %v4367_v31, %v4043_v32  ;;  %v725_v3 = vld [vmem:[#allocation2 + $0x68] sm:$0xff] }
 0x1c3   : > { %1721 = vst.msk [vmem:[#allocation2 + $0x60] sm:$0xff] %vm1708_vm1, %v1688_v29 }
 0x1c4   : > { %v1539_v47 = vpop.f32.mrf.mxu2  ;;  %v1364_v50 = vpop.f32.mrf.mxu0 }
 0x1c5   : > { %v1628_v42 = vpop.f32.mrf.mxu3  ;;  %v1540_v18 = vadd.f32 %v1539_v47, %v1451_v49  ;;  %v1453_v55 = vpop.f32.mrf.mxu1 }
 0x1c6   : > { %v1454_v7 = vadd.f32 %v1453_v55, %v1364_v50  ;;  %v727_v50 = vld [vmem:[#allocation2 + $0x78] sm:$0xff] }
 0x1c7   : > { %v1629_v6 = vadd.f32 %v1628_v42, %v1540_v18  ;;  %1403 = vmatmul.bf16.gmra.mxu0 %v5539_v24 }
 0x1c8   : > { %1492 = vmatmul.bf16.gmra.mxu1 %v5541_v41 }
 0x1c9   : > { %v1689_v56 = vadd.f32 %v1629_v6, %v725_v3  ;;  %1581 = vmatmul.bf16.gmra.mxu2 %v5543_v8 }
 0x1ca   : > { %1670 = vmatmul.bf16.gmra.mxu3 %v5545_v23 }
 0x1cb   : > { %1722 = vst.msk [vmem:[#allocation2 + $0x68] sm:$0xff] %vm1708_vm1, %v1689_v56 }
 0x1cc   : > { %v1542_v20 = vpop.f32.mrf.mxu2  ;;  %v1366_v30 = vpop.f32.mrf.mxu0 }
 0x1cd   : > { %v1631_v21 = vpop.f32.mrf.mxu3  ;;  %v1543_v29 = vadd.f32 %v1542_v20, %v1454_v7  ;;  %v1455_v48 = vpop.f32.mrf.mxu1 }
 0x1ce   : > { %v1456_v31 = vadd.f32 %v1455_v48, %v1366_v30  ;;  %v728_v48 = vld [vmem:[#allocation2 + $0x80] sm:$0xff] }
 0x1cf   : > { %v1632_v17 = vadd.f32 %v1631_v21, %v1543_v29 }
 0x1d1   : > { %v1690_v42 = vadd.f32 %v1632_v17, %v726_v22 }
 0x1d3   : > { %1723 = vst.msk [vmem:[#allocation2 + $0x70] sm:$0xff] %vm1708_vm1, %v1690_v42 }
 0x1d4   : > { %v1544_v32 = vpop.f32.mrf.mxu2  ;;  %v1369_v47 = vpop.f32.mrf.mxu0 }
 0x1d5   : > { %v1633_v6 = vpop.f32.mrf.mxu3  ;;  %v1545_v49 = vadd.f32 %v1544_v32, %v1456_v31  ;;  %v1458_v18 = vpop.f32.mrf.mxu1 }
 0x1d6   : > { %v1459_v56 = vadd.f32 %v1458_v18, %v1369_v47 }
 0x1d7   : > { %v1634_v55 = vadd.f32 %v1633_v6, %v1545_v49  ;;  %2037 = vmatmul.bf16.vlgmr.msrb.gmra.mxu0 %v5196_v43  ;;  %v729_v6 = vld [vmem:[#allocation2 + $0x88] sm:$0xff] }
 0x1d8   : > { %2126 = vmatmul.bf16.vlgmr.msrb.gmra.mxu1 %v5198_v44 }
 0x1d9   : > { %v1691_v3 = vadd.f32 %v1634_v55, %v727_v50  ;;  %2215 = vmatmul.bf16.vlgmr.msrb.gmra.mxu2 %v5200_v45 }
 0x1da   : > { %2304 = vmatmul.bf16.vlgmr.msrb.gmra.mxu3 %v5202_v46 }
 0x1db   : > { %1724 = vst.msk [vmem:[#allocation2 + $0x78] sm:$0xff] %vm1708_vm1, %v1691_v3 }
 0x1dc   : > { %v1547_v7 = vpop.f32.mrf.mxu2  ;;  %v1371_v29 = vpop.f32.mrf.mxu0 }
 0x1dd   : > { %v1636_v20 = vpop.f32.mrf.mxu3  ;;  %v1548_v21 = vadd.f32 %v1547_v7, %v1459_v56  ;;  %v1460_v30 = vpop.f32.mrf.mxu1  ;;  %v730_v7 = vld [vmem:[#allocation2 + $0x90] sm:$0xff] }
 0x1de   : > { %v1461_v43 = vadd.f32 %v1460_v30, %v1371_v29 }
 0x1df   : > { %v1637_v22 = vadd.f32 %v1636_v20, %v1548_v21 }
 0x1e1   : > { %v1692_v17 = vadd.f32 %v1637_v22, %v728_v48  ;;  %v731_v22 = vld [vmem:[#allocation2 + $0x98] sm:$0xff] }
 0x1e3   : > { %1725 = vst.msk [vmem:[#allocation2 + $0x80] sm:$0xff] %vm1708_vm1, %v1692_v17 }
 0x1e4   : > { %v1549_v44 = vpop.f32.mrf.mxu2  ;;  %v1374_v32 = vpop.f32.mrf.mxu0 }
 0x1e5   : > { %v1638_v42 = vpop.f32.mrf.mxu3  ;;  %v1550_v31 = vadd.f32 %v1549_v44, %v1461_v43  ;;  %v1463_v45 = vpop.f32.mrf.mxu1 }
 0x1e6   : > { %v1464_v47 = vadd.f32 %v1463_v45, %v1374_v32 }
 0x1e7   : > { %v1639_v46 = vadd.f32 %v1638_v42, %v1550_v31  ;;  %2042 = vmatmul.bf16.gmra.mxu0 %v5222_v61 }
 0x1e8   : > { %2131 = vmatmul.bf16.gmra.mxu1 %v5224_v62 }
 0x1e9   : > { %v1693_v49 = vadd.f32 %v1639_v46, %v729_v6  ;;  %2220 = vmatmul.bf16.gmra.mxu2 %v5226_v63  ;;  %v732_v6 = vld [vmem:[#allocation2 + $0xa0] sm:$0xff] }
 0x1ea   : > { %2309 = vmatmul.bf16.gmra.mxu3 %v5228_v0 }
 0x1eb   : > { %1726 = vst.msk [vmem:[#allocation2 + $0x88] sm:$0xff] %vm1708_vm1, %v1693_v49 }
 0x1ec   : > { %v1552_v18 = vpop.f32.mrf.mxu2  ;;  %v1376_v3 = vpop.f32.mrf.mxu0 }
 0x1ed   : > { %v1641_v50 = vpop.f32.mrf.mxu3  ;;  %v1553_v55 = vadd.f32 %v1552_v18, %v1464_v47  ;;  %v1465_v56 = vpop.f32.mrf.mxu1 }
 0x1ee   : > { %v1466_v61 = vadd.f32 %v1465_v56, %v1376_v3 }
 0x1ef   : > { %v1642_v20 = vadd.f32 %v1641_v50, %v1553_v55  ;;  %v733_v55 = vld [vmem:[#allocation2 + $0xa8] sm:$0xff] }
 0x1f1   : > { %v1694_v21 = vadd.f32 %v1642_v20, %v730_v7 }
 0x1f3   : > { %1727 = vst.msk [vmem:[#allocation2 + $0x90] sm:$0xff] %vm1708_vm1, %v1694_v21 }
 0x1f4   : > { %v1554_v62 = vpop.f32.mrf.mxu2  ;;  %v1379_v48 = vpop.f32.mrf.mxu0 }
 0x1f5   : > { %v1643_v29 = vpop.f32.mrf.mxu3  ;;  %v1555_v30 = vadd.f32 %v1554_v62, %v1466_v61  ;;  %v1468_v63 = vpop.f32.mrf.mxu1 }
 0x1f6   : > { %v1469_v43 = vadd.f32 %v1468_v63, %v1379_v48 }
 0x1f7   : > { %v1644_v0 = vadd.f32 %v1643_v29, %v1555_v30  ;;  %2047 = vmatmul.bf16.gmra.mxu0 %v5242_v9  ;;  %v734_v29 = vld [vmem:[#allocation2 + $0xb0] sm:$0xff] }
 0x1f8   : > { %2136 = vmatmul.bf16.gmra.mxu1 %v5244_v10 }
 0x1f9   : > { %v1695_v17 = vadd.f32 %v1644_v0, %v731_v22  ;;  %2225 = vmatmul.bf16.gmra.mxu2 %v5246_v11 }
 0x1fa   : > { %2314 = vmatmul.bf16.gmra.mxu3 %v5248_v12 }
 0x1fb   : > { %1728 = vst.msk [vmem:[#allocation2 + $0x98] sm:$0xff] %vm1708_vm1, %v1695_v17  ;;  %v735_v17 = vld [vmem:[#allocation2 + $0xb8] sm:$0xff] }
 0x1fc   : > { %v1557_v44 = vpop.f32.mrf.mxu2  ;;  %v1381_v32 = vpop.f32.mrf.mxu0 }
 0x1fd   : > { %v1646_v42 = vpop.f32.mrf.mxu3  ;;  %v1558_v31 = vadd.f32 %v1557_v44, %v1469_v43  ;;  %v1470_v45 = vpop.f32.mrf.mxu1 }
 0x1fe   : > { %v1471_v9 = vadd.f32 %v1470_v45, %v1381_v32 }
 0x1ff   : > { %v1647_v46 = vadd.f32 %v1646_v42, %v1558_v31 }
 0x201   : > { %v1696_v49 = vadd.f32 %v1647_v46, %v732_v6  ;;  %v736_v46 = vld [vmem:[#allocation2 + $0xc0] sm:$0xff] }
 0x203   : > { %1729 = vst.msk [vmem:[#allocation2 + $0xa0] sm:$0xff] %vm1708_vm1, %v1696_v49 }
 0x204   : > { %v1559_v10 = vpop.f32.mrf.mxu2  ;;  %v1384_v50 = vpop.f32.mrf.mxu0 }
 0x205   : > { %v1648_v47 = vpop.f32.mrf.mxu3  ;;  %v1560_v18 = vadd.f32 %v1559_v10, %v1471_v9  ;;  %v1473_v11 = vpop.f32.mrf.mxu1 }
 0x206   : > { %v1474_v56 = vadd.f32 %v1473_v11, %v1384_v50  ;;  %v737_v50 = vld [vmem:[#allocation2 + $0xc8] sm:$0xff] }
 0x207   : > { %v1649_v12 = vadd.f32 %v1648_v47, %v1560_v18  ;;  %2052 = vmatmul.bf16.gmra.mxu0 %v5266_v25 }
 0x208   : > { %2141 = vmatmul.bf16.gmra.mxu1 %v5268_v26 }
 0x209   : > { %v1697_v3 = vadd.f32 %v1649_v12, %v733_v55  ;;  %2230 = vmatmul.bf16.gmra.mxu2 %v5270_v27 }
 0x20a   : > { %2319 = vmatmul.bf16.gmra.mxu3 %v5272_v28 }
 0x20b   : > { %1730 = vst.msk [vmem:[#allocation2 + $0xa8] sm:$0xff] %vm1708_vm1, %v1697_v3 }
 0x20c   : > { %v1562_v7 = vpop.f32.mrf.mxu2  ;;  %v1386_v61 = vpop.f32.mrf.mxu0 }
 0x20d   : > { %v1651_v20 = vpop.f32.mrf.mxu3  ;;  %v1563_v21 = vadd.f32 %v1562_v7, %v1474_v56  ;;  %v1475_v62 = vpop.f32.mrf.mxu1 }
 0x20e   : > { %v1476_v25 = vadd.f32 %v1475_v62, %v1386_v61 }
 0x20f   : > { %v1652_v30 = vadd.f32 %v1651_v20, %v1563_v21  ;;  %v738_v21 = vld [vmem:[#allocation2 + $0xd0] sm:$0xff] }
 0x211   : > { %v1698_v48 = vadd.f32 %v1652_v30, %v734_v29 }
 0x213   : > { %1731 = vst.msk [vmem:[#allocation2 + $0xb0] sm:$0xff] %vm1708_vm1, %v1698_v48 }
 0x214   : > { %v1564_v26 = vpop.f32.mrf.mxu2  ;;  %v1389_v0 = vpop.f32.mrf.mxu0 }
 0x215   : > { %v1653_v63 = vpop.f32.mrf.mxu3  ;;  %v1565_v22 = vadd.f32 %v1564_v26, %v1476_v25  ;;  %v1478_v27 = vpop.f32.mrf.mxu1  ;;  %v739_v25 = vld [vmem:[#allocation2 + $0xd8] sm:$0xff] }
 0x216   : > { %v1479_v44 = vadd.f32 %v1478_v27, %v1389_v0 }
 0x217   : > { %v1654_v28 = vadd.f32 %v1653_v63, %v1565_v22  ;;  %2057 = vmatmul.bf16.gmra.mxu0 %v5286_v37 }
 0x218   : > { %2146 = vmatmul.bf16.gmra.mxu1 %v5288_v38 }
 0x219   : > { %v1699_v43 = vadd.f32 %v1654_v28, %v735_v17  ;;  %2235 = vmatmul.bf16.gmra.mxu2 %v5290_v39 }
 0x21a   : > { %2324 = vmatmul.bf16.gmra.mxu3 %v5292_v40 }
 0x21b   : > { %1732 = vst.msk [vmem:[#allocation2 + $0xb8] sm:$0xff] %vm1708_vm1, %v1699_v43  ;;  %v740_v43 = vld [vmem:[#allocation2 + $0xe0] sm:$0xff] }
 0x21c   : > { %v1567_v42 = vpop.f32.mrf.mxu2  ;;  %v1391_v45 = vpop.f32.mrf.mxu0 }
 0x21d   : > { %v1656_v31 = vpop.f32.mrf.mxu3  ;;  %v1568_v32 = vadd.f32 %v1567_v42, %v1479_v44  ;;  %v1480_v6 = vpop.f32.mrf.mxu1 }
 0x21e   : > { %v1481_v37 = vadd.f32 %v1480_v6, %v1391_v45  ;;  %v741_v6 = vld [vmem:[#allocation2 + $0xe8] sm:$0xff] }
 0x21f   : > { %v1657_v49 = vadd.f32 %v1656_v31, %v1568_v32 }
 0x221   : > { %v1700_v9 = vadd.f32 %v1657_v49, %v736_v46 }
 0x223   : > { %1733 = vst.msk [vmem:[#allocation2 + $0xc0] sm:$0xff] %vm1708_vm1, %v1700_v9 }
 0x224   : > { %v1569_v38 = vpop.f32.mrf.mxu2  ;;  %v1394_v18 = vpop.f32.mrf.mxu0 }
 0x225   : > { %v1658_v10 = vpop.f32.mrf.mxu3  ;;  %v1570_v47 = vadd.f32 %v1569_v38, %v1481_v37  ;;  %v1483_v39 = vpop.f32.mrf.mxu1 }
 0x226   : > { %v1484_v55 = vadd.f32 %v1483_v39, %v1394_v18  ;;  %v742_v18 = vld [vmem:[#allocation2 + $0xf0] sm:$0xff] }
 0x227   : > { %v1659_v40 = vadd.f32 %v1658_v10, %v1570_v47  ;;  %2062 = vmatmul.bf16.gmra.mxu0 %v5310_v57 }
 0x228   : > { %2151 = vmatmul.bf16.gmra.mxu1 %v5312_v58 }
 0x229   : > { %v1701_v11 = vadd.f32 %v1659_v40, %v737_v50  ;;  %2240 = vmatmul.bf16.gmra.mxu2 %v5314_v59 }
 0x22a   : > { %2329 = vmatmul.bf16.gmra.mxu3 %v5316_v60 }
 0x22b   : > { %1734 = vst.msk [vmem:[#allocation2 + $0xc8] sm:$0xff] %vm1708_vm1, %v1701_v11 }
 0x22c   : > { %v1572_v12 = vpop.f32.mrf.mxu2  ;;  %v1396_v7 = vpop.f32.mrf.mxu0 }
 0x22d   : > { %v1661_v3 = vpop.f32.mrf.mxu3  ;;  %v1573_v56 = vadd.f32 %v1572_v12, %v1484_v55  ;;  %v1485_v20 = vpop.f32.mrf.mxu1  ;;  %v743_v12 = vld [vmem:[#allocation2 + $0xf8] sm:$0xff] }
 0x22e   : > { %v1486_v57 = vadd.f32 %v1485_v20, %v1396_v7 }
 0x22f   : > { %v1662_v61 = vadd.f32 %v1661_v3, %v1573_v56 }
 0x231   : > { %v1702_v62 = vadd.f32 %v1662_v61, %v738_v21 }
 0x233   : > { %1735 = vst.msk [vmem:[#allocation2 + $0xd0] sm:$0xff] %vm1708_vm1, %v1702_v62 }
 0x234   : > { %v1574_v58 = vpop.f32.mrf.mxu2  ;;  %v1399_v48 = vpop.f32.mrf.mxu0 }
 0x235   : > { %v1663_v29 = vpop.f32.mrf.mxu3  ;;  %v1575_v30 = vadd.f32 %v1574_v58, %v1486_v57  ;;  %v1488_v59 = vpop.f32.mrf.mxu1  ;;  %v1741_v57 = vld [vmem:[#allocation3] sm:$0xff] }
 0x236   : > { %v1489_v63 = vadd.f32 %v1488_v59, %v1399_v48 }
 0x237   : > { %v1664_v60 = vadd.f32 %v1663_v29, %v1575_v30  ;;  %2067 = vmatmul.bf16.gmra.mxu0 %v5330_v13 }
 0x238   : > { %2156 = vmatmul.bf16.gmra.mxu1 %v5332_v14 }
 0x239   : > { %v1703_v26 = vadd.f32 %v1664_v60, %v739_v25  ;;  %2245 = vmatmul.bf16.gmra.mxu2 %v5334_v15  ;;  %v1742_v25 = vld [vmem:[#allocation3 + $0x8] sm:$0xff] }
 0x23a   : > { %2334 = vmatmul.bf16.gmra.mxu3 %v5336_v16 }
 0x23b   : > { %1736 = vst.msk [vmem:[#allocation2 + $0xd8] sm:$0xff] %vm1708_vm1, %v1703_v26 }
 0x23c   : > { %v1577_v22 = vpop.f32.mrf.mxu2  ;;  %v1401_v17 = vpop.f32.mrf.mxu0 }
 0x23d   : > { %v1666_v0 = vpop.f32.mrf.mxu3  ;;  %v1578_v27 = vadd.f32 %v1577_v22, %v1489_v63  ;;  %v1490_v28 = vpop.f32.mrf.mxu1 }
 0x23e   : > { %v1491_v13 = vadd.f32 %v1490_v28, %v1401_v17  ;;  %v1743_v28 = vld [vmem:[#allocation3 + $0x10] sm:$0xff] }
 0x23f   : > { %v1667_v44 = vadd.f32 %v1666_v0, %v1578_v27 }
 0x241   : > { %v1704_v42 = vadd.f32 %v1667_v44, %v740_v43 }
 0x243   : > { %1737 = vst.msk [vmem:[#allocation2 + $0xe0] sm:$0xff] %vm1708_vm1, %v1704_v42 }
 0x244   : > { %v1579_v14 = vpop.f32.mrf.mxu2  ;;  %v1404_v45 = vpop.f32.mrf.mxu0 }
 0x245   : > { %v1668_v31 = vpop.f32.mrf.mxu3  ;;  %v1580_v32 = vadd.f32 %v1579_v14, %v1491_v13  ;;  %v1493_v15 = vpop.f32.mrf.mxu1 }
 0x246   : > { %v1494_v49 = vadd.f32 %v1493_v15, %v1404_v45  ;;  %v6846_v45 = vld [vmem:[#allocation8_spill] sm:$0xff] }
 0x247   : > { %v1669_v16 = vadd.f32 %v1668_v31, %v1580_v32  ;;  %2072 = vmatmul.bf16.gmra.mxu0 %v5354_v33  ;;  %v1744_v31 = vld [vmem:[#allocation3 + $0x18] sm:$0xff]  ;;  %v6845_v32 = vld [vmem:[#allocation7_spill] sm:$0xff] }
 0x248   : > { %2161 = vmatmul.bf16.gmra.mxu1 %v5356_v34 }
 0x249   : > { %v1705_v46 = vadd.f32 %v1669_v16, %v741_v6  ;;  %2250 = vmatmul.bf16.gmra.mxu2 %v5358_v35  ;;  %v6847_v16 = vld [vmem:[#allocation9_spill] sm:$0xff] }
 0x24a   : > { %2339 = vmatmul.bf16.gmra.mxu3 %v5360_v36 }
 0x24b   : > { %1738 = vst.msk [vmem:[#allocation2 + $0xe8] sm:$0xff] %vm1708_vm1, %v1705_v46  ;;  %v6848_v46 = vld [vmem:[#allocation10_spill] sm:$0xff] }
 0x24c   : > { %v1582_v9 = vpop.f32.mrf.mxu2  ;;  %v1406_v10 = vpop.f32.mrf.mxu0 }
 0x24d   : > { %v1671_v37 = vpop.f32.mrf.mxu3  ;;  %v1583_v38 = vadd.f32 %v1582_v9, %v1494_v49  ;;  %v1495_v47 = vpop.f32.mrf.mxu1 }
 0x24e   : > { %v1496_v33 = vadd.f32 %v1495_v47, %v1406_v10  ;;  %v1745_v47 = vld [vmem:[#allocation3 + $0x20] sm:$0xff] }
 0x24f   : > { %v1672_v39 = vadd.f32 %v1671_v37, %v1583_v38 }
 0x251   : > { %v1706_v50 = vadd.f32 %v1672_v39, %v742_v18 }
 0x253   : > { %1739 = vst.msk [vmem:[#allocation2 + $0xf0] sm:$0xff] %vm1708_vm1, %v1706_v50 }
 0x254   : > { %v1584_v34 = vpop.f32.mrf.mxu2  ;;  %v2038_v55 = vpop.f32.mrf.mxu0 }
 0x255   : > { %v1673_v40 = vpop.f32.mrf.mxu3  ;;  %v1585_v11 = vadd.f32 %v1584_v34, %v1496_v33  ;;  %v2127_v35 = vpop.f32.mrf.mxu1 }
 0x256   : > { %v2128_v56 = vadd.f32 %v2127_v35, %v2038_v55  ;;  %v1746_v35 = vld [vmem:[#allocation3 + $0x28] sm:$0xff] }
 0x257   : > { %v1674_v36 = vadd.f32 %v1673_v40, %v1585_v11  ;;  %2077 = vmatmul.bf16.gmra.mxu0 %v5374_v53 }
 0x258   : > { %2166 = vmatmul.bf16.gmra.mxu1 %v5376_v54 }
 0x259   : > { %v1707_v3 = vadd.f32 %v1674_v36, %v743_v12  ;;  %2255 = vmatmul.bf16.gmra.mxu2 %v5378_v1  ;;  %v6849_v36 = vld [vmem:[#allocation11_spill] sm:$0xff] }
 0x25a   : > { %2344 = vmatmul.bf16.gmra.mxu3 %v5380_v2 }
 0x25b   : > { %1740 = vst.msk [vmem:[#allocation2 + $0xf8] sm:$0xff] %vm1708_vm1, %v1707_v3  ;;  %v6850_v3 = vld [vmem:[#allocation12_spill] sm:$0xff] }
 0x25c   : > { %v2216_v7 = vpop.f32.mrf.mxu2  ;;  %v2040_v61 = vpop.f32.mrf.mxu0 }
 0x25d   : > { %v2305_v20 = vpop.f32.mrf.mxu3  ;;  %v2217_v21 = vadd.f32 %v2216_v7, %v2128_v56  ;;  %v2129_v62 = vpop.f32.mrf.mxu1 }
 0x25e   : > { %v2130_v53 = vadd.f32 %v2129_v62, %v2040_v61 }
 0x25f   : > { %v2306_v58 = vadd.f32 %v2305_v20, %v2217_v21  ;;  %v6851_v20 = vld [vmem:[#allocation13_spill] sm:$0xff]  ;;  %v6852_v21 = vld [vmem:[#allocation14_spill] sm:$0xff] }
 0x261   : > { %v2385_v29 = vadd.f32 %v2306_v58, %v1741_v57 }
 0x263   : > { %2417 = vst.msk [vmem:[#allocation3] sm:$0xff] %vm1708_vm1, %v2385_v29 }
 0x264   : > { %v2218_v54 = vpop.f32.mrf.mxu2  ;;  %v2043_v59 = vpop.f32.mrf.mxu0 }
 0x265   : > { %v2307_v30 = vpop.f32.mrf.mxu3  ;;  %v2219_v48 = vadd.f32 %v2218_v54, %v2130_v53  ;;  %v2132_v1 = vpop.f32.mrf.mxu1  ;;  %v1747_v53 = vld [vmem:[#allocation3 + $0x30] sm:$0xff] }
 0x266   : > { %v2133_v26 = vadd.f32 %v2132_v1, %v2043_v59 }
 0x267   : > { %v2308_v2 = vadd.f32 %v2307_v30, %v2219_v48  ;;  %2082 = vmatmul.bf16.gmra.mxu0 %v5399_v51 }
 0x268   : > { %2171 = vmatmul.bf16.gmra.mxu1 %v5401_v52 }
 0x269   : > { %v2386_v60 = vadd.f32 %v2308_v2, %v1742_v25  ;;  %2260 = vmatmul.bf16.gmra.mxu2 %v5403_v4 }
 0x26a   : > { %2349 = vmatmul.bf16.gmra.mxu3 %v5405_v5 }
 0x26b   : > { %2418 = vst.msk [vmem:[#allocation3 + $0x8] sm:$0xff] %vm1708_vm1, %v2386_v60 }
 0x26c   : > { %v2221_v63 = vpop.f32.mrf.mxu2  ;;  %v2045_v27 = vpop.f32.mrf.mxu0 }
 0x26d   : > { %v2310_v22 = vpop.f32.mrf.mxu3  ;;  %v2222_v0 = vadd.f32 %v2221_v63, %v2133_v26  ;;  %v2134_v17 = vpop.f32.mrf.mxu1  ;;  %v1748_v26 = vld [vmem:[#allocation3 + $0x38] sm:$0xff] }
 0x26e   : > { %v2135_v51 = vadd.f32 %v2134_v17, %v2045_v27 }
 0x26f   : > { %v2311_v43 = vadd.f32 %v2310_v22, %v2222_v0  ;;  %v6853_v22 = vld [vmem:[#allocation15_spill] sm:$0xff]  ;;  %v6854_v0 = vld [vmem:[#allocation16_spill] sm:$0xff] }
 0x271   : > { %v2387_v44 = vadd.f32 %v2311_v43, %v1743_v28  ;;  %v6855_v28 = vld [vmem:[#allocation17_spill] sm:$0xff]  ;;  %v6856_v43 = vld [vmem:[#allocation18_spill] sm:$0xff] }
 0x273   : > { %2419 = vst.msk [vmem:[#allocation3 + $0x10] sm:$0xff] %vm1708_vm1, %v2387_v44 }
 0x274   : > { %v2223_v52 = vpop.f32.mrf.mxu2  ;;  %v2048_v14 = vpop.f32.mrf.mxu0 }
 0x275   : > { %v2312_v42 = vpop.f32.mrf.mxu3  ;;  %v2224_v13 = vadd.f32 %v2223_v52, %v2135_v51  ;;  %v2137_v4 = vpop.f32.mrf.mxu1 }
 0x276   : > { %v2138_v6 = vadd.f32 %v2137_v4, %v2048_v14  ;;  %v1749_v14 = vld [vmem:[#allocation3 + $0x40] sm:$0xff] }
 0x277   : > { %v2313_v5 = vadd.f32 %v2312_v42, %v2224_v13  ;;  %2087 = vmatmul.bf16.gmra.mxu0 %v6845_v32 }
 0x278   : > { %2176 = vmatmul.bf16.gmra.mxu1 %v6846_v45 }
 0x279   : > { %v2388_v15 = vadd.f32 %v2313_v5, %v1744_v31  ;;  %2265 = vmatmul.bf16.gmra.mxu2 %v6847_v16 }
 0x27a   : > { %2354 = vmatmul.bf16.gmra.mxu3 %v6848_v46  ;;  %v1750_v46 = vld [vmem:[#allocation3 + $0x48] sm:$0xff] }
 0x27b   : > { %2420 = vst.msk [vmem:[#allocation3 + $0x18] sm:$0xff] %vm1708_vm1, %v2388_v15 }
 0x27c   : > { %v2226_v49 = vpop.f32.mrf.mxu2  ;;  %v2050_v38 = vpop.f32.mrf.mxu0 }
 0x27d   : > { %v2315_v9 = vpop.f32.mrf.mxu3  ;;  %v2227_v37 = vadd.f32 %v2226_v49, %v2138_v6  ;;  %v2139_v10 = vpop.f32.mrf.mxu1 }
 0x27e   : > { %v2140_v50 = vadd.f32 %v2139_v10, %v2050_v38  ;;  %v6858_v10 = vld [vmem:[#allocation20_spill] sm:$0xff] }
 0x27f   : > { %v2316_v18 = vadd.f32 %v2315_v9, %v2227_v37  ;;  %v6857_v9 = vld [vmem:[#allocation19_spill] sm:$0xff] }
 0x281   : > { %v2389_v39 = vadd.f32 %v2316_v18, %v1745_v47  ;;  %v6859_v47 = vld [vmem:[#allocation21_spill] sm:$0xff] }
 0x283   : > { %2421 = vst.msk [vmem:[#allocation3 + $0x20] sm:$0xff] %vm1708_vm1, %v2389_v39 }
 0x284   : > { %v2228_v33 = vpop.f32.mrf.mxu2  ;;  %v2053_v11 = vpop.f32.mrf.mxu0 }
 0x285   : > { %v2317_v34 = vpop.f32.mrf.mxu3  ;;  %v2229_v40 = vadd.f32 %v2228_v33, %v2140_v50  ;;  %v2142_v55 = vpop.f32.mrf.mxu1 }
 0x286   : > { %v2143_v7 = vadd.f32 %v2142_v55, %v2053_v11 }
 0x287   : > { %v2318_v12 = vadd.f32 %v2317_v34, %v2229_v40  ;;  %2092 = vmatmul.bf16.gmra.mxu0 %v6849_v36  ;;  %v1751_v40 = vld [vmem:[#allocation3 + $0x50] sm:$0xff] }
 0x288   : > { %2181 = vmatmul.bf16.gmra.mxu1 %v6850_v3 }
 0x289   : > { %v2390_v56 = vadd.f32 %v2318_v12, %v1746_v35  ;;  %2270 = vmatmul.bf16.gmra.mxu2 %v6851_v20 }
 0x28a   : > { %2359 = vmatmul.bf16.gmra.mxu3 %v6852_v21  ;;  %v6860_v21 = vld [vmem:[#allocation22_spill] sm:$0xff] }
 0x28b   : > { %2422 = vst.msk [vmem:[#allocation3 + $0x28] sm:$0xff] %vm1708_vm1, %v2390_v56 }
 0x28c   : > { %v2231_v61 = vpop.f32.mrf.mxu2  ;;  %v2055_v58 = vpop.f32.mrf.mxu0 }
 0x28d   : > { %v2320_v62 = vpop.f32.mrf.mxu3  ;;  %v2232_v57 = vadd.f32 %v2231_v61, %v2143_v7  ;;  %v2144_v29 = vpop.f32.mrf.mxu1  ;;  %v1752_v7 = vld [vmem:[#allocation3 + $0x58] sm:$0xff]  ;;  %v6861_v61 = vld [vmem:[#allocation23_spill] sm:$0xff] }
 0x28e   : > { %v2145_v48 = vadd.f32 %v2144_v29, %v2055_v58  ;;  %v6862_v58 = vld [vmem:[#allocation24_spill] sm:$0xff]  ;;  %v6863_v29 = vld [vmem:[#allocation25_spill] sm:$0xff] }
 0x28f   : > { %v2321_v54 = vadd.f32 %v2320_v62, %v2232_v57 }
 0x291   : > { %v2391_v30 = vadd.f32 %v2321_v54, %v1747_v53 }
 0x293   : > { %2423 = vst.msk [vmem:[#allocation3 + $0x30] sm:$0xff] %vm1708_vm1, %v2391_v30 }
 0x294   : > { %v2233_v59 = vpop.f32.mrf.mxu2  ;;  %v2058_v2 = vpop.f32.mrf.mxu0 }
 0x295   : > { %v2322_v1 = vpop.f32.mrf.mxu3  ;;  %v2234_v25 = vadd.f32 %v2233_v59, %v2145_v48  ;;  %v2147_v60 = vpop.f32.mrf.mxu1 }
 0x296   : > { %v2148_v17 = vadd.f32 %v2147_v60, %v2058_v2 }
 0x297   : > { %v2323_v63 = vadd.f32 %v2322_v1, %v2234_v25  ;;  %2097 = vmatmul.bf16.gmra.mxu0 %v6853_v22  ;;  %v1753_v1 = vld [vmem:[#allocation3 + $0x60] sm:$0xff] }
 0x298   : > { %2186 = vmatmul.bf16.gmra.mxu1 %v6854_v0 }
 0x299   : > { %v2392_v27 = vadd.f32 %v2323_v63, %v1748_v26  ;;  %2275 = vmatmul.bf16.gmra.mxu2 %v6855_v28 }
 0x29a   : > { %2364 = vmatmul.bf16.gmra.mxu3 %v6856_v43 }
 0x29b   : > { %2424 = vst.msk [vmem:[#allocation3 + $0x38] sm:$0xff] %vm1708_vm1, %v2392_v27 }
 0x29c   : > { %v2236_v44 = vpop.f32.mrf.mxu2  ;;  %v2060_v42 = vpop.f32.mrf.mxu0 }
 0x29d   : > { %v2325_v51 = vpop.f32.mrf.mxu3  ;;  %v2237_v52 = vadd.f32 %v2236_v44, %v2148_v17  ;;  %v2149_v13 = vpop.f32.mrf.mxu1  ;;  %v1754_v17 = vld [vmem:[#allocation3 + $0x68] sm:$0xff] }
 0x29e   : > { %v2150_v5 = vadd.f32 %v2149_v13, %v2060_v42 }
 0x29f   : > { %v2326_v4 = vadd.f32 %v2325_v51, %v2237_v52 }
 0x2a1   : > { %v2393_v31 = vadd.f32 %v2326_v4, %v1749_v14  ;;  %v1755_v4 = vld [vmem:[#allocation3 + $0x70] sm:$0xff] }
 0x2a3   : > { %2425 = vst.msk [vmem:[#allocation3 + $0x40] sm:$0xff] %vm1708_vm1, %v2393_v31 }
 0x2a4   : > { %v2238_v32 = vpop.f32.mrf.mxu2  ;;  %v2063_v6 = vpop.f32.mrf.mxu0 }
 0x2a5   : > { %v2327_v45 = vpop.f32.mrf.mxu3  ;;  %v2239_v15 = vadd.f32 %v2238_v32, %v2150_v5  ;;  %v2152_v16 = vpop.f32.mrf.mxu1 }
 0x2a6   : > { %v2153_v38 = vadd.f32 %v2152_v16, %v2063_v6  ;;  %v1756_v6 = vld [vmem:[#allocation3 + $0x78] sm:$0xff] }
 0x2a7   : > { %v2328_v49 = vadd.f32 %v2327_v45, %v2239_v15  ;;  %2102 = vmatmul.bf16.gmra.mxu0 %v5495_v19 }
 0x2a8   : > { %2191 = vmatmul.bf16.gmra.mxu1 %v6857_v9 }
 0x2a9   : > { %v2394_v37 = vadd.f32 %v2328_v49, %v1750_v46  ;;  %2280 = vmatmul.bf16.gmra.mxu2 %v6858_v10 }
 0x2aa   : > { %2369 = vmatmul.bf16.gmra.mxu3 %v6859_v47  ;;  %v1757_v47 = vld [vmem:[#allocation3 + $0x80] sm:$0xff] }
 0x2ab   : > { %2426 = vst.msk [vmem:[#allocation3 + $0x48] sm:$0xff] %vm1708_vm1, %v2394_v37 }
 0x2ac   : > { %v2241_v18 = vpop.f32.mrf.mxu2  ;;  %v2065_v33 = vpop.f32.mrf.mxu0 }
 0x2ad   : > { %v2330_v39 = vpop.f32.mrf.mxu3  ;;  %v2242_v50 = vadd.f32 %v2241_v18, %v2153_v38  ;;  %v2154_v34 = vpop.f32.mrf.mxu1 }
 0x2ae   : > { %v2155_v19 = vadd.f32 %v2154_v34, %v2065_v33 }
 0x2af   : > { %v2331_v11 = vadd.f32 %v2330_v39, %v2242_v50 }
 0x2b1   : > { %v2395_v55 = vadd.f32 %v2331_v11, %v1751_v40 }
 0x2b3   : > { %2427 = vst.msk [vmem:[#allocation3 + $0x50] sm:$0xff] %vm1708_vm1, %v2395_v55 }
 0x2b4   : > { %v2243_v35 = vpop.f32.mrf.mxu2  ;;  %v2068_v3 = vpop.f32.mrf.mxu0 }
 0x2b5   : > { %v2332_v12 = vpop.f32.mrf.mxu3  ;;  %v2244_v36 = vadd.f32 %v2243_v35, %v2155_v19  ;;  %v2157_v56 = vpop.f32.mrf.mxu1  ;;  %v1758_v19 = vld [vmem:[#allocation3 + $0x88] sm:$0xff] }
 0x2b6   : > { %v2158_v57 = vadd.f32 %v2157_v56, %v2068_v3 }
 0x2b7   : > { %v2333_v20 = vadd.f32 %v2332_v12, %v2244_v36  ;;  %2107 = vmatmul.bf16.gmra.mxu0 %v6860_v21 }
 0x2b8   : > { %2196 = vmatmul.bf16.gmra.mxu1 %v6861_v61  ;;  %v1759_v61 = vld [vmem:[#allocation3 + $0x90] sm:$0xff] }
 0x2b9   : > { %v2396_v62 = vadd.f32 %v2333_v20, %v1752_v7  ;;  %2285 = vmatmul.bf16.gmra.mxu2 %v6862_v58 }
 0x2ba   : > { %2374 = vmatmul.bf16.gmra.mxu3 %v6863_v29 }
 0x2bb   : > { %2428 = vst.msk [vmem:[#allocation3 + $0x58] sm:$0xff] %vm1708_vm1, %v2396_v62 }
 0x2bc   : > { %v2246_v53 = vpop.f32.mrf.mxu2  ;;  %v2070_v48 = vpop.f32.mrf.mxu0 }
 0x2bd   : > { %v2335_v54 = vpop.f32.mrf.mxu3  ;;  %v2247_v30 = vadd.f32 %v2246_v53, %v2158_v57  ;;  %v2159_v59 = vpop.f32.mrf.mxu1 }
 0x2be   : > { %v2160_v60 = vadd.f32 %v2159_v59, %v2070_v48  ;;  %v1760_v59 = vld [vmem:[#allocation3 + $0x98] sm:$0xff] }
 0x2bf   : > { %v2336_v25 = vadd.f32 %v2335_v54, %v2247_v30 }
 0x2c1   : > { %v2397_v2 = vadd.f32 %v2336_v25, %v1753_v1 }
 0x2c3   : > { %2429 = vst.msk [vmem:[#allocation3 + $0x60] sm:$0xff] %vm1708_vm1, %v2397_v2 }
 0x2c4   : > { %v2248_v26 = vpop.f32.mrf.mxu2  ;;  %v2073_v0 = vpop.f32.mrf.mxu0 }
 0x2c5   : > { %v2337_v63 = vpop.f32.mrf.mxu3  ;;  %v2249_v22 = vadd.f32 %v2248_v26, %v2160_v60  ;;  %v2162_v27 = vpop.f32.mrf.mxu1 }
 0x2c6   : > { %v2163_v44 = vadd.f32 %v2162_v27, %v2073_v0  ;;  %v1761_v27 = vld [vmem:[#allocation3 + $0xa0] sm:$0xff] }
 0x2c7   : > { %v2338_v28 = vadd.f32 %v2337_v63, %v2249_v22  ;;  %2112 = vmatmul.bf16.gmra.mxu0 %v5539_v24 }
 0x2c8   : > { %2201 = vmatmul.bf16.gmra.mxu1 %v5541_v41 }
 0x2c9   : > { %v2398_v43 = vadd.f32 %v2338_v28, %v1754_v17  ;;  %2290 = vmatmul.bf16.gmra.mxu2 %v5543_v8 }
 0x2ca   : > { %2379 = vmatmul.bf16.gmra.mxu3 %v5545_v23 }
 0x2cb   : > { %2430 = vst.msk [vmem:[#allocation3 + $0x68] sm:$0xff] %vm1708_vm1, %v2398_v43 }
 0x2cc   : > { %v2251_v51 = vpop.f32.mrf.mxu2  ;;  %v2075_v13 = vpop.f32.mrf.mxu0 }
 0x2cd   : > { %v2340_v52 = vpop.f32.mrf.mxu3  ;;  %v2252_v42 = vadd.f32 %v2251_v51, %v2163_v44  ;;  %v2164_v14 = vpop.f32.mrf.mxu1 }
 0x2ce   : > { %v2165_v24 = vadd.f32 %v2164_v14, %v2075_v13  ;;  %v1762_v14 = vld [vmem:[#allocation3 + $0xa8] sm:$0xff] }
 0x2cf   : > { %v2341_v31 = vadd.f32 %v2340_v52, %v2252_v42 }
 0x2d1   : > { %v2399_v5 = vadd.f32 %v2341_v31, %v1755_v4 }
 0x2d3   : > { %2431 = vst.msk [vmem:[#allocation3 + $0x70] sm:$0xff] %vm1708_vm1, %v2399_v5 }
 0x2d4   : > { %v2253_v41 = vpop.f32.mrf.mxu2  ;;  %v2078_v15 = vpop.f32.mrf.mxu0 }
 0x2d5   : > { %v2342_v32 = vpop.f32.mrf.mxu3  ;;  %v2254_v45 = vadd.f32 %v2253_v41, %v2165_v24  ;;  %v2167_v8 = vpop.f32.mrf.mxu1 }
 0x2d6   : > { %v2168_v46 = vadd.f32 %v2167_v8, %v2078_v15  ;;  %v1763_v8 = vld [vmem:[#allocation3 + $0xb0] sm:$0xff] }
 0x2d7   : > { %v2343_v23 = vadd.f32 %v2342_v32, %v2254_v45 }
 0x2d9   : > { %v2400_v16 = vadd.f32 %v2343_v23, %v1756_v6 }
 0x2db   : > { %2432 = vst.msk [vmem:[#allocation3 + $0x78] sm:$0xff] %vm1708_vm1, %v2400_v16 }
 0x2dc   : > { %v2256_v49 = vpop.f32.mrf.mxu2  ;;  %v2080_v38 = vpop.f32.mrf.mxu0 }
 0x2dd   : > { %v2345_v9 = vpop.f32.mrf.mxu3  ;;  %v2257_v37 = vadd.f32 %v2256_v49, %v2168_v46  ;;  %v2169_v10 = vpop.f32.mrf.mxu1 }
 0x2de   : > { %v2170_v50 = vadd.f32 %v2169_v10, %v2080_v38  ;;  %v1764_v10 = vld [vmem:[#allocation3 + $0xb8] sm:$0xff] }
 0x2df   : > { %v2346_v18 = vadd.f32 %v2345_v9, %v2257_v37 }
 0x2e1   : > { %v2401_v39 = vadd.f32 %v2346_v18, %v1757_v47 }
 0x2e3   : > { %2433 = vst.msk [vmem:[#allocation3 + $0x80] sm:$0xff] %vm1708_vm1, %v2401_v39 }
 0x2e4   : > { %v2258_v33 = vpop.f32.mrf.mxu2  ;;  %v2083_v11 = vpop.f32.mrf.mxu0 }
 0x2e5   : > { %v2347_v34 = vpop.f32.mrf.mxu3  ;;  %v2259_v40 = vadd.f32 %v2258_v33, %v2170_v50  ;;  %v2172_v55 = vpop.f32.mrf.mxu1 }
 0x2e6   : > { %v2173_v36 = vadd.f32 %v2172_v55, %v2083_v11  ;;  %v1765_v55 = vld [vmem:[#allocation3 + $0xc0] sm:$0xff] }
 0x2e7   : > { %v2348_v35 = vadd.f32 %v2347_v34, %v2259_v40 }
 0x2e9   : > { %v2402_v12 = vadd.f32 %v2348_v35, %v1758_v19 }
 0x2eb   : > { %2434 = vst.msk [vmem:[#allocation3 + $0x88] sm:$0xff] %vm1708_vm1, %v2402_v12 }
 0x2ec   : > { %v2261_v3 = vpop.f32.mrf.mxu2  ;;  %v2085_v20 = vpop.f32.mrf.mxu0 }
 0x2ed   : > { %v2350_v56 = vpop.f32.mrf.mxu3  ;;  %v2262_v7 = vadd.f32 %v2261_v3, %v2173_v36  ;;  %v2174_v21 = vpop.f32.mrf.mxu1 }
 0x2ee   : > { %v2175_v58 = vadd.f32 %v2174_v21, %v2085_v20  ;;  %v1766_v21 = vld [vmem:[#allocation3 + $0xc8] sm:$0xff] }
 0x2ef   : > { %v2351_v62 = vadd.f32 %v2350_v56, %v2262_v7 }
 0x2f1   : > { %v2403_v57 = vadd.f32 %v2351_v62, %v1759_v61 }
 0x2f3   : > { %2435 = vst.msk [vmem:[#allocation3 + $0x90] sm:$0xff] %vm1708_vm1, %v2403_v57 }
 0x2f4   : > { %v2263_v29 = vpop.f32.mrf.mxu2  ;;  %v2088_v30 = vpop.f32.mrf.mxu0 }
 0x2f5   : > { %v2352_v53 = vpop.f32.mrf.mxu3  ;;  %v2264_v54 = vadd.f32 %v2263_v29, %v2175_v58  ;;  %v2177_v48 = vpop.f32.mrf.mxu1 }
 0x2f6   : > { %v2178_v2 = vadd.f32 %v2177_v48, %v2088_v30  ;;  %v1767_v48 = vld [vmem:[#allocation3 + $0xd0] sm:$0xff] }
 0x2f7   : > { %v2353_v1 = vadd.f32 %v2352_v53, %v2264_v54 }
 0x2f9   : > { %v2404_v25 = vadd.f32 %v2353_v1, %v1760_v59 }
 0x2fb   : > { %2436 = vst.msk [vmem:[#allocation3 + $0x98] sm:$0xff] %vm1708_vm1, %v2404_v25 }
 0x2fc   : > { %v2266_v60 = vpop.f32.mrf.mxu2  ;;  %v2090_v22 = vpop.f32.mrf.mxu0 }
 0x2fd   : > { %v2355_v26 = vpop.f32.mrf.mxu3  ;;  %v2267_v63 = vadd.f32 %v2266_v60, %v2178_v2  ;;  %v2179_v0 = vpop.f32.mrf.mxu1 }
 0x2fe   : > { %v2180_v43 = vadd.f32 %v2179_v0, %v2090_v22  ;;  %v1768_v0 = vld [vmem:[#allocation3 + $0xd8] sm:$0xff] }
 0x2ff   : > { %v2356_v17 = vadd.f32 %v2355_v26, %v2267_v63 }
 0x301   : > { %v2405_v28 = vadd.f32 %v2356_v17, %v1761_v27 }
 0x303   : > { %2437 = vst.msk [vmem:[#allocation3 + $0xa0] sm:$0xff] %vm1708_vm1, %v2405_v28 }
 0x304   : > { %v2268_v44 = vpop.f32.mrf.mxu2  ;;  %v2093_v42 = vpop.f32.mrf.mxu0 }
 0x305   : > { %v2357_v51 = vpop.f32.mrf.mxu3  ;;  %v2269_v52 = vadd.f32 %v2268_v44, %v2180_v43  ;;  %v2182_v13 = vpop.f32.mrf.mxu1 }
 0x306   : > { %v2183_v5 = vadd.f32 %v2182_v13, %v2093_v42  ;;  %v1769_v13 = vld [vmem:[#allocation3 + $0xe0] sm:$0xff] }
 0x307   : > { %v2358_v4 = vadd.f32 %v2357_v51, %v2269_v52 }
 0x309   : > { %v2406_v31 = vadd.f32 %v2358_v4, %v1762_v14 }
 0x30b   : > { %2438 = vst.msk [vmem:[#allocation3 + $0xa8] sm:$0xff] %vm1708_vm1, %v2406_v31 }
 0x30c   : > { %v2271_v24 = vpop.f32.mrf.mxu2  ;;  %v2095_v45 = vpop.f32.mrf.mxu0 }
 0x30d   : > { %v2360_v41 = vpop.f32.mrf.mxu3  ;;  %v2272_v32 = vadd.f32 %v2271_v24, %v2183_v5  ;;  %v2184_v15 = vpop.f32.mrf.mxu1 }
 0x30e   : > { %v2185_v16 = vadd.f32 %v2184_v15, %v2095_v45 }
 0x30f   : > { %v2361_v6 = vadd.f32 %v2360_v41, %v2272_v32  ;;  %v1770_v32 = vld [vmem:[#allocation3 + $0xe8] sm:$0xff] }
 0x311   : > { %v2407_v23 = vadd.f32 %v2361_v6, %v1763_v8 }
 0x313   : > { %2439 = vst.msk [vmem:[#allocation3 + $0xb0] sm:$0xff] %vm1708_vm1, %v2407_v23 }
 0x314   : > { %v2273_v46 = vpop.f32.mrf.mxu2  ;;  %v2098_v37 = vpop.f32.mrf.mxu0 }
 0x315   : > { %v2362_v49 = vpop.f32.mrf.mxu3  ;;  %v2274_v9 = vadd.f32 %v2273_v46, %v2185_v16  ;;  %v2187_v38 = vpop.f32.mrf.mxu1 }
 0x316   : > { %v2188_v39 = vadd.f32 %v2187_v38, %v2098_v37 }
 0x317   : > { %v2363_v47 = vadd.f32 %v2362_v49, %v2274_v9  ;;  %v1771_v9 = vld [vmem:[#allocation3 + $0xf0] sm:$0xff] }
 0x319   : > { %v2408_v18 = vadd.f32 %v2363_v47, %v1764_v10 }
 0x31b   : > { %2440 = vst.msk [vmem:[#allocation3 + $0xb8] sm:$0xff] %vm1708_vm1, %v2408_v18 }
 0x31c   : > { %v2276_v50 = vpop.f32.mrf.mxu2  ;;  %v2100_v40 = vpop.f32.mrf.mxu0 }
 0x31d   : > { %v2365_v33 = vpop.f32.mrf.mxu3  ;;  %v2277_v34 = vadd.f32 %v2276_v50, %v2188_v39  ;;  %v2189_v11 = vpop.f32.mrf.mxu1 }
 0x31e   : > { %v2190_v12 = vadd.f32 %v2189_v11, %v2100_v40 }
 0x31f   : > { %v2366_v19 = vadd.f32 %v2365_v33, %v2277_v34  ;;  %v1772_v33 = vld [vmem:[#allocation3 + $0xf8] sm:$0xff] }
 0x321   : > { %v2409_v35 = vadd.f32 %v2366_v19, %v1765_v55 }
 0x323   : > { %2441 = vst.msk [vmem:[#allocation3 + $0xc0] sm:$0xff] %vm1708_vm1, %v2409_v35 }
 0x324   : > { %v2278_v36 = vpop.f32.mrf.mxu2  ;;  %v2103_v7 = vpop.f32.mrf.mxu0 }
 0x325   : > { %v2367_v3 = vpop.f32.mrf.mxu3  ;;  %v2279_v56 = vadd.f32 %v2278_v36, %v2190_v12  ;;  %v2192_v20 = vpop.f32.mrf.mxu1 }
 0x326   : > { %v2193_v57 = vadd.f32 %v2192_v20, %v2103_v7 }
 0x327   : > { %v2368_v61 = vadd.f32 %v2367_v3, %v2279_v56 }
 0x329   : > { %v2410_v62 = vadd.f32 %v2368_v61, %v1766_v21 }
 0x32b   : > { %2442 = vst.msk [vmem:[#allocation3 + $0xc8] sm:$0xff] %vm1708_vm1, %v2410_v62 }
 0x32c   : > { %v2281_v58 = vpop.f32.mrf.mxu2  ;;  %v2105_v54 = vpop.f32.mrf.mxu0 }
 0x32d   : > { %v2370_v29 = vpop.f32.mrf.mxu3  ;;  %v2282_v53 = vadd.f32 %v2281_v58, %v2193_v57  ;;  %v2194_v30 = vpop.f32.mrf.mxu1 }
 0x32e   : > { %v2195_v25 = vadd.f32 %v2194_v30, %v2105_v54 }
 0x32f   : > { %v2371_v59 = vadd.f32 %v2370_v29, %v2282_v53 }
 0x331   : > { %v2411_v1 = vadd.f32 %v2371_v59, %v1767_v48 }
 0x333   : > { %2443 = vst.msk [vmem:[#allocation3 + $0xd0] sm:$0xff] %vm1708_vm1, %v2411_v1 }
 0x334   : > { %v2283_v2 = vpop.f32.mrf.mxu2  ;;  %v2108_v63 = vpop.f32.mrf.mxu0 }
 0x335   : > { %v2372_v60 = vpop.f32.mrf.mxu3  ;;  %v2284_v26 = vadd.f32 %v2283_v2, %v2195_v25  ;;  %v2197_v22 = vpop.f32.mrf.mxu1 }
 0x336   : > { %v2198_v28 = vadd.f32 %v2197_v22, %v2108_v63 }
 0x337   : > { %v2373_v27 = vadd.f32 %v2372_v60, %v2284_v26 }
 0x339   : > { %v2412_v17 = vadd.f32 %v2373_v27, %v1768_v0 }
 0x33b   : > { %2444 = vst.msk [vmem:[#allocation3 + $0xd8] sm:$0xff] %vm1708_vm1, %v2412_v17 }
 0x33c   : > { %v2286_v43 = vpop.f32.mrf.mxu2  ;;  %v2110_v52 = vpop.f32.mrf.mxu0 }
 0x33d   : > { %v2375_v44 = vpop.f32.mrf.mxu3  ;;  %v2287_v51 = vadd.f32 %v2286_v43, %v2198_v28  ;;  %v2199_v42 = vpop.f32.mrf.mxu1 }
 0x33e   : > { %v2200_v31 = vadd.f32 %v2199_v42, %v2110_v52 }
 0x33f   : > { %v2376_v14 = vadd.f32 %v2375_v44, %v2287_v51 }
 0x341   : > { %v2413_v4 = vadd.f32 %v2376_v14, %v1769_v13 }
 0x343   : > { %2445 = vst.msk [vmem:[#allocation3 + $0xe0] sm:$0xff] %vm1708_vm1, %v2413_v4 }
 0x344   : > { %v2288_v5 = vpop.f32.mrf.mxu2  ;;  %v2113_v45 = vpop.f32.mrf.mxu0 }
 0x345   : > { %v2377_v24 = vpop.f32.mrf.mxu3  ;;  %v2289_v41 = vadd.f32 %v2288_v5, %v2200_v31  ;;  %v2202_v15 = vpop.f32.mrf.mxu1 }
 0x346   : > { %v2203_v23 = vadd.f32 %v2202_v15, %v2113_v45 }
 0x347   : > { %v2378_v8 = vadd.f32 %v2377_v24, %v2289_v41 }
 0x349   : > { %v2414_v6 = vadd.f32 %v2378_v8, %v1770_v32 }
 0x34b   : > { %2446 = vst.msk [vmem:[#allocation3 + $0xe8] sm:$0xff] %vm1708_vm1, %v2414_v6 }
 0x34c   : > { %v2291_v16 = vpop.f32.mrf.mxu2  ;;  %v2115_v38 = vpop.f32.mrf.mxu0 }
 0x34d   : > { %v2380_v46 = vpop.f32.mrf.mxu3  ;;  %v2292_v49 = vadd.f32 %v2291_v16, %v2203_v23  ;;  %v2204_v10 = vpop.f32.mrf.mxu1 }
 0x34e   : > { %v2205_v18 = vadd.f32 %v2204_v10, %v2115_v38 }
 0x34f   : > { %v2381_v37 = vadd.f32 %v2380_v46, %v2292_v49 }
 0x351   : > { %v2415_v47 = vadd.f32 %v2381_v37, %v1771_v9 }
 0x353   : > { %2447 = vst.msk [vmem:[#allocation3 + $0xf0] sm:$0xff] %vm1708_vm1, %v2415_v47 }
 0x354   : > { %v2293_v39 = vpop.f32.mrf.mxu2 }
 0x355   : > { %v2294_v50 = vadd.f32 %v2293_v39, %v2205_v18  ;;  %v2382_v34 = vpop.f32.mrf.mxu3 }
 0x357   : > { %v2383_v40 = vadd.f32 %v2382_v34, %v2294_v50  ;;  %2452 = sbr.rel (%p4303_p13) target bundleno = 1217 (0x4c1), region = 83 }
 0x359   : > { %v2416_v11 = vadd.f32 %v2383_v40, %v1772_v33 }
 0x35b   : > { %2448 = vst.msk [vmem:[#allocation3 + $0xf8] sm:$0xff] %vm1708_vm1, %v2416_v11 }
 0x35c   : > { %v2455_v55 = vld [vmem:[#allocation2 + $0x10] sm:$0xff]  ;;  %v5670_v19 = vld [vmem:[%s6792_s3] ss:$0 sm:$0xff]  ;;  %v2456_v61 = vld [vmem:[#allocation2 + $0x18] sm:$0xff] }
 0x35d   : > { %v5675_v35 = vld [vmem:[%s6794_s5] ss:$0 sm:$0xff]  ;;  %v2491_v12 = vadd.f32 %v5670_v19, %v2455_v55  ;;  %v2454_v62 = vld [vmem:[#allocation2 + $0x8] sm:$0xff]  ;;  %v2559_v58 = vld [vmem:[#allocation3 + $0x10] sm:$0xff]  ;;  %v2492_v29 = vadd.f32 %v5670_v19, %v2456_v61 }
 0x35e   : > { %v5681_v36 = vld [vmem:[%s6793_s4] ss:$0 sm:$0xff]  ;;  %v2458_v57 = vld [vmem:[#allocation2 + $0x28] sm:$0xff]  ;;  %v2490_v53 = vadd.f32 %v5670_v19, %v2454_v62  ;;  %v2460_v30 = vld [vmem:[#allocation2 + $0x38] sm:$0xff] }
 0x35f   : > { %v2453_v3 = vld [vmem:[#allocation2] sm:$0xff]  ;;  %v2527_v7 = vmul.f32 %v5675_v35, %v2491_v12  ;;  %v2494_v54 = vadd.f32 %v5670_v19, %v2458_v57  ;;  %v2528_v25 = vmul.f32 %v5675_v35, %v2492_v29  ;;  %v2496_v26 = vadd.f32 %v5670_v19, %v2460_v30  ;;  %v2459_v63 = vld [vmem:[#allocation2 + $0x30] sm:$0xff]  ;;  %v2462_v11 = vld [vmem:[#allocation2 + $0x48] sm:$0xff] }
 0x360   : > { %v2457_v56 = vld [vmem:[#allocation2 + $0x20] sm:$0xff]  ;;  %v2489_v20 = vadd.f32 %v5670_v19, %v2453_v3  ;;  %v2526_v2 = vmul.f32 %v5675_v35, %v2490_v53  ;;  %v2595_v22 = vadd.f32 %v5681_v36, %v2559_v58  ;;  %v2495_v14 = vadd.f32 %v5670_v19, %v2459_v63  ;;  %v2463_v49 = vld [vmem:[#allocation2 + $0x50] sm:$0xff] }
 0x361   : > { %v2493_v21 = vadd.f32 %v5670_v19, %v2457_v56  ;;  %v2663_v48 = vadd.f32 2.0, %v2527_v7  ;;  %v2530_v60 = vmul.f32 %v5675_v35, %v2494_v54  ;;  %v2664_v28 = vadd.f32 2.0, %v2528_v25  ;;  %v2461_v4 = vld [vmem:[#allocation2 + $0x40] sm:$0xff]  ;;  %v3303_v50 = vld [vmem:[%s5011_s17 + $0x10] sm:$0xff] }
 0x362   : > { %v2525_v59 = vmul.f32 %v5675_v35, %v2489_v20  ;;  %v2662_v43 = vadd.f32 2.0, %v2526_v2  ;;  %v2532_v51 = vmul.f32 %v5675_v35, %v2496_v26  ;;  %v5701_v31 = vld [vmem:[%s6795_s6] ss:$0 sm:$0xff]  ;;  %v2531_v8 = vmul.f32 %v5675_v35, %v2495_v14  ;;  %v2560_v20 = vld [vmem:[#allocation3 + $0x18] sm:$0xff] }
 0x363   : > { %v2529_v1 = vmul.f32 %v5675_v35, %v2493_v21  ;;  %v2695_v0 = vsub.f32 0.0, %v2663_v48  ;;  %v2666_v44 = vadd.f32 2.0, %v2530_v60  ;;  %v2696_v5 = vsub.f32 0.0, %v2664_v28  ;;  %v2557_v10 = vld [vmem:[#allocation3] sm:$0xff] }
 0x364   : > { %v2661_v27 = vadd.f32 2.0, %v2525_v59  ;;  %v2694_v24 = vsub.f32 0.0, %v2662_v43  ;;  %v2668_v32 = vadd.f32 2.0, %v2532_v51  ;;  %v2497_v23 = vadd.f32 %v5670_v19, %v2461_v4  ;;  %v2561_v12 = vld [vmem:[#allocation3 + $0x20] sm:$0xff] }
 0x365   : > { %v2665_v17 = vadd.f32 2.0, %v2529_v1  ;;  %v2729_v52 = vmul.f32 1.442695, %v2695_v0  ;;  %v2698_v41 = vsub.f32 0.0, %v2666_v44  ;;  %v2731_v6 = vmul.f32 1.442695, %v2696_v5 }
 0x366   : > { %v2693_v42 = vsub.f32 0.0, %v2661_v27  ;;  %v2700_v16 = vsub.f32 0.0, %v2668_v32  ;;  %v2667_v46 = vadd.f32 2.0, %v2531_v8  ;;  %v2631_v9 = vmul.f32 %v5701_v31, %v2595_v22  ;;  %v3301_v1 = vld [vmem:[%s5011_s17] sm:$0xff] }
 0x367   : > { %v2697_v13 = vsub.f32 0.0, %v2665_v17  ;;  %4496 = vpow2.f32 %v2729_v52  ;;  %v2727_v37 = vmul.f32 1.442695, %v2694_v24  ;;  %v2735_v38 = vmul.f32 1.442695, %v2698_v41  ;;  %v3305_v52 = vld [vmem:[%s5011_s17 + $0x20] sm:$0xff] }
 0x368   : > { %v2725_v45 = vmul.f32 1.442695, %v2693_v42  ;;  %v2699_v47 = vsub.f32 0.0, %v2667_v46  ;;  %v2533_v18 = vmul.f32 %v5675_v35, %v2497_v23  ;;  %v2499_v39 = vadd.f32 %v5670_v19, %v2463_v49  ;;  %v2558_v42 = vld [vmem:[#allocation3 + $0x8] sm:$0xff] }
 0x369   : > { %v2733_v15 = vmul.f32 1.442695, %v2697_v13  ;;  %v2593_v33 = vadd.f32 %v5681_v36, %v2557_v10  ;;  %v2739_v40 = vmul.f32 1.442695, %v2700_v16  ;;  %v5712_v7 = vadd.f32 %v3303_v50, %v2631_v9 }
 0x36a   : > { %4498 = vpow2.f32 %v2725_v45  ;;  %v2737_v3 = vmul.f32 1.442695, %v2699_v47  ;;  %v5714_v21 = vadd.f32 2.0, %v2533_v18  ;;  %v2535_v61 = vmul.f32 %v5675_v35, %v2499_v39  ;;  %v3304_v45 = vld [vmem:[%s5011_s17 + $0x18] sm:$0xff] }
 0x36b   : > { %4500 = vpow2.f32 %v2733_v15  ;;  %v2629_v57 = vmul.f32 %v5701_v31, %v2593_v33  ;;  %v2597_v58 = vadd.f32 %v5681_v36, %v2561_v12  ;;  %v5721_v29 = vadd.f32 %v5670_v19, %v2462_v11  ;;  %v2562_v15 = vld [vmem:[#allocation3 + $0x28] sm:$0xff] }
 0x36c   : > { %4502 = vpow2.f32 %v2731_v6  ;;  %v2596_v25 = vadd.f32 %v5681_v36, %v2560_v20  ;;  %v2701_v60 = vsub.f32 0.0, %v5714_v21  ;;  %v5736_v26 = vadd.f32 2.0, %v2535_v61 }
 0x36d   : > { %v4497_v34 = vpop.eup %4496  ;;  %4504 = vpow2.f32 %v2727_v37  ;;  %v2633_v27 = vmul.f32 %v5701_v31, %v2597_v58  ;;  %v5746_v43 = vadd.f32 %v3301_v1, %v2629_v57  ;;  %v2594_v46 = vadd.f32 %v5681_v36, %v2558_v42 }
 0x36e   : > { %v5710_v55 = vadd.f32 1.0, %v4497_v34  ;;  %4506 = vpow2.f32 %v2735_v38  ;;  %v2632_v4 = vmul.f32 %v5701_v31, %v2596_v25  ;;  %v2598_v50 = vadd.f32 %v5681_v36, %v2562_v15 }
 0x36f   : > { %v5767_v16 = vadd.f32 %v3305_v52, %v2633_v27  ;;  %v2630_v61 = vmul.f32 %v5701_v31, %v2594_v46 }
 0x370   : > { %v4499_v56 = vpop.eup %4498  ;;  %4508 = vrcp.f32 %v5710_v55  ;;  %v2860_v54 = vand.u32 2147483647, %v5710_v55  ;;  %v2862_v59 = vand.u32 2147483648, %v5710_v55  ;;  %vm2856_vm2 = vweird.f32 %v5710_v55 }
 0x371   : > { %v4501_v62 = vpop.eup %4500  ;;  %v5724_v30 = vadd.f32 1.0, %v4499_v56  ;;  %4510 = vpow2.f32 %v2739_v40  ;;  %v5778_v39 = vadd.f32 %v3304_v45, %v2632_v4  ;;  %v2634_v4 = vmul.f32 %v5701_v31, %v2598_v50 }
 0x372   : > { %v4503_v53 = vpop.eup %4502  ;;  %v5726_v48 = vadd.f32 1.0, %v4501_v62  ;;  %4512 = vpow2.f32 %v2737_v3  ;;  %vm5742_vm3 = vcmp.eq.f32.partialorder %v2860_v54, 8.507059e+37  ;;  %v2863_v14 = vor.u32 1.1754944e-38, %v2862_v59  ;;  %v3302_v54 = vld [vmem:[%s5011_s17 + $0x8] sm:$0xff] }
 0x373   : > { %v5731_v2 = vadd.f32 1.0, %v4503_v53  ;;  %4514 = vrcp.f32 %v5724_v30  ;;  %v4505_v63 = vpop.eup %4504  ;;  %v2830_v22 = vand.u32 2147483647, %v5724_v30  ;;  %v2832_v0 = vand.u32 2147483648, %v5724_v30 }
 0x374   : > { %4516 = vrcp.f32 %v5726_v48  ;;  %v4507_v17 = vpop.eup %4506  ;;  %v2890_v44 = vand.u32 2147483647, %v5726_v48  ;;  %v2892_v51 = vand.u32 2147483648, %v5726_v48  ;;  %vm2826_vm4 = vweird.f32 %v5724_v30 }
 0x375   : > { %4518 = vrcp.f32 %v5731_v2  ;;  %vm2886_vm5 = vweird.f32 %v5726_v48  ;;  %v2875_v41 = vand.u32 2147483647, %v5731_v2  ;;  %v2877_v32 = vand.u32 2147483648, %v5731_v2 }
 0x376   : > { %v4509_v13 = vpop.eup %4508  ;;  %vm5763_vm6 = vcmp.eq.f32.partialorder %v2830_v22, 8.507059e+37  ;;  %v2833_v23 = vor.u32 1.1754944e-38, %v2832_v0  ;;  %v5770_v49 = vadd.f32 1.0, %v4505_v63  ;;  %vm5772_vm8 = vcmp.eq.f32.partialorder %v2890_v44, 8.507059e+37  ;;  %v3308_v44 = vld [vmem:[%s5011_s17 + $0x38] sm:$0xff] }
 0x377   : > { %v5754_v5 = vpop.eup %4510  ;;  %v2852_v24 = vmul.f32 %v4509_v13, %v5710_v55  ;;  %vm2857_vm7 = vweird.f32 %v4509_v13  ;;  %v2893_v10 = vor.u32 1.1754944e-38, %v2892_v51  ;;  %vm2871_vm9 = vweird.f32 %v5731_v2 }
 0x378   : > { %v5761_v8 = vpop.eup %4512  ;;  %4520 = vrcp.f32 %v5770_v49  ;;  %vm5783_vm10 = vcmp.eq.f32.partialorder %v2875_v41, 8.507059e+37  ;;  %v2878_v11 = vor.u32 1.1754944e-38, %v2877_v32  ;;  %v5787_v12 = vadd.f32 1.0, %v4507_v17  ;;  %vm5792_vm11 = vmor %vm2856_vm2, %vm2857_vm7 }
 0x379   : > { %v4515_v9 = vpop.eup %4514  ;;  %v2853_v37 = vsub.f32 1.0, %v2852_v24  ;;  %v2845_v62 = vand.u32 2147483647, %v5770_v49  ;;  %vm2841_vm15 = vweird.f32 %v5770_v49  ;;  %v2847_v55 = vand.u32 2147483648, %v5770_v49 }
 0x37a   : > { %v4517_v47 = vpop.eup %4516  ;;  %v2822_v18 = vmul.f32 %v4515_v9, %v5724_v30  ;;  %vm2827_vm12 = vweird.f32 %v4515_v9  ;;  %4522 = vrcp.f32 %v5787_v12  ;;  %v3334_v51 = vadd.f32 %v3302_v54, %v2630_v61 }
 0x37b   : > { %v2854_v33 = vmul.f32 %v4509_v13, %v2853_v37  ;;  %v2882_v34 = vmul.f32 %v4517_v47, %v5726_v48  ;;  %v4519_v3 = vpop.eup %4518  ;;  %vm2887_vm13 = vweird.f32 %v4517_v47  ;;  %vm5806_vm0 = vmor %vm2826_vm4, %vm2827_vm12  ;;  %vm5822_vm4 = vcmp.eq.f32.partialorder %v2845_v62, 8.507059e+37  ;;  %v2565_v48 = vld [vmem:[#allocation3 + $0x40] sm:$0xff] }
 0x37c   : > { %v2823_v20 = vsub.f32 1.0, %v2822_v18  ;;  %v2867_v53 = vmul.f32 %v4519_v3, %v5731_v2  ;;  %vm2872_vm14 = vweird.f32 %v4519_v3  ;;  %vm5818_vm2 = vmor %vm2886_vm5, %vm2887_vm13  ;;  %v2848_v38 = vor.u32 1.1754944e-38, %v2847_v55  ;;  %v2564_v18 = vld [vmem:[#allocation3 + $0x38] sm:$0xff] }
 0x37d   : > { %v2855_v57 = vadd.f32 %v4509_v13, %v2854_v33  ;;  %v2883_v58 = vsub.f32 1.0, %v2882_v34  ;;  %vm2901_vm7 = vweird.f32 %v5787_v12  ;;  %v5900_v25 = vadd.f32 1.0, %v5761_v8 }
 0x37e   : > { %v2824_v59 = vmul.f32 %v4515_v9, %v2823_v20  ;;  %v2868_v22 = vsub.f32 1.0, %v2867_v53  ;;  %v5811_v0 = vpop.eup %4520  ;;  %v2600_v20 = vadd.f32 %v5681_v36, %v2564_v18 }
 0x37f   : > { %v2859_v1 = vsel %vm5792_vm11, %v4509_v13, %v2855_v57  ;;  %v2884_v63 = vmul.f32 %v4517_v47, %v2883_v58  ;;  %vm2842_vm5 = vweird.f32 %v5811_v0  ;;  %vm2916_vm13 = vweird.f32 %v5900_v25 }
 0x380   : > { %v2864_v27 = vsel %vm5742_vm3, %v2863_v14, %v2859_v1  ;;  %v2825_v17 = vadd.f32 %v4515_v9, %v2824_v59  ;;  %v2869_v13 = vmul.f32 %v4519_v3, %v2868_v22  ;;  %vm5832_vm3 = vmor %vm2871_vm9, %vm2872_vm14  ;;  %v2837_v14 = vmul.f32 %v5811_v0, %v5770_v49  ;;  %v4523_v46 = vpop.eup %4522 }
 0x381   : > { %4524 = vlog2.f32 %v2864_v27  ;;  %v3367_v52 = vmul.f32 %v5712_v7, %v2864_v27  ;;  %v2885_v42 = vadd.f32 %v4517_v47, %v2884_v63  ;;  %v2905_v7 = vand.u32 2147483647, %v5787_v12 }
 0x382   : > { %v2829_v28 = vsel %vm5806_vm0, %v4515_v9, %v2825_v17  ;;  %v2870_v41 = vadd.f32 %v4519_v3, %v2869_v13  ;;  %v2838_v15 = vsub.f32 1.0, %v2837_v14  ;;  %v2907_v9 = vand.u32 2147483648, %v5787_v12 }
 0x383   : > { %3399 = vst.msk [vmem:[%s5016_s20 + $0x10] sm:$0xff] %vm1708_vm1, %v3367_v52  ;;  %v2834_v24 = vsel %vm5763_vm6, %v2833_v23, %v2829_v28  ;;  %v2889_v2 = vsel %vm5818_vm2, %v4517_v47, %v2885_v42  ;;  %v3306_v47 = vld [vmem:[%s5011_s17 + $0x28] sm:$0xff]  ;;  %vm5868_vm6 = vmor %vm2841_vm15, %vm2842_vm5  ;;  %vm5879_vm9 = vcmp.eq.f32.partialorder %v2905_v7, 8.507059e+37  ;;  %v2636_v30 = vmul.f32 %v5701_v31, %v2600_v20 }
 0x384   : > { %4526 = vlog2.f32 %v2834_v24  ;;  %v3365_v32 = vmul.f32 %v5746_v43, %v2834_v24  ;;  %v2894_v45 = vsel %vm5772_vm8, %v2893_v10, %v2889_v2  ;;  %v2874_v23 = vsel %vm5832_vm3, %v4519_v3, %v2870_v41 }
 0x385   : > { %4528 = vlog2.f32 %v2894_v45  ;;  %v3369_v6 = vmul.f32 %v5767_v16, %v2894_v45  ;;  %v2879_v37 = vsel %vm5783_vm10, %v2878_v11, %v2874_v23  ;;  %v2839_v43 = vmul.f32 %v5811_v0, %v2838_v15  ;;  %v2464_v45 = vld [vmem:[#allocation2 + $0x58] sm:$0xff] }
 0x386   : > { %3397 = vst.msk [vmem:[%s5016_s20] sm:$0xff] %vm1708_vm1, %v3365_v32  ;;  %v2897_v10 = vmul.f32 %v4523_v46, %v5787_v12  ;;  %v3368_v16 = vmul.f32 %v5778_v39, %v2879_v37  ;;  %4530 = vlog2.f32 %v2879_v37  ;;  %vm2902_vm8 = vweird.f32 %v4523_v46 }
 0x387   : > { %v4525_v50 = vpop.eup %4524  ;;  %3401 = vst.msk [vmem:[%s5016_s20 + $0x20] sm:$0xff] %vm1708_vm1, %v3369_v6  ;;  %v2840_v40 = vadd.f32 %v5811_v0, %v2839_v43  ;;  %v5875_v3 = vadd.f32 1.0, %v5754_v5  ;;  %v2908_v49 = vor.u32 1.1754944e-38, %v2907_v9  ;;  %v3338_v56 = vadd.f32 %v3306_v47, %v2634_v4  ;;  %v2563_v5 = vld [vmem:[#allocation3 + $0x30] sm:$0xff]  ;;  %vm5894_vm10 = vmor %vm2901_vm7, %vm2902_vm8  ;;  %v2466_v43 = vld [vmem:[#allocation2 + $0x68] sm:$0xff] }
 0x388   : > { %v3434_v34 = vmul.f32 0.6931472, %v4525_v50  ;;  %v2898_v11 = vsub.f32 1.0, %v2897_v10  ;;  %3400 = vst.msk [vmem:[%s5016_s20 + $0x18] sm:$0xff] %vm1708_vm1, %v3368_v16  ;;  %v2599_v52 = vadd.f32 %v5681_v36, %v2563_v5  ;;  %v2534_v14 = vmul.f32 %v5675_v35, %v5721_v29  ;;  %v3307_v29 = vld [vmem:[%s5011_s17 + $0x30] sm:$0xff] }
 0x389   : > { %v2844_v57 = vsel %vm5868_vm6, %v5811_v0, %v2840_v40  ;;  %4532 = vrcp.f32 %v5875_v3  ;;  %v2935_v1 = vand.u32 2147483647, %v5875_v3  ;;  %v2937_v12 = vand.u32 2147483648, %v5875_v3 }
 0x38a   : > { %v4527_v61 = vpop.eup %4526  ;;  %v3499_v62 = vsel %vm1708_vm1, %v3434_v34, 0.0  ;;  %v2899_v58 = vmul.f32 %v4523_v46, %v2898_v11  ;;  %v2849_v59 = vsel %vm5822_vm4, %v2848_v38, %v2844_v57  ;;  %vm2931_vm11 = vweird.f32 %v5875_v3  ;;  %v2567_v57 = vld [vmem:[#allocation3 + $0x50] sm:$0xff] }
 0x38b   : > { %v4529_v53 = vpop.eup %4528  ;;  %3500 = vadd.xlane.f32.xlu1 %v3499_v62  ;;  %v3430_v54 = vmul.f32 0.6931472, %v4527_v61  ;;  %v3366_v22 = vmul.f32 %v3334_v51, %v2849_v59  ;;  %4534 = vlog2.f32 %v2849_v59  ;;  %v2741_v51 = vmul.f32 1.442695, %v2701_v60 }
 0x38c   : > { %v3438_v63 = vmul.f32 0.6931472, %v4529_v53  ;;  %v2900_v0 = vadd.f32 %v4523_v46, %v2899_v58  ;;  %v4531_v27 = vpop.eup %4530  ;;  %4536 = vrcp.f32 %v5900_v25  ;;  %vm5921_vm12 = vcmp.eq.f32.partialorder %v2935_v1, 8.507059e+37 }
 0x38d   : > { %v3493_v17 = vsel %vm1708_vm1, %v3430_v54, 0.0  ;;  %v3436_v13 = vmul.f32 0.6931472, %v4531_v27  ;;  %3398 = vst.msk [vmem:[%s5016_s20 + $0x8] sm:$0xff] %vm1708_vm1, %v3366_v22  ;;  %v2938_v2 = vor.u32 1.1754944e-38, %v2937_v12  ;;  %v3340_v41 = vadd.f32 %v3308_v44, %v2636_v30 }
 0x38e   : > { %3494 = vadd.xlane.f32.xlu0 %v3493_v17  ;;  %v3505_v42 = vsel %vm1708_vm1, %v3438_v63, 0.0  ;;  %v2904_v8 = vsel %vm5894_vm10, %v4523_v46, %v2900_v0  ;;  %v2635_v32 = vmul.f32 %v5701_v31, %v2599_v52  ;;  %v2601_v46 = vadd.f32 %v5681_v36, %v2565_v48  ;;  %v2566_v48 = vld [vmem:[#allocation3 + $0x48] sm:$0xff] }
 0x38f   : > { %3506 = vadd.xlane.f32.xlu2 %v3505_v42  ;;  %v2909_v28 = vsel %vm5879_vm9, %v2908_v49, %v2904_v8  ;;  %v4533_v4 = vpop.eup %4532  ;;  %v3502_v7 = vsel %vm1708_vm1, %v3436_v13, 0.0  ;;  %v2703_v6 = vsub.f32 0.0, %v5736_v26  ;;  %v2670_v37 = vadd.f32 2.0, %v2534_v14  ;;  %v2465_v26 = vld [vmem:[#allocation2 + $0x60] sm:$0xff] }
 0x390   : > { %v3370_v24 = vmul.f32 %v3338_v56, %v2909_v28  ;;  %4538 = vlog2.f32 %v2909_v28  ;;  %v2927_v60 = vmul.f32 %v4533_v4, %v5875_v3  ;;  %vm2932_vm14 = vweird.f32 %v4533_v4  ;;  %v3309_v42 = vld [vmem:[%s5011_s17 + $0x40] sm:$0xff] }
 0x391   : > { %v4535_v15 = vpop.eup %4534  ;;  %4540 = vpow2.f32 %v2741_v51  ;;  %v2920_v38 = vand.u32 2147483647, %v5900_v25  ;;  %v2922_v10 = vand.u32 2147483648, %v5900_v25  ;;  %v2745_v47 = vmul.f32 1.442695, %v2703_v6  ;;  %vm5940_vm15 = vmor %vm2931_vm11, %vm2932_vm14 }
 0x392   : > { %3402 = vst.msk [vmem:[%s5016_s20 + $0x28] sm:$0xff] %vm1708_vm1, %v3370_v24  ;;  %v3432_v23 = vmul.f32 0.6931472, %v4535_v15  ;;  %v2928_v9 = vsub.f32 1.0, %v2927_v60  ;;  %v2500_v18 = vadd.f32 %v5670_v19, %v2464_v45  ;;  %v4537_v50 = vpop.eup %4536  ;;  %v3339_v34 = vadd.f32 %v3307_v29, %v2635_v32  ;;  %v2568_v15 = vld [vmem:[#allocation3 + $0x58] sm:$0xff] }
 0x393   : > { %3503 = vadd.xlane.f32.xlu1 %v3502_v7  ;;  %v2702_v40 = vsub.f32 0.0, %v2670_v37  ;;  %v2912_v49 = vmul.f32 %v4537_v50, %v5900_v25  ;;  %v2637_v56 = vmul.f32 %v5701_v31, %v2601_v46  ;;  %4542 = vpow2.f32 %v2745_v47 }
 0x394   : > { %v3496_v16 = vsel %vm1708_vm1, %v3432_v23, 0.0  ;;  %v2929_v33 = vmul.f32 %v4533_v4, %v2928_v9  ;;  %v2502_v20 = vadd.f32 %v5670_v19, %v2466_v43  ;;  %v2536_v5 = vmul.f32 %v5675_v35, %v2500_v18 }
 0x395   : > { %v2743_v58 = vmul.f32 1.442695, %v2702_v40  ;;  %v2913_v54 = vsub.f32 1.0, %v2912_v49  ;;  %vm2917_vm0 = vweird.f32 %v4537_v50  ;;  %v2603_v3 = vadd.f32 %v5681_v36, %v2567_v57  ;;  %v3310_v49 = vld [vmem:[%s5011_s17 + $0x48] sm:$0xff] }
 0x396   : > { %v4539_v11 = vpop.eup %4538  ;;  %3497 = vadd.xlane.f32.xlu0 %v3496_v16  ;;  %v2930_v62 = vadd.f32 %v4533_v4, %v2929_v33  ;;  %v2501_v59 = vadd.f32 %v5670_v19, %v2465_v26  ;;  %v2672_v27 = vadd.f32 2.0, %v2536_v5  ;;  %v2538_v17 = vmul.f32 %v5675_v35, %v2502_v20  ;;  %vm5960_vm2 = vmor %vm2916_vm13, %vm2917_vm0 }
 0x397   : > { %v3440_v61 = vmul.f32 0.6931472, %v4539_v11  ;;  %v4541_v53 = vpop.eup %4540  ;;  %4544 = vpow2.f32 %v2743_v58  ;;  %v2914_v0 = vmul.f32 %v4537_v50, %v2913_v54  ;;  %vm5964_vm4 = vcmp.eq.f32.partialorder %v2920_v38, 8.507059e+37 }
 0x398   : > { %v2934_v1 = vsel %vm5940_vm15, %v4533_v4, %v2930_v62  ;;  %v5953_v63 = vadd.f32 1.0, %v4541_v53  ;;  %v2923_v52 = vor.u32 1.1754944e-38, %v2922_v10  ;;  %v2639_v28 = vmul.f32 %v5701_v31, %v2603_v3  ;;  %v3311_v4 = vld [vmem:[%s5011_s17 + $0x50] sm:$0xff] }
 0x399   : > { %v3508_v55 = vsel %vm1708_vm1, %v3440_v61, 0.0  ;;  %v2939_v22 = vsel %vm5921_vm12, %v2938_v2, %v2934_v1  ;;  %v4543_v13 = vpop.eup %4542  ;;  %v2915_v8 = vadd.f32 %v4537_v50, %v2914_v0  ;;  %v2704_v7 = vsub.f32 0.0, %v2672_v27  ;;  %v3312_v1 = vld [vmem:[%s5011_s17 + $0x58] sm:$0xff] }
 0x39a   : > { %3509 = vadd.xlane.f32.xlu2 %v3508_v55  ;;  %v3372_v30 = vmul.f32 %v3340_v41, %v2939_v22  ;;  %4546 = vlog2.f32 %v2939_v22  ;;  %v2952_v51 = vand.u32 2147483648, %v5953_v63  ;;  %v2950_v25 = vand.u32 2147483647, %v5953_v63 }
 0x39b   : > { %4548 = vrcp.f32 %v5953_v63  ;;  %v5975_v14 = vadd.f32 1.0, %v4543_v13  ;;  %v2537_v24 = vmul.f32 %v5675_v35, %v2501_v59  ;;  %v2919_v21 = vsel %vm5960_vm2, %v4537_v50, %v2915_v8 }
 0x39c   : > { %3404 = vst.msk [vmem:[%s5016_s20 + $0x38] sm:$0xff] %vm1708_vm1, %v3372_v30  ;;  %v5981_v60 = vadd.f32 %v3309_v42, %v2637_v56  ;;  %v2674_v2 = vadd.f32 2.0, %v2538_v17  ;;  %v2924_v32 = vsel %vm5964_vm4, %v2923_v52, %v2919_v21  ;;  %vm2946_vm3 = vweird.f32 %v5953_v63  ;;  %v2467_v17 = vld [vmem:[#allocation2 + $0x70] sm:$0xff] }
 0x39d   : > { %v4545_v41 = vpop.eup %4544  ;;  %4550 = vrcp.f32 %v5975_v14  ;;  %v2602_v45 = vadd.f32 %v5681_v36, %v2566_v48  ;;  %v3371_v29 = vmul.f32 %v3339_v34, %v2924_v32  ;;  %v5988_v46 = vor.u32 1.1754944e-38, %v2952_v51  ;;  %v2469_v48 = vld [vmem:[#allocation2 + $0x80] sm:$0xff] }
 0x39e   : > { %4552 = vlog2.f32 %v2924_v32  ;;  %v5990_v6 = vadd.f32 %v3311_v4, %v2639_v28  ;;  %vm5992_vm5 = vcmp.eq.f32.partialorder %v2950_v25, 8.507059e+37  ;;  %v2980_v37 = vand.u32 2147483647, %v5975_v14  ;;  %v2468_v25 = vld [vmem:[#allocation2 + $0x78] sm:$0xff] }
 0x39f   : > { %v5997_v43 = vadd.f32 1.0, %v4545_v41  ;;  %v2747_v38 = vmul.f32 1.442695, %v2704_v7  ;;  %v2673_v10 = vadd.f32 2.0, %v2537_v24  ;;  %3403 = vst.msk [vmem:[%s5016_s20 + $0x30] sm:$0xff] %vm1708_vm1, %v3371_v29  ;;  %v2982_v50 = vand.u32 2147483648, %v5975_v14 }
 0x3a0   : > { %v4547_v23 = vpop.eup %4546  ;;  %v2604_v16 = vadd.f32 %v5681_v36, %v2568_v15  ;;  %v2706_v33 = vsub.f32 0.0, %v2674_v2  ;;  %vm2976_vm6 = vweird.f32 %v5975_v14  ;;  %v2638_v40 = vmul.f32 %v5701_v31, %v2602_v45  ;;  %v2569_v29 = vld [vmem:[#allocation3 + $0x60] sm:$0xff] }
 0x3a1   : > { %v4549_v47 = vpop.eup %4548  ;;  %v3444_v18 = vmul.f32 0.6931472, %v4547_v23  ;;  %4554 = vrcp.f32 %v5997_v43  ;;  %v2965_v11 = vand.u32 2147483647, %v5997_v43  ;;  %v2967_v39 = vand.u32 2147483648, %v5997_v43 }
 0x3a2   : > { %v2942_v34 = vmul.f32 %v4549_v47, %v5953_v63  ;;  %vm2947_vm7 = vweird.f32 %v4549_v47  ;;  %4556 = vpow2.f32 %v2747_v38  ;;  %v2751_v61 = vmul.f32 1.442695, %v2706_v33  ;;  %v2570_v63 = vld [vmem:[#allocation3 + $0x68] sm:$0xff] }
 0x3a3   : > { %v3514_v26 = vsel %vm1708_vm1, %v3444_v18, 0.0  ;;  %v4551_v56 = vpop.eup %4550  ;;  %v2705_v62 = vsub.f32 0.0, %v2673_v10  ;;  %vm6012_vm8 = vcmp.eq.f32.partialorder %v2980_v37, 8.507059e+37  ;;  %v2983_v53 = vor.u32 1.1754944e-38, %v2982_v50  ;;  %vm6023_vm9 = vmor %vm2946_vm3, %vm2947_vm7  ;;  %v2470_v10 = vld [vmem:[#allocation2 + $0x88] sm:$0xff] }
 0x3a4   : > { %3515 = vadd.xlane.f32.xlu1 %v3514_v26  ;;  %v2943_v20 = vsub.f32 1.0, %v2942_v34  ;;  %v4553_v57 = vpop.eup %4552  ;;  %v2972_v58 = vmul.f32 %v4551_v56, %v5975_v14  ;;  %v2640_v54 = vmul.f32 %v5701_v31, %v2604_v16  ;;  %v6017_v55 = vadd.f32 %v3310_v49, %v2638_v40  ;;  %v3314_v33 = vld [vmem:[%s5011_s17 + $0x68] sm:$0xff] }
 0x3a5   : > { %v3442_v3 = vmul.f32 0.6931472, %v4553_v57  ;;  %4558 = vpow2.f32 %v2751_v61  ;;  %vm2977_vm10 = vweird.f32 %v4551_v56  ;;  %vm2961_vm11 = vweird.f32 %v5997_v43  ;;  %v2471_v57 = vld [vmem:[#allocation2 + $0x90] sm:$0xff] }
 0x3a6   : > { %v2944_v59 = vmul.f32 %v4549_v47, %v2943_v20  ;;  %v2973_v0 = vsub.f32 1.0, %v2972_v58  ;;  %v2749_v27 = vmul.f32 1.442695, %v2705_v62  ;;  %vm6029_vm12 = vcmp.eq.f32.partialorder %v2965_v11, 8.507059e+37  ;;  %vm6042_vm13 = vmor %vm2976_vm6, %vm2977_vm10 }
 0x3a7   : > { %v4555_v30 = vpop.eup %4554  ;;  %v3511_v12 = vsel %vm1708_vm1, %v3442_v3, 0.0  ;;  %v2968_v42 = vor.u32 1.1754944e-38, %v2967_v39  ;;  %v6034_v51 = vadd.f32 %v3312_v1, %v2640_v54  ;;  %v2606_v28 = vadd.f32 %v5681_v36, %v2570_v63  ;;  %v2571_v54 = vld [vmem:[#allocation3 + $0x70] sm:$0xff] }
 0x3a8   : > { %v2945_v44 = vadd.f32 %v4549_v47, %v2944_v59  ;;  %3512 = vadd.xlane.f32.xlu0 %v3511_v12  ;;  %v2974_v13 = vmul.f32 %v4551_v56, %v2973_v0  ;;  %v2957_v8 = vmul.f32 %v4555_v30, %v5997_v43  ;;  %v4557_v4 = vpop.eup %4556  ;;  %vm2962_vm14 = vweird.f32 %v4555_v30 }
 0x3a9   : > { %4560 = vpow2.f32 %v2749_v27  ;;  %v2503_v21 = vadd.f32 %v5670_v19, %v2467_v17  ;;  %v6050_v45 = vadd.f32 1.0, %v4557_v4  ;;  %v2505_v23 = vadd.f32 %v5670_v19, %v2469_v48  ;;  %vm6068_vm15 = vmor %vm2961_vm11, %vm2962_vm14  ;;  %v3313_v27 = vld [vmem:[%s5011_s17 + $0x60] sm:$0xff]  ;;  %v2472_v4 = vld [vmem:[#allocation2 + $0x98] sm:$0xff] }
 0x3aa   : > { %v2949_v7 = vsel %vm6023_vm9, %v4549_v47, %v2945_v44  ;;  %v2975_v41 = vadd.f32 %v4551_v56, %v2974_v13  ;;  %v2958_v32 = vsub.f32 1.0, %v2957_v8  ;;  %v6055_v37 = vadd.f32 %v5670_v19, %v2468_v25 }
 0x3ab   : > { %v2954_v2 = vsel %vm5992_vm5, %v5988_v46, %v2949_v7  ;;  %v4559_v15 = vpop.eup %4558  ;;  %v2642_v46 = vmul.f32 %v5701_v31, %v2606_v28  ;;  %v2995_v18 = vand.u32 2147483647, %v6050_v45  ;;  %v2997_v50 = vand.u32 2147483648, %v6050_v45 }
 0x3ac   : > { %v3373_v14 = vmul.f32 %v5981_v60, %v2954_v2  ;;  %4562 = vlog2.f32 %v2954_v2  ;;  %v2979_v9 = vsel %vm6042_vm13, %v4551_v56, %v2975_v41  ;;  %v2959_v38 = vmul.f32 %v4555_v30, %v2958_v32 }
 0x3ad   : > { %4564 = vrcp.f32 %v6050_v45  ;;  %v2984_v60 = vsel %vm6012_vm8, %v2983_v53, %v2979_v9  ;;  %v6074_v16 = vadd.f32 1.0, %v4559_v15  ;;  %v2605_v26 = vadd.f32 %v5681_v36, %v2569_v29 }
 0x3ae   : > { %3405 = vst.msk [vmem:[%s5016_s20 + $0x40] sm:$0xff] %vm1708_vm1, %v3373_v14  ;;  %v3375_v34 = vmul.f32 %v5990_v6, %v2984_v60  ;;  %4566 = vlog2.f32 %v2984_v60  ;;  %v2960_v40 = vadd.f32 %v4555_v30, %v2959_v38  ;;  %v2539_v43 = vmul.f32 %v5675_v35, %v2503_v21 }
 0x3af   : > { %v4561_v11 = vpop.eup %4560  ;;  %4568 = vrcp.f32 %v6074_v16  ;;  %v2541_v39 = vmul.f32 %v5675_v35, %v2505_v23  ;;  %v2506_v49 = vadd.f32 %v5670_v19, %v2470_v10  ;;  %vm2991_vm0 = vweird.f32 %v6050_v45 }
 0x3b0   : > { %3407 = vst.msk [vmem:[%s5016_s20 + $0x50] sm:$0xff] %vm1708_vm1, %v3375_v34  ;;  %v2964_v56 = vsel %vm6068_vm15, %v4555_v30, %v2960_v40  ;;  %v3025_v6 = vand.u32 2147483647, %v6074_v16  ;;  %v6089_v20 = vadd.f32 %v3314_v33, %v2642_v46  ;;  %vm6093_vm2 = vcmp.eq.f32.partialorder %v2995_v18, 8.507059e+37 }
 0x3b1   : > { %v2969_v62 = vsel %vm6029_vm12, %v2968_v42, %v2964_v56  ;;  %v2998_v58 = vor.u32 1.1754944e-38, %v2997_v50  ;;  %v3027_v5 = vand.u32 2147483648, %v6074_v16  ;;  %v6098_v53 = vadd.f32 1.0, %v4561_v11 }
 0x3b2   : > { %v4563_v61 = vpop.eup %4562  ;;  %v3374_v1 = vmul.f32 %v6017_v55, %v2969_v62  ;;  %4570 = vlog2.f32 %v2969_v62  ;;  %v2641_v22 = vmul.f32 %v5701_v31, %v2605_v26  ;;  %vm3021_vm4 = vweird.f32 %v6074_v16 }
 0x3b3   : > { %v4565_v3 = vpop.eup %4564  ;;  %v3446_v59 = vmul.f32 0.6931472, %v4563_v61  ;;  %4572 = vrcp.f32 %v6098_v53  ;;  %v2675_v17 = vadd.f32 2.0, %v2539_v43  ;;  %vm6109_vm5 = vcmp.eq.f32.partialorder %v3025_v6, 8.507059e+37  ;;  %v6164_v61 = vld [vmem:[%s6794_s5] ss:$0 sm:$0xff] }
 0x3b4   : > { %v2987_v0 = vmul.f32 %v4565_v3, %v6050_v45  ;;  %v4567_v30 = vpop.eup %4566  ;;  %3406 = vst.msk [vmem:[%s5016_s20 + $0x48] sm:$0xff] %vm1708_vm1, %v3374_v1  ;;  %vm2992_vm3 = vweird.f32 %v4565_v3  ;;  %v6114_v55 = vadd.f32 %v5681_v36, %v2571_v54  ;;  %v3028_v13 = vor.u32 1.1754944e-38, %v3027_v5  ;;  %v2573_v54 = vld [vmem:[#allocation3 + $0x80] sm:$0xff] }
 0x3b5   : > { %v3517_v12 = vsel %vm1708_vm1, %v3446_v59, 0.0  ;;  %v4569_v52 = vpop.eup %4568  ;;  %v3450_v42 = vmul.f32 0.6931472, %v4567_v30  ;;  %vm3006_vm6 = vweird.f32 %v6098_v53  ;;  %v3010_v28 = vand.u32 2147483647, %v6098_v53  ;;  %vm6126_vm8 = vmor %vm2991_vm0, %vm2992_vm3  ;;  %v2572_v30 = vld [vmem:[#allocation3 + $0x78] sm:$0xff] }
 0x3b6   : > { %3518 = vadd.xlane.f32.xlu2 %v3517_v12  ;;  %v2988_v63 = vsub.f32 1.0, %v2987_v0  ;;  %v3017_v8 = vmul.f32 %v4569_v52, %v6074_v16  ;;  %v3012_v48 = vand.u32 2147483648, %v6098_v53  ;;  %v6120_v25 = vadd.f32 %v3313_v27, %v2641_v22  ;;  %v6177_v1 = vld [vmem:[%s6793_s4] ss:$0 sm:$0xff] }
 0x3b7   : > { %v3523_v7 = vsel %vm1708_vm1, %v3450_v42, 0.0  ;;  %vm3022_vm7 = vweird.f32 %v4569_v52  ;;  %v2707_v24 = vsub.f32 0.0, %v2675_v17  ;;  %v2677_v32 = vadd.f32 2.0, %v2541_v39  ;;  %v3315_v17 = vld [vmem:[%s5011_s17 + $0x70] sm:$0xff]  ;;  %v6190_v12 = vld [vmem:[%s6792_s3] ss:$0 sm:$0xff] }
 0x3b8   : > { %v2989_v36 = vmul.f32 %v4565_v3, %v2988_v63  ;;  %v4571_v21 = vpop.eup %4570  ;;  %3524 = vadd.xlane.f32.xlu1 %v3523_v7  ;;  %v3018_v41 = vsub.f32 1.0, %v3017_v8  ;;  %v2540_v15 = vmul.f32 %v5675_v35, %v6055_v37  ;;  %v2542_v14 = vmul.f32 %v5675_v35, %v2506_v49  ;;  %vm6141_vm10 = vmor %vm3021_vm4, %vm3022_vm7 }
 0x3b9   : > { %v4573_v29 = vpop.eup %4572  ;;  %v3448_v23 = vmul.f32 0.6931472, %v4571_v21  ;;  %v2753_v38 = vmul.f32 1.442695, %v2707_v24  ;;  %v2508_v46 = vadd.f32 %v5670_v19, %v2472_v4  ;;  %v2709_v60 = vsub.f32 0.0, %v2677_v32  ;;  %v2574_v24 = vld [vmem:[#allocation3 + $0x88] sm:$0xff] }
 0x3ba   : > { %v2990_v9 = vadd.f32 %v4565_v3, %v2989_v36  ;;  %v3019_v10 = vmul.f32 %v4569_v52, %v3018_v41  ;;  %v3002_v45 = vmul.f32 %v4573_v29, %v6098_v53  ;;  %vm3007_vm9 = vweird.f32 %v4573_v29  ;;  %v3317_v32 = vld [vmem:[%s5011_s17 + $0x80] sm:$0xff] }
 0x3bb   : > { %v3520_v47 = vsel %vm1708_vm1, %v3448_v23, 0.0  ;;  %4574 = vpow2.f32 %v2753_v38  ;;  %v2676_v19 = vadd.f32 2.0, %v2540_v15  ;;  %v2757_v34 = vmul.f32 1.442695, %v2709_v60  ;;  %vm6157_vm11 = vmor %vm3006_vm6, %vm3007_vm9 }
 0x3bc   : > { %v2994_v18 = vsel %vm6126_vm8, %v4565_v3, %v2990_v9  ;;  %3521 = vadd.xlane.f32.xlu0 %v3520_v47  ;;  %v3020_v50 = vadd.f32 %v4569_v52, %v3019_v10  ;;  %v3003_v33 = vsub.f32 1.0, %v3002_v45  ;;  %v2678_v11 = vadd.f32 2.0, %v2542_v14  ;;  %v6219_v9 = vld [vmem:[%s6795_s6] ss:$0 sm:$0xff] }
 0x3bd   : > { %v2999_v37 = vsel %vm6093_vm2, %v2998_v58, %v2994_v18  ;;  %v2708_v26 = vsub.f32 0.0, %v2676_v19  ;;  %v3013_v39 = vor.u32 1.1754944e-38, %v3012_v48  ;;  %v2544_v62 = vmul.f32 %v6164_v61, %v2508_v46  ;;  %v2473_v48 = vld [vmem:[#allocation2 + $0xa0] sm:$0xff]  ;;  %v3316_v19 = vld [vmem:[%s5011_s17 + $0x78] sm:$0xff] }
 0x3be   : > { %v3376_v40 = vmul.f32 %v6034_v51, %v2999_v37  ;;  %4576 = vlog2.f32 %v2999_v37  ;;  %v3024_v16 = vsel %vm6141_vm10, %v4569_v52, %v3020_v50  ;;  %v3004_v43 = vmul.f32 %v4573_v29, %v3003_v33  ;;  %v2576_v37 = vld [vmem:[#allocation3 + $0x98] sm:$0xff] }
 0x3bf   : > { %4578 = vpow2.f32 %v2757_v34  ;;  %v3029_v49 = vsel %vm6109_vm5, %v3028_v13, %v3024_v16  ;;  %v2755_v51 = vmul.f32 1.442695, %v2708_v26  ;;  %v2710_v6 = vsub.f32 0.0, %v2678_v11 }
 0x3c0   : > { %3408 = vst.msk [vmem:[%s5016_s20 + $0x58] sm:$0xff] %vm1708_vm1, %v3376_v40  ;;  %v3378_v58 = vmul.f32 %v6089_v20, %v3029_v49  ;;  %4580 = vlog2.f32 %v3029_v49  ;;  %v3005_v5 = vadd.f32 %v4573_v29, %v3004_v43  ;;  %vm6168_vm12 = vcmp.eq.f32.partialorder %v3010_v28, 8.507059e+37 }
 0x3c1   : > { %v4575_v3 = vpop.eup %4574  ;;  %v2643_v59 = vmul.f32 %v5701_v31, %v6114_v55  ;;  %v2609_v22 = vadd.f32 %v6177_v1, %v2573_v54  ;;  %4582 = vpow2.f32 %v2755_v51  ;;  %v2759_v20 = vmul.f32 1.442695, %v2710_v6 }
 0x3c2   : > { %3410 = vst.msk [vmem:[%s5016_s20 + $0x68] sm:$0xff] %vm1708_vm1, %v3378_v58  ;;  %v3009_v0 = vsel %vm6157_vm11, %v4573_v29, %v3005_v5  ;;  %v6184_v27 = vadd.f32 1.0, %v4575_v3  ;;  %v2507_v44 = vadd.f32 %v6190_v12, %v2471_v57  ;;  %v6195_v42 = vadd.f32 2.0, %v2544_v62 }
 0x3c3   : > { %v3014_v52 = vsel %vm6168_vm12, %v3013_v39, %v3009_v0  ;;  %4584 = vpow2.f32 %v2759_v20  ;;  %v2608_v28 = vadd.f32 %v6177_v1, %v2572_v30  ;;  %v6200_v4 = vadd.f32 %v3315_v17, %v2643_v59 }
 0x3c4   : > { %v4577_v55 = vpop.eup %4576  ;;  %v3377_v8 = vmul.f32 %v6120_v25, %v3014_v52  ;;  %4586 = vlog2.f32 %v3014_v52  ;;  %v2645_v7 = vmul.f32 %v5701_v31, %v2609_v22  ;;  %v3040_v25 = vand.u32 2147483647, %v6184_v27 }
 0x3c5   : > { %v4579_v63 = vpop.eup %4578  ;;  %v3452_v13 = vmul.f32 0.6931472, %v4577_v55  ;;  %4588 = vrcp.f32 %v6184_v27  ;;  %v3042_v41 = vand.u32 2147483648, %v6184_v27  ;;  %v2543_v15 = vmul.f32 %v6164_v61, %v2507_v44  ;;  %v2475_v44 = vld [vmem:[#allocation2 + $0xb0] sm:$0xff] }
 0x3c6   : > { %v6203_v36 = vadd.f32 1.0, %v4579_v63  ;;  %v4581_v21 = vpop.eup %4580  ;;  %3409 = vst.msk [vmem:[%s5016_s20 + $0x60] sm:$0xff] %vm1708_vm1, %v3377_v8  ;;  %v2712_v31 = vsub.f32 0.0, %v6195_v42  ;;  %v2509_v23 = vadd.f32 %v6190_v12, %v2473_v48  ;;  %vm3036_vm13 = vweird.f32 %v6184_v27 }
 0x3c7   : > { %v3526_v2 = vsel %vm1708_vm1, %v3452_v13, 0.0  ;;  %v4583_v14 = vpop.eup %4582  ;;  %v3456_v29 = vmul.f32 0.6931472, %v4581_v21  ;;  %v2644_v38 = vmul.f32 %v6219_v9, %v2608_v28  ;;  %v2610_v10 = vadd.f32 %v6177_v1, %v2574_v24 }
 0x3c8   : > { %3527 = vadd.xlane.f32.xlu2 %v3526_v2  ;;  %4590 = vrcp.f32 %v6203_v36  ;;  %v6222_v46 = vadd.f32 1.0, %v4583_v14  ;;  %v3070_v47 = vand.u32 2147483647, %v6203_v36  ;;  %v3072_v18 = vand.u32 2147483648, %v6203_v36 }
 0x3c9   : > { %v4585_v45 = vpop.eup %4584  ;;  %v3532_v60 = vsel %vm1708_vm1, %v3456_v29, 0.0  ;;  %v6228_v35 = vadd.f32 %v3317_v32, %v2645_v7  ;;  %vm6231_vm14 = vcmp.eq.f32.partialorder %v3040_v25, 8.507059e+37  ;;  %v3043_v34 = vor.u32 1.1754944e-38, %v3042_v41 }
 0x3ca   : > { %v4587_v50 = vpop.eup %4586  ;;  %3533 = vadd.xlane.f32.xlu1 %v3532_v60  ;;  %vm3066_vm15 = vweird.f32 %v6203_v36  ;;  %4592 = vrcp.f32 %v6222_v46  ;;  %v3055_v11 = vand.u32 2147483647, %v6222_v46  ;;  %v3057_v16 = vand.u32 2147483648, %v6222_v46  ;;  %v3318_v60 = vld [vmem:[%s5011_s17 + $0x88] sm:$0xff] }
 0x3cb   : > { %v4589_v40 = vpop.eup %4588  ;;  %v3454_v26 = vmul.f32 0.6931472, %v4587_v50  ;;  %v6239_v43 = vadd.f32 1.0, %v4585_v45  ;;  %v6242_v49 = vadd.f32 %v3316_v19, %v2644_v38  ;;  %v6245_v56 = vmul.f32 %v6219_v9, %v2610_v10  ;;  %v2474_v50 = vld [vmem:[#allocation2 + $0xa8] sm:$0xff] }
 0x3cc   : > { %v3032_v39 = vmul.f32 %v4589_v40, %v6184_v27  ;;  %v6248_v51 = vadd.f32 %v6177_v1, %v2576_v37  ;;  %vm6251_vm0 = vcmp.eq.f32.partialorder %v3070_v47, 8.507059e+37  ;;  %v3073_v58 = vor.u32 1.1754944e-38, %v3072_v18  ;;  %v2575_v47 = vld [vmem:[#allocation3 + $0x90] sm:$0xff] }
 0x3cd   : > { %v3529_v62 = vsel %vm1708_vm1, %v3454_v26, 0.0  ;;  %4594 = vrcp.f32 %v6239_v43  ;;  %vm3037_vm2 = vweird.f32 %v4589_v40  ;;  %vm3051_vm4 = vweird.f32 %v6222_v46 }
 0x3ce   : > { %v4591_v6 = vpop.eup %4590  ;;  %3530 = vadd.xlane.f32.xlu0 %v3529_v62  ;;  %v3033_v5 = vsub.f32 1.0, %v3032_v39  ;;  %vm6258_vm5 = vcmp.eq.f32.partialorder %v3055_v11, 8.507059e+37  ;;  %v3058_v3 = vor.u32 1.1754944e-38, %v3057_v16  ;;  %v2763_v59 = vmul.f32 1.442695, %v2712_v31  ;;  %vm6265_vm6 = vmor %vm3036_vm13, %vm3037_vm2  ;;  %v2577_v62 = vld [vmem:[#allocation3 + $0xa0] sm:$0xff] }
 0x3cf   : > { %v3062_v53 = vmul.f32 %v4591_v6, %v6203_v36  ;;  %vm3067_vm3 = vweird.f32 %v4591_v6  ;;  %v2679_v17 = vadd.f32 2.0, %v2543_v15  ;;  %v2545_v30 = vmul.f32 %v6164_v61, %v2509_v23  ;;  %v2477_v16 = vld [vmem:[#allocation2 + $0xc0] sm:$0xff] }
 0x3d0   : > { %v4593_v22 = vpop.eup %4592  ;;  %v3034_v20 = vmul.f32 %v4589_v40, %v3033_v5  ;;  %vm3081_vm7 = vweird.f32 %v6239_v43  ;;  %v3085_v42 = vand.u32 2147483647, %v6239_v43  ;;  %v3087_v63 = vand.u32 2147483648, %v6239_v43  ;;  %vm6276_vm8 = vmor %vm3066_vm15, %vm3067_vm3 }
 0x3d1   : > { %v3063_v0 = vsub.f32 1.0, %v3062_v53  ;;  %v3047_v52 = vmul.f32 %v4593_v22, %v6222_v46  ;;  %4596 = vpow2.f32 %v2763_v59  ;;  %v2711_v28 = vsub.f32 0.0, %v2679_v17  ;;  %v3320_v53 = vld [vmem:[%s5011_s17 + $0x98] sm:$0xff] }
 0x3d2   : > { %v3035_v13 = vadd.f32 %v4589_v40, %v3034_v20  ;;  %vm3052_vm9 = vweird.f32 %v4593_v22  ;;  %v2681_v24 = vadd.f32 2.0, %v2545_v30  ;;  %v2511_v21 = vadd.f32 %v6190_v12, %v2475_v44  ;;  %v3319_v44 = vld [vmem:[%s5011_s17 + $0x90] sm:$0xff] }
 0x3d3   : > { %v3064_v8 = vmul.f32 %v4591_v6, %v3063_v0  ;;  %v4595_v48 = vpop.eup %4594  ;;  %v3048_v7 = vsub.f32 1.0, %v3047_v52  ;;  %v2761_v15 = vmul.f32 1.442695, %v2711_v28  ;;  %vm6291_vm11 = vmor %vm3051_vm4, %vm3052_vm9  ;;  %v2611_v37 = vadd.f32 %v6177_v1, %v2575_v47 }
 0x3d4   : > { %v3039_v2 = vsel %vm6265_vm6, %v4589_v40, %v3035_v13  ;;  %v3077_v41 = vmul.f32 %v4595_v48, %v6239_v43  ;;  %vm3082_vm10 = vweird.f32 %v4595_v48  ;;  %v2713_v14 = vsub.f32 0.0, %v2681_v24 }
 0x3d5   : > { %v3065_v25 = vadd.f32 %v4591_v6, %v3064_v8  ;;  %v3044_v36 = vsel %vm6231_vm14, %v3043_v34, %v3039_v2  ;;  %v3049_v32 = vmul.f32 %v4593_v22, %v3048_v7  ;;  %vm6307_vm12 = vmor %vm3081_vm7, %vm3082_vm10  ;;  %v3088_v40 = vor.u32 1.1754944e-38, %v3087_v63  ;;  %v2579_v8 = vld [vmem:[#allocation3 + $0xb0] sm:$0xff]  ;;  %v3321_v2 = vld [vmem:[%s5011_s17 + $0xa0] sm:$0xff] }
 0x3d6   : > { %v3379_v29 = vmul.f32 %v6200_v4, %v3044_v36  ;;  %4598 = vlog2.f32 %v3044_v36  ;;  %v3078_v38 = vsub.f32 1.0, %v3077_v41  ;;  %v2765_v4 = vmul.f32 1.442695, %v2713_v14 }
 0x3d7   : > { %v3069_v31 = vsel %vm6276_vm8, %v4591_v6, %v3065_v25  ;;  %v3050_v45 = vadd.f32 %v4593_v22, %v3049_v32  ;;  %4600 = vpow2.f32 %v2761_v15  ;;  %v4597_v18 = vpop.eup %4596  ;;  %vm6317_vm13 = vcmp.eq.f32.partialorder %v3085_v42, 8.507059e+37 }
 0x3d8   : > { %v3074_v10 = vsel %vm6251_vm0, %v3073_v58, %v3069_v31  ;;  %3411 = vst.msk [vmem:[%s5016_s20 + $0x70] sm:$0xff] %vm1708_vm1, %v3379_v29  ;;  %v3079_v46 = vmul.f32 %v4595_v48, %v3078_v38  ;;  %v6311_v26 = vadd.f32 1.0, %v4597_v18  ;;  %v3350_v43 = vadd.f32 %v3318_v60, %v6245_v56  ;;  %v2476_v31 = vld [vmem:[#allocation2 + $0xb8] sm:$0xff] }
 0x3d9   : > { %v3381_v19 = vmul.f32 %v6228_v35, %v3074_v10  ;;  %4602 = vlog2.f32 %v3074_v10  ;;  %v3054_v33 = vsel %vm6291_vm11, %v4593_v22, %v3050_v45  ;;  %v2648_v6 = vmul.f32 %v6219_v9, %v6248_v51 }
 0x3da   : > { %4604 = vpow2.f32 %v2765_v4  ;;  %v3059_v35 = vsel %vm6258_vm5, %v3058_v3, %v3054_v33  ;;  %v3080_v11 = vadd.f32 %v4595_v48, %v3079_v46  ;;  %v2510_v57 = vadd.f32 %v6190_v12, %v2474_v50 }
 0x3db   : > { %3413 = vst.msk [vmem:[%s5016_s20 + $0x80] sm:$0xff] %vm1708_vm1, %v3381_v19  ;;  %v3380_v39 = vmul.f32 %v6242_v49, %v3059_v35  ;;  %4606 = vlog2.f32 %v3059_v35  ;;  %v2647_v54 = vmul.f32 %v6219_v9, %v2611_v37  ;;  %v2547_v56 = vmul.f32 %v6164_v61, %v2511_v21  ;;  %v2478_v19 = vld [vmem:[#allocation2 + $0xc8] sm:$0xff] }
 0x3dc   : > { %v4599_v58 = vpop.eup %4598  ;;  %v3084_v5 = vsel %vm6307_vm12, %v4595_v48, %v3080_v11  ;;  %4608 = vrcp.f32 %v6311_v26  ;;  %v3115_v59 = vand.u32 2147483647, %v6311_v26  ;;  %v2613_v22 = vadd.f32 %v6177_v1, %v2577_v62 }
 0x3dd   : > { %v4601_v49 = vpop.eup %4600  ;;  %v3458_v3 = vmul.f32 0.6931472, %v4599_v58  ;;  %3412 = vst.msk [vmem:[%s5016_s20 + $0x78] sm:$0xff] %vm1708_vm1, %v3380_v39  ;;  %v3089_v51 = vsel %vm6317_vm13, %v3088_v40, %v3084_v5  ;;  %v3117_v17 = vand.u32 2147483648, %v6311_v26  ;;  %v6343_v63 = vadd.f32 %v3320_v53, %v2648_v6 }
 0x3de   : > { %v3382_v0 = vmul.f32 %v3350_v43, %v3089_v51  ;;  %4610 = vlog2.f32 %v3089_v51  ;;  %v6339_v30 = vadd.f32 1.0, %v4601_v49  ;;  %vm3111_vm14 = vweird.f32 %v6311_v26 }
 0x3df   : > { %v4603_v20 = vpop.eup %4602  ;;  %v3535_v52 = vsel %vm1708_vm1, %v3458_v3, 0.0  ;;  %v2649_v13 = vmul.f32 %v6219_v9, %v2613_v22  ;;  %v2546_v28 = vmul.f32 %v6164_v61, %v2510_v57  ;;  %vm6352_vm15 = vcmp.eq.f32.partialorder %v3115_v59, 8.507059e+37 }
 0x3e0   : > { %v4605_v55 = vpop.eup %4604  ;;  %v3462_v42 = vmul.f32 0.6931472, %v4603_v20  ;;  %3536 = vadd.xlane.f32.xlu2 %v3535_v52  ;;  %3414 = vst.msk [vmem:[%s5016_s20 + $0x88] sm:$0xff] %vm1708_vm1, %v3382_v0  ;;  %4612 = vrcp.f32 %v6339_v30  ;;  %v6356_v24 = vadd.f32 %v3319_v44, %v2647_v54  ;;  %v3118_v36 = vor.u32 1.1754944e-38, %v3117_v17  ;;  %v2578_v52 = vld [vmem:[#allocation3 + $0xa8] sm:$0xff] }
 0x3e1   : > { %v4607_v48 = vpop.eup %4606  ;;  %v6358_v21 = vadd.f32 1.0, %v4605_v55  ;;  %v3102_v32 = vand.u32 2147483648, %v6339_v30  ;;  %v2683_v15 = vadd.f32 2.0, %v2547_v56  ;;  %vm3096_vm0 = vweird.f32 %v6339_v30 }
 0x3e2   : > { %v3541_v27 = vsel %vm1708_vm1, %v3462_v42, 0.0  ;;  %v4609_v25 = vpop.eup %4608  ;;  %v3460_v41 = vmul.f32 0.6931472, %v4607_v48  ;;  %v6366_v29 = vadd.f32 %v6177_v1, %v2579_v8  ;;  %v3100_v10 = vand.u32 2147483647, %v6339_v30 }
 0x3e3   : > { %3542 = vadd.xlane.f32.xlu1 %v3541_v27  ;;  %v3107_v14 = vmul.f32 %v4609_v25, %v6311_v26  ;;  %4614 = vrcp.f32 %v6358_v21  ;;  %v6370_v45 = vadd.f32 %v3321_v2, %v2649_v13  ;;  %v2715_v60 = vsub.f32 0.0, %v2683_v15 }
 0x3e4   : > { %v4611_v23 = vpop.eup %4610  ;;  %v3538_v38 = vsel %vm1708_vm1, %v3460_v41, 0.0  ;;  %vm3112_vm2 = vweird.f32 %v4609_v25  ;;  %v2682_v18 = vadd.f32 2.0, %v2546_v28  ;;  %v3103_v37 = vor.u32 1.1754944e-38, %v3102_v32 }
 0x3e5   : > { %3539 = vadd.xlane.f32.xlu0 %v3538_v38  ;;  %v3464_v47 = vmul.f32 0.6931472, %v4611_v23  ;;  %v3108_v4 = vsub.f32 1.0, %v3107_v14  ;;  %vm3126_vm4 = vweird.f32 %v6358_v21  ;;  %v2769_v50 = vmul.f32 1.442695, %v2715_v60  ;;  %vm6379_vm3 = vmor %vm3111_vm14, %vm3112_vm2  ;;  %v3323_v60 = vld [vmem:[%s5011_s17 + $0xb0] sm:$0xff] }
 0x3e6   : > { %v4613_v46 = vpop.eup %4612  ;;  %v2512_v33 = vadd.f32 %v6190_v12, %v2476_v31  ;;  %v3130_v11 = vand.u32 2147483647, %v6358_v21  ;;  %v2714_v39 = vsub.f32 0.0, %v2682_v18  ;;  %v2514_v62 = vadd.f32 %v6190_v12, %v2478_v19 }
 0x3e7   : > { %v3544_v34 = vsel %vm1708_vm1, %v3464_v47, 0.0  ;;  %v3109_v40 = vmul.f32 %v4609_v25, %v3108_v4  ;;  %v3092_v35 = vmul.f32 %v4613_v46, %v6339_v30  ;;  %4616 = vpow2.f32 %v2769_v50  ;;  %v2580_v50 = vld [vmem:[#allocation3 + $0xb8] sm:$0xff] }
 0x3e8   : > { %3545 = vadd.xlane.f32.xlu2 %v3544_v34  ;;  %v2548_v6 = vmul.f32 %v6164_v61, %v2512_v33  ;;  %vm3097_vm5 = vweird.f32 %v4613_v46  ;;  %v3132_v53 = vand.u32 2147483648, %v6358_v21  ;;  %v2767_v56 = vmul.f32 1.442695, %v2714_v39  ;;  %v2582_v39 = vld [vmem:[#allocation3 + $0xc8] sm:$0xff] }
 0x3e9   : > { %v4615_v57 = vpop.eup %4614  ;;  %v3110_v58 = vadd.f32 %v4609_v25, %v3109_v40  ;;  %v3093_v5 = vsub.f32 1.0, %v3092_v35  ;;  %v2513_v49 = vadd.f32 %v6190_v12, %v2477_v16  ;;  %v2550_v59 = vmul.f32 %v6164_v61, %v2514_v62  ;;  %vm6395_vm7 = vmor %vm3096_vm0, %vm3097_vm5 }
 0x3ea   : > { %v3122_v54 = vmul.f32 %v4615_v57, %v6358_v21  ;;  %v2684_v26 = vadd.f32 2.0, %v2548_v6  ;;  %vm3127_vm6 = vweird.f32 %v4615_v57  ;;  %4618 = vpow2.f32 %v2767_v56 }
 0x3eb   : > { %v3114_v3 = vsel %vm6379_vm3, %v4609_v25, %v3110_v58  ;;  %v3094_v51 = vmul.f32 %v4613_v46, %v3093_v5  ;;  %vm3101_vm8 = vcmp.eq.f32.partialorder %v3100_v10, 8.507059e+37  ;;  %vm6400_vm9 = vcmp.eq.f32.partialorder %v3130_v11, 8.507059e+37  ;;  %vm6411_vm10 = vmor %vm3126_vm4, %vm3127_vm6  ;;  %v2479_v25 = vld [vmem:[#allocation2 + $0xd0] sm:$0xff] }
 0x3ec   : > { %v3119_v22 = vsel %vm6352_vm15, %v3118_v36, %v3114_v3  ;;  %v3123_v0 = vsub.f32 1.0, %v3122_v54  ;;  %v2716_v17 = vsub.f32 0.0, %v2684_v26  ;;  %v2686_v28 = vadd.f32 2.0, %v2550_v59 }
 0x3ed   : > { %v3384_v44 = vmul.f32 %v6343_v63, %v3119_v22  ;;  %4620 = vlog2.f32 %v3119_v22  ;;  %v3095_v55 = vadd.f32 %v4613_v46, %v3094_v51  ;;  %v4617_v42 = vpop.eup %4616  ;;  %v3133_v27 = vor.u32 1.1754944e-38, %v3132_v53 }
 0x3ee   : > { %v3124_v13 = vmul.f32 %v4615_v57, %v3123_v0  ;;  %v2771_v30 = vmul.f32 1.442695, %v2716_v17  ;;  %v6415_v7 = vadd.f32 1.0, %v4617_v42  ;;  %v2549_v2 = vmul.f32 %v6164_v61, %v2513_v49 }
 0x3ef   : > { %3416 = vst.msk [vmem:[%s5016_s20 + $0x98] sm:$0xff] %vm1708_vm1, %v3384_v44  ;;  %v3099_v48 = vsel %vm6395_vm7, %v4613_v46, %v3095_v55  ;;  %v2614_v32 = vadd.f32 %v6177_v1, %v2578_v52  ;;  %v2651_v21 = vmul.f32 %v6219_v9, %v6366_v29  ;;  %v2718_v23 = vsub.f32 0.0, %v2686_v28 }
 0x3f0   : > { %v3104_v41 = vsel %vm3101_vm8, %v3103_v37, %v3099_v48  ;;  %v3125_v36 = vadd.f32 %v4615_v57, %v3124_v13  ;;  %4622 = vpow2.f32 %v2771_v30  ;;  %v4619_v14 = vpop.eup %4618  ;;  %v2515_v38 = vadd.f32 %v6190_v12, %v2479_v25  ;;  %v3322_v37 = vld [vmem:[%s5011_s17 + $0xa8] sm:$0xff] }
 0x3f1   : > { %v3383_v15 = vmul.f32 %v6356_v24, %v3104_v41  ;;  %4624 = vlog2.f32 %v3104_v41  ;;  %v6431_v47 = vadd.f32 1.0, %v4619_v14  ;;  %v2685_v29 = vadd.f32 2.0, %v2549_v2  ;;  %v2481_v2 = vld [vmem:[#allocation2 + $0xe0] sm:$0xff] }
 0x3f2   : > { %v3129_v31 = vsel %vm6411_vm10, %v4615_v57, %v3125_v36  ;;  %4626 = vrcp.f32 %v6415_v7  ;;  %v2650_v19 = vmul.f32 %v6219_v9, %v2614_v32  ;;  %v3160_v46 = vand.u32 2147483647, %v6415_v7 }
 0x3f3   : > { %v4621_v10 = vpop.eup %4620  ;;  %3415 = vst.msk [vmem:[%s5016_s20 + $0x90] sm:$0xff] %vm1708_vm1, %v3383_v15  ;;  %v3134_v24 = vsel %vm6400_vm9, %v3133_v27, %v3129_v31  ;;  %v6441_v40 = vadd.f32 %v3323_v60, %v2651_v21  ;;  %v2775_v35 = vmul.f32 1.442695, %v2718_v23  ;;  %v2551_v11 = vmul.f32 %v6164_v61, %v2515_v38  ;;  %v3324_v31 = vld [vmem:[%s5011_s17 + $0xb8] sm:$0xff]  ;;  %v3326_v23 = vld [vmem:[%s5011_s17 + $0xc8] sm:$0xff] }
 0x3f4   : > { %v3468_v4 = vmul.f32 0.6931472, %v4621_v10  ;;  %v3385_v18 = vmul.f32 %v6370_v45, %v3134_v24  ;;  %4628 = vlog2.f32 %v3134_v24  ;;  %vm3156_vm11 = vweird.f32 %v6415_v7  ;;  %v2581_v24 = vld [vmem:[#allocation3 + $0xc0] sm:$0xff] }
 0x3f5   : > { %4630 = vrcp.f32 %v6431_v47  ;;  %v3162_v16 = vand.u32 2147483648, %v6415_v7  ;;  %v2717_v6 = vsub.f32 0.0, %v2685_v29  ;;  %v6448_v58 = vadd.f32 %v3322_v37, %v2650_v19 }
 0x3f6   : > { %v4623_v33 = vpop.eup %4622  ;;  %v3550_v34 = vsel %vm1708_vm1, %v3468_v4, 0.0  ;;  %3417 = vst.msk [vmem:[%s5016_s20 + $0xa0] sm:$0xff] %vm1708_vm1, %v3385_v18  ;;  %v2616_v5 = vadd.f32 %v6177_v1, %v2580_v50  ;;  %4632 = vpow2.f32 %v2775_v35  ;;  %vm6452_vm12 = vcmp.eq.f32.partialorder %v3160_v46, 8.507059e+37 }
 0x3f7   : > { %v4625_v45 = vpop.eup %4624  ;;  %3551 = vadd.xlane.f32.xlu1 %v3550_v34  ;;  %v6446_v43 = vadd.f32 1.0, %v4623_v33  ;;  %v3145_v56 = vand.u32 2147483647, %v6431_v47  ;;  %v3147_v3 = vand.u32 2147483648, %v6431_v47  ;;  %v2618_v51 = vadd.f32 %v6177_v1, %v2582_v39 }
 0x3f8   : > { %v4627_v62 = vpop.eup %4626  ;;  %v3466_v57 = vmul.f32 0.6931472, %v4625_v45  ;;  %v2773_v0 = vmul.f32 1.442695, %v2717_v6  ;;  %v2687_v17 = vadd.f32 2.0, %v2551_v11  ;;  %v3163_v44 = vor.u32 1.1754944e-38, %v3162_v16 }
 0x3f9   : > { %v3152_v53 = vmul.f32 %v4627_v62, %v6415_v7  ;;  %4634 = vrcp.f32 %v6446_v43  ;;  %vm3157_vm13 = vweird.f32 %v4627_v62  ;;  %vm3141_vm14 = vweird.f32 %v6431_v47  ;;  %v2480_v45 = vld [vmem:[#allocation2 + $0xd8] sm:$0xff] }
 0x3fa   : > { %v4629_v26 = vpop.eup %4628  ;;  %v3547_v49 = vsel %vm1708_vm1, %v3466_v57, 0.0  ;;  %v2652_v52 = vmul.f32 %v6219_v9, %v2616_v5  ;;  %vm6465_vm15 = vcmp.eq.f32.partialorder %v3145_v56, 8.507059e+37  ;;  %4636 = vpow2.f32 %v2773_v0  ;;  %vm6472_vm0 = vmor %vm3156_vm11, %vm3157_vm13  ;;  %v2482_v5 = vld [vmem:[#allocation2 + $0xe8] sm:$0xff] }
 0x3fb   : > { %v4631_v59 = vpop.eup %4630  ;;  %3548 = vadd.xlane.f32.xlu0 %v3547_v49  ;;  %v3470_v22 = vmul.f32 0.6931472, %v4629_v26  ;;  %v3153_v20 = vsub.f32 1.0, %v3152_v53  ;;  %v3148_v63 = vor.u32 1.1754944e-38, %v3147_v3  ;;  %v2719_v27 = vsub.f32 0.0, %v2687_v17 }
 0x3fc   : > { %v3137_v55 = vmul.f32 %v4631_v59, %v6431_v47  ;;  %v4633_v30 = vpop.eup %4632  ;;  %vm3142_vm2 = vweird.f32 %v4631_v59  ;;  %vm3171_vm4 = vweird.f32 %v6446_v43  ;;  %v2654_v36 = vmul.f32 %v6219_v9, %v2618_v51 }
 0x3fd   : > { %v3553_v42 = vsel %vm1708_vm1, %v3470_v22, 0.0  ;;  %v3154_v13 = vmul.f32 %v4627_v62, %v3153_v20  ;;  %v6478_v32 = vadd.f32 1.0, %v4633_v30  ;;  %v3175_v21 = vand.u32 2147483647, %v6446_v43  ;;  %vm6490_vm3 = vmor %vm3141_vm14, %vm3142_vm2  ;;  %v2583_v22 = vld [vmem:[#allocation3 + $0xd0] sm:$0xff] }
 0x3fe   : > { %3554 = vadd.xlane.f32.xlu2 %v3553_v42  ;;  %v3138_v48 = vsub.f32 1.0, %v3137_v55  ;;  %v3177_v14 = vand.u32 2147483648, %v6446_v43  ;;  %v2777_v60 = vmul.f32 1.442695, %v2719_v27  ;;  %v2517_v29 = vadd.f32 %v6190_v12, %v2481_v2  ;;  %v2484_v2 = vld [vmem:[#allocation2 + $0xf8] sm:$0xff] }
 0x3ff   : > { %v4635_v25 = vpop.eup %4634  ;;  %v3155_v41 = vadd.f32 %v4627_v62, %v3154_v13  ;;  %4638 = vrcp.f32 %v6478_v32  ;;  %v3356_v37 = vadd.f32 %v3324_v31, %v2652_v52  ;;  %v6499_v50 = vadd.f32 %v3326_v23, %v2654_v36  ;;  %v3325_v31 = vld [vmem:[%s5011_s17 + $0xc0] sm:$0xff]  ;;  %v2584_v52 = vld [vmem:[#allocation3 + $0xd8] sm:$0xff] }
 0x400   : > { %v3139_v7 = vmul.f32 %v4631_v59, %v3138_v48  ;;  %v3167_v15 = vmul.f32 %v4635_v25, %v6446_v43  ;;  %vm3172_vm5 = vweird.f32 %v4635_v25  ;;  %v4637_v46 = vpop.eup %4636  ;;  %v2617_v35 = vadd.f32 %v6177_v1, %v2581_v24 }
 0x401   : > { %v3159_v38 = vsel %vm6472_vm0, %v4627_v62, %v3155_v41  ;;  %v6504_v11 = vadd.f32 1.0, %v4637_v46  ;;  %vm6512_vm6 = vmor %vm3171_vm4, %vm3172_vm5  ;;  %v3178_v39 = vor.u32 1.1754944e-38, %v3177_v14  ;;  %v2553_v6 = vmul.f32 %v6164_v61, %v2517_v29 }
 0x402   : > { %v3164_v4 = vsel %vm6452_vm12, %v3163_v44, %v3159_v38  ;;  %v3140_v18 = vadd.f32 %v4631_v59, %v3139_v7  ;;  %v3168_v19 = vsub.f32 1.0, %v3167_v15  ;;  %vm3176_vm7 = vcmp.eq.f32.partialorder %v3175_v21, 8.507059e+37 }
 0x403   : > { %v3387_v47 = vmul.f32 %v6441_v40, %v3164_v4  ;;  %4640 = vlog2.f32 %v3164_v4  ;;  %v3205_v54 = vand.u32 2147483647, %v6478_v32  ;;  %v3207_v56 = vand.u32 2147483648, %v6478_v32 }
 0x404   : > { %v3144_v33 = vsel %vm6490_vm3, %v4631_v59, %v3140_v18  ;;  %v3169_v34 = vmul.f32 %v4635_v25, %v3168_v19  ;;  %4642 = vpow2.f32 %v2777_v60  ;;  %v2516_v43 = vadd.f32 %v6190_v12, %v2480_v45 }
 0x405   : > { %3419 = vst.msk [vmem:[%s5016_s20 + $0xb0] sm:$0xff] %vm1708_vm1, %v3387_v47  ;;  %v3149_v16 = vsel %vm6465_vm15, %v3148_v63, %v3144_v33  ;;  %v4639_v53 = vpop.eup %4638  ;;  %v2653_v49 = vmul.f32 %v6219_v9, %v2617_v35  ;;  %v2689_v3 = vadd.f32 2.0, %v2553_v6  ;;  %vm3201_vm8 = vweird.f32 %v6478_v32  ;;  %v2483_v35 = vld [vmem:[#allocation2 + $0xf0] sm:$0xff] }
 0x406   : > { %v3386_v62 = vmul.f32 %v6448_v58, %v3149_v16  ;;  %4644 = vlog2.f32 %v3149_v16  ;;  %v3170_v57 = vadd.f32 %v4635_v25, %v3169_v34  ;;  %v3197_v58 = vmul.f32 %v4639_v53, %v6478_v32 }
 0x407   : > { %4646 = vrcp.f32 %v6504_v11  ;;  %vm3202_vm9 = vweird.f32 %v4639_v53  ;;  %v2518_v20 = vadd.f32 %v6190_v12, %v2482_v5  ;;  %vm6530_vm10 = vcmp.eq.f32.partialorder %v3205_v54, 8.507059e+37 }
 0x408   : > { %3418 = vst.msk [vmem:[%s5016_s20 + $0xa8] sm:$0xff] %vm1708_vm1, %v3386_v62  ;;  %v3174_v26 = vsel %vm6512_vm6, %v4635_v25, %v3170_v57  ;;  %v3198_v44 = vsub.f32 1.0, %v3197_v58  ;;  %v3208_v42 = vor.u32 1.1754944e-38, %v3207_v56  ;;  %v2721_v13 = vsub.f32 0.0, %v2689_v3  ;;  %vm6544_vm11 = vmor %vm3201_vm8, %vm3202_vm9 }
 0x409   : > { %v4641_v51 = vpop.eup %4640  ;;  %v3179_v59 = vsel %vm3176_vm7, %v3178_v39, %v3174_v26  ;;  %v2552_v8 = vmul.f32 %v6164_v61, %v2516_v43  ;;  %v2619_v63 = vadd.f32 %v6177_v1, %v2583_v22  ;;  %vm3186_vm12 = vweird.f32 %v6504_v11 }
 0x40a   : > { %v3474_v0 = vmul.f32 0.6931472, %v4641_v51  ;;  %v3388_v17 = vmul.f32 %v3356_v37, %v3179_v59  ;;  %4648 = vlog2.f32 %v3179_v59  ;;  %v4643_v55 = vpop.eup %4642  ;;  %v3199_v48 = vmul.f32 %v4639_v53, %v3198_v44  ;;  %v3327_v51 = vld [vmem:[%s5011_s17 + $0xd0] sm:$0xff] }
 0x40b   : > { %v6539_v27 = vadd.f32 1.0, %v4643_v55  ;;  %v3190_v7 = vand.u32 2147483647, %v6504_v11  ;;  %v2781_v15 = vmul.f32 1.442695, %v2721_v13  ;;  %v2688_v23 = vadd.f32 2.0, %v2552_v8 }
 0x40c   : > { %v4645_v30 = vpop.eup %4644  ;;  %v3559_v28 = vsel %vm1708_vm1, %v3474_v0, 0.0  ;;  %3420 = vst.msk [vmem:[%s5016_s20 + $0xb8] sm:$0xff] %vm1708_vm1, %v3388_v17  ;;  %v3200_v21 = vadd.f32 %v4639_v53, %v3199_v48  ;;  %v3192_v32 = vand.u32 2147483648, %v6504_v11  ;;  %v2554_v10 = vmul.f32 %v6164_v61, %v2518_v20  ;;  %v2585_v55 = vld [vmem:[#allocation3 + $0xe0] sm:$0xff] }
 0x40d   : > { %v4647_v25 = vpop.eup %4646  ;;  %3560 = vadd.xlane.f32.xlu1 %v3559_v28  ;;  %v3472_v41 = vmul.f32 0.6931472, %v4645_v30  ;;  %4650 = vrcp.f32 %v6539_v27  ;;  %v2520_v24 = vadd.f32 %v6190_v12, %v2484_v2  ;;  %v3357_v46 = vadd.f32 %v3325_v31, %v2653_v49 }
 0x40e   : > { %v3182_v14 = vmul.f32 %v4647_v25, %v6504_v11  ;;  %v3204_v29 = vsel %vm6544_vm11, %v4639_v53, %v3200_v21  ;;  %vm3187_vm13 = vweird.f32 %v4647_v25  ;;  %4652 = vpow2.f32 %v2781_v15 }
 0x40f   : > { %v3556_v38 = vsel %vm1708_vm1, %v3472_v41, 0.0  ;;  %v3209_v19 = vsel %vm6530_vm10, %v3208_v42, %v3204_v29  ;;  %v2655_v47 = vmul.f32 %v6219_v9, %v2619_v63  ;;  %v2720_v34 = vsub.f32 0.0, %v2688_v23  ;;  %vm6566_vm14 = vmor %vm3186_vm12, %vm3187_vm13 }
 0x410   : > { %v4649_v60 = vpop.eup %4648  ;;  %3557 = vadd.xlane.f32.xlu0 %v3556_v38  ;;  %v3183_v4 = vsub.f32 1.0, %v3182_v14  ;;  %v3390_v37 = vmul.f32 %v6499_v50, %v3209_v19  ;;  %4654 = vlog2.f32 %v3209_v19  ;;  %v3193_v40 = vor.u32 1.1754944e-38, %v3192_v32 }
 0x411   : > { %v3476_v18 = vmul.f32 0.6931472, %v4649_v60  ;;  %v2690_v39 = vadd.f32 2.0, %v2554_v10  ;;  %v2556_v6 = vmul.f32 %v6164_v61, %v2520_v24  ;;  %vm3191_vm15 = vcmp.eq.f32.partialorder %v3190_v7, 8.507059e+37  ;;  %v2586_v24 = vld [vmem:[#allocation3 + $0xe8] sm:$0xff] }
 0x412   : > { %v3184_v33 = vmul.f32 %v4647_v25, %v3183_v4  ;;  %3422 = vst.msk [vmem:[%s5016_s20 + $0xc8] sm:$0xff] %vm1708_vm1, %v3390_v37  ;;  %vm3216_vm0 = vweird.f32 %v6539_v27  ;;  %v2779_v57 = vmul.f32 1.442695, %v2720_v34  ;;  %v3220_v5 = vand.u32 2147483647, %v6539_v27  ;;  %v3328_v37 = vld [vmem:[%s5011_s17 + $0xd8] sm:$0xff] }
 0x413   : > { %v3562_v45 = vsel %vm1708_vm1, %v3476_v18, 0.0  ;;  %v4651_v62 = vpop.eup %4650  ;;  %v2722_v53 = vsub.f32 0.0, %v2690_v39  ;;  %v2519_v54 = vadd.f32 %v6190_v12, %v2483_v35  ;;  %v3222_v26 = vand.u32 2147483648, %v6539_v27 }
 0x414   : > { %3563 = vadd.xlane.f32.xlu2 %v3562_v45  ;;  %v3185_v50 = vadd.f32 %v4647_v25, %v3184_v33  ;;  %v3212_v11 = vmul.f32 %v4651_v62, %v6539_v27  ;;  %v4653_v56 = vpop.eup %4652  ;;  %4656 = vpow2.f32 %v2779_v57  ;;  %v2692_v58 = vadd.f32 2.0, %v2556_v6 }
 0x415   : > { %vm3217_vm2 = vweird.f32 %v4651_v62  ;;  %v6581_v59 = vadd.f32 1.0, %v4653_v56  ;;  %v2783_v0 = vmul.f32 1.442695, %v2722_v53  ;;  %v2555_v42 = vmul.f32 %v6164_v61, %v2519_v54 }
 0x416   : > { %v3189_v43 = vsel %vm6566_vm14, %v4647_v25, %v3185_v50  ;;  %v3213_v3 = vsub.f32 1.0, %v3212_v11  ;;  %v4655_v22 = vpop.eup %4654  ;;  %v2724_v12 = vsub.f32 0.0, %v2692_v58  ;;  %vm6590_vm4 = vmor %vm3216_vm0, %vm3217_vm2  ;;  %v3223_v8 = vor.u32 1.1754944e-38, %v3222_v26  ;;  %v2588_v50 = vld [vmem:[#allocation3 + $0xf8] sm:$0xff] }
 0x417   : > { %v3194_v49 = vsel %vm3191_vm15, %v3193_v40, %v3189_v43  ;;  %v3480_v17 = vmul.f32 0.6931472, %v4655_v22  ;;  %v3359_v30 = vadd.f32 %v3327_v51, %v2655_v47  ;;  %vm3221_vm3 = vcmp.eq.f32.partialorder %v3220_v5, 8.507059e+37  ;;  %v3329_v47 = vld [vmem:[%s5011_s17 + $0xe0] sm:$0xff] }
 0x418   : > { %v3389_v20 = vmul.f32 %v3357_v46, %v3194_v49  ;;  %4658 = vlog2.f32 %v3194_v49  ;;  %v3214_v44 = vmul.f32 %v4651_v62, %v3213_v3  ;;  %v2787_v63 = vmul.f32 1.442695, %v2724_v12  ;;  %v3330_v49 = vld [vmem:[%s5011_s17 + $0xe8] sm:$0xff]  ;;  %v6638_v3 = vld [vmem:[%s6793_s4] ss:$0 sm:$0xff] }
 0x419   : > { %4660 = vrcp.f32 %v6581_v59  ;;  %v3568_v28 = vsel %vm1708_vm1, %v3480_v17, 0.0  ;;  %v2621_v61 = vadd.f32 %v6177_v1, %v2585_v55  ;;  %v2620_v25 = vadd.f32 %v6177_v1, %v2584_v52 }
 0x41a   : > { %3421 = vst.msk [vmem:[%s5016_s20 + $0xc0] sm:$0xff] %vm1708_vm1, %v3389_v20  ;;  %4662 = vpow2.f32 %v2783_v0  ;;  %v3215_v48 = vadd.f32 %v4651_v62, %v3214_v44  ;;  %v4657_v2 = vpop.eup %4656  ;;  %3569 = vadd.xlane.f32.xlu1 %v3568_v28  ;;  %v2691_v36 = vadd.f32 2.0, %v2555_v42  ;;  %v3252_v29 = vand.u32 2147483648, %v6581_v59 }
 0x41b   : > { %v6599_v41 = vadd.f32 1.0, %v4657_v2  ;;  %4664 = vpow2.f32 %v2787_v63  ;;  %v2657_v38 = vmul.f32 %v6219_v9, %v2621_v61  ;;  %v2656_v10 = vmul.f32 %v6219_v9, %v2620_v25  ;;  %v3501_v61 = vpop.xlane.xlu1 %3500  ;;  %v3495_v25 = vpop.xlane.xlu0 %3494 }
 0x41c   : > { %v3219_v27 = vsel %vm6590_vm4, %v4651_v62, %v3215_v48  ;;  %v2723_v18 = vsub.f32 0.0, %v2691_v36  ;;  %vm3246_vm5 = vweird.f32 %v6581_v59  ;;  %v3250_v46 = vand.u32 2147483647, %v6581_v59  ;;  %v4693_v48 = vld [vmem:[%s6795_s6] ss:$0 sm:$0xff] }
 0x41d   : > { %v3224_v15 = vsel %vm3221_vm3, %v3223_v8, %v3219_v27  ;;  %v2622_v34 = vadd.f32 %v6177_v1, %v2586_v24  ;;  %v3253_v39 = vor.u32 1.1754944e-38, %v3252_v29  ;;  %v3361_v6 = vadd.f32 %v3329_v47, %v2657_v38  ;;  %v3332_v38 = vld [vmem:[%s5011_s17 + $0xf8] sm:$0xff] }
 0x41e   : > { %v4659_v7 = vpop.eup %4658  ;;  %v3391_v31 = vmul.f32 %v3359_v30, %v3224_v15  ;;  %4666 = vlog2.f32 %v3224_v15  ;;  %v6623_v62 = vadd.f32 %v3328_v37, %v2656_v10  ;;  %v2785_v57 = vmul.f32 1.442695, %v2723_v18 }
 0x41f   : > { %v4661_v21 = vpop.eup %4660  ;;  %v3478_v14 = vmul.f32 0.6931472, %v4659_v7  ;;  %4668 = vrcp.f32 %v6599_v41  ;;  %vm3251_vm8 = vcmp.eq.f32.partialorder %v3250_v46, 8.507059e+37  ;;  %v3235_v54 = vand.u32 2147483647, %v6599_v41  ;;  %v3507_v7 = vpop.xlane.xlu2 %3506 }
 0x420   : > { %v4663_v23 = vpop.eup %4662  ;;  %v3242_v32 = vmul.f32 %v4661_v21, %v6581_v59  ;;  %3423 = vst.msk [vmem:[%s5016_s20 + $0xd0] sm:$0xff] %vm1708_vm1, %v3391_v31  ;;  %vm3247_vm6 = vweird.f32 %v4661_v21  ;;  %v3237_v56 = vand.u32 2147483648, %v6599_v41  ;;  %v2658_v43 = vmul.f32 %v6219_v9, %v2622_v34 }
 0x421   : > { %v3565_v60 = vsel %vm1708_vm1, %v3478_v14, 0.0  ;;  %v6609_v4 = vadd.f32 1.0, %v4663_v23  ;;  %v4665_v33 = vpop.eup %4664  ;;  %vm6619_vm7 = vmor %vm3246_vm5, %vm3247_vm6  ;;  %vm3231_vm9 = vweird.f32 %v6599_v41  ;;  %v2624_v51 = vadd.f32 %v6638_v3, %v2588_v50 }
 0x422   : > { %3566 = vadd.xlane.f32.xlu0 %v3565_v60  ;;  %v3243_v19 = vsub.f32 1.0, %v3242_v32  ;;  %v6617_v45 = vadd.f32 1.0, %v4665_v33  ;;  %vm6643_vm11 = vcmp.eq.f32.partialorder %v3235_v54, 8.507059e+37  ;;  %v3238_v55 = vor.u32 1.1754944e-38, %v3237_v56 }
 0x423   : > { %4670 = vrcp.f32 %v6609_v4  ;;  %v3267_v12 = vand.u32 2147483648, %v6609_v4  ;;  %v3362_v52 = vadd.f32 %v3330_v49, %v2658_v43  ;;  %vm3261_vm13 = vweird.f32 %v6609_v4 }
 0x424   : > { %v3244_v35 = vmul.f32 %v4661_v21, %v3243_v19  ;;  %v4667_v16 = vpop.eup %4666  ;;  %4672 = vrcp.f32 %v6617_v45  ;;  %v3265_v30 = vand.u32 2147483647, %v6609_v4  ;;  %v2660_v63 = vmul.f32 %v4693_v48, %v2624_v51 }
 0x425   : > { %v4669_v11 = vpop.eup %4668  ;;  %v3482_v5 = vmul.f32 0.6931472, %v4667_v16  ;;  %4674 = vpow2.f32 %v2785_v57  ;;  %vm3589_vm15 = vcmask 7168   ;;  %vm3291_vm0 = vweird.f32 %v6617_v45  ;;  %v2587_v16 = vld [vmem:[#allocation3 + $0xf0] sm:$0xff] }
 0x426   : > { %v3245_v1 = vadd.f32 %v4661_v21, %v3244_v35  ;;  %v3227_v53 = vmul.f32 %v4669_v11, %v6599_v41  ;;  %vm3232_vm10 = vweird.f32 %v4669_v11  ;;  %v3268_v41 = vor.u32 1.1754944e-38, %v3267_v12  ;;  %3592 = vst.msk [vmem:[%s5021_s1 + $0x10] sm:$0xff] %vm3589_vm15, %v3501_v61 }
 0x427   : > { %v3571_v26 = vsel %vm1708_vm1, %v3482_v5, 0.0  ;;  %vm6651_vm12 = vmor %vm3231_vm9, %vm3232_vm10  ;;  %v3297_v36 = vand.u32 2147483648, %v6617_v45  ;;  %v3295_v23 = vand.u32 2147483647, %v6617_v45  ;;  %3590 = vst.msk [vmem:[%s5021_s1] sm:$0xff] %vm3589_vm15, %v3495_v25  ;;  %vm3266_vm3 = vcmp.eq.f32.partialorder %v3265_v30, 8.507059e+37  ;;  %v3510_v57 = vpop.xlane.xlu2 %3509 }
 0x428   : > { %v3249_v58 = vsel %vm6619_vm7, %v4661_v21, %v3245_v1  ;;  %3572 = vadd.xlane.f32.xlu2 %v3571_v26  ;;  %v3228_v9 = vsub.f32 1.0, %v3227_v53  ;;  %3594 = vst.msk [vmem:[%s5021_s1 + $0x20] sm:$0xff] %vm3589_vm15, %v3507_v7  ;;  %v3364_v37 = vadd.f32 %v3332_v38, %v2660_v63  ;;  %v2623_v50 = vadd.f32 %v6638_v3, %v2587_v16 }
 0x429   : > { %v4671_v59 = vpop.eup %4670  ;;  %v3254_v22 = vsel %vm3251_vm8, %v3253_v39, %v3249_v58  ;;  %v3298_v47 = vor.u32 1.1754944e-38, %v3297_v36  ;;  %vm3296_vm6 = vcmp.eq.f32.partialorder %v3295_v23, 8.507059e+37  ;;  %v3504_v39 = vpop.xlane.xlu1 %3503  ;;  %3595 = vst.msk [vmem:[%s5021_s1 + $0x28] sm:$0xff] %vm3589_vm15, %v3510_v57 }
 0x42a   : > { %v3393_v20 = vmul.f32 %v3361_v6, %v3254_v22  ;;  %4676 = vlog2.f32 %v3254_v22  ;;  %v3257_v0 = vmul.f32 %v4671_v59, %v6609_v4  ;;  %v3229_v17 = vmul.f32 %v4669_v11, %v3228_v9  ;;  %v4673_v42 = vpop.eup %4672  ;;  %v3498_v6 = vpop.xlane.xlu0 %3497  ;;  %3593 = vst.msk [vmem:[%s5021_s1 + $0x18] sm:$0xff] %vm3589_vm15, %v3504_v39 }
 0x42b   : > { %vm3262_vm14 = vweird.f32 %v4671_v59  ;;  %v3287_v2 = vmul.f32 %v4673_v42, %v6617_v45  ;;  %v4675_v15 = vpop.eup %4674  ;;  %vm3292_vm4 = vweird.f32 %v4673_v42  ;;  %3591 = vst.msk [vmem:[%s5021_s1 + $0x8] sm:$0xff] %vm3589_vm15, %v3498_v6  ;;  %v2659_v26 = vmul.f32 %v4693_v48, %v2623_v50 }
 0x42c   : > { %3425 = vst.msk [vmem:[%s5016_s20 + $0xe0] sm:$0xff] %vm1708_vm1, %v3393_v20  ;;  %v3258_v8 = vsub.f32 1.0, %v3257_v0  ;;  %v3230_v28 = vadd.f32 %v4669_v11, %v3229_v17  ;;  %vm6670_vm2 = vmor %vm3261_vm13, %vm3262_vm14  ;;  %v2819_v60 = vadd.f32 1.0, %v4675_v15 }
 0x42d   : > { %v3288_v31 = vsub.f32 1.0, %v3287_v2  ;;  %vm6688_vm5 = vmor %vm3291_vm0, %vm3292_vm4 }
 0x42e   : > { %v3259_v27 = vmul.f32 %v4671_v59, %v3258_v8  ;;  %v3234_v21 = vsel %vm6651_vm12, %v4669_v11, %v3230_v28  ;;  %vm3276_vm7 = vweird.f32 %v2819_v60  ;;  %v3282_v58 = vand.u32 2147483648, %v2819_v60 }
 0x42f   : > { %v3239_v10 = vsel %vm6643_vm11, %v3238_v55, %v3234_v21  ;;  %v3289_v18 = vmul.f32 %v4673_v42, %v3288_v31  ;;  %v3280_v51 = vand.u32 2147483647, %v2819_v60  ;;  %v3519_v55 = vpop.xlane.xlu2 %3518 }
 0x430   : > { %v4677_v32 = vpop.eup %4676  ;;  %v3260_v24 = vadd.f32 %v4671_v59, %v3259_v27  ;;  %v3392_v4 = vmul.f32 %v6623_v62, %v3239_v10  ;;  %4678 = vlog2.f32 %v3239_v10  ;;  %v3283_v44 = vor.u32 1.1754944e-38, %v3282_v58  ;;  %3598 = vst.msk [vmem:[%s5021_s1 + $0x40] sm:$0xff] %vm3589_vm15, %v3519_v55 }
 0x431   : > { %v3486_v29 = vmul.f32 0.6931472, %v4677_v32  ;;  %4680 = vrcp.f32 %v2819_v60  ;;  %v3290_v35 = vadd.f32 %v4673_v42, %v3289_v18  ;;  %v3516_v0 = vpop.xlane.xlu1 %3515  ;;  %vm3281_vm10 = vcmp.eq.f32.partialorder %v3280_v51, 8.507059e+37 }
 0x432   : > { %v3264_v19 = vsel %vm6670_vm2, %v4671_v59, %v3260_v24  ;;  %3424 = vst.msk [vmem:[%s5016_s20 + $0xd8] sm:$0xff] %vm1708_vm1, %v3392_v4  ;;  %v3331_v59 = vld [vmem:[%s5011_s17 + $0xf0] sm:$0xff]  ;;  %v3513_v12 = vpop.xlane.xlu0 %3512 }
 0x433   : > { %v3577_v33 = vsel %vm1708_vm1, %v3486_v29, 0.0  ;;  %v3269_v34 = vsel %vm3266_vm3, %v3268_v41, %v3264_v19  ;;  %v3294_v40 = vsel %vm6688_vm5, %v4673_v42, %v3290_v35  ;;  %3597 = vst.msk [vmem:[%s5021_s1 + $0x38] sm:$0xff] %vm3589_vm15, %v3516_v0  ;;  %v3363_v42 = vadd.f32 %v3331_v59, %v2659_v26 }
 0x434   : > { %3578 = vadd.xlane.f32.xlu1 %v3577_v33  ;;  %v3394_v45 = vmul.f32 %v3362_v52, %v3269_v34  ;;  %4682 = vlog2.f32 %v3269_v34  ;;  %v3299_v62 = vsel %vm3296_vm6, %v3298_v47, %v3294_v40  ;;  %3596 = vst.msk [vmem:[%s5021_s1 + $0x30] sm:$0xff] %vm3589_vm15, %v3513_v12 }
 0x435   : > { %v3396_v5 = vmul.f32 %v3364_v37, %v3299_v62  ;;  %4684 = vlog2.f32 %v3299_v62 }
 0x436   : > { %3426 = vst.msk [vmem:[%s5016_s20 + $0xe8] sm:$0xff] %vm1708_vm1, %v3394_v45  ;;  %v4679_v11 = vpop.eup %4678 }
 0x437   : > { %v4681_v1 = vpop.eup %4680  ;;  %v3484_v53 = vmul.f32 0.6931472, %v4679_v11  ;;  %3428 = vst.msk [vmem:[%s5016_s20 + $0xf8] sm:$0xff] %vm1708_vm1, %v3396_v5 }
 0x438   : > { %v3272_v54 = vmul.f32 %v4681_v1, %v2819_v60  ;;  %vm3277_vm8 = vweird.f32 %v4681_v1 }
 0x439   : > { %v3574_v43 = vsel %vm1708_vm1, %v3484_v53, 0.0  ;;  %vm3278_vm9 = vmor %vm3276_vm7, %vm3277_vm8  ;;  %v3525_v48 = vpop.xlane.xlu1 %3524 }
 0x43a   : > { %v4683_v56 = vpop.eup %4682  ;;  %3575 = vadd.xlane.f32.xlu0 %v3574_v43  ;;  %v3273_v3 = vsub.f32 1.0, %v3272_v54  ;;  %v3522_v63 = vpop.xlane.xlu0 %3521  ;;  %3600 = vst.msk [vmem:[%s5021_s1 + $0x50] sm:$0xff] %vm3589_vm15, %v3525_v48 }
 0x43b   : > { %v3488_v49 = vmul.f32 0.6931472, %v4683_v56  ;;  %v4685_v22 = vpop.eup %4684  ;;  %v3528_v2 = vpop.xlane.xlu2 %3527  ;;  %3599 = vst.msk [vmem:[%s5021_s1 + $0x48] sm:$0xff] %vm3589_vm15, %v3522_v63 }
 0x43c   : > { %v3274_v20 = vmul.f32 %v4681_v1, %v3273_v3  ;;  %v3492_v17 = vmul.f32 0.6931472, %v4685_v22  ;;  %3601 = vst.msk [vmem:[%s5021_s1 + $0x58] sm:$0xff] %vm3589_vm15, %v3528_v2 }
 0x43d   : > { %v3580_v9 = vsel %vm1708_vm1, %v3488_v49, 0.0 }
 0x43e   : > { %3581 = vadd.xlane.f32.xlu2 %v3580_v9  ;;  %v3275_v52 = vadd.f32 %v4681_v1, %v3274_v20  ;;  %v3586_v13 = vsel %vm1708_vm1, %v3492_v17, 0.0 }
 0x43f   : > { %3587 = vadd.xlane.f32.xlu1 %v3586_v13 }
 0x440   : > { %v3279_v8 = vsel %vm3278_vm9, %v4681_v1, %v3275_v52 }
 0x441   : > { %v3284_v30 = vsel %vm3281_vm10, %v3283_v44, %v3279_v8  ;;  %v3534_v41 = vpop.xlane.xlu1 %3533 }
 0x442   : > { %v3395_v28 = vmul.f32 %v3363_v42, %v3284_v30  ;;  %4686 = vlog2.f32 %v3284_v30  ;;  %v3531_v36 = vpop.xlane.xlu0 %3530  ;;  %3603 = vst.msk [vmem:[%s5021_s1 + $0x68] sm:$0xff] %vm3589_vm15, %v3534_v41 }
 0x443   : > { %3602 = vst.msk [vmem:[%s5021_s1 + $0x60] sm:$0xff] %vm3589_vm15, %v3531_v36 }
 0x444   : > { %3427 = vst.msk [vmem:[%s5016_s20 + $0xf0] sm:$0xff] %vm1708_vm1, %v3395_v28 }
 0x448   : > { %v4687_v61 = vpop.eup %4686 }
 0x449   : > { %v3490_v25 = vmul.f32 0.6931472, %v4687_v61 }
 0x44b   : > { %v3583_v27 = vsel %vm1708_vm1, %v3490_v25, 0.0 }
 0x44c   : > { %3584 = vadd.xlane.f32.xlu0 %v3583_v27 }
 0x453   : > { %v3537_v7 = vpop.xlane.xlu2 %3536 }
 0x454   : > { %3604 = vst.msk [vmem:[%s5021_s1 + $0x70] sm:$0xff] %vm3589_vm15, %v3537_v7 }
 0x456   : > { %v3543_v15 = vpop.xlane.xlu1 %3542 }
 0x457   : > { %3606 = vst.msk [vmem:[%s5021_s1 + $0x80] sm:$0xff] %vm3589_vm15, %v3543_v15 }
 0x458   : > { %v3540_v21 = vpop.xlane.xlu0 %3539 }
 0x459   : > { %3605 = vst.msk [vmem:[%s5021_s1 + $0x78] sm:$0xff] %vm3589_vm15, %v3540_v21 }
 0x45b   : > { %v3546_v14 = vpop.xlane.xlu2 %3545 }
 0x45c   : > { %3607 = vst.msk [vmem:[%s5021_s1 + $0x88] sm:$0xff] %vm3589_vm15, %v3546_v14 }
 0x46a   : > { %v3552_v31 = vpop.xlane.xlu1 %3551 }
 0x46b   : > { %3609 = vst.msk [vmem:[%s5021_s1 + $0x98] sm:$0xff] %vm3589_vm15, %v3552_v31 }
 0x46e   : > { %v3549_v23 = vpop.xlane.xlu0 %3548 }
 0x46f   : > { %3608 = vst.msk [vmem:[%s5021_s1 + $0x90] sm:$0xff] %vm3589_vm15, %v3549_v23 }
 0x471   : > { %v3555_v38 = vpop.xlane.xlu2 %3554 }
 0x472   : > { %3610 = vst.msk [vmem:[%s5021_s1 + $0xa0] sm:$0xff] %vm3589_vm15, %v3555_v38 }
 0x480   : > { %v3561_v32 = vpop.xlane.xlu1 %3560 }
 0x481   : > { %3612 = vst.msk [vmem:[%s5021_s1 + $0xb0] sm:$0xff] %vm3589_vm15, %v3561_v32 }
 0x483   : > { %v3558_v10 = vpop.xlane.xlu0 %3557 }
 0x484   : > { %3611 = vst.msk [vmem:[%s5021_s1 + $0xa8] sm:$0xff] %vm3589_vm15, %v3558_v10 }
 0x487   : > { %v3564_v24 = vpop.xlane.xlu2 %3563 }
 0x488   : > { %3613 = vst.msk [vmem:[%s5021_s1 + $0xb8] sm:$0xff] %vm3589_vm15, %v3564_v24 }
 0x48d   : > { %v3570_v60 = vpop.xlane.xlu1 %3569 }
 0x48e   : > { %3615 = vst.msk [vmem:[%s5021_s1 + $0xc8] sm:$0xff] %vm3589_vm15, %v3570_v60 }
 0x495   : > { %v3567_v29 = vpop.xlane.xlu0 %3566 }
 0x496   : > { %3614 = vst.msk [vmem:[%s5021_s1 + $0xc0] sm:$0xff] %vm3589_vm15, %v3567_v29 }
 0x49b   : > { %v3573_v4 = vpop.xlane.xlu2 %3572 }
 0x49c   : > { %3616 = vst.msk [vmem:[%s5021_s1 + $0xd0] sm:$0xff] %vm3589_vm15, %v3573_v4 }
 0x4a7   : > { %v3579_v18 = vpop.xlane.xlu1 %3578 }
 0x4a8   : > { %3618 = vst.msk [vmem:[%s5021_s1 + $0xe0] sm:$0xff] %vm3589_vm15, %v3579_v18 }
 0x4ad   : > { %v3576_v19 = vpop.xlane.xlu0 %3575 }
 0x4ae   : > { %3617 = vst.msk [vmem:[%s5021_s1 + $0xd8] sm:$0xff] %vm3589_vm15, %v3576_v19 }
 0x4b1   : > { %v3582_v46 = vpop.xlane.xlu2 %3581 }
 0x4b2   : > { %3619 = vst.msk [vmem:[%s5021_s1 + $0xe8] sm:$0xff] %vm3589_vm15, %v3582_v46  ;;  %v3588_v47 = vpop.xlane.xlu1 %3587 }
 0x4b3   : > { %3621 = vst.msk [vmem:[%s5021_s1 + $0xf8] sm:$0xff] %vm3589_vm15, %v3588_v47 }
 0x4bf   : > { %v3585_v37 = vpop.xlane.xlu0 %3584 }
 0x4c0   : > { %3620 = vst.msk [vmem:[%s5021_s1 + $0xf0] sm:$0xff] %vm3589_vm15, %v3585_v37 }
 0x4c1 PF: > { %s20_s15 = sadd.s32 1, %s4748_s15   ;;  %s6974_s17 = sld [smem:[#allocation5_spill]] }
 0x4c2   : > { %p17_p0 = scmp.ge.s32.totalorder %s20_s15, 20   ;;  %s6975_s20 = sld [smem:[#allocation6_spill]] }
 0x4c3   : > { %s6976_s30 = smov %s4728_s10  ;;  %s6977_s10 = smov %s4852_s22 }
 0x4c4   : > { %s6978_s11 = smov %s4740_s13  ;;  %s6979_s12 = smov %s4744_s14 }
 0x4c5   :  { %19 = sbr.rel (!%p17_p0) target bundleno = 7 (0x7), region = 139 }
 0x4c7   : > { %s6980_s13 = smov %s6974_s17 }
 0x4c8   : > { %s6981_s14 = smov %s6975_s20 }

</bundles_post_ra>
